<compile_context>
chip_gen: v6e
topology: v6e:2x2x1
jax: 0.10.0
libtpu: 0.0.40
codegen_flags: <defaults>
</compile_context>

<pallas_src>
import math

import jax
import jax.numpy as jnp
from jax import lax
from jax.experimental import pallas as pl
from jax.experimental.pallas import tpu as pltpu


def _pick_tile(dim, candidates=(512, 256, 128)):
    """Largest lane/MXU-friendly tile that divides `dim`; else the full dim
    (full-extent blocks are always legal, even for small/ragged axes).
    NOTE: the full-dim fallback can create one giant block for ragged shapes;
    cap it / switch to a masked cdiv grid if such shapes show up in practice."""
    for c in candidates:
        if dim % c == 0:
            return c
    return dim


def _vmem_limit_bytes():
    """Scoped-VMEM budget: raise the conservative compiler default, but leave
    headroom on v7x's 64 MiB-per-TC parts (v5e/v6e have 128 MiB physical)."""
    try:
        cap = pltpu.get_tpu_info().vmem_capacity_bytes
    except Exception:  # interpret mode / older runtimes — v7x-safe fallback
        return 48 * 1024 * 1024
    return int(min(96 * 1024 * 1024, (cap * 3) // 4))


# ------------------------- fused Q/K/V projection -----------------------------

def _qkv_proj_kernel(x_ref, w_ref, b_ref, o_ref, acc_ref):
    # x_ref : (tm, tk)  activation tile
    # w_ref : (tk, tn)  weight tile (pre-transposed to (in, out) on the host)
    # b_ref : (1, tn)   bias tile
    # o_ref : (tm, tn)  output tile
    # acc_ref: (tm, tn) f32 accumulator, resident across the K grid axis
    k = pl.program_id(2)

    @pl.when(k == 0)
    def _init():
        acc_ref[...] = jnp.zeros_like(acc_ref)

    acc_ref[...] += jnp.dot(x_ref[...], w_ref[...],
                            preferred_element_type=jnp.float32)

    @pl.when(k == pl.num_programs(2) - 1)
    def _finalize():
        # Bias added once here (not per K step) to keep the inner loop MXU-only.
        o_ref[...] = (acc_ref[...] + b_ref[...].astype(jnp.float32)).astype(o_ref.dtype)


def _qkv_proj_kernel_1k(x_ref, w_ref, b_ref, o_ref):
    # Degenerate single-K-step configuration: no accumulator round-trip needed.
    o_ref[...] = (jnp.dot(x_ref[...], w_ref[...],
                          preferred_element_type=jnp.float32)
                  + b_ref[...].astype(jnp.float32)).astype(o_ref.dtype)


def pallas_qkv_proj(x2d, w_t, b):
    """out = x2d @ w_t + b, with w_t already in (in_features, out_features) layout."""
    M, K = x2d.shape
    K2, N = w_t.shape
    assert K == K2

    tm = _pick_tile(M, (512, 256, 128))
    # Small N (=3D, e.g. 384): take the full extent so the j axis is trivial,
    # each x tile is DMAed once per i, and the MXU output is not stuck at 128.
    tn = N if N <= 512 else _pick_tile(N, (512, 256, 128))
    tk = _pick_tile(K, (512, 256, 128))
    grid = (M // tm, N // tn, K // tk)

    single_k = grid[2] == 1
    kernel = _qkv_proj_kernel_1k if single_k else _qkv_proj_kernel
    scratch = [] if single_k else [pltpu.VMEM((tm, tn), jnp.float32)]

    return pl.pallas_call(
        kernel,
        out_shape=jax.ShapeDtypeStruct((M, N), x2d.dtype),
        grid_spec=pltpu.PrefetchScalarGridSpec(
            num_scalar_prefetch=0,
            grid=grid,
            in_specs=[
                pl.BlockSpec((tm, tk), lambda i, j, k: (i, k)),
                pl.BlockSpec((tk, tn), lambda i, j, k: (k, j)),
                pl.BlockSpec((1, tn), lambda i, j, k: (0, j)),
            ],
            out_specs=pl.BlockSpec((tm, tn), lambda i, j, k: (i, j)),
            scratch_shapes=scratch,
        ),
        compiler_params=pltpu.CompilerParams(
            # M / N tiles shard across the two TensorCores on v7x; K is a reduction.
            dimension_semantics=("parallel", "parallel", "arbitrary"),
            vmem_limit_bytes=_vmem_limit_bytes(),
        ),
    )(x2d, w_t, b.reshape(1, N))


# ------------------------- flash-style attention -------------------------------

def _flash_attn_kernel(q_ref, k_ref, v_ref, o_ref, m_ref, l_ref, acc_ref):
    # q_ref: (1, tq, D)   k_ref/v_ref: (1, tkv, D)   o_ref: (1, tq, D)
    # The 1/sqrt(D) scale is already folded into the Q projection weights.
    kv = pl.program_id(2)

    @pl.when(kv == 0)
    def _init():
        m_ref[...] = jnp.full_like(m_ref, -jnp.inf)
        l_ref[...] = jnp.zeros_like(l_ref)
        acc_ref[...] = jnp.zeros_like(acc_ref)

    q = q_ref[0]            # (tq, D)
    k = k_ref[0]            # (tkv, D)
    v = v_ref[0]            # (tkv, D)

    # scores tile: q @ k.T, f32 on the MXU (contract both operands on axis 1).
    s = lax.dot_general(
        q, k, dimension_numbers=(((1,), (1,)), ((), ())),
        preferred_element_type=jnp.float32)                   # (tq, tkv)

    m_prev = m_ref[...]                                       # (tq, 1)
    m_new = jnp.maximum(m_prev, s.max(axis=-1, keepdims=True))
    alpha = jnp.exp(m_prev - m_new)
    p = jnp.exp(s - m_new)                                    # (tq, tkv)
    l_ref[...] = alpha * l_ref[...] + p.sum(axis=-1, keepdims=True)
    acc_ref[...] = alpha * acc_ref[...] + jnp.dot(
        p.astype(v.dtype), v, preferred_element_type=jnp.float32)
    m_ref[...] = m_new

    @pl.when(kv == pl.num_programs(2) - 1)
    def _finalize():
        # Exact reciprocal keeps the result bit-close to a plain softmax;
        # switch to approx=True (EUP vrcp) if ~1e-3 relative error is acceptable.
        inv_l = pl.reciprocal(l_ref[...], approx=False)
        o_ref[0] = (acc_ref[...] * inv_l).astype(o_ref.dtype)


def pallas_attention(qkv, D):
    """Flash attention reading q/k/v slabs directly out of the fused (B, S, 3D)
    projection output — no jnp.split HBM round-trip."""
    B, S, threeD = qkv.shape
    assert threeD == 3 * D

    tq = _pick_tile(S, (512, 256, 128))
    tkv = _pick_tile(S, (512, 256, 128))

    if D % 128 == 0:
        # Lane-aligned slab select: last-dim block index 0/1/2 picks q/k/v.
        q_arr = k_arr = v_arr = qkv
        q_col, k_col, v_col = 0, 1, 2
    else:
        # Fallback for non-lane-aligned D (materializes the split; slower).
        q_arr, k_arr, v_arr = jnp.split(qkv, 3, axis=-1)
        q_col = k_col = v_col = 0

    grid = (B, S // tq, S // tkv)
    return pl.pallas_call(
        _flash_attn_kernel,
        out_shape=jax.ShapeDtypeStruct((B, S, D), qkv.dtype),
        grid_spec=pltpu.PrefetchScalarGridSpec(
            num_scalar_prefetch=0,
            grid=grid,
            in_specs=[
                # If profiling shows exposed DMA on the K/V stream, add
                # pipeline_mode=pl.Buffered(3) to the k/v specs below.
                pl.BlockSpec((1, tq, D), lambda b, qi, ki: (b, qi, q_col)),
                pl.BlockSpec((1, tkv, D), lambda b, qi, ki: (b, ki, k_col)),
                pl.BlockSpec((1, tkv, D), lambda b, qi, ki: (b, ki, v_col)),
            ],
            out_specs=pl.BlockSpec((1, tq, D), lambda b, qi, ki: (b, qi, 0)),
            scratch_shapes=[
                pltpu.VMEM((tq, 1), jnp.float32),   # running max m
                pltpu.VMEM((tq, 1), jnp.float32),   # running denominator l
                pltpu.VMEM((tq, D), jnp.float32),   # f32 output accumulator
            ],
        ),
        compiler_params=pltpu.CompilerParams(
            dimension_semantics=("parallel", "parallel", "arbitrary"),
            vmem_limit_bytes=_vmem_limit_bytes(),
        ),
    )(q_arr, k_arr, v_arr)


# --------------------------- module equivalent ---------------------------------

def init_self_attention_params(key, dim, dtype=jnp.float32):
    """query/key/value = three nn.Linear(dim, dim), PyTorch default init,
    stored pre-stacked as one (3*dim, dim) weight and (3*dim,) bias."""
    bound = 1.0 / math.sqrt(dim)
    kw, kb = jax.random.split(key)
    w_qkv = jax.random.uniform(kw, (3 * dim, dim), dtype, minval=-bound, maxval=bound)
    b_qkv = jax.random.uniform(kb, (3 * dim,), dtype, minval=-bound, maxval=bound)
    return {"w_qkv": w_qkv, "b_qkv": b_qkv}


def prepare_params(params, dim):
    """One-time host-side prep (outside jit):
      * fold the 1/sqrt(dim) softmax scale into the Q rows of W/b (exact, free),
      * transpose W to (in_features, 3*dim) so the projection kernel contracts
        a standard (tk, tn) RHS — no per-tile XLU transpose in the K loop."""
    w = params["w_qkv"]                      # (3D, D), PyTorch (out, in) layout
    b = params["b_qkv"]                      # (3D,)
    scale = 1.0 / math.sqrt(dim)
    scale_vec = jnp.concatenate([
        jnp.full((dim,), scale, w.dtype),    # q rows get the scale
        jnp.ones((2 * dim,), w.dtype),       # k / v rows unchanged
    ])
    w_scaled = w * scale_vec[:, None]
    b_scaled = b * scale_vec
    return {"w_t": jnp.transpose(w_scaled), "b": b_scaled}   # w_t: (D, 3D)


@jax.jit
def self_attention_forward(x, prepared):
    """Mirrors SelfAttention.forward (scale pre-folded into the Q projection)."""
    B, S, D = x.shape
    qkv = pallas_qkv_proj(x.reshape(B * S, D), prepared["w_t"], prepared["b"])
    qkv = qkv.reshape(B, S, 3 * D)           # free reshape, no HBM copy
    return pallas_attention(qkv, D)


# ------------------------------------ main --------------------------------------

if __name__ == "__main__":
    key = jax.random.PRNGKey(0)
    kx, kp = jax.random.split(key)

    # Tile-friendly demo shapes: (batch, seq, hidden) = (2, 1024, 128)
    # -> projection grid (4, 1, 1) [single-K fast path], attention grid (2, 2, 2)
    #    which exercises the multi-step online softmax.
    B, S, D = 2, 1024, 128
    x = jax.random.normal(kx, (B, S, D), dtype=jnp.float32)
    params = init_self_attention_params(kp, D)
    prepared = prepare_params(params, D)

    out = self_attention_forward(x, prepared)
    out = jax.block_until_ready(out)
    assert out.shape == (B, S, D)

    # Plain-JAX reference (same math as the PyTorch forward, raw weights + explicit scale).
    hp = lax.Precision.HIGHEST
    wq, wk, wv = jnp.split(params["w_qkv"], 3, axis=0)
    bq, bk, bv = jnp.split(params["b_qkv"], 3, axis=0)
    q_ref = jnp.dot(x, wq.T, precision=hp) + bq
    k_ref = jnp.dot(x, wk.T, precision=hp) + bk
    v_ref = jnp.dot(x, wv.T, precision=hp) + bv
    scores = jnp.einsum("bqd,bkd->bqk", q_ref, k_ref, precision=hp) / math.sqrt(D)
    attn = jax.nn.softmax(scores, axis=-1)
    ref = jnp.einsum("bqk,bkd->bqd", attn, v_ref, precision=hp)

    err = float(jnp.max(jnp.abs(out - ref)))
    assert jnp.allclose(out, ref, atol=1e-4, rtol=1e-4), f"max abs err {err}"

    print("KERNEL_OK")
</pallas_src>

<mosaic_0001>
module attributes {stable_mosaic.version = 11 : i64} {
  func.func @_flash_attn_kernel(%arg0: i32, %arg1: i32, %arg2: i32, %arg3: memref<1x512x128xf32, #tpu.memory_space<vmem>>, %arg4: memref<1x512x128xf32, #tpu.memory_space<vmem>>, %arg5: memref<1x512x128xf32, #tpu.memory_space<vmem>>, %arg6: memref<1x512x128xf32, #tpu.memory_space<vmem>>, %arg7: memref<512x1xf32, #tpu.memory_space<vmem>>, %arg8: memref<512x1xf32, #tpu.memory_space<vmem>>, %arg9: memref<512x128xf32, #tpu.memory_space<vmem>>) attributes {dimension_semantics = [#tpu.dimension_semantics<parallel>, #tpu.dimension_semantics<parallel>, #tpu.dimension_semantics<arbitrary>], iteration_bounds = array<i64: 2, 2, 2>, scalar_prefetch = 0 : i64, scratch_operands = 3 : i64, tpu.core_type = #tpu.core_type<tc>, window_params = [{transform_indices = @transform_0, window_bounds = array<i64: 1, 512, 128>}, {transform_indices = @transform_1, window_bounds = array<i64: 1, 512, 128>}, {transform_indices = @transform_2, window_bounds = array<i64: 1, 512, 128>}, {transform_indices = @transform_3, window_bounds = array<i64: 1, 512, 128>}]} {
    %c0_i32 = arith.constant 0 : i32
    %0 = arith.cmpi eq, %arg2, %c0_i32 : i32
    %1 = arith.extui %0 : i1 to i32
    %c0_i32_0 = arith.constant 0 : i32
    %2 = arith.cmpi ne, %1, %c0_i32_0 : i32
    scf.if %2 {
      %cst_25 = arith.constant 0xFF800000 : f32
      %35 = vector.broadcast %cst_25 : f32 to vector<512x1xf32>
      %c0_26 = arith.constant 0 : index
      %c0_27 = arith.constant 0 : index
      %36 = vector.load %arg7[%c0_26, %c0_27] : memref<512x1xf32, #tpu.memory_space<vmem>>, vector<512x1xf32>
      tpu.vector_store %arg7[%c0_26, %c0_27], %35 {strides = array<i32>} : memref<512x1xf32, #tpu.memory_space<vmem>>, vector<512x1xf32>,
      %cst_28 = arith.constant 0.000000e+00 : f32
      %37 = vector.broadcast %cst_28 : f32 to vector<512x1xf32>
      %c0_29 = arith.constant 0 : index
      %c0_30 = arith.constant 0 : index
      %38 = vector.load %arg8[%c0_29, %c0_30] : memref<512x1xf32, #tpu.memory_space<vmem>>, vector<512x1xf32>
      tpu.vector_store %arg8[%c0_29, %c0_30], %37 {strides = array<i32>} : memref<512x1xf32, #tpu.memory_space<vmem>>, vector<512x1xf32>,
      %cst_31 = arith.constant 0.000000e+00 : f32
      %39 = vector.broadcast %cst_31 : f32 to vector<512x128xf32>
      %c0_32 = arith.constant 0 : index
      %c0_33 = arith.constant 0 : index
      %40 = vector.load %arg9[%c0_32, %c0_33] : memref<512x128xf32, #tpu.memory_space<vmem>>, vector<512x128xf32>
      tpu.vector_store %arg9[%c0_32, %c0_33], %39 {strides = array<i32>} : memref<512x128xf32, #tpu.memory_space<vmem>>, vector<512x128xf32>,
    } else {
    }
    %c0 = arith.constant 0 : index
    %c0_1 = arith.constant 0 : index
    %c0_2 = arith.constant 0 : index
    %3 = vector.load %arg3[%c0, %c0_1, %c0_2] : memref<1x512x128xf32, #tpu.memory_space<vmem>>, vector<1x512x128xf32>
    %4 = vector.shape_cast %3 : vector<1x512x128xf32> to vector<512x128xf32>
    %c0_3 = arith.constant 0 : index
    %c0_4 = arith.constant 0 : index
    %c0_5 = arith.constant 0 : index
    %5 = vector.load %arg4[%c0_3, %c0_4, %c0_5] : memref<1x512x128xf32, #tpu.memory_space<vmem>>, vector<1x512x128xf32>
    %6 = vector.shape_cast %5 : vector<1x512x128xf32> to vector<512x128xf32>
    %c0_6 = arith.constant 0 : index
    %c0_7 = arith.constant 0 : index
    %c0_8 = arith.constant 0 : index
    %7 = vector.load %arg5[%c0_6, %c0_7, %c0_8] : memref<1x512x128xf32, #tpu.memory_space<vmem>>, vector<1x512x128xf32>
    %8 = vector.shape_cast %7 : vector<1x512x128xf32> to vector<512x128xf32>
    %cst = arith.constant dense<0.000000e+00> : vector<512x512xf32>
    %9 = tpu.matmul %4, %6, %cst {dimension_numbers = #tpu.dot_dimension_numbers<[1], [1], [0], [0], [0, 0, 1, 0], [], []>} : vector<512x128xf32>, vector<512x128xf32>, vector<512x512xf32> -> vector<512x512xf32>
    %c0_9 = arith.constant 0 : index
    %c0_10 = arith.constant 0 : index
    %10 = vector.load %arg7[%c0_9, %c0_10] : memref<512x1xf32, #tpu.memory_space<vmem>>, vector<512x1xf32>
    %cst_11 = arith.constant dense<0xFF800000> : vector<512xf32>
    %11 = vector.multi_reduction <maximumf>, %9, %cst_11 [1] : vector<512x512xf32> to vector<512xf32>
    %12 = vector.shape_cast %11 : vector<512xf32> to vector<512x1xf32>
    %13 = arith.maximumf %10, %12 : vector<512x1xf32>
    %14 = arith.subf %10, %13 : vector<512x1xf32>
    %15 = math.exp %14 : vector<512x1xf32>
    %16 = vector.broadcast %13 : vector<512x1xf32> to vector<512x512xf32>
    %17 = arith.subf %9, %16 : vector<512x512xf32>
    %18 = math.exp %17 : vector<512x512xf32>
    %c0_12 = arith.constant 0 : index
    %c0_13 = arith.constant 0 : index
    %19 = vector.load %arg8[%c0_12, %c0_13] : memref<512x1xf32, #tpu.memory_space<vmem>>, vector<512x1xf32>
    %20 = arith.mulf %15, %19 : vector<512x1xf32>
    %cst_14 = arith.constant dense<0.000000e+00> : vector<512xf32>
    %21 = vector.multi_reduction <add>, %18, %cst_14 [1] : vector<512x512xf32> to vector<512xf32>
    %22 = vector.shape_cast %21 : vector<512xf32> to vector<512x1xf32>
    %23 = arith.addf %20, %22 : vector<512x1xf32>
    %c0_15 = arith.constant 0 : index
    %c0_16 = arith.constant 0 : index
    %24 = vector.load %arg8[%c0_15, %c0_16] : memref<512x1xf32, #tpu.memory_space<vmem>>, vector<512x1xf32>
    tpu.vector_store %arg8[%c0_15, %c0_16], %23 {strides = array<i32>} : memref<512x1xf32, #tpu.memory_space<vmem>>, vector<512x1xf32>,
    %c0_17 = arith.constant 0 : index
    %c0_18 = arith.constant 0 : index
    %25 = vector.load %arg9[%c0_17, %c0_18] : memref<512x128xf32, #tpu.memory_space<vmem>>, vector<512x128xf32>
    %26 = vector.broadcast %15 : vector<512x1xf32> to vector<512x128xf32>
    %27 = arith.mulf %26, %25 : vector<512x128xf32>
    %cst_19 = arith.constant dense<0.000000e+00> : vector<512x128xf32>
    %28 = tpu.matmul %18, %8, %cst_19 {dimension_numbers = #tpu.dot_dimension_numbers<[1], [0], [0], [1], [0, 0, 1, 1], [], []>} : vector<512x512xf32>, vector<512x128xf32>, vector<512x128xf32> -> vector<512x128xf32>
    %29 = arith.addf %27, %28 : vector<512x128xf32>
    %c0_20 = arith.constant 0 : index
    %c0_21 = arith.constant 0 : index
    %30 = vector.load %arg9[%c0_20, %c0_21] : memref<512x128xf32, #tpu.memory_space<vmem>>, vector<512x128xf32>
    tpu.vector_store %arg9[%c0_20, %c0_21], %29 {strides = array<i32>} : memref<512x128xf32, #tpu.memory_space<vmem>>, vector<512x128xf32>,
    %c0_22 = arith.constant 0 : index
    %c0_23 = arith.constant 0 : index
    %31 = vector.load %arg7[%c0_22, %c0_23] : memref<512x1xf32, #tpu.memory_space<vmem>>, vector<512x1xf32>
    tpu.vector_store %arg7[%c0_22, %c0_23], %13 {strides = array<i32>} : memref<512x1xf32, #tpu.memory_space<vmem>>, vector<512x1xf32>,
    %c1_i32 = arith.constant 1 : i32
    %32 = arith.cmpi eq, %arg2, %c1_i32 : i32
    %33 = arith.extui %32 : i1 to i32
    %c0_i32_24 = arith.constant 0 : i32
    %34 = arith.cmpi ne, %33, %c0_i32_24 : i32
    scf.if %34 {
      %c0_25 = arith.constant 0 : index
      %c0_26 = arith.constant 0 : index
      %35 = vector.load %arg8[%c0_25, %c0_26] : memref<512x1xf32, #tpu.memory_space<vmem>>, vector<512x1xf32>
      %36 = tpu.reciprocal %35 : vector<512x1xf32> -> vector<512x1xf32>
      %c0_27 = arith.constant 0 : index
      %c0_28 = arith.constant 0 : index
      %37 = vector.load %arg9[%c0_27, %c0_28] : memref<512x128xf32, #tpu.memory_space<vmem>>, vector<512x128xf32>
      %38 = vector.broadcast %36 : vector<512x1xf32> to vector<512x128xf32>
      %39 = arith.mulf %37, %38 : vector<512x128xf32>
      %c0_29 = arith.constant 0 : index
      %c0_30 = arith.constant 0 : index
      %c0_31 = arith.constant 0 : index
      %40 = vector.load %arg6[%c0_29, %c0_30, %c0_31] : memref<1x512x128xf32, #tpu.memory_space<vmem>>, vector<1x512x128xf32>
      %41 = vector.shape_cast %40 : vector<1x512x128xf32> to vector<512x128xf32>
      %42 = vector.shape_cast %39 : vector<512x128xf32> to vector<1x512x128xf32>
      tpu.vector_store %arg6[%c0_29, %c0_30, %c0_31], %42 {strides = array<i32>} : memref<1x512x128xf32, #tpu.memory_space<vmem>>, vector<1x512x128xf32>,
    } else {
    }
    return
  }
  func.func @transform_0(%arg0: i32, %arg1: i32, %arg2: i32) -> (i32, i32, i32) {
    %c0_i32 = arith.constant 0 : i32
    %c0_i32_0 = arith.constant 0 : i32
    return %arg0, %arg1, %c0_i32 : i32, i32, i32
  }
  func.func @transform_1(%arg0: i32, %arg1: i32, %arg2: i32) -> (i32, i32, i32) {
    %c1_i32 = arith.constant 1 : i32
    %c0_i32 = arith.constant 0 : i32
    return %arg0, %arg2, %c1_i32 : i32, i32, i32
  }
  func.func @transform_2(%arg0: i32, %arg1: i32, %arg2: i32) -> (i32, i32, i32) {
    %c2_i32 = arith.constant 2 : i32
    %c0_i32 = arith.constant 0 : i32
    return %arg0, %arg2, %c2_i32 : i32, i32, i32
  }
  func.func @transform_3(%arg0: i32, %arg1: i32, %arg2: i32) -> (i32, i32, i32) {
    %c0_i32 = arith.constant 0 : i32
    %c0_i32_0 = arith.constant 0 : i32
    return %arg0, %arg1, %c0_i32 : i32, i32, i32
  }
}

module attributes {stable_mosaic.version = 11 : i64} {
  func.func @_qkv_proj_kernel_1k(%arg0: i32, %arg1: i32, %arg2: i32, %arg3: memref<512x128xf32, #tpu.memory_space<vmem>>, %arg4: memref<128x384xf32, #tpu.memory_space<vmem>>, %arg5: memref<1x384xf32, #tpu.memory_space<vmem>>, %arg6: memref<512x384xf32, #tpu.memory_space<vmem>>) attributes {dimension_semantics = [#tpu.dimension_semantics<parallel>, #tpu.dimension_semantics<parallel>, #tpu.dimension_semantics<arbitrary>], iteration_bounds = array<i64: 4, 1, 1>, scalar_prefetch = 0 : i64, scratch_operands = 0 : i64, tpu.core_type = #tpu.core_type<tc>, window_params = [{transform_indices = @transform_0, window_bounds = array<i64: 512, 128>}, {transform_indices = @transform_1, window_bounds = array<i64: 128, 384>}, {transform_indices = @transform_2, window_bounds = array<i64: 1, 384>}, {transform_indices = @transform_3, window_bounds = array<i64: 512, 384>}]} {
    %c0 = arith.constant 0 : index
    %c0_0 = arith.constant 0 : index
    %0 = vector.load %arg3[%c0, %c0_0] : memref<512x128xf32, #tpu.memory_space<vmem>>, vector<512x128xf32>
    %c0_1 = arith.constant 0 : index
    %c0_2 = arith.constant 0 : index
    %1 = vector.load %arg4[%c0_1, %c0_2] : memref<128x384xf32, #tpu.memory_space<vmem>>, vector<128x384xf32>
    %cst = arith.constant dense<0.000000e+00> : vector<512x384xf32>
    %2 = tpu.matmul %0, %1, %cst {dimension_numbers = #tpu.dot_dimension_numbers<[1], [0], [0], [1], [0, 0, 1, 1], [], []>} : vector<512x128xf32>, vector<128x384xf32>, vector<512x384xf32> -> vector<512x384xf32>
    %c0_3 = arith.constant 0 : index
    %c0_4 = arith.constant 0 : index
    %3 = vector.load %arg5[%c0_3, %c0_4] : memref<1x384xf32, #tpu.memory_space<vmem>>, vector<1x384xf32>
    %4 = vector.broadcast %3 : vector<1x384xf32> to vector<512x384xf32>
    %5 = arith.addf %2, %4 : vector<512x384xf32>
    %c0_5 = arith.constant 0 : index
    %c0_6 = arith.constant 0 : index
    %6 = vector.load %arg6[%c0_5, %c0_6] : memref<512x384xf32, #tpu.memory_space<vmem>>, vector<512x384xf32>
    tpu.vector_store %arg6[%c0_5, %c0_6], %5 {strides = array<i32>} : memref<512x384xf32, #tpu.memory_space<vmem>>, vector<512x384xf32>,
    return
  }
  func.func @transform_0(%arg0: i32, %arg1: i32, %arg2: i32) -> (i32, i32) {
    %c0_i32 = arith.constant 0 : i32
    return %arg0, %arg2 : i32, i32
  }
  func.func @transform_1(%arg0: i32, %arg1: i32, %arg2: i32) -> (i32, i32) {
    %c0_i32 = arith.constant 0 : i32
    return %arg2, %arg1 : i32, i32
  }
  func.func @transform_2(%arg0: i32, %arg1: i32, %arg2: i32) -> (i32, i32) {
    %c0_i32 = arith.constant 0 : i32
    %c0_i32_0 = arith.constant 0 : i32
    return %c0_i32, %arg1 : i32, i32
  }
  func.func @transform_3(%arg0: i32, %arg1: i32, %arg2: i32) -> (i32, i32) {
    %c0_i32 = arith.constant 0 : i32
    return %arg0, %arg1 : i32, i32
  }
}

</mosaic_0001>

<bundles_post_ra>
// kernel: self_attention_forward.2
= control target key start
LH: loop header
LB: loop body
LE: loop exit
PB: predicated region body
PF: predicated region fallthrough
CT: control target
= control target key end

     0   :  { %8 = vsyncpa [#allocation3], 0  ;;  %s2796_s0 = inlined_call_operand.hbm [shape: f32[2048,128], index: 0, kind: input, shape index: {}]   ;;  %s2797_s1 = inlined_call_operand.hbm [shape: f32[128,384], index: 1, kind: input, shape index: {}]   ;;  %s2798_s2 = inlined_call_operand.vmem [shape: f32[1,384], index: 2, kind: input, shape index: {}]   ;;  %s2799_s3 = inlined_call_operand.vmem [shape: f32[2048,384], index: 3, kind: output, shape index: {}]  }
   0x1   :  { %10 = vsyncpa [#allocation3 + $0x1], 0 }
   0x2   :  { %11 = vsyncpa [#allocation5], 0  ;;  %s2025_s12 = smov 0   ;;  %s2027_s13 = smov 0  }
   0x3   :  { %s2029_s14 = smov 0   ;;  %s2031_s15 = smov 0  }
   0x4   :  { %s2033_s16 = smov 0   ;;  %s2035_s17 = smov 0  }
   0x5 LB: > { %s1559_s18 = sadd.s32 4294967295, %s1996_s17   ;;  %p58_p0 = scmp.ne.s32.totalorder %s1980_s13, %s1976_s12  ;;  %s1996_s17 = sphi %s2035_s17, %s17_s17   ;;  %s1992_s16 = sphi %s2033_s16, %s2809_s16   ;;  %s1988_s15 = sphi %s2031_s15, %s2808_s15   ;;  %s1984_s14 = sphi %s2029_s14, %s2807_s14   ;;  %s1980_s13 = sphi %s2027_s13, %s2806_s13   ;;  %s1976_s12 = sphi %s2025_s12, %s2805_s12  }
   0x6   : > { %p2055_p1 = scmp.eq.s32.totalorder %s1559_s18, 0  ;;  %p1561_p2 = scmp.ge.s32.totalorder %s1996_s17, 1 }
   0x7   : > { %p151_p3 = scmp.lt.s32.totalorder %s1996_s17, 5  ;;  %s1998_s22 = smov [#allocation4]  }
   0x8   : > { %p2063_p4 = por %p2055_p1, %p58_p0  ;;  %s169_s23 = sshll.u32 %s1998_s22, 4  ;;  %s170_s23 = int_to_ptr.vmem [resolvable:$true] %s169_s23 }
   0x9   : > { %p2067_p5 = pnand %p1561_p2, %p151_p3  ;;  %s36_s25 = sadd.s32 1, %s1992_s16 }
   0xa   : > { %s1899_s26 = scalar_lea.vmem %s170_s23, 6144  ;;  %p1907_p12 = scmp.lt.s32.totalorder %s170_s23, %s170_s23 }
   0xb   : > { %p1823_p6 = pneg %p2067_p5  ;;  %p1900_p9 = scmp.ne.s32.totalorder %s170_s23, %s1899_s26 }
   0xc   : > { %p1908_p13 = scmp.lt.s32.totalorder %s1899_s26, %s1899_s26 }
   0xd   : > { %p2075_p7 = pnand %p1823_p6, %p2055_p1 }
   0xe   : > { %p1909_p0 = por %p1908_p13, %p1907_p12 }
   0xf   : > { %p1890_p8 = pneg %p2075_p7 }
  0x11   : > { %p1902_p10 = pnand %p1900_p9, %p1890_p8 }
  0x13   : > { %p1903_p11 = pneg %p1902_p10 }
  0x15   : > { %p1910_p2 = pnand %p1909_p0, %p1903_p11 }
  0x17   : > { %1913 = shalt.err (!%p1910_p2)
}
  0x18   : > { %s1999_s27 = smov 384   ;;  %s2000_s28 = smov 24  }
  0x19   : > { %1826 = dma.hbm_to_vmem [thread:$0]  (!%p2075_p7), %s2797_s1, 6144, %s170_s23, [#allocation5], %s1999_s27, %s1999_s27, %s2000_s28  }
  0x1a   : > { %p38_p3 = scmp.ge.s32.totalorder %s36_s25, 4  ;;  %s45_s4 = sadd.s32 1, %s1984_s14 }
  0x1b   : > { %p52_p6 = scmp.ne.s32.totalorder %s1984_s14, %s1980_s13  ;;  %p53_p8 = scmp.eq.s32.totalorder %s1996_s17, 0 }
  0x1c   : > { %s2811_s25 = smov (%p38_p3, %s36_s25), 0  ;;  %p1832_p10 = scmp.lt.s32.totalorder %s1996_s17, 4 }
  0x1d   : > { %p54_p9 = por %p53_p8, %p52_p6  ;;  %s40_s5 = ssub.s32 %s1992_s16, %s2811_s25 }
  0x1e   : > { %s191_s6 = sand.u32 1, %s1984_s14   ;;  %p43_p11 = scmp.eq.s32.totalorder %s40_s5, 0 }
  0x1f   : > { %s1565_s7 = sshll.u32 %s191_s6, 9  ;;  %s1575_s8 = sshll.u32 %s1992_s16, 13 }
  0x20   : > { %s2099_s9 = scalar_select %p43_p11, %s1984_s14, %s45_s4  }
  0x21   : > { %s202_s12 = scalar_lea.hbm %s2796_s0, %s1575_s8  ;;  %s195_s18 = scalar_lea.vmem [#allocation2], %s1565_s7 }
  0x22   : > { %s203_s22 = sshll.u32 %s195_s18, 4  ;;  %p2104_p7 = pnand %p1832_p10, %p54_p9  ;;  %s204_s22 = int_to_ptr.vmem [resolvable:$true] %s203_s22 }
  0x23   : > { %s192_s24 = scalar_lea.sflag [#allocation3], %s191_s6  ;;  %s1927_s26 = scalar_lea.vmem %s204_s22, 8192 }
  0x24   : > { %p1916_p12 = pneg %p2104_p7  ;;  %p1928_p13 = scmp.ne.s32.totalorder %s204_s22, %s1927_s26 }
  0x25   : > { %s2001_s27 = smov [#allocation2]  }
  0x26   : > { %p1930_p0 = pnand %p1928_p13, %p1916_p12  ;;  %s1932_s28 = sshll.u32 %s2001_s27, 4  ;;  %s1933_s28 = int_to_ptr.vmem [resolvable:$false] %s1932_s28 }
  0x27   : > { %s1934_s29 = scalar_lea.vmem %s1933_s28, 16384  ;;  %p1935_p3 = scmp.lt.s32.totalorder %s204_s22, %s1933_s28 }
  0x28   : > { %p1931_p2 = pneg %p1930_p0  ;;  %p1936_p6 = scmp.lt.s32.totalorder %s1934_s29, %s1927_s26 }
  0x2a   : > { %p1937_p8 = por %p1936_p6, %p1935_p3 }
  0x2c   : > { %p1938_p9 = pnand %p1937_p8, %p1931_p2 }
  0x2e   : > { %1941 = shalt.err (!%p1938_p9)
}
  0x2f   : > { %s2002_s30 = smov 128   ;;  %s2003_s4 = smov 8  }
  0x30   : > { %1830 = dma.hbm_to_vmem [thread:$0]  (!%p2104_p7), %s202_s12, 8192, %s204_s22, %s192_s24, %s2002_s30, %s2002_s30, %s2003_s4  }
  0x31   : > { %215 = sbr.rel (%p2067_p5) target bundleno = 477 (0x1dd), region = 32  ;;  %s217_s5 = sand.u32 (!%p2067_p5), 1, %s1980_s13  }
  0x32   : > { %s1569_s6 = sshll.u32 (!%p2067_p5), %s217_s5, 9  ;;  %s218_s7 = scalar_lea.sflag (!%p2067_p5), [#allocation3], %s217_s5 }
  0x33   : > { %s2115_s8 = scalar_lea.vmem (!%p2067_p5), [#allocation2], %s1569_s6 }
  0x36   : > { %1967 = dma.done.wait (%p2063_p4), %s218_s7, 8192  }
  0x37   : > { %1969 = vsyncadd (%p2063_p4), %s218_s7, 4294959104 }
  0x38   : > { %1971 = dma.done.wait (%p2055_p1), [#allocation5], 6144  }
  0x39   : > { %1973 = vsyncadd (%p2055_p1), [#allocation5], 4294961152  ;;  %v2004_v0 = vmov 0.0   ;;  %v387_v1 = vld [vmem:[#allocation4 + $0x170] sm:$0xff]  ;;  %v386_v2 = vld [vmem:[#allocation4 + $0x168] sm:$0xff]  ;;  %s1571_s21 = sshll.u32 %s1988_s15, 6 }
  0x3a   : > { %470 = vmatprep.mubr.f32.mxu0 %v2004_v0  ;;  %758 = vmatprep.mubr.f32.mxu1 %v2004_v0  ;;  %v384_v3 = vld [vmem:[#allocation4 + $0x158] sm:$0xff]  ;;  %v383_v4 = vld [vmem:[#allocation4 + $0x150] sm:$0xff]  ;;  %v381_v5 = vld [vmem:[#allocation4 + $0x140] sm:$0xff]  ;;  %p267_p1 = scmp.lt.s32.totalorder %s1571_s21, 255 }
  0x3b   : > { %406 = vmatprep.subr.mxu0 %v387_v1  ;;  %1784 = vmatprep.subr.mxu1 %v387_v1  ;;  %v380_v6 = vld [vmem:[#allocation4 + $0x138] sm:$0xff]  ;;  %v378_v7 = vld [vmem:[#allocation4 + $0x128] sm:$0xff]  ;;  %v377_v8 = vld [vmem:[#allocation4 + $0x120] sm:$0xff] }
  0x3c   : > { %407 = vmatpush1.msra.mxu0 %v386_v2  ;;  %1800 = vmatpush1.msra.mxu1 %v386_v2  ;;  %v375_v9 = vld [vmem:[#allocation4 + $0x110] sm:$0xff]  ;;  %v374_v10 = vld [vmem:[#allocation4 + $0x108] sm:$0xff]  ;;  %v372_v11 = vld [vmem:[#allocation4 + $0xf8] sm:$0xff]  ;;  %s2813_s21 = smov (!%p267_p1, %s1571_s21), 255 }
  0x3d   : > { %408 = vmatprep.subr.mxu0 %v384_v3  ;;  %1785 = vmatprep.subr.mxu1 %v384_v3  ;;  %v371_v12 = vld [vmem:[#allocation4 + $0xf0] sm:$0xff]  ;;  %v369_v13 = vld [vmem:[#allocation4 + $0xe0] sm:$0xff]  ;;  %v368_v14 = vld [vmem:[#allocation4 + $0xd8] sm:$0xff]  ;;  %s1816_s15 = smul.u32 24, %s2813_s21 }
  0x3e   : > { %409 = vmatpush1.msra.mxu0 %v383_v4  ;;  %1801 = vmatpush1.msra.mxu1 %v383_v4  ;;  %v366_v15 = vld [vmem:[#allocation4 + $0xc8] sm:$0xff]  ;;  %v365_v16 = vld [vmem:[#allocation4 + $0xc0] sm:$0xff]  ;;  %v363_v17 = vld [vmem:[#allocation4 + $0xb0] sm:$0xff] }
  0x3f   : > { %410 = vmatprep.subr.mxu0 %v381_v5  ;;  %1786 = vmatprep.subr.mxu1 %v381_v5  ;;  %v362_v18 = vld [vmem:[#allocation4 + $0xa8] sm:$0xff]  ;;  %v360_v19 = vld [vmem:[#allocation4 + $0x98] sm:$0xff]  ;;  %v359_v20 = vld [vmem:[#allocation4 + $0x90] sm:$0xff]  ;;  %s2392_s12 = scalar_lea.vmem %s2799_s3, %s1816_s15 }
  0x40   : > { %411 = vmatpush1.msra.mxu0 %v380_v6  ;;  %1802 = vmatpush1.msra.mxu1 %v380_v6  ;;  %v357_v21 = vld [vmem:[#allocation4 + $0x80] sm:$0xff]  ;;  %v356_v22 = vld [vmem:[#allocation4 + $0x78] sm:$0xff]  ;;  %v354_v23 = vld [vmem:[#allocation4 + $0x68] sm:$0xff] }
  0x41   : > { %412 = vmatprep.subr.mxu0 %v378_v7  ;;  %1787 = vmatprep.subr.mxu1 %v378_v7  ;;  %v353_v24 = vld [vmem:[#allocation4 + $0x60] sm:$0xff]  ;;  %v351_v25 = vld [vmem:[#allocation4 + $0x50] sm:$0xff]  ;;  %v350_v26 = vld [vmem:[#allocation4 + $0x48] sm:$0xff] }
  0x42   : > { %413 = vmatpush1.msra.mxu0 %v377_v8  ;;  %1803 = vmatpush1.msra.mxu1 %v377_v8  ;;  %v348_v27 = vld [vmem:[#allocation4 + $0x38] sm:$0xff]  ;;  %v347_v28 = vld [vmem:[#allocation4 + $0x30] sm:$0xff]  ;;  %v345_v29 = vld [vmem:[#allocation4 + $0x20] sm:$0xff] }
  0x43   : > { %414 = vmatprep.subr.mxu0 %v375_v9  ;;  %1788 = vmatprep.subr.mxu1 %v375_v9  ;;  %v344_v30 = vld [vmem:[#allocation4 + $0x18] sm:$0xff]  ;;  %v342_v31 = vld [vmem:[#allocation4 + $0x8] sm:$0xff]  ;;  %v341_v32 = vld [vmem:[#allocation4] sm:$0xff] }
  0x44   : > { %415 = vmatpush1.msra.mxu0 %v374_v10  ;;  %1804 = vmatpush1.msra.mxu1 %v374_v10  ;;  %v2128_v33 = vld [vmem:[%s2115_s8] sm:$0xff]  ;;  %v388_v35 = vld [vmem:[#allocation4 + $0x178] sm:$0xff]  ;;  %v2137_v37 = vld [vmem:[%s2115_s8 + $0x8] sm:$0xff] }
  0x45   : > { %416 = vmatprep.subr.mxu0 %v372_v11  ;;  %1789 = vmatprep.subr.mxu1 %v372_v11  ;;  %v2131_v34 = vld [vmem:[%s2115_s8 + $0x180] sm:$0xff]  ;;  %v2140_v38 = vld [vmem:[%s2115_s8 + $0x188] sm:$0xff]  ;;  %v2147_v40 = vld [vmem:[%s2115_s8 + $0x10] sm:$0xff] }
  0x46   : > { %417 = vmatpush1.msra.mxu0 %v371_v12  ;;  %1805 = vmatpush1.msra.mxu1 %v371_v12  ;;  %v385_v36 = vld [vmem:[#allocation4 + $0x160] sm:$0xff]  ;;  %v382_v39 = vld [vmem:[#allocation4 + $0x148] sm:$0xff]  ;;  %v2150_v41 = vld [vmem:[%s2115_s8 + $0x190] sm:$0xff] }
  0x47   : > { %418 = vmatprep.subr.mxu0 %v369_v13  ;;  %1790 = vmatprep.subr.mxu1 %v369_v13  ;;  %v379_v42 = vld [vmem:[#allocation4 + $0x130] sm:$0xff]  ;;  %v2158_v43 = vld [vmem:[%s2115_s8 + $0x18] sm:$0xff]  ;;  %v2168_v46 = vld [vmem:[%s2115_s8 + $0x20] sm:$0xff] }
  0x48   : > { %419 = vmatpush1.msra.mxu0 %v368_v14  ;;  %1806 = vmatpush1.msra.mxu1 %v368_v14  ;;  %v2161_v44 = vld [vmem:[%s2115_s8 + $0x198] sm:$0xff]  ;;  %v2171_v47 = vld [vmem:[%s2115_s8 + $0x1a0] sm:$0xff]  ;;  %v2178_v49 = vld [vmem:[%s2115_s8 + $0x28] sm:$0xff] }
  0x49   : > { %420 = vmatprep.subr.mxu0 %v366_v15  ;;  %1791 = vmatprep.subr.mxu1 %v366_v15  ;;  %v376_v45 = vld [vmem:[#allocation4 + $0x118] sm:$0xff]  ;;  %v373_v48 = vld [vmem:[#allocation4 + $0x100] sm:$0xff]  ;;  %v2181_v50 = vld [vmem:[%s2115_s8 + $0x1a8] sm:$0xff] }
  0x4a   : > { %421 = vmatpush1.msra.mxu0 %v365_v16  ;;  %1807 = vmatpush1.msra.mxu1 %v365_v16  ;;  %v370_v51 = vld [vmem:[#allocation4 + $0xe8] sm:$0xff]  ;;  %v2188_v52 = vld [vmem:[%s2115_s8 + $0x30] sm:$0xff]  ;;  %v2198_v55 = vld [vmem:[%s2115_s8 + $0x38] sm:$0xff] }
  0x4b   : > { %422 = vmatprep.subr.mxu0 %v363_v17  ;;  %1792 = vmatprep.subr.mxu1 %v363_v17  ;;  %v2191_v53 = vld [vmem:[%s2115_s8 + $0x1b0] sm:$0xff]  ;;  %v2201_v56 = vld [vmem:[%s2115_s8 + $0x1b8] sm:$0xff]  ;;  %v2208_v58 = vld [vmem:[%s2115_s8 + $0x40] sm:$0xff] }
  0x4c   : > { %423 = vmatpush1.msra.mxu0 %v362_v18  ;;  %1808 = vmatpush1.msra.mxu1 %v362_v18  ;;  %v367_v54 = vld [vmem:[#allocation4 + $0xd0] sm:$0xff]  ;;  %v364_v57 = vld [vmem:[#allocation4 + $0xb8] sm:$0xff]  ;;  %v2211_v59 = vld [vmem:[%s2115_s8 + $0x1c0] sm:$0xff] }
  0x4d   : > { %424 = vmatprep.subr.mxu0 %v360_v19  ;;  %1793 = vmatprep.subr.mxu1 %v360_v19  ;;  %v361_v60 = vld [vmem:[#allocation4 + $0xa0] sm:$0xff]  ;;  %v2218_v61 = vld [vmem:[%s2115_s8 + $0x48] sm:$0xff]  ;;  %v2228_v1 = vld [vmem:[%s2115_s8 + $0x50] sm:$0xff] }
  0x4e   : > { %425 = vmatpush1.msra.mxu0 %v359_v20  ;;  %1809 = vmatpush1.msra.mxu1 %v359_v20  ;;  %v2221_v62 = vld [vmem:[%s2115_s8 + $0x1c8] sm:$0xff]  ;;  %v2231_v2 = vld [vmem:[%s2115_s8 + $0x1d0] sm:$0xff]  ;;  %v2238_v4 = vld [vmem:[%s2115_s8 + $0x58] sm:$0xff] }
  0x4f   : > { %426 = vmatprep.subr.mxu0 %v357_v21  ;;  %1794 = vmatprep.subr.mxu1 %v357_v21  ;;  %v358_v63 = vld [vmem:[#allocation4 + $0x88] sm:$0xff]  ;;  %v355_v3 = vld [vmem:[#allocation4 + $0x70] sm:$0xff]  ;;  %v2241_v5 = vld [vmem:[%s2115_s8 + $0x1d8] sm:$0xff] }
  0x50   : > { %427 = vmatpush1.msra.mxu0 %v356_v22  ;;  %1810 = vmatpush1.msra.mxu1 %v356_v22  ;;  %v352_v6 = vld [vmem:[#allocation4 + $0x58] sm:$0xff]  ;;  %v2248_v7 = vld [vmem:[%s2115_s8 + $0x60] sm:$0xff]  ;;  %v290_v10 = vld [vmem:[%s2115_s8 + $0x68] sm:$0xff] }
  0x51   : > { %428 = vmatprep.subr.mxu0 %v354_v23  ;;  %1795 = vmatprep.subr.mxu1 %v354_v23  ;;  %v2251_v8 = vld [vmem:[%s2115_s8 + $0x1e0] sm:$0xff]  ;;  %v2259_v11 = vld [vmem:[%s2115_s8 + $0x1e8] sm:$0xff]  ;;  %v291_v13 = vld [vmem:[%s2115_s8 + $0x70] sm:$0xff] }
  0x52   : > { %429 = vmatpush1.msra.mxu0 %v353_v24  ;;  %1811 = vmatpush1.msra.mxu1 %v353_v24  ;;  %v349_v9 = vld [vmem:[#allocation4 + $0x40] sm:$0xff]  ;;  %v346_v12 = vld [vmem:[#allocation4 + $0x28] sm:$0xff]  ;;  %v2266_v14 = vld [vmem:[%s2115_s8 + $0x1f0] sm:$0xff] }
  0x53   : > { %430 = vmatprep.subr.mxu0 %v351_v25  ;;  %1796 = vmatprep.subr.mxu1 %v351_v25  ;;  %v343_v15 = vld [vmem:[#allocation4 + $0x10] sm:$0xff]  ;;  %v292_v16 = vld [vmem:[%s2115_s8 + $0x78] sm:$0xff]  ;;  %v293_v18 = vld [vmem:[%s2115_s8 + $0x80] sm:$0xff] }
  0x54   : > { %431 = vmatpush1.msra.mxu0 %v350_v26  ;;  %1812 = vmatpush1.msra.mxu1 %v350_v26  ;;  %v2273_v17 = vld [vmem:[%s2115_s8 + $0x1f8] sm:$0xff]  ;;  %v294_v19 = vld [vmem:[%s2115_s8 + $0x88] sm:$0xff]  ;;  %v295_v20 = vld [vmem:[%s2115_s8 + $0x90] sm:$0xff] }
  0x55   : > { %432 = vmatprep.subr.mxu0 %v348_v27  ;;  %1797 = vmatprep.subr.mxu1 %v348_v27  ;;  %v296_v21 = vld [vmem:[%s2115_s8 + $0x98] sm:$0xff]  ;;  %v297_v22 = vld [vmem:[%s2115_s8 + $0xa0] sm:$0xff]  ;;  %v298_v23 = vld [vmem:[%s2115_s8 + $0xa8] sm:$0xff] }
  0x56   : > { %433 = vmatpush1.msra.mxu0 %v347_v28  ;;  %1813 = vmatpush1.msra.mxu1 %v347_v28  ;;  %v299_v24 = vld [vmem:[%s2115_s8 + $0xb0] sm:$0xff]  ;;  %v300_v25 = vld [vmem:[%s2115_s8 + $0xb8] sm:$0xff]  ;;  %v301_v26 = vld [vmem:[%s2115_s8 + $0xc0] sm:$0xff] }
  0x57   : > { %434 = vmatprep.subr.mxu0 %v345_v29  ;;  %1798 = vmatprep.subr.mxu1 %v345_v29  ;;  %v302_v27 = vld [vmem:[%s2115_s8 + $0xc8] sm:$0xff]  ;;  %v303_v28 = vld [vmem:[%s2115_s8 + $0xd0] sm:$0xff]  ;;  %v304_v29 = vld [vmem:[%s2115_s8 + $0xd8] sm:$0xff] }
  0x58   : > { %435 = vmatpush1.msra.mxu0 %v344_v30  ;;  %1814 = vmatpush1.msra.mxu1 %v344_v30  ;;  %v305_v30 = vld [vmem:[%s2115_s8 + $0xe0] sm:$0xff] }
  0x59   : > { %436 = vmatprep.subr.mxu0 %v342_v31  ;;  %1799 = vmatprep.subr.mxu1 %v342_v31  ;;  %v306_v31 = vld [vmem:[%s2115_s8 + $0xe8] sm:$0xff] }
  0x5a   : > { %437 = vmatpush1.msra.mxu0 %v341_v32  ;;  %1815 = vmatpush1.msra.mxu1 %v341_v32  ;;  %v307_v32 = vld [vmem:[%s2115_s8 + $0xf0] sm:$0xff] }
  0x5b   : > { %471 = vmatmul.mubr.f32.vlgmr.msra.gmra.mxu0 %v2128_v33  ;;  %759 = vmatmul.mubr.f32.vlgmr.msra.gmra.mxu1 %v2131_v34 }
  0x5c   : > { %1656 = vmatprep.subr.mxu1 %v388_v35  ;;  %476 = vmatprep.mubr.f32.mxu0 %v2004_v0 }
  0x5d   : > { %1657 = vmatpush3.msra.mxu1 %v388_v35  ;;  %764 = vmatprep.mubr.f32.mxu1 %v2004_v0  ;;  %v308_v35 = vld [vmem:[%s2115_s8 + $0xf8] sm:$0xff] }
  0x5e   : > { %1658 = vmatprep.subr.mxu1 %v385_v36 }
  0x5f   : > { %477 = vmatmul.mubr.f32.gmra.mxu0 %v2137_v37  ;;  %765 = vmatmul.mubr.f32.gmra.mxu1 %v2140_v38 }
  0x60   : > { %1659 = vmatpush3.msra.mxu1 %v385_v36  ;;  %482 = vmatprep.mubr.f32.mxu0 %v2004_v0  ;;  %v309_v36 = vld [vmem:[%s2115_s8 + $0x100] sm:$0xff] }
  0x61   : > { %770 = vmatprep.mubr.f32.mxu1 %v2004_v0  ;;  %1660 = vmatprep.subr.mxu1 %v382_v39 }
  0x62   : > { %1661 = vmatpush3.msra.mxu1 %v382_v39  ;;  %v310_v39 = vld [vmem:[%s2115_s8 + $0x108] sm:$0xff] }
  0x63   : > { %483 = vmatmul.mubr.f32.gmra.mxu0 %v2147_v40  ;;  %771 = vmatmul.mubr.f32.gmra.mxu1 %v2150_v41 }
  0x64   : > { %488 = vmatprep.mubr.f32.mxu0 %v2004_v0  ;;  %776 = vmatprep.mubr.f32.mxu1 %v2004_v0 }
  0x65   : > { %1662 = vmatprep.subr.mxu1 %v379_v42 }
  0x66   : > { %1663 = vmatpush3.msra.mxu1 %v379_v42  ;;  %v311_v42 = vld [vmem:[%s2115_s8 + $0x110] sm:$0xff] }
  0x67   : > { %489 = vmatmul.mubr.f32.gmra.mxu0 %v2158_v43  ;;  %777 = vmatmul.mubr.f32.gmra.mxu1 %v2161_v44 }
  0x68   : > { %494 = vmatprep.mubr.f32.mxu0 %v2004_v0  ;;  %782 = vmatprep.mubr.f32.mxu1 %v2004_v0 }
  0x69   : > { %1664 = vmatprep.subr.mxu1 %v376_v45 }
  0x6a   : > { %1665 = vmatpush3.msra.mxu1 %v376_v45 }
  0x6b   : > { %495 = vmatmul.mubr.f32.gmra.mxu0 %v2168_v46  ;;  %783 = vmatmul.mubr.f32.gmra.mxu1 %v2171_v47 }
  0x6c   : > { %500 = vmatprep.mubr.f32.mxu0 %v2004_v0  ;;  %788 = vmatprep.mubr.f32.mxu1 %v2004_v0 }
  0x6d   : > { %1666 = vmatprep.subr.mxu1 %v373_v48 }
  0x6e   : > { %1667 = vmatpush3.msra.mxu1 %v373_v48  ;;  %v313_v48 = vld [vmem:[%s2115_s8 + $0x120] sm:$0xff] }
  0x6f   : > { %501 = vmatmul.mubr.f32.gmra.mxu0 %v2178_v49  ;;  %789 = vmatmul.mubr.f32.gmra.mxu1 %v2181_v50 }
  0x70   : > { %506 = vmatprep.mubr.f32.mxu0 %v2004_v0  ;;  %794 = vmatprep.mubr.f32.mxu1 %v2004_v0 }
  0x71   : > { %1668 = vmatprep.subr.mxu1 %v370_v51 }
  0x72   : > { %1669 = vmatpush3.msra.mxu1 %v370_v51  ;;  %v315_v51 = vld [vmem:[%s2115_s8 + $0x130] sm:$0xff] }
  0x73   : > { %507 = vmatmul.mubr.f32.gmra.mxu0 %v2188_v52  ;;  %795 = vmatmul.mubr.f32.gmra.mxu1 %v2191_v53 }
  0x74   : > { %512 = vmatprep.mubr.f32.mxu0 %v2004_v0  ;;  %800 = vmatprep.mubr.f32.mxu1 %v2004_v0 }
  0x75   : > { %1670 = vmatprep.subr.mxu1 %v367_v54 }
  0x76   : > { %1671 = vmatpush3.msra.mxu1 %v367_v54  ;;  %v317_v54 = vld [vmem:[%s2115_s8 + $0x140] sm:$0xff] }
  0x77   : > { %513 = vmatmul.mubr.f32.gmra.mxu0 %v2198_v55  ;;  %801 = vmatmul.mubr.f32.gmra.mxu1 %v2201_v56 }
  0x78   : > { %518 = vmatprep.mubr.f32.mxu0 %v2004_v0  ;;  %806 = vmatprep.mubr.f32.mxu1 %v2004_v0 }
  0x79   : > { %1672 = vmatprep.subr.mxu1 %v364_v57 }
  0x7a   : > { %1673 = vmatpush3.msra.mxu1 %v364_v57  ;;  %v319_v57 = vld [vmem:[%s2115_s8 + $0x150] sm:$0xff] }
  0x7b   : > { %519 = vmatmul.mubr.f32.gmra.mxu0 %v2208_v58  ;;  %807 = vmatmul.mubr.f32.gmra.mxu1 %v2211_v59 }
  0x7c   : > { %524 = vmatprep.mubr.f32.mxu0 %v2004_v0  ;;  %812 = vmatprep.mubr.f32.mxu1 %v2004_v0 }
  0x7d   : > { %1674 = vmatprep.subr.mxu1 %v361_v60 }
  0x7e   : > { %1675 = vmatpush3.msra.mxu1 %v361_v60  ;;  %v321_v60 = vld [vmem:[%s2115_s8 + $0x160] sm:$0xff] }
  0x7f   : > { %525 = vmatmul.mubr.f32.gmra.mxu0 %v2218_v61  ;;  %813 = vmatmul.mubr.f32.gmra.mxu1 %v2221_v62 }
  0x80   : > { %530 = vmatprep.mubr.f32.mxu0 %v2004_v0  ;;  %818 = vmatprep.mubr.f32.mxu1 %v2004_v0 }
  0x81   : > { %1676 = vmatprep.subr.mxu1 %v358_v63 }
  0x82   : > { %1677 = vmatpush3.msra.mxu1 %v358_v63  ;;  %v323_v63 = vld [vmem:[%s2115_s8 + $0x170] sm:$0xff] }
  0x83   : > { %531 = vmatmul.mubr.f32.gmra.mxu0 %v2228_v1  ;;  %819 = vmatmul.mubr.f32.gmra.mxu1 %v2231_v2 }
  0x84   : > { %536 = vmatprep.mubr.f32.mxu0 %v2004_v0  ;;  %824 = vmatprep.mubr.f32.mxu1 %v2004_v0 }
  0x85   : > { %1678 = vmatprep.subr.mxu1 %v355_v3 }
  0x86   : > { %1679 = vmatpush3.msra.mxu1 %v355_v3 }
  0x87   : > { %537 = vmatmul.mubr.f32.gmra.mxu0 %v2238_v4  ;;  %825 = vmatmul.mubr.f32.gmra.mxu1 %v2241_v5 }
  0x88   : > { %542 = vmatprep.mubr.f32.mxu0 %v2004_v0  ;;  %830 = vmatprep.mubr.f32.mxu1 %v2004_v0 }
  0x89   : > { %1680 = vmatprep.subr.mxu1 %v352_v6 }
  0x8a   : > { %1681 = vmatpush3.msra.mxu1 %v352_v6 }
  0x8b   : > { %543 = vmatmul.mubr.f32.gmra.mxu0 %v2248_v7  ;;  %831 = vmatmul.mubr.f32.gmra.mxu1 %v2251_v8 }
  0x8c   : > { %548 = vmatprep.mubr.f32.mxu0 %v2004_v0  ;;  %836 = vmatprep.mubr.f32.mxu1 %v2004_v0 }
  0x8d   : > { %1682 = vmatprep.subr.mxu1 %v349_v9 }
  0x8e   : > { %1683 = vmatpush3.msra.mxu1 %v349_v9 }
  0x8f   : > { %549 = vmatmul.mubr.f32.gmra.mxu0 %v290_v10  ;;  %837 = vmatmul.mubr.f32.gmra.mxu1 %v2259_v11 }
  0x90   : > { %554 = vmatprep.mubr.f32.mxu0 %v2004_v0  ;;  %842 = vmatprep.mubr.f32.mxu1 %v2004_v0 }
  0x91   : > { %1684 = vmatprep.subr.mxu1 %v346_v12 }
  0x92   : > { %1685 = vmatpush3.msra.mxu1 %v346_v12 }
  0x93   : > { %555 = vmatmul.mubr.f32.gmra.mxu0 %v291_v13  ;;  %843 = vmatmul.mubr.f32.gmra.mxu1 %v2266_v14 }
  0x94   : > { %560 = vmatprep.mubr.f32.mxu0 %v2004_v0  ;;  %848 = vmatprep.mubr.f32.mxu1 %v2004_v0 }
  0x95   : > { %1686 = vmatprep.subr.mxu1 %v343_v15 }
  0x96   : > { %1687 = vmatpush3.msra.mxu1 %v343_v15 }
  0x97   : > { %561 = vmatmul.mubr.f32.gmra.mxu0 %v292_v16  ;;  %849 = vmatmul.mubr.f32.gmra.mxu1 %v2273_v17 }
  0x98   : > { %566 = vmatprep.mubr.f32.mxu0 %v2004_v0  ;;  %1688 = vmatprep.mubr.f32.mxu1 %v2128_v33  ;;  %v391_v33 = vlaneseq }
  0x9b   : > { %567 = vmatmul.mubr.f32.gmra.mxu0 %v293_v18  ;;  %1689 = vmatmul.mubr.f32.vlgmr.msra.gmra.mxu1 %v2137_v37  ;;  %v2322_v37 = vshrl.u32 %v391_v33, 7 }
  0x9c   : > { %572 = vmatprep.mubr.f32.mxu0 %v2004_v0  ;;  %1691 = vmatprep.mubr.f32.mxu1 %v2147_v40 }
  0x9d   : > { %v401_v40 = vsub.s32 2, %v2322_v37 }
  0x9f   : > { %573 = vmatmul.mubr.f32.gmra.mxu0 %v294_v19  ;;  %1692 = vmatmul.mubr.f32.gmra.mxu1 %v2158_v43  ;;  %v2331_v43 = vld [vmem:[%s2798_s2] sm:$0x7] }
  0xa0   : > { %578 = vmatprep.mubr.f32.mxu0 %v2004_v0  ;;  %1694 = vmatprep.mubr.f32.mxu1 %v2168_v46  ;;  %v2334_v45 = vrot.slane %v2331_v43, %v401_v40  ;;  %v312_v46 = vld [vmem:[%s2115_s8 + $0x118] sm:$0xff] }
  0xa3   : > { %579 = vmatmul.mubr.f32.gmra.mxu0 %v295_v20  ;;  %1695 = vmatmul.mubr.f32.gmra.mxu1 %v2178_v49  ;;  %v314_v49 = vld [vmem:[%s2115_s8 + $0x128] sm:$0xff] }
  0xa4   : > { %584 = vmatprep.mubr.f32.mxu0 %v2004_v0  ;;  %1697 = vmatprep.mubr.f32.mxu1 %v2188_v52  ;;  %v316_v52 = vld [vmem:[%s2115_s8 + $0x138] sm:$0xff] }
  0xa7   : > { %585 = vmatmul.mubr.f32.gmra.mxu0 %v296_v21  ;;  %1698 = vmatmul.mubr.f32.gmra.mxu1 %v2198_v55  ;;  %v318_v55 = vld [vmem:[%s2115_s8 + $0x148] sm:$0xff] }
  0xa8   : > { %590 = vmatprep.mubr.f32.mxu0 %v2004_v0  ;;  %1700 = vmatprep.mubr.f32.mxu1 %v2208_v58  ;;  %v320_v58 = vld [vmem:[%s2115_s8 + $0x158] sm:$0xff] }
  0xab   : > { %591 = vmatmul.mubr.f32.gmra.mxu0 %v297_v22  ;;  %1701 = vmatmul.mubr.f32.gmra.mxu1 %v2218_v61  ;;  %v322_v61 = vld [vmem:[%s2115_s8 + $0x168] sm:$0xff] }
  0xac   : > { %596 = vmatprep.mubr.f32.mxu0 %v2004_v0  ;;  %1703 = vmatprep.mubr.f32.mxu1 %v2228_v1  ;;  %v324_v1 = vld [vmem:[%s2115_s8 + $0x178] sm:$0xff] }
  0xaf   : > { %597 = vmatmul.mubr.f32.gmra.mxu0 %v298_v23  ;;  %1704 = vmatmul.mubr.f32.gmra.mxu1 %v2238_v4 }
  0xb0   : > { %602 = vmatprep.mubr.f32.mxu0 %v2004_v0  ;;  %1706 = vmatprep.mubr.f32.mxu1 %v2248_v7 }
  0xb3   : > { %603 = vmatmul.mubr.f32.gmra.mxu0 %v299_v24  ;;  %1707 = vmatmul.mubr.f32.gmra.mxu1 %v290_v10 }
  0xb4   : > { %608 = vmatprep.mubr.f32.mxu0 %v2004_v0  ;;  %1709 = vmatprep.mubr.f32.mxu1 %v291_v13 }
  0xb7   : > { %609 = vmatmul.mubr.f32.gmra.mxu0 %v300_v25  ;;  %1710 = vmatmul.mubr.f32.gmra.mxu1 %v292_v16 }
  0xb8   : > { %614 = vmatprep.mubr.f32.mxu0 %v2004_v0  ;;  %1712 = vmatprep.mubr.f32.mxu1 %v293_v18 }
  0xbb   : > { %615 = vmatmul.mubr.f32.gmra.mxu0 %v301_v26  ;;  %1713 = vmatmul.mubr.f32.gmra.mxu1 %v294_v19 }
  0xbc   : > { %620 = vmatprep.mubr.f32.mxu0 %v2004_v0  ;;  %1715 = vmatprep.mubr.f32.mxu1 %v295_v20 }
  0xbf   : > { %621 = vmatmul.mubr.f32.gmra.mxu0 %v302_v27  ;;  %1716 = vmatmul.mubr.f32.gmra.mxu1 %v296_v21 }
  0xc0   : > { %626 = vmatprep.mubr.f32.mxu0 %v2004_v0  ;;  %1718 = vmatprep.mubr.f32.mxu1 %v297_v22 }
  0xc3   : > { %627 = vmatmul.mubr.f32.gmra.mxu0 %v303_v28  ;;  %1719 = vmatmul.mubr.f32.gmra.mxu1 %v298_v23 }
  0xc4   : > { %632 = vmatprep.mubr.f32.mxu0 %v2004_v0  ;;  %1721 = vmatprep.mubr.f32.mxu1 %v299_v24 }
  0xc7   : > { %633 = vmatmul.mubr.f32.gmra.mxu0 %v304_v29  ;;  %1722 = vmatmul.mubr.f32.gmra.mxu1 %v300_v25 }
  0xc8   : > { %638 = vmatprep.mubr.f32.mxu0 %v2004_v0  ;;  %1724 = vmatprep.mubr.f32.mxu1 %v301_v26 }
  0xcb   : > { %639 = vmatmul.mubr.f32.gmra.mxu0 %v305_v30  ;;  %1725 = vmatmul.mubr.f32.gmra.mxu1 %v302_v27 }
  0xcc   : > { %644 = vmatprep.mubr.f32.mxu0 %v2004_v0  ;;  %1727 = vmatprep.mubr.f32.mxu1 %v303_v28 }
  0xcf   : > { %645 = vmatmul.mubr.f32.gmra.mxu0 %v306_v31  ;;  %1728 = vmatmul.mubr.f32.gmra.mxu1 %v304_v29 }
  0xd0   : > { %650 = vmatprep.mubr.f32.mxu0 %v2004_v0  ;;  %1730 = vmatprep.mubr.f32.mxu1 %v305_v30 }
  0xd3   : > { %651 = vmatmul.mubr.f32.gmra.mxu0 %v307_v32  ;;  %1731 = vmatmul.mubr.f32.gmra.mxu1 %v306_v31 }
  0xd4   : > { %656 = vmatprep.mubr.f32.mxu0 %v2004_v0  ;;  %1733 = vmatprep.mubr.f32.mxu1 %v307_v32 }
  0xd7   : > { %657 = vmatmul.mubr.f32.gmra.mxu0 %v308_v35  ;;  %1734 = vmatmul.mubr.f32.gmra.mxu1 %v308_v35 }
  0xd8   : > { %662 = vmatprep.mubr.f32.mxu0 %v2004_v0  ;;  %1736 = vmatprep.mubr.f32.mxu1 %v309_v36 }
  0xdb   : > { %663 = vmatmul.mubr.f32.gmra.mxu0 %v309_v36  ;;  %1737 = vmatmul.mubr.f32.gmra.mxu1 %v310_v39 }
  0xdc   : > { %668 = vmatprep.mubr.f32.mxu0 %v2004_v0  ;;  %1739 = vmatprep.mubr.f32.mxu1 %v311_v42 }
  0xdf   : > { %669 = vmatmul.mubr.f32.gmra.mxu0 %v310_v39  ;;  %1740 = vmatmul.mubr.f32.gmra.mxu1 %v312_v46 }
  0xe0   : > { %674 = vmatprep.mubr.f32.mxu0 %v2004_v0  ;;  %1742 = vmatprep.mubr.f32.mxu1 %v313_v48 }
  0xe3   : > { %675 = vmatmul.mubr.f32.gmra.mxu0 %v311_v42  ;;  %1743 = vmatmul.mubr.f32.gmra.mxu1 %v314_v49 }
  0xe4   : > { %680 = vmatprep.mubr.f32.mxu0 %v2004_v0  ;;  %1745 = vmatprep.mubr.f32.mxu1 %v315_v51 }
  0xe7   : > { %681 = vmatmul.mubr.f32.gmra.mxu0 %v312_v46  ;;  %1746 = vmatmul.mubr.f32.gmra.mxu1 %v316_v52 }
  0xe8   : > { %686 = vmatprep.mubr.f32.mxu0 %v2004_v0  ;;  %1748 = vmatprep.mubr.f32.mxu1 %v317_v54 }
  0xeb   : > { %687 = vmatmul.mubr.f32.gmra.mxu0 %v313_v48  ;;  %1749 = vmatmul.mubr.f32.gmra.mxu1 %v318_v55 }
  0xec   : > { %692 = vmatprep.mubr.f32.mxu0 %v2004_v0  ;;  %1751 = vmatprep.mubr.f32.mxu1 %v319_v57 }
  0xef   : > { %693 = vmatmul.mubr.f32.gmra.mxu0 %v314_v49  ;;  %1752 = vmatmul.mubr.f32.gmra.mxu1 %v320_v58 }
  0xf0   : > { %698 = vmatprep.mubr.f32.mxu0 %v2004_v0  ;;  %1754 = vmatprep.mubr.f32.mxu1 %v321_v60 }
  0xf3   : > { %699 = vmatmul.mubr.f32.gmra.mxu0 %v315_v51  ;;  %1755 = vmatmul.mubr.f32.gmra.mxu1 %v322_v61 }
  0xf4   : > { %704 = vmatprep.mubr.f32.mxu0 %v2004_v0  ;;  %1757 = vmatprep.mubr.f32.mxu1 %v323_v63 }
  0xf7   : > { %705 = vmatmul.mubr.f32.gmra.mxu0 %v316_v52  ;;  %1758 = vmatmul.mubr.f32.gmra.mxu1 %v324_v1 }
  0xf8   : > { %710 = vmatprep.mubr.f32.mxu0 %v2004_v0  ;;  %1760 = vmatprep.mubr.f32.mxu1 %v2131_v34  ;;  %v393_v34 = vsub.s32 0, %v2322_v37 }
  0xfb   : > { %711 = vmatmul.mubr.f32.gmra.mxu0 %v317_v54  ;;  %1761 = vmatmul.mubr.f32.gmra.mxu1 %v2140_v38  ;;  %v397_v38 = vsub.s32 1, %v2322_v37 }
  0xfc   : > { %716 = vmatprep.mubr.f32.mxu0 %v2004_v0  ;;  %1763 = vmatprep.mubr.f32.mxu1 %v2150_v41  ;;  %v2384_v41 = vrot.slane %v2331_v43, %v393_v34 }
  0xff   : > { %717 = vmatmul.mubr.f32.gmra.mxu0 %v318_v55  ;;  %1764 = vmatmul.mubr.f32.gmra.mxu1 %v2161_v44  ;;  %v2387_v44 = vrot.slane %v2331_v43, %v397_v38 }
 0x100   : > { %722 = vmatprep.mubr.f32.mxu0 %v2004_v0  ;;  %1766 = vmatprep.mubr.f32.mxu1 %v2171_v47 }
 0x103   : > { %723 = vmatmul.mubr.f32.gmra.mxu0 %v319_v57  ;;  %1767 = vmatmul.mubr.f32.gmra.mxu1 %v2181_v50 }
 0x104   : > { %728 = vmatprep.mubr.f32.mxu0 %v2004_v0  ;;  %1769 = vmatprep.mubr.f32.mxu1 %v2191_v53 }
 0x107   : > { %729 = vmatmul.mubr.f32.gmra.mxu0 %v320_v58  ;;  %1770 = vmatmul.mubr.f32.gmra.mxu1 %v2201_v56 }
 0x108   : > { %734 = vmatprep.mubr.f32.mxu0 %v2004_v0  ;;  %1772 = vmatprep.mubr.f32.mxu1 %v2211_v59 }
 0x10b   : > { %735 = vmatmul.mubr.f32.gmra.mxu0 %v321_v60  ;;  %1773 = vmatmul.mubr.f32.gmra.mxu1 %v2221_v62 }
 0x10c   : > { %740 = vmatprep.mubr.f32.mxu0 %v2004_v0  ;;  %1775 = vmatprep.mubr.f32.mxu1 %v2231_v2 }
 0x10f   : > { %741 = vmatmul.mubr.f32.gmra.mxu0 %v322_v61  ;;  %1776 = vmatmul.mubr.f32.gmra.mxu1 %v2241_v5 }
 0x110   : > { %746 = vmatprep.mubr.f32.mxu0 %v2004_v0  ;;  %1778 = vmatprep.mubr.f32.mxu1 %v2251_v8 }
 0x113   : > { %747 = vmatmul.mubr.f32.gmra.mxu0 %v323_v63  ;;  %1779 = vmatmul.mubr.f32.gmra.mxu1 %v2259_v11 }
 0x114   : > { %752 = vmatprep.mubr.f32.mxu0 %v2004_v0  ;;  %1781 = vmatprep.mubr.f32.mxu1 %v2266_v14 }
 0x117   : > { %753 = vmatmul.mubr.f32.gmra.mxu0 %v324_v1  ;;  %1782 = vmatmul.mubr.f32.gmra.mxu1 %v2273_v17 }
 0x11b   : > { %v472_v0 = vpop.f32.mrf.mxu0  ;;  %v760_v47 = vpop.f32.mrf.mxu1 }
 0x11c   : > { %v473_v50 = vadd.f32 %v472_v0, %v2384_v41  ;;  %v761_v53 = vadd.f32 %v760_v47, %v2384_v41 }
 0x11d   : > { %v474_v56 = vpop.f32.mrf.mxu0  ;;  %v762_v59 = vpop.f32.mrf.mxu1 }
 0x11e   : > { %1240 = vst [vmem:[%s2392_s12] sm:$0xff] %v473_v50  ;;  %1384 = vst [vmem:[%s2392_s12 + $0x480] sm:$0xff] %v761_v53  ;;  %v475_v62 = vadd.f32 %v474_v56, %v2387_v44  ;;  %v763_v2 = vadd.f32 %v762_v59, %v2387_v44 }
 0x11f   : > { %v478_v3 = vpop.f32.mrf.mxu0  ;;  %v766_v4 = vpop.f32.mrf.mxu1 }
 0x120   : > { %1241 = vst [vmem:[%s2392_s12 + $0x8] sm:$0xff] %v475_v62  ;;  %1385 = vst [vmem:[%s2392_s12 + $0x488] sm:$0xff] %v763_v2  ;;  %v479_v5 = vadd.f32 %v478_v3, %v2384_v41  ;;  %v767_v6 = vadd.f32 %v766_v4, %v2384_v41 }
 0x121   : > { %v480_v7 = vpop.f32.mrf.mxu0  ;;  %v768_v8 = vpop.f32.mrf.mxu1 }
 0x122   : > { %1243 = vst [vmem:[%s2392_s12 + $0x18] sm:$0xff] %v479_v5  ;;  %1387 = vst [vmem:[%s2392_s12 + $0x498] sm:$0xff] %v767_v6  ;;  %v481_v9 = vadd.f32 %v480_v7, %v2387_v44  ;;  %v769_v10 = vadd.f32 %v768_v8, %v2387_v44 }
 0x123   : > { %v484_v11 = vpop.f32.mrf.mxu0  ;;  %v772_v12 = vpop.f32.mrf.mxu1 }
 0x124   : > { %1244 = vst [vmem:[%s2392_s12 + $0x20] sm:$0xff] %v481_v9  ;;  %1388 = vst [vmem:[%s2392_s12 + $0x4a0] sm:$0xff] %v769_v10  ;;  %v485_v13 = vadd.f32 %v484_v11, %v2384_v41  ;;  %v773_v14 = vadd.f32 %v772_v12, %v2384_v41 }
 0x125   : > { %v486_v15 = vpop.f32.mrf.mxu0  ;;  %v774_v16 = vpop.f32.mrf.mxu1 }
 0x126   : > { %1246 = vst [vmem:[%s2392_s12 + $0x30] sm:$0xff] %v485_v13  ;;  %1390 = vst [vmem:[%s2392_s12 + $0x4b0] sm:$0xff] %v773_v14  ;;  %v487_v17 = vadd.f32 %v486_v15, %v2387_v44  ;;  %v775_v18 = vadd.f32 %v774_v16, %v2387_v44 }
 0x127   : > { %v490_v19 = vpop.f32.mrf.mxu0  ;;  %v778_v20 = vpop.f32.mrf.mxu1 }
 0x128   : > { %1247 = vst [vmem:[%s2392_s12 + $0x38] sm:$0xff] %v487_v17  ;;  %1391 = vst [vmem:[%s2392_s12 + $0x4b8] sm:$0xff] %v775_v18  ;;  %v491_v21 = vadd.f32 %v490_v19, %v2384_v41  ;;  %v779_v22 = vadd.f32 %v778_v20, %v2384_v41 }
 0x129   : > { %v492_v23 = vpop.f32.mrf.mxu0  ;;  %v780_v24 = vpop.f32.mrf.mxu1 }
 0x12a   : > { %1249 = vst [vmem:[%s2392_s12 + $0x48] sm:$0xff] %v491_v21  ;;  %1393 = vst [vmem:[%s2392_s12 + $0x4c8] sm:$0xff] %v779_v22  ;;  %v493_v25 = vadd.f32 %v492_v23, %v2387_v44  ;;  %v781_v26 = vadd.f32 %v780_v24, %v2387_v44 }
 0x12b   : > { %v496_v27 = vpop.f32.mrf.mxu0  ;;  %v784_v28 = vpop.f32.mrf.mxu1 }
 0x12c   : > { %1250 = vst [vmem:[%s2392_s12 + $0x50] sm:$0xff] %v493_v25  ;;  %1394 = vst [vmem:[%s2392_s12 + $0x4d0] sm:$0xff] %v781_v26  ;;  %v497_v29 = vadd.f32 %v496_v27, %v2384_v41  ;;  %v785_v30 = vadd.f32 %v784_v28, %v2384_v41 }
 0x12d   : > { %v498_v31 = vpop.f32.mrf.mxu0  ;;  %v786_v32 = vpop.f32.mrf.mxu1 }
 0x12e   : > { %1252 = vst [vmem:[%s2392_s12 + $0x60] sm:$0xff] %v497_v29  ;;  %1396 = vst [vmem:[%s2392_s12 + $0x4e0] sm:$0xff] %v785_v30  ;;  %v499_v33 = vadd.f32 %v498_v31, %v2387_v44  ;;  %v787_v35 = vadd.f32 %v786_v32, %v2387_v44 }
 0x12f   : > { %v502_v36 = vpop.f32.mrf.mxu0  ;;  %v790_v37 = vpop.f32.mrf.mxu1 }
 0x130   : > { %1253 = vst [vmem:[%s2392_s12 + $0x68] sm:$0xff] %v499_v33  ;;  %1397 = vst [vmem:[%s2392_s12 + $0x4e8] sm:$0xff] %v787_v35  ;;  %v503_v39 = vadd.f32 %v502_v36, %v2384_v41  ;;  %v791_v40 = vadd.f32 %v790_v37, %v2384_v41 }
 0x131   : > { %v504_v42 = vpop.f32.mrf.mxu0  ;;  %v792_v43 = vpop.f32.mrf.mxu1 }
 0x132   : > { %1255 = vst [vmem:[%s2392_s12 + $0x78] sm:$0xff] %v503_v39  ;;  %1399 = vst [vmem:[%s2392_s12 + $0x4f8] sm:$0xff] %v791_v40  ;;  %v505_v46 = vadd.f32 %v504_v42, %v2387_v44  ;;  %v793_v48 = vadd.f32 %v792_v43, %v2387_v44 }
 0x133   : > { %v508_v49 = vpop.f32.mrf.mxu0  ;;  %v796_v51 = vpop.f32.mrf.mxu1 }
 0x134   : > { %1256 = vst [vmem:[%s2392_s12 + $0x80] sm:$0xff] %v505_v46  ;;  %1400 = vst [vmem:[%s2392_s12 + $0x500] sm:$0xff] %v793_v48  ;;  %v509_v52 = vadd.f32 %v508_v49, %v2384_v41  ;;  %v797_v54 = vadd.f32 %v796_v51, %v2384_v41 }
 0x135   : > { %v510_v55 = vpop.f32.mrf.mxu0  ;;  %v798_v57 = vpop.f32.mrf.mxu1 }
 0x136   : > { %1258 = vst [vmem:[%s2392_s12 + $0x90] sm:$0xff] %v509_v52  ;;  %1402 = vst [vmem:[%s2392_s12 + $0x510] sm:$0xff] %v797_v54  ;;  %v511_v58 = vadd.f32 %v510_v55, %v2387_v44  ;;  %v799_v60 = vadd.f32 %v798_v57, %v2387_v44 }
 0x137   : > { %v514_v61 = vpop.f32.mrf.mxu0  ;;  %v802_v63 = vpop.f32.mrf.mxu1 }
 0x138   : > { %1259 = vst [vmem:[%s2392_s12 + $0x98] sm:$0xff] %v511_v58  ;;  %1403 = vst [vmem:[%s2392_s12 + $0x518] sm:$0xff] %v799_v60  ;;  %v515_v1 = vadd.f32 %v514_v61, %v2384_v41  ;;  %v803_v34 = vadd.f32 %v802_v63, %v2384_v41 }
 0x139   : > { %v516_v38 = vpop.f32.mrf.mxu0  ;;  %v804_v0 = vpop.f32.mrf.mxu1 }
 0x13a   : > { %1261 = vst [vmem:[%s2392_s12 + $0xa8] sm:$0xff] %v515_v1  ;;  %1405 = vst [vmem:[%s2392_s12 + $0x528] sm:$0xff] %v803_v34  ;;  %v517_v47 = vadd.f32 %v516_v38, %v2387_v44  ;;  %v805_v50 = vadd.f32 %v804_v0, %v2387_v44 }
 0x13b   : > { %v520_v53 = vpop.f32.mrf.mxu0  ;;  %v808_v56 = vpop.f32.mrf.mxu1 }
 0x13c   : > { %1262 = vst [vmem:[%s2392_s12 + $0xb0] sm:$0xff] %v517_v47  ;;  %1406 = vst [vmem:[%s2392_s12 + $0x530] sm:$0xff] %v805_v50  ;;  %v521_v59 = vadd.f32 %v520_v53, %v2384_v41  ;;  %v809_v62 = vadd.f32 %v808_v56, %v2384_v41 }
 0x13d   : > { %v522_v2 = vpop.f32.mrf.mxu0  ;;  %v810_v3 = vpop.f32.mrf.mxu1 }
 0x13e   : > { %1264 = vst [vmem:[%s2392_s12 + $0xc0] sm:$0xff] %v521_v59  ;;  %1408 = vst [vmem:[%s2392_s12 + $0x540] sm:$0xff] %v809_v62  ;;  %v523_v4 = vadd.f32 %v522_v2, %v2387_v44  ;;  %v811_v5 = vadd.f32 %v810_v3, %v2387_v44 }
 0x13f   : > { %v526_v6 = vpop.f32.mrf.mxu0  ;;  %v814_v7 = vpop.f32.mrf.mxu1 }
 0x140   : > { %1265 = vst [vmem:[%s2392_s12 + $0xc8] sm:$0xff] %v523_v4  ;;  %1409 = vst [vmem:[%s2392_s12 + $0x548] sm:$0xff] %v811_v5  ;;  %v527_v8 = vadd.f32 %v526_v6, %v2384_v41  ;;  %v815_v9 = vadd.f32 %v814_v7, %v2384_v41 }
 0x141   : > { %v528_v10 = vpop.f32.mrf.mxu0  ;;  %v816_v11 = vpop.f32.mrf.mxu1 }
 0x142   : > { %1267 = vst [vmem:[%s2392_s12 + $0xd8] sm:$0xff] %v527_v8  ;;  %1411 = vst [vmem:[%s2392_s12 + $0x558] sm:$0xff] %v815_v9  ;;  %v529_v12 = vadd.f32 %v528_v10, %v2387_v44  ;;  %v817_v13 = vadd.f32 %v816_v11, %v2387_v44 }
 0x143   : > { %v532_v14 = vpop.f32.mrf.mxu0  ;;  %v820_v15 = vpop.f32.mrf.mxu1 }
 0x144   : > { %1268 = vst [vmem:[%s2392_s12 + $0xe0] sm:$0xff] %v529_v12  ;;  %1412 = vst [vmem:[%s2392_s12 + $0x560] sm:$0xff] %v817_v13  ;;  %v533_v16 = vadd.f32 %v532_v14, %v2384_v41  ;;  %v821_v17 = vadd.f32 %v820_v15, %v2384_v41 }
 0x145   : > { %v534_v18 = vpop.f32.mrf.mxu0  ;;  %v822_v19 = vpop.f32.mrf.mxu1 }
 0x146   : > { %1270 = vst [vmem:[%s2392_s12 + $0xf0] sm:$0xff] %v533_v16  ;;  %1414 = vst [vmem:[%s2392_s12 + $0x570] sm:$0xff] %v821_v17  ;;  %v535_v20 = vadd.f32 %v534_v18, %v2387_v44  ;;  %v823_v21 = vadd.f32 %v822_v19, %v2387_v44 }
 0x147   : > { %v538_v22 = vpop.f32.mrf.mxu0  ;;  %v826_v23 = vpop.f32.mrf.mxu1 }
 0x148   : > { %1271 = vst [vmem:[%s2392_s12 + $0xf8] sm:$0xff] %v535_v20  ;;  %1415 = vst [vmem:[%s2392_s12 + $0x578] sm:$0xff] %v823_v21  ;;  %v539_v24 = vadd.f32 %v538_v22, %v2384_v41  ;;  %v827_v25 = vadd.f32 %v826_v23, %v2384_v41 }
 0x149   : > { %v540_v26 = vpop.f32.mrf.mxu0  ;;  %v828_v27 = vpop.f32.mrf.mxu1 }
 0x14a   : > { %1273 = vst [vmem:[%s2392_s12 + $0x108] sm:$0xff] %v539_v24  ;;  %1417 = vst [vmem:[%s2392_s12 + $0x588] sm:$0xff] %v827_v25  ;;  %v541_v28 = vadd.f32 %v540_v26, %v2387_v44  ;;  %v829_v29 = vadd.f32 %v828_v27, %v2387_v44 }
 0x14b   : > { %v544_v30 = vpop.f32.mrf.mxu0  ;;  %v832_v31 = vpop.f32.mrf.mxu1 }
 0x14c   : > { %1274 = vst [vmem:[%s2392_s12 + $0x110] sm:$0xff] %v541_v28  ;;  %1418 = vst [vmem:[%s2392_s12 + $0x590] sm:$0xff] %v829_v29  ;;  %v545_v32 = vadd.f32 %v544_v30, %v2384_v41  ;;  %v833_v33 = vadd.f32 %v832_v31, %v2384_v41 }
 0x14d   : > { %v546_v35 = vpop.f32.mrf.mxu0  ;;  %v834_v36 = vpop.f32.mrf.mxu1 }
 0x14e   : > { %1276 = vst [vmem:[%s2392_s12 + $0x120] sm:$0xff] %v545_v32  ;;  %1420 = vst [vmem:[%s2392_s12 + $0x5a0] sm:$0xff] %v833_v33  ;;  %v547_v37 = vadd.f32 %v546_v35, %v2387_v44  ;;  %v835_v39 = vadd.f32 %v834_v36, %v2387_v44 }
 0x14f   : > { %v550_v40 = vpop.f32.mrf.mxu0  ;;  %v838_v42 = vpop.f32.mrf.mxu1 }
 0x150   : > { %1277 = vst [vmem:[%s2392_s12 + $0x128] sm:$0xff] %v547_v37  ;;  %1421 = vst [vmem:[%s2392_s12 + $0x5a8] sm:$0xff] %v835_v39  ;;  %v551_v43 = vadd.f32 %v550_v40, %v2384_v41  ;;  %v839_v46 = vadd.f32 %v838_v42, %v2384_v41 }
 0x151   : > { %v552_v48 = vpop.f32.mrf.mxu0  ;;  %v840_v49 = vpop.f32.mrf.mxu1 }
 0x152   : > { %1279 = vst [vmem:[%s2392_s12 + $0x138] sm:$0xff] %v551_v43  ;;  %1423 = vst [vmem:[%s2392_s12 + $0x5b8] sm:$0xff] %v839_v46  ;;  %v553_v51 = vadd.f32 %v552_v48, %v2387_v44  ;;  %v841_v52 = vadd.f32 %v840_v49, %v2387_v44 }
 0x153   : > { %v556_v54 = vpop.f32.mrf.mxu0  ;;  %v844_v55 = vpop.f32.mrf.mxu1 }
 0x154   : > { %1280 = vst [vmem:[%s2392_s12 + $0x140] sm:$0xff] %v553_v51  ;;  %1424 = vst [vmem:[%s2392_s12 + $0x5c0] sm:$0xff] %v841_v52  ;;  %v557_v57 = vadd.f32 %v556_v54, %v2384_v41  ;;  %v845_v58 = vadd.f32 %v844_v55, %v2384_v41 }
 0x155   : > { %v558_v60 = vpop.f32.mrf.mxu0  ;;  %v846_v61 = vpop.f32.mrf.mxu1 }
 0x156   : > { %1282 = vst [vmem:[%s2392_s12 + $0x150] sm:$0xff] %v557_v57  ;;  %1426 = vst [vmem:[%s2392_s12 + $0x5d0] sm:$0xff] %v845_v58  ;;  %v559_v63 = vadd.f32 %v558_v60, %v2387_v44  ;;  %v847_v1 = vadd.f32 %v846_v61, %v2387_v44 }
 0x157   : > { %v562_v34 = vpop.f32.mrf.mxu0  ;;  %v850_v38 = vpop.f32.mrf.mxu1 }
 0x158   : > { %1283 = vst [vmem:[%s2392_s12 + $0x158] sm:$0xff] %v559_v63  ;;  %1427 = vst [vmem:[%s2392_s12 + $0x5d8] sm:$0xff] %v847_v1  ;;  %v563_v0 = vadd.f32 %v562_v34, %v2384_v41  ;;  %v851_v47 = vadd.f32 %v850_v38, %v2384_v41 }
 0x159   : > { %v564_v50 = vpop.f32.mrf.mxu0  ;;  %v852_v53 = vpop.f32.mrf.mxu1 }
 0x15a   : > { %1285 = vst [vmem:[%s2392_s12 + $0x168] sm:$0xff] %v563_v0  ;;  %1429 = vst [vmem:[%s2392_s12 + $0x5e8] sm:$0xff] %v851_v47  ;;  %v565_v56 = vadd.f32 %v564_v50, %v2387_v44  ;;  %v853_v59 = vadd.f32 %v852_v53, %v2387_v44 }
 0x15b   : > { %v568_v62 = vpop.f32.mrf.mxu0  ;;  %v1690_v2 = vpop.f32.mrf.mxu1 }
 0x15c   : > { %1286 = vst [vmem:[%s2392_s12 + $0x170] sm:$0xff] %v565_v56  ;;  %1430 = vst [vmem:[%s2392_s12 + $0x5f0] sm:$0xff] %v853_v59  ;;  %v569_v3 = vadd.f32 %v568_v62, %v2384_v41  ;;  %v927_v4 = vadd.f32 %v1690_v2, %v2334_v45 }
 0x15d   : > { %v570_v5 = vpop.f32.mrf.mxu0  ;;  %v921_v6 = vpop.f32.mrf.mxu1 }
 0x15e   : > { %1288 = vst [vmem:[%s2392_s12 + $0x180] sm:$0xff] %v569_v3  ;;  %1245 = vst [vmem:[%s2392_s12 + $0x28] sm:$0xff] %v927_v4  ;;  %v571_v7 = vadd.f32 %v570_v5, %v2387_v44  ;;  %v922_v8 = vadd.f32 %v921_v6, %v2334_v45 }
 0x15f   : > { %v574_v9 = vpop.f32.mrf.mxu0  ;;  %v1693_v10 = vpop.f32.mrf.mxu1 }
 0x160   : > { %1289 = vst [vmem:[%s2392_s12 + $0x188] sm:$0xff] %v571_v7  ;;  %1242 = vst [vmem:[%s2392_s12 + $0x10] sm:$0xff] %v922_v8  ;;  %v575_v11 = vadd.f32 %v574_v9, %v2384_v41  ;;  %v937_v12 = vadd.f32 %v1693_v10, %v2334_v45 }
 0x161   : > { %v576_v13 = vpop.f32.mrf.mxu0  ;;  %v931_v14 = vpop.f32.mrf.mxu1 }
 0x162   : > { %1291 = vst [vmem:[%s2392_s12 + $0x198] sm:$0xff] %v575_v11  ;;  %1251 = vst [vmem:[%s2392_s12 + $0x58] sm:$0xff] %v937_v12  ;;  %v577_v15 = vadd.f32 %v576_v13, %v2387_v44  ;;  %v932_v16 = vadd.f32 %v931_v14, %v2334_v45 }
 0x163   : > { %v580_v17 = vpop.f32.mrf.mxu0  ;;  %v1696_v18 = vpop.f32.mrf.mxu1 }
 0x164   : > { %1292 = vst [vmem:[%s2392_s12 + $0x1a0] sm:$0xff] %v577_v15  ;;  %1248 = vst [vmem:[%s2392_s12 + $0x40] sm:$0xff] %v932_v16  ;;  %v581_v19 = vadd.f32 %v580_v17, %v2384_v41  ;;  %v947_v20 = vadd.f32 %v1696_v18, %v2334_v45 }
 0x165   : > { %v582_v21 = vpop.f32.mrf.mxu0  ;;  %v941_v22 = vpop.f32.mrf.mxu1 }
 0x166   : > { %1294 = vst [vmem:[%s2392_s12 + $0x1b0] sm:$0xff] %v581_v19  ;;  %1257 = vst [vmem:[%s2392_s12 + $0x88] sm:$0xff] %v947_v20  ;;  %v583_v23 = vadd.f32 %v582_v21, %v2387_v44  ;;  %v942_v24 = vadd.f32 %v941_v22, %v2334_v45 }
 0x167   : > { %v586_v25 = vpop.f32.mrf.mxu0  ;;  %v1699_v26 = vpop.f32.mrf.mxu1 }
 0x168   : > { %1295 = vst [vmem:[%s2392_s12 + $0x1b8] sm:$0xff] %v583_v23  ;;  %1254 = vst [vmem:[%s2392_s12 + $0x70] sm:$0xff] %v942_v24  ;;  %v587_v27 = vadd.f32 %v586_v25, %v2384_v41  ;;  %v957_v28 = vadd.f32 %v1699_v26, %v2334_v45 }
 0x169   : > { %v588_v29 = vpop.f32.mrf.mxu0  ;;  %v951_v30 = vpop.f32.mrf.mxu1 }
 0x16a   : > { %1297 = vst [vmem:[%s2392_s12 + $0x1c8] sm:$0xff] %v587_v27  ;;  %1263 = vst [vmem:[%s2392_s12 + $0xb8] sm:$0xff] %v957_v28  ;;  %v589_v31 = vadd.f32 %v588_v29, %v2387_v44  ;;  %v952_v32 = vadd.f32 %v951_v30, %v2334_v45 }
 0x16b   : > { %v592_v33 = vpop.f32.mrf.mxu0  ;;  %v1702_v35 = vpop.f32.mrf.mxu1 }
 0x16c   : > { %1298 = vst [vmem:[%s2392_s12 + $0x1d0] sm:$0xff] %v589_v31  ;;  %1260 = vst [vmem:[%s2392_s12 + $0xa0] sm:$0xff] %v952_v32  ;;  %v593_v36 = vadd.f32 %v592_v33, %v2384_v41  ;;  %v967_v37 = vadd.f32 %v1702_v35, %v2334_v45 }
 0x16d   : > { %v594_v39 = vpop.f32.mrf.mxu0  ;;  %v961_v40 = vpop.f32.mrf.mxu1 }
 0x16e   : > { %1300 = vst [vmem:[%s2392_s12 + $0x1e0] sm:$0xff] %v593_v36  ;;  %1269 = vst [vmem:[%s2392_s12 + $0xe8] sm:$0xff] %v967_v37  ;;  %v595_v42 = vadd.f32 %v594_v39, %v2387_v44  ;;  %v962_v43 = vadd.f32 %v961_v40, %v2334_v45 }
 0x16f   : > { %v598_v46 = vpop.f32.mrf.mxu0  ;;  %v1705_v48 = vpop.f32.mrf.mxu1 }
 0x170   : > { %1301 = vst [vmem:[%s2392_s12 + $0x1e8] sm:$0xff] %v595_v42  ;;  %1266 = vst [vmem:[%s2392_s12 + $0xd0] sm:$0xff] %v962_v43  ;;  %v599_v49 = vadd.f32 %v598_v46, %v2384_v41  ;;  %v977_v51 = vadd.f32 %v1705_v48, %v2334_v45 }
 0x171   : > { %v600_v52 = vpop.f32.mrf.mxu0  ;;  %v971_v54 = vpop.f32.mrf.mxu1 }
 0x172   : > { %1303 = vst [vmem:[%s2392_s12 + $0x1f8] sm:$0xff] %v599_v49  ;;  %1275 = vst [vmem:[%s2392_s12 + $0x118] sm:$0xff] %v977_v51  ;;  %v601_v55 = vadd.f32 %v600_v52, %v2387_v44  ;;  %v972_v57 = vadd.f32 %v971_v54, %v2334_v45 }
 0x173   : > { %v604_v58 = vpop.f32.mrf.mxu0  ;;  %v1708_v60 = vpop.f32.mrf.mxu1 }
 0x174   : > { %1304 = vst [vmem:[%s2392_s12 + $0x200] sm:$0xff] %v601_v55  ;;  %1272 = vst [vmem:[%s2392_s12 + $0x100] sm:$0xff] %v972_v57  ;;  %v605_v61 = vadd.f32 %v604_v58, %v2384_v41  ;;  %v987_v63 = vadd.f32 %v1708_v60, %v2334_v45 }
 0x175   : > { %v606_v1 = vpop.f32.mrf.mxu0  ;;  %v981_v34 = vpop.f32.mrf.mxu1 }
 0x176   : > { %1306 = vst [vmem:[%s2392_s12 + $0x210] sm:$0xff] %v605_v61  ;;  %1281 = vst [vmem:[%s2392_s12 + $0x148] sm:$0xff] %v987_v63  ;;  %v607_v38 = vadd.f32 %v606_v1, %v2387_v44  ;;  %v982_v0 = vadd.f32 %v981_v34, %v2334_v45 }
 0x177   : > { %v610_v47 = vpop.f32.mrf.mxu0  ;;  %v1711_v50 = vpop.f32.mrf.mxu1 }
 0x178   : > { %1307 = vst [vmem:[%s2392_s12 + $0x218] sm:$0xff] %v607_v38  ;;  %1278 = vst [vmem:[%s2392_s12 + $0x130] sm:$0xff] %v982_v0  ;;  %v611_v53 = vadd.f32 %v610_v47, %v2384_v41  ;;  %v997_v56 = vadd.f32 %v1711_v50, %v2334_v45 }
 0x179   : > { %v612_v59 = vpop.f32.mrf.mxu0  ;;  %v991_v62 = vpop.f32.mrf.mxu1 }
 0x17a   : > { %1309 = vst [vmem:[%s2392_s12 + $0x228] sm:$0xff] %v611_v53  ;;  %1287 = vst [vmem:[%s2392_s12 + $0x178] sm:$0xff] %v997_v56  ;;  %v613_v2 = vadd.f32 %v612_v59, %v2387_v44  ;;  %v992_v3 = vadd.f32 %v991_v62, %v2334_v45 }
 0x17b   : > { %v616_v4 = vpop.f32.mrf.mxu0  ;;  %v1714_v5 = vpop.f32.mrf.mxu1 }
 0x17c   : > { %1310 = vst [vmem:[%s2392_s12 + $0x230] sm:$0xff] %v613_v2  ;;  %1284 = vst [vmem:[%s2392_s12 + $0x160] sm:$0xff] %v992_v3  ;;  %v617_v6 = vadd.f32 %v616_v4, %v2384_v41  ;;  %v1007_v7 = vadd.f32 %v1714_v5, %v2334_v45 }
 0x17d   : > { %v618_v8 = vpop.f32.mrf.mxu0  ;;  %v1001_v9 = vpop.f32.mrf.mxu1 }
 0x17e   : > { %1312 = vst [vmem:[%s2392_s12 + $0x240] sm:$0xff] %v617_v6  ;;  %1293 = vst [vmem:[%s2392_s12 + $0x1a8] sm:$0xff] %v1007_v7  ;;  %v619_v10 = vadd.f32 %v618_v8, %v2387_v44  ;;  %v1002_v11 = vadd.f32 %v1001_v9, %v2334_v45 }
 0x17f   : > { %v622_v12 = vpop.f32.mrf.mxu0  ;;  %v1717_v13 = vpop.f32.mrf.mxu1 }
 0x180   : > { %1313 = vst [vmem:[%s2392_s12 + $0x248] sm:$0xff] %v619_v10  ;;  %1290 = vst [vmem:[%s2392_s12 + $0x190] sm:$0xff] %v1002_v11  ;;  %v623_v14 = vadd.f32 %v622_v12, %v2384_v41  ;;  %v1017_v15 = vadd.f32 %v1717_v13, %v2334_v45 }
 0x181   : > { %v624_v16 = vpop.f32.mrf.mxu0  ;;  %v1011_v17 = vpop.f32.mrf.mxu1 }
 0x182   : > { %1315 = vst [vmem:[%s2392_s12 + $0x258] sm:$0xff] %v623_v14  ;;  %1299 = vst [vmem:[%s2392_s12 + $0x1d8] sm:$0xff] %v1017_v15  ;;  %v625_v18 = vadd.f32 %v624_v16, %v2387_v44  ;;  %v1012_v19 = vadd.f32 %v1011_v17, %v2334_v45 }
 0x183   : > { %v628_v20 = vpop.f32.mrf.mxu0  ;;  %v1720_v21 = vpop.f32.mrf.mxu1 }
 0x184   : > { %1316 = vst [vmem:[%s2392_s12 + $0x260] sm:$0xff] %v625_v18  ;;  %1296 = vst [vmem:[%s2392_s12 + $0x1c0] sm:$0xff] %v1012_v19  ;;  %v629_v22 = vadd.f32 %v628_v20, %v2384_v41  ;;  %v1027_v23 = vadd.f32 %v1720_v21, %v2334_v45 }
 0x185   : > { %v630_v24 = vpop.f32.mrf.mxu0  ;;  %v1021_v25 = vpop.f32.mrf.mxu1 }
 0x186   : > { %1318 = vst [vmem:[%s2392_s12 + $0x270] sm:$0xff] %v629_v22  ;;  %1305 = vst [vmem:[%s2392_s12 + $0x208] sm:$0xff] %v1027_v23  ;;  %v631_v26 = vadd.f32 %v630_v24, %v2387_v44  ;;  %v1022_v27 = vadd.f32 %v1021_v25, %v2334_v45 }
 0x187   : > { %v634_v28 = vpop.f32.mrf.mxu0  ;;  %v1723_v29 = vpop.f32.mrf.mxu1 }
 0x188   : > { %1319 = vst [vmem:[%s2392_s12 + $0x278] sm:$0xff] %v631_v26  ;;  %1302 = vst [vmem:[%s2392_s12 + $0x1f0] sm:$0xff] %v1022_v27  ;;  %v635_v30 = vadd.f32 %v634_v28, %v2384_v41  ;;  %v1037_v31 = vadd.f32 %v1723_v29, %v2334_v45 }
 0x189   : > { %v636_v32 = vpop.f32.mrf.mxu0  ;;  %v1031_v33 = vpop.f32.mrf.mxu1 }
 0x18a   : > { %1321 = vst [vmem:[%s2392_s12 + $0x288] sm:$0xff] %v635_v30  ;;  %1311 = vst [vmem:[%s2392_s12 + $0x238] sm:$0xff] %v1037_v31  ;;  %v637_v35 = vadd.f32 %v636_v32, %v2387_v44  ;;  %v1032_v36 = vadd.f32 %v1031_v33, %v2334_v45 }
 0x18b   : > { %v640_v37 = vpop.f32.mrf.mxu0  ;;  %v1726_v39 = vpop.f32.mrf.mxu1 }
 0x18c   : > { %1322 = vst [vmem:[%s2392_s12 + $0x290] sm:$0xff] %v637_v35  ;;  %1308 = vst [vmem:[%s2392_s12 + $0x220] sm:$0xff] %v1032_v36  ;;  %v641_v40 = vadd.f32 %v640_v37, %v2384_v41  ;;  %v1047_v42 = vadd.f32 %v1726_v39, %v2334_v45 }
 0x18d   : > { %v642_v43 = vpop.f32.mrf.mxu0  ;;  %v1041_v46 = vpop.f32.mrf.mxu1 }
 0x18e   : > { %1324 = vst [vmem:[%s2392_s12 + $0x2a0] sm:$0xff] %v641_v40  ;;  %1317 = vst [vmem:[%s2392_s12 + $0x268] sm:$0xff] %v1047_v42  ;;  %v643_v48 = vadd.f32 %v642_v43, %v2387_v44  ;;  %v1042_v49 = vadd.f32 %v1041_v46, %v2334_v45 }
 0x18f   : > { %v646_v51 = vpop.f32.mrf.mxu0  ;;  %v1729_v52 = vpop.f32.mrf.mxu1 }
 0x190   : > { %1325 = vst [vmem:[%s2392_s12 + $0x2a8] sm:$0xff] %v643_v48  ;;  %1314 = vst [vmem:[%s2392_s12 + $0x250] sm:$0xff] %v1042_v49  ;;  %v647_v54 = vadd.f32 %v646_v51, %v2384_v41  ;;  %v1057_v55 = vadd.f32 %v1729_v52, %v2334_v45 }
 0x191   : > { %v648_v57 = vpop.f32.mrf.mxu0  ;;  %v1051_v58 = vpop.f32.mrf.mxu1 }
 0x192   : > { %1327 = vst [vmem:[%s2392_s12 + $0x2b8] sm:$0xff] %v647_v54  ;;  %1323 = vst [vmem:[%s2392_s12 + $0x298] sm:$0xff] %v1057_v55  ;;  %v649_v60 = vadd.f32 %v648_v57, %v2387_v44  ;;  %v1052_v61 = vadd.f32 %v1051_v58, %v2334_v45 }
 0x193   : > { %v652_v63 = vpop.f32.mrf.mxu0  ;;  %v1732_v1 = vpop.f32.mrf.mxu1 }
 0x194   : > { %1328 = vst [vmem:[%s2392_s12 + $0x2c0] sm:$0xff] %v649_v60  ;;  %1320 = vst [vmem:[%s2392_s12 + $0x280] sm:$0xff] %v1052_v61  ;;  %v653_v34 = vadd.f32 %v652_v63, %v2384_v41  ;;  %v1067_v38 = vadd.f32 %v1732_v1, %v2334_v45 }
 0x195   : > { %v654_v0 = vpop.f32.mrf.mxu0  ;;  %v1061_v47 = vpop.f32.mrf.mxu1 }
 0x196   : > { %1330 = vst [vmem:[%s2392_s12 + $0x2d0] sm:$0xff] %v653_v34  ;;  %1329 = vst [vmem:[%s2392_s12 + $0x2c8] sm:$0xff] %v1067_v38  ;;  %v655_v50 = vadd.f32 %v654_v0, %v2387_v44  ;;  %v1062_v53 = vadd.f32 %v1061_v47, %v2334_v45 }
 0x197   : > { %v658_v56 = vpop.f32.mrf.mxu0  ;;  %v1735_v59 = vpop.f32.mrf.mxu1 }
 0x198   : > { %1331 = vst [vmem:[%s2392_s12 + $0x2d8] sm:$0xff] %v655_v50  ;;  %1326 = vst [vmem:[%s2392_s12 + $0x2b0] sm:$0xff] %v1062_v53  ;;  %v659_v62 = vadd.f32 %v658_v56, %v2384_v41  ;;  %v1077_v2 = vadd.f32 %v1735_v59, %v2334_v45 }
 0x199   : > { %v660_v3 = vpop.f32.mrf.mxu0  ;;  %v1071_v4 = vpop.f32.mrf.mxu1 }
 0x19a   : > { %1333 = vst [vmem:[%s2392_s12 + $0x2e8] sm:$0xff] %v659_v62  ;;  %1335 = vst [vmem:[%s2392_s12 + $0x2f8] sm:$0xff] %v1077_v2  ;;  %v661_v5 = vadd.f32 %v660_v3, %v2387_v44  ;;  %v1072_v6 = vadd.f32 %v1071_v4, %v2334_v45 }
 0x19b   : > { %v664_v7 = vpop.f32.mrf.mxu0  ;;  %v1738_v8 = vpop.f32.mrf.mxu1 }
 0x19c   : > { %1334 = vst [vmem:[%s2392_s12 + $0x2f0] sm:$0xff] %v661_v5  ;;  %1332 = vst [vmem:[%s2392_s12 + $0x2e0] sm:$0xff] %v1072_v6  ;;  %v665_v9 = vadd.f32 %v664_v7, %v2384_v41  ;;  %v1087_v10 = vadd.f32 %v1738_v8, %v2334_v45 }
 0x19d   : > { %v666_v11 = vpop.f32.mrf.mxu0  ;;  %v1081_v12 = vpop.f32.mrf.mxu1 }
 0x19e   : > { %1336 = vst [vmem:[%s2392_s12 + $0x300] sm:$0xff] %v665_v9  ;;  %1341 = vst [vmem:[%s2392_s12 + $0x328] sm:$0xff] %v1087_v10  ;;  %v667_v13 = vadd.f32 %v666_v11, %v2387_v44  ;;  %v1082_v14 = vadd.f32 %v1081_v12, %v2334_v45 }
 0x19f   : > { %v670_v15 = vpop.f32.mrf.mxu0  ;;  %v1741_v16 = vpop.f32.mrf.mxu1 }
 0x1a0   : > { %1337 = vst [vmem:[%s2392_s12 + $0x308] sm:$0xff] %v667_v13  ;;  %1338 = vst [vmem:[%s2392_s12 + $0x310] sm:$0xff] %v1082_v14  ;;  %v671_v17 = vadd.f32 %v670_v15, %v2384_v41  ;;  %v1097_v18 = vadd.f32 %v1741_v16, %v2334_v45 }
 0x1a1   : > { %v672_v19 = vpop.f32.mrf.mxu0  ;;  %v1091_v20 = vpop.f32.mrf.mxu1 }
 0x1a2   : > { %1339 = vst [vmem:[%s2392_s12 + $0x318] sm:$0xff] %v671_v17  ;;  %1347 = vst [vmem:[%s2392_s12 + $0x358] sm:$0xff] %v1097_v18  ;;  %v673_v21 = vadd.f32 %v672_v19, %v2387_v44  ;;  %v1092_v22 = vadd.f32 %v1091_v20, %v2334_v45 }
 0x1a3   : > { %v676_v23 = vpop.f32.mrf.mxu0  ;;  %v1744_v24 = vpop.f32.mrf.mxu1 }
 0x1a4   : > { %1340 = vst [vmem:[%s2392_s12 + $0x320] sm:$0xff] %v673_v21  ;;  %1344 = vst [vmem:[%s2392_s12 + $0x340] sm:$0xff] %v1092_v22  ;;  %v677_v25 = vadd.f32 %v676_v23, %v2384_v41  ;;  %v1107_v26 = vadd.f32 %v1744_v24, %v2334_v45 }
 0x1a5   : > { %v678_v27 = vpop.f32.mrf.mxu0  ;;  %v1101_v28 = vpop.f32.mrf.mxu1 }
 0x1a6   : > { %1342 = vst [vmem:[%s2392_s12 + $0x330] sm:$0xff] %v677_v25  ;;  %1353 = vst [vmem:[%s2392_s12 + $0x388] sm:$0xff] %v1107_v26  ;;  %v679_v29 = vadd.f32 %v678_v27, %v2387_v44  ;;  %v1102_v30 = vadd.f32 %v1101_v28, %v2334_v45 }
 0x1a7   : > { %v682_v31 = vpop.f32.mrf.mxu0  ;;  %v1747_v32 = vpop.f32.mrf.mxu1 }
 0x1a8   : > { %1343 = vst [vmem:[%s2392_s12 + $0x338] sm:$0xff] %v679_v29  ;;  %1350 = vst [vmem:[%s2392_s12 + $0x370] sm:$0xff] %v1102_v30  ;;  %v683_v33 = vadd.f32 %v682_v31, %v2384_v41  ;;  %v1117_v35 = vadd.f32 %v1747_v32, %v2334_v45 }
 0x1a9   : > { %v684_v36 = vpop.f32.mrf.mxu0  ;;  %v1111_v37 = vpop.f32.mrf.mxu1 }
 0x1aa   : > { %1345 = vst [vmem:[%s2392_s12 + $0x348] sm:$0xff] %v683_v33  ;;  %1359 = vst [vmem:[%s2392_s12 + $0x3b8] sm:$0xff] %v1117_v35  ;;  %v685_v39 = vadd.f32 %v684_v36, %v2387_v44  ;;  %v1112_v40 = vadd.f32 %v1111_v37, %v2334_v45 }
 0x1ab   : > { %v688_v42 = vpop.f32.mrf.mxu0  ;;  %v1750_v43 = vpop.f32.mrf.mxu1 }
 0x1ac   : > { %1346 = vst [vmem:[%s2392_s12 + $0x350] sm:$0xff] %v685_v39  ;;  %1356 = vst [vmem:[%s2392_s12 + $0x3a0] sm:$0xff] %v1112_v40  ;;  %v689_v46 = vadd.f32 %v688_v42, %v2384_v41  ;;  %v1127_v48 = vadd.f32 %v1750_v43, %v2334_v45 }
 0x1ad   : > { %v690_v49 = vpop.f32.mrf.mxu0  ;;  %v1121_v51 = vpop.f32.mrf.mxu1 }
 0x1ae   : > { %1348 = vst [vmem:[%s2392_s12 + $0x360] sm:$0xff] %v689_v46  ;;  %1365 = vst [vmem:[%s2392_s12 + $0x3e8] sm:$0xff] %v1127_v48  ;;  %v691_v52 = vadd.f32 %v690_v49, %v2387_v44  ;;  %v1122_v54 = vadd.f32 %v1121_v51, %v2334_v45 }
 0x1af   : > { %v694_v55 = vpop.f32.mrf.mxu0  ;;  %v1753_v57 = vpop.f32.mrf.mxu1 }
 0x1b0   : > { %1349 = vst [vmem:[%s2392_s12 + $0x368] sm:$0xff] %v691_v52  ;;  %1362 = vst [vmem:[%s2392_s12 + $0x3d0] sm:$0xff] %v1122_v54  ;;  %v695_v58 = vadd.f32 %v694_v55, %v2384_v41  ;;  %v1137_v60 = vadd.f32 %v1753_v57, %v2334_v45 }
 0x1b1   : > { %v696_v61 = vpop.f32.mrf.mxu0  ;;  %v1131_v63 = vpop.f32.mrf.mxu1 }
 0x1b2   : > { %1351 = vst [vmem:[%s2392_s12 + $0x378] sm:$0xff] %v695_v58  ;;  %1371 = vst [vmem:[%s2392_s12 + $0x418] sm:$0xff] %v1137_v60  ;;  %v697_v1 = vadd.f32 %v696_v61, %v2387_v44  ;;  %v1132_v34 = vadd.f32 %v1131_v63, %v2334_v45 }
 0x1b3   : > { %v700_v38 = vpop.f32.mrf.mxu0  ;;  %v1756_v0 = vpop.f32.mrf.mxu1 }
 0x1b4   : > { %1352 = vst [vmem:[%s2392_s12 + $0x380] sm:$0xff] %v697_v1  ;;  %1368 = vst [vmem:[%s2392_s12 + $0x400] sm:$0xff] %v1132_v34  ;;  %v701_v47 = vadd.f32 %v700_v38, %v2384_v41  ;;  %v1147_v50 = vadd.f32 %v1756_v0, %v2334_v45 }
 0x1b5   : > { %v702_v53 = vpop.f32.mrf.mxu0  ;;  %v1141_v56 = vpop.f32.mrf.mxu1 }
 0x1b6   : > { %1354 = vst [vmem:[%s2392_s12 + $0x390] sm:$0xff] %v701_v47  ;;  %1377 = vst [vmem:[%s2392_s12 + $0x448] sm:$0xff] %v1147_v50  ;;  %v703_v59 = vadd.f32 %v702_v53, %v2387_v44  ;;  %v1142_v62 = vadd.f32 %v1141_v56, %v2334_v45 }
 0x1b7   : > { %v706_v2 = vpop.f32.mrf.mxu0  ;;  %v1759_v3 = vpop.f32.mrf.mxu1 }
 0x1b8   : > { %1355 = vst [vmem:[%s2392_s12 + $0x398] sm:$0xff] %v703_v59  ;;  %1374 = vst [vmem:[%s2392_s12 + $0x430] sm:$0xff] %v1142_v62  ;;  %v707_v4 = vadd.f32 %v706_v2, %v2384_v41  ;;  %v1157_v5 = vadd.f32 %v1759_v3, %v2334_v45 }
 0x1b9   : > { %v708_v6 = vpop.f32.mrf.mxu0  ;;  %v1151_v7 = vpop.f32.mrf.mxu1 }
 0x1ba   : > { %1357 = vst [vmem:[%s2392_s12 + $0x3a8] sm:$0xff] %v707_v4  ;;  %1383 = vst [vmem:[%s2392_s12 + $0x478] sm:$0xff] %v1157_v5  ;;  %v709_v8 = vadd.f32 %v708_v6, %v2387_v44  ;;  %v1152_v9 = vadd.f32 %v1151_v7, %v2334_v45 }
 0x1bb   : > { %v712_v10 = vpop.f32.mrf.mxu0  ;;  %v1762_v11 = vpop.f32.mrf.mxu1 }
 0x1bc   : > { %1358 = vst [vmem:[%s2392_s12 + $0x3b0] sm:$0xff] %v709_v8  ;;  %1380 = vst [vmem:[%s2392_s12 + $0x460] sm:$0xff] %v1152_v9  ;;  %v713_v12 = vadd.f32 %v712_v10, %v2384_v41  ;;  %v1167_v13 = vadd.f32 %v1762_v11, %v2334_v45 }
 0x1bd   : > { %v714_v14 = vpop.f32.mrf.mxu0  ;;  %v1161_v15 = vpop.f32.mrf.mxu1 }
 0x1be   : > { %1360 = vst [vmem:[%s2392_s12 + $0x3c0] sm:$0xff] %v713_v12  ;;  %1389 = vst [vmem:[%s2392_s12 + $0x4a8] sm:$0xff] %v1167_v13  ;;  %v715_v16 = vadd.f32 %v714_v14, %v2387_v44  ;;  %v1162_v17 = vadd.f32 %v1161_v15, %v2334_v45 }
 0x1bf   : > { %v718_v18 = vpop.f32.mrf.mxu0  ;;  %v1765_v19 = vpop.f32.mrf.mxu1 }
 0x1c0   : > { %1361 = vst [vmem:[%s2392_s12 + $0x3c8] sm:$0xff] %v715_v16  ;;  %1386 = vst [vmem:[%s2392_s12 + $0x490] sm:$0xff] %v1162_v17  ;;  %v719_v20 = vadd.f32 %v718_v18, %v2384_v41  ;;  %v1177_v21 = vadd.f32 %v1765_v19, %v2334_v45 }
 0x1c1   : > { %v720_v22 = vpop.f32.mrf.mxu0  ;;  %v1171_v23 = vpop.f32.mrf.mxu1 }
 0x1c2   : > { %1363 = vst [vmem:[%s2392_s12 + $0x3d8] sm:$0xff] %v719_v20  ;;  %1395 = vst [vmem:[%s2392_s12 + $0x4d8] sm:$0xff] %v1177_v21  ;;  %v721_v24 = vadd.f32 %v720_v22, %v2387_v44  ;;  %v1172_v25 = vadd.f32 %v1171_v23, %v2334_v45 }
 0x1c3   : > { %v724_v26 = vpop.f32.mrf.mxu0  ;;  %v1768_v27 = vpop.f32.mrf.mxu1 }
 0x1c4   : > { %1364 = vst [vmem:[%s2392_s12 + $0x3e0] sm:$0xff] %v721_v24  ;;  %1392 = vst [vmem:[%s2392_s12 + $0x4c0] sm:$0xff] %v1172_v25  ;;  %v725_v28 = vadd.f32 %v724_v26, %v2384_v41  ;;  %v1187_v29 = vadd.f32 %v1768_v27, %v2334_v45 }
 0x1c5   : > { %v726_v30 = vpop.f32.mrf.mxu0  ;;  %v1181_v31 = vpop.f32.mrf.mxu1 }
 0x1c6   : > { %1366 = vst [vmem:[%s2392_s12 + $0x3f0] sm:$0xff] %v725_v28  ;;  %1401 = vst [vmem:[%s2392_s12 + $0x508] sm:$0xff] %v1187_v29  ;;  %v727_v32 = vadd.f32 %v726_v30, %v2387_v44  ;;  %v1182_v33 = vadd.f32 %v1181_v31, %v2334_v45 }
 0x1c7   : > { %v730_v35 = vpop.f32.mrf.mxu0  ;;  %v1771_v36 = vpop.f32.mrf.mxu1 }
 0x1c8   : > { %1367 = vst [vmem:[%s2392_s12 + $0x3f8] sm:$0xff] %v727_v32  ;;  %1398 = vst [vmem:[%s2392_s12 + $0x4f0] sm:$0xff] %v1182_v33  ;;  %v731_v37 = vadd.f32 %v730_v35, %v2384_v41  ;;  %v1197_v39 = vadd.f32 %v1771_v36, %v2334_v45 }
 0x1c9   : > { %v732_v40 = vpop.f32.mrf.mxu0  ;;  %v1191_v42 = vpop.f32.mrf.mxu1 }
 0x1ca   : > { %1369 = vst [vmem:[%s2392_s12 + $0x408] sm:$0xff] %v731_v37  ;;  %1407 = vst [vmem:[%s2392_s12 + $0x538] sm:$0xff] %v1197_v39  ;;  %v733_v43 = vadd.f32 %v732_v40, %v2387_v44  ;;  %v1192_v46 = vadd.f32 %v1191_v42, %v2334_v45 }
 0x1cb   : > { %v736_v48 = vpop.f32.mrf.mxu0  ;;  %v1774_v49 = vpop.f32.mrf.mxu1 }
 0x1cc   : > { %1370 = vst [vmem:[%s2392_s12 + $0x410] sm:$0xff] %v733_v43  ;;  %1404 = vst [vmem:[%s2392_s12 + $0x520] sm:$0xff] %v1192_v46  ;;  %v737_v51 = vadd.f32 %v736_v48, %v2384_v41  ;;  %v1207_v52 = vadd.f32 %v1774_v49, %v2334_v45 }
 0x1cd   : > { %v738_v54 = vpop.f32.mrf.mxu0  ;;  %v1201_v55 = vpop.f32.mrf.mxu1 }
 0x1ce   : > { %1372 = vst [vmem:[%s2392_s12 + $0x420] sm:$0xff] %v737_v51  ;;  %1413 = vst [vmem:[%s2392_s12 + $0x568] sm:$0xff] %v1207_v52  ;;  %v739_v57 = vadd.f32 %v738_v54, %v2387_v44  ;;  %v1202_v58 = vadd.f32 %v1201_v55, %v2334_v45 }
 0x1cf   : > { %v742_v60 = vpop.f32.mrf.mxu0  ;;  %v1777_v61 = vpop.f32.mrf.mxu1 }
 0x1d0   : > { %1373 = vst [vmem:[%s2392_s12 + $0x428] sm:$0xff] %v739_v57  ;;  %1410 = vst [vmem:[%s2392_s12 + $0x550] sm:$0xff] %v1202_v58  ;;  %v743_v63 = vadd.f32 %v742_v60, %v2384_v41  ;;  %v1217_v1 = vadd.f32 %v1777_v61, %v2334_v45 }
 0x1d1   : > { %v744_v34 = vpop.f32.mrf.mxu0  ;;  %v1211_v38 = vpop.f32.mrf.mxu1 }
 0x1d2   : > { %1375 = vst [vmem:[%s2392_s12 + $0x438] sm:$0xff] %v743_v63  ;;  %1419 = vst [vmem:[%s2392_s12 + $0x598] sm:$0xff] %v1217_v1  ;;  %v745_v0 = vadd.f32 %v744_v34, %v2387_v44  ;;  %v1212_v47 = vadd.f32 %v1211_v38, %v2334_v45 }
 0x1d3   : > { %v748_v50 = vpop.f32.mrf.mxu0  ;;  %v1780_v53 = vpop.f32.mrf.mxu1 }
 0x1d4   : > { %1376 = vst [vmem:[%s2392_s12 + $0x440] sm:$0xff] %v745_v0  ;;  %1416 = vst [vmem:[%s2392_s12 + $0x580] sm:$0xff] %v1212_v47  ;;  %v749_v56 = vadd.f32 %v748_v50, %v2384_v41  ;;  %v1227_v59 = vadd.f32 %v1780_v53, %v2334_v45 }
 0x1d5   : > { %v750_v62 = vpop.f32.mrf.mxu0  ;;  %v1221_v2 = vpop.f32.mrf.mxu1 }
 0x1d6   : > { %1378 = vst [vmem:[%s2392_s12 + $0x450] sm:$0xff] %v749_v56  ;;  %1425 = vst [vmem:[%s2392_s12 + $0x5c8] sm:$0xff] %v1227_v59  ;;  %v751_v3 = vadd.f32 %v750_v62, %v2387_v44  ;;  %v1222_v4 = vadd.f32 %v1221_v2, %v2334_v45 }
 0x1d7   : > { %v754_v5 = vpop.f32.mrf.mxu0  ;;  %v1783_v6 = vpop.f32.mrf.mxu1 }
 0x1d8   : > { %1379 = vst [vmem:[%s2392_s12 + $0x458] sm:$0xff] %v751_v3  ;;  %1422 = vst [vmem:[%s2392_s12 + $0x5b0] sm:$0xff] %v1222_v4  ;;  %v755_v7 = vadd.f32 %v754_v5, %v2384_v41  ;;  %v1237_v8 = vadd.f32 %v1783_v6, %v2334_v45 }
 0x1d9   : > { %v756_v9 = vpop.f32.mrf.mxu0  ;;  %v1231_v10 = vpop.f32.mrf.mxu1 }
 0x1da   : > { %1381 = vst [vmem:[%s2392_s12 + $0x468] sm:$0xff] %v755_v7  ;;  %1431 = vst [vmem:[%s2392_s12 + $0x5f8] sm:$0xff] %v1237_v8  ;;  %v757_v11 = vadd.f32 %v756_v9, %v2387_v44  ;;  %v1232_v12 = vadd.f32 %v1231_v10, %v2334_v45 }
 0x1dc   : > { %1382 = vst [vmem:[%s2392_s12 + $0x470] sm:$0xff] %v757_v11  ;;  %1428 = vst [vmem:[%s2392_s12 + $0x5e0] sm:$0xff] %v1232_v12 }
 0x1dd PF: > { %s17_s17 = sadd.s32 1, %s1996_s17   ;;  %s2805_s12 = smov %s1980_s13 }
 0x1de   : > { %p14_p4 = scmp.ge.s32.totalorder %s17_s17, 6   ;;  %s2806_s13 = smov %s1984_s14 }
 0x1df   : > { %s2807_s14 = smov %s2099_s9  ;;  %s2808_s15 = smov %s1992_s16 }
 0x1e0   : > { %s2809_s16 = smov %s2811_s25  ;;  %16 = sbr.rel (!%p14_p4) target bundleno = 5 (0x5), region = 80 }
 0x1e5   :  { %1465 = vsyncpa [#allocation3], 1 }
 0x1e6   :  { %1467 = vsyncpa [#allocation3 + $0x1], 1 }
 0x1e7   :  { %1468 = vsyncpa [#allocation5], 1 }

// kernel: self_attention_forward.3
= control target key start
LH: loop header
LB: loop body
LE: loop exit
PB: predicated region body
PF: predicated region fallthrough
CT: control target
= control target key end

     0   :  { %8 = vsyncpa [#allocation9], 0  ;;  %s12503_s0 = inlined_call_operand.vmem [shape: f32[2,1024,384], index: 0, kind: input, shape index: {}, may-alias: {0,1,2}]   ;;  %s12504_s1 = inlined_call_operand.vmem [shape: f32[2,1024,384], index: 1, kind: input, shape index: {}, may-alias: {0,1,2}]   ;;  %s12505_s2 = inlined_call_operand.vmem [shape: f32[2,1024,384], index: 2, kind: input, shape index: {}, may-alias: {0,1,2}]   ;;  %s12506_s3 = inlined_call_operand.hbm [shape: f32[2,1024,128], index: 3, kind: output, shape index: {}]  }
   0x1   :  { %10 = vsyncpa [#allocation9 + $0x1], 0  ;;  %s8423_s12 = smov 0   ;;  %s8425_s13 = smov 0  }
   0x2   :  { %s8427_s14 = smov 0   ;;  %s8429_s15 = smov 0  }
   0x3   :  { %s8431_s16 = smov 0   ;;  %s8433_s17 = smov 0  }
   0x4   :  { %s8435_s18 = smov 0   ;;  %s8437_s19 = smov 0  }
   0x5   :  { %s8439_s20 = smov 0   ;;  %s8441_s21 = smov 0  }
   0x6   :  { %s8443_s22 = smov 0   ;;  %s8445_s23 = smov 0  }
   0x7 LB: > { %s6912_s24 = sadd.s32 4294967295, %s8393_s23   ;;  %s6913_s25 = sadd.s32 4294967294, %s8393_s23   ;;  %s8393_s23 = sphi %s8445_s23, %s16_s23   ;;  %s8389_s22 = sphi %s8443_s22, %s14060_s22   ;;  %s8385_s21 = sphi %s8441_s21, %s14059_s21   ;;  %s8381_s20 = sphi %s8439_s20, %s14058_s20   ;;  %s8377_s19 = sphi %s8437_s19, %s14057_s19   ;;  %s8373_s18 = sphi %s8435_s18, %s14056_s18   ;;  %s8369_s17 = sphi %s8433_s17, %s14055_s17   ;;  %s8365_s16 = sphi %s8431_s16, %s14054_s16   ;;  %s8361_s15 = sphi %s8429_s15, %s14053_s15   ;;  %s8357_s14 = sphi %s8427_s14, %s14052_s14   ;;  %s8353_s13 = sphi %s8425_s13, %s14051_s13   ;;  %s8349_s12 = sphi %s8423_s12, %s14050_s12  }
   0x8   : > { %s28_s26 = sadd.s32 1, %s8381_s20  ;;  %s31_s27 = sadd.s32 1, %s8385_s21 }
   0x9   : > { %p29_p0 = scmp.ge.s32.totalorder %s28_s26, 2  ;;  %s35_s28 = sadd.s32 1, %s8389_s22 }
   0xa   : > { %p51_p1 = scmp.ne.s32.totalorder %s8365_s16, %s8361_s15  ;;  %s44_s29 = sadd.s32 1, %s8365_s16 }
   0xb   : > { %s14062_s26 = smov (%p29_p0, %s28_s26), 0  ;;  %s14064_s27 = smov (!%p29_p0, %s31_s27), %s8385_s21 }
   0xc   : > { %13035 = sst [smem:[#allocation11_spill]] %s14062_s26  ;;  %p52_p2 = scmp.eq.s32.totalorder %s8393_s23, 0 }
   0xd   : > { %p33_p3 = scmp.ge.s32.totalorder %s14064_s27, 2  ;;  %s68_s30 = ssub.s32 %s8381_s20, %s14062_s26 }
   0xe   : > { %p8500_p4 = por %p52_p2, %p51_p1  ;;  %p79_p5 = scmp.ne.s32.totalorder %s8357_s14, %s8353_s13 }
   0xf   : > { %s14066_s27 = smov (%p33_p3, %s14064_s27), 0  ;;  %s14068_s28 = smov (!%p33_p3, %s35_s28), %s8389_s22 }
  0x10   : > { %13037 = sst [smem:[#allocation12_spill]] %s14066_s27  ;;  %s40_s5 = ssub.s32 %s8385_s21, %s14066_s27 }
  0x11   : > { %p8511_p6 = por %p79_p5, %p52_p2  ;;  %p37_p7 = scmp.ge.s32.totalorder %s14068_s28, 2 }
  0x12   : > { %p139_p8 = scmp.eq.s32.totalorder %s6912_s24, 7  ;;  %p144_p9 = scmp.ne.s32.totalorder %s8361_s15, %s8349_s12 }
  0x13   : > { %p145_p10 = scmp.eq.s32.totalorder %s6913_s25, 7  ;;  %s14070_s28 = smov (%p37_p7, %s14068_s28), 0 }
  0x14   : > { %13039 = sst [smem:[#allocation13_spill]] %s14070_s28  ;;  %p8522_p11 = por %p139_p8, %p51_p1 }
  0x15   : > { %p8526_p12 = por %p145_p10, %p144_p9  ;;  %s39_s9 = ssub.s32 %s8389_s22, %s14070_s28 }
  0x16   : > { %s72_s10 = sadd.s32 1, %s8357_s14  ;;  %s41_s11 = sor.u32 %s40_s5, %s39_s9 }
  0x17   : > { %s13041_s8 = scalar_select %p8526_p12, 1, 0 }
  0x18   : > { %s69_s27 = sor.u32 %s68_s30, %s39_s9  ;;  %p42_p13 = scmp.eq.s32.totalorder %s41_s11, 0 }
  0x19   : > { %13042 = sst [smem:[#allocation14_spill]] %s13041_s8  ;;  %p70_p0 = scmp.eq.s32.totalorder %s69_s27, 0 }
  0x1a   : > { %s8534_s24 = scalar_select %p42_p13, %s8365_s16, %s44_s29  }
  0x1b   : > { %s8537_s25 = scalar_select %p70_p0, %s8357_s14, %s72_s10  }
  0x1c   : > { %p6915_p2 = scmp.ge.s32.totalorder %s8393_s23, 8 }
  0x1e   : > { %161 = sbr.rel (%p6915_p2) target bundleno = 155 (0x9b), region = 16 }
  0x23   : > { %164 = sbr.rel (!%p8500_p4) target bundleno = 75 (0x4b), region = 20  ;;  %s166_s26 = sand.u32 (%p8500_p4), 1, %s8365_s16  }
  0x24   : > { %s7385_s28 = smul.u32 (%p8500_p4), 192, %s8385_s21  ;;  %s6916_s8 = sshll.u32 (%p8500_p4), %s166_s26, 9 }
  0x25   : > { %s7386_s5 = smul.u32 (%p8500_p4), 384, %s8389_s22  ;;  %s8553_s26 = scalar_lea.vmem (%p8500_p4), [#allocation5], %s6916_s8 }
  0x27   : > { %s172_s30 = sadd.s32 (%p8500_p4), %s7386_s5, %s7385_s28 }
  0x28   : > { %s6919_s9 = sshll.u32 %s172_s30, 3 }
  0x29   : > { %s8548_s10 = scalar_lea.vmem %s12503_s0, %s6919_s9 }
  0x2a   : > { %v329_v0 = vld [vmem:[%s8548_s10] sm:$0xff]  ;;  %v331_v1 = vld [vmem:[%s8548_s10 + $0x18] sm:$0xff]  ;;  %v333_v2 = vld [vmem:[%s8548_s10 + $0x30] sm:$0xff] }
  0x2b   : > { %330 = vst [vmem:[%s8553_s26] sm:$0xff] %v329_v0  ;;  %332 = vst [vmem:[%s8553_s26 + $0x8] sm:$0xff] %v331_v1  ;;  %v335_v3 = vld [vmem:[%s8548_s10 + $0x48] sm:$0xff]  ;;  %v337_v4 = vld [vmem:[%s8548_s10 + $0x60] sm:$0xff] }
  0x2c   : > { %334 = vst [vmem:[%s8553_s26 + $0x10] sm:$0xff] %v333_v2  ;;  %v339_v5 = vld [vmem:[%s8548_s10 + $0x78] sm:$0xff]  ;;  %336 = vst [vmem:[%s8553_s26 + $0x18] sm:$0xff] %v335_v3  ;;  %v341_v6 = vld [vmem:[%s8548_s10 + $0x90] sm:$0xff] }
  0x2d   : > { %338 = vst [vmem:[%s8553_s26 + $0x20] sm:$0xff] %v337_v4  ;;  %340 = vst [vmem:[%s8553_s26 + $0x28] sm:$0xff] %v339_v5  ;;  %v343_v7 = vld [vmem:[%s8548_s10 + $0xa8] sm:$0xff]  ;;  %v345_v8 = vld [vmem:[%s8548_s10 + $0xc0] sm:$0xff] }
  0x2e   : > { %342 = vst [vmem:[%s8553_s26 + $0x30] sm:$0xff] %v341_v6  ;;  %344 = vst [vmem:[%s8553_s26 + $0x38] sm:$0xff] %v343_v7  ;;  %v347_v9 = vld [vmem:[%s8548_s10 + $0xd8] sm:$0xff]  ;;  %v349_v10 = vld [vmem:[%s8548_s10 + $0xf0] sm:$0xff] }
  0x2f   : > { %346 = vst [vmem:[%s8553_s26 + $0x40] sm:$0xff] %v345_v8  ;;  %v351_v11 = vld [vmem:[%s8548_s10 + $0x108] sm:$0xff]  ;;  %348 = vst [vmem:[%s8553_s26 + $0x48] sm:$0xff] %v347_v9  ;;  %v353_v12 = vld [vmem:[%s8548_s10 + $0x120] sm:$0xff] }
  0x30   : > { %350 = vst [vmem:[%s8553_s26 + $0x50] sm:$0xff] %v349_v10  ;;  %352 = vst [vmem:[%s8553_s26 + $0x58] sm:$0xff] %v351_v11  ;;  %v355_v13 = vld [vmem:[%s8548_s10 + $0x138] sm:$0xff]  ;;  %v357_v14 = vld [vmem:[%s8548_s10 + $0x150] sm:$0xff] }
  0x31   : > { %354 = vst [vmem:[%s8553_s26 + $0x60] sm:$0xff] %v353_v12  ;;  %356 = vst [vmem:[%s8553_s26 + $0x68] sm:$0xff] %v355_v13  ;;  %v359_v15 = vld [vmem:[%s8548_s10 + $0x168] sm:$0xff]  ;;  %v361_v16 = vld [vmem:[%s8548_s10 + $0x180] sm:$0xff] }
  0x32   : > { %358 = vst [vmem:[%s8553_s26 + $0x70] sm:$0xff] %v357_v14  ;;  %v363_v17 = vld [vmem:[%s8548_s10 + $0x198] sm:$0xff]  ;;  %360 = vst [vmem:[%s8553_s26 + $0x78] sm:$0xff] %v359_v15  ;;  %v365_v18 = vld [vmem:[%s8548_s10 + $0x1b0] sm:$0xff] }
  0x33   : > { %362 = vst [vmem:[%s8553_s26 + $0x80] sm:$0xff] %v361_v16  ;;  %364 = vst [vmem:[%s8553_s26 + $0x88] sm:$0xff] %v363_v17  ;;  %v367_v19 = vld [vmem:[%s8548_s10 + $0x1c8] sm:$0xff]  ;;  %v369_v20 = vld [vmem:[%s8548_s10 + $0x1e0] sm:$0xff] }
  0x34   : > { %366 = vst [vmem:[%s8553_s26 + $0x90] sm:$0xff] %v365_v18  ;;  %368 = vst [vmem:[%s8553_s26 + $0x98] sm:$0xff] %v367_v19  ;;  %v371_v21 = vld [vmem:[%s8548_s10 + $0x1f8] sm:$0xff]  ;;  %v373_v22 = vld [vmem:[%s8548_s10 + $0x210] sm:$0xff] }
  0x35   : > { %370 = vst [vmem:[%s8553_s26 + $0xa0] sm:$0xff] %v369_v20  ;;  %v375_v23 = vld [vmem:[%s8548_s10 + $0x228] sm:$0xff]  ;;  %372 = vst [vmem:[%s8553_s26 + $0xa8] sm:$0xff] %v371_v21  ;;  %v377_v24 = vld [vmem:[%s8548_s10 + $0x240] sm:$0xff] }
  0x36   : > { %374 = vst [vmem:[%s8553_s26 + $0xb0] sm:$0xff] %v373_v22  ;;  %376 = vst [vmem:[%s8553_s26 + $0xb8] sm:$0xff] %v375_v23  ;;  %v379_v25 = vld [vmem:[%s8548_s10 + $0x258] sm:$0xff]  ;;  %v381_v26 = vld [vmem:[%s8548_s10 + $0x270] sm:$0xff] }
  0x37   : > { %378 = vst [vmem:[%s8553_s26 + $0xc0] sm:$0xff] %v377_v24  ;;  %380 = vst [vmem:[%s8553_s26 + $0xc8] sm:$0xff] %v379_v25  ;;  %v383_v27 = vld [vmem:[%s8548_s10 + $0x288] sm:$0xff]  ;;  %v385_v28 = vld [vmem:[%s8548_s10 + $0x2a0] sm:$0xff] }
  0x38   : > { %382 = vst [vmem:[%s8553_s26 + $0xd0] sm:$0xff] %v381_v26  ;;  %v387_v29 = vld [vmem:[%s8548_s10 + $0x2b8] sm:$0xff]  ;;  %384 = vst [vmem:[%s8553_s26 + $0xd8] sm:$0xff] %v383_v27  ;;  %v389_v30 = vld [vmem:[%s8548_s10 + $0x2d0] sm:$0xff] }
  0x39   : > { %386 = vst [vmem:[%s8553_s26 + $0xe0] sm:$0xff] %v385_v28  ;;  %388 = vst [vmem:[%s8553_s26 + $0xe8] sm:$0xff] %v387_v29  ;;  %v391_v31 = vld [vmem:[%s8548_s10 + $0x2e8] sm:$0xff]  ;;  %v393_v32 = vld [vmem:[%s8548_s10 + $0x300] sm:$0xff] }
  0x3a   : > { %390 = vst [vmem:[%s8553_s26 + $0xf0] sm:$0xff] %v389_v30  ;;  %392 = vst [vmem:[%s8553_s26 + $0xf8] sm:$0xff] %v391_v31  ;;  %v395_v33 = vld [vmem:[%s8548_s10 + $0x318] sm:$0xff]  ;;  %v397_v34 = vld [vmem:[%s8548_s10 + $0x330] sm:$0xff] }
  0x3b   : > { %394 = vst [vmem:[%s8553_s26 + $0x100] sm:$0xff] %v393_v32  ;;  %v399_v35 = vld [vmem:[%s8548_s10 + $0x348] sm:$0xff]  ;;  %396 = vst [vmem:[%s8553_s26 + $0x108] sm:$0xff] %v395_v33  ;;  %v401_v36 = vld [vmem:[%s8548_s10 + $0x360] sm:$0xff] }
  0x3c   : > { %398 = vst [vmem:[%s8553_s26 + $0x110] sm:$0xff] %v397_v34  ;;  %400 = vst [vmem:[%s8553_s26 + $0x118] sm:$0xff] %v399_v35  ;;  %v403_v37 = vld [vmem:[%s8548_s10 + $0x378] sm:$0xff]  ;;  %v405_v38 = vld [vmem:[%s8548_s10 + $0x390] sm:$0xff] }
  0x3d   : > { %402 = vst [vmem:[%s8553_s26 + $0x120] sm:$0xff] %v401_v36  ;;  %404 = vst [vmem:[%s8553_s26 + $0x128] sm:$0xff] %v403_v37  ;;  %v407_v39 = vld [vmem:[%s8548_s10 + $0x3a8] sm:$0xff]  ;;  %v409_v40 = vld [vmem:[%s8548_s10 + $0x3c0] sm:$0xff] }
  0x3e   : > { %406 = vst [vmem:[%s8553_s26 + $0x130] sm:$0xff] %v405_v38  ;;  %v411_v41 = vld [vmem:[%s8548_s10 + $0x3d8] sm:$0xff]  ;;  %408 = vst [vmem:[%s8553_s26 + $0x138] sm:$0xff] %v407_v39  ;;  %v413_v42 = vld [vmem:[%s8548_s10 + $0x3f0] sm:$0xff] }
  0x3f   : > { %410 = vst [vmem:[%s8553_s26 + $0x140] sm:$0xff] %v409_v40  ;;  %412 = vst [vmem:[%s8553_s26 + $0x148] sm:$0xff] %v411_v41  ;;  %v415_v43 = vld [vmem:[%s8548_s10 + $0x408] sm:$0xff]  ;;  %v417_v44 = vld [vmem:[%s8548_s10 + $0x420] sm:$0xff] }
  0x40   : > { %414 = vst [vmem:[%s8553_s26 + $0x150] sm:$0xff] %v413_v42  ;;  %416 = vst [vmem:[%s8553_s26 + $0x158] sm:$0xff] %v415_v43  ;;  %v419_v45 = vld [vmem:[%s8548_s10 + $0x438] sm:$0xff]  ;;  %v421_v46 = vld [vmem:[%s8548_s10 + $0x450] sm:$0xff] }
  0x41   : > { %418 = vst [vmem:[%s8553_s26 + $0x160] sm:$0xff] %v417_v44  ;;  %v423_v47 = vld [vmem:[%s8548_s10 + $0x468] sm:$0xff]  ;;  %420 = vst [vmem:[%s8553_s26 + $0x168] sm:$0xff] %v419_v45  ;;  %v425_v48 = vld [vmem:[%s8548_s10 + $0x480] sm:$0xff] }
  0x42   : > { %422 = vst [vmem:[%s8553_s26 + $0x170] sm:$0xff] %v421_v46  ;;  %424 = vst [vmem:[%s8553_s26 + $0x178] sm:$0xff] %v423_v47  ;;  %v427_v49 = vld [vmem:[%s8548_s10 + $0x498] sm:$0xff]  ;;  %v429_v50 = vld [vmem:[%s8548_s10 + $0x4b0] sm:$0xff] }
  0x43   : > { %426 = vst [vmem:[%s8553_s26 + $0x180] sm:$0xff] %v425_v48  ;;  %428 = vst [vmem:[%s8553_s26 + $0x188] sm:$0xff] %v427_v49  ;;  %v431_v51 = vld [vmem:[%s8548_s10 + $0x4c8] sm:$0xff]  ;;  %v433_v52 = vld [vmem:[%s8548_s10 + $0x4e0] sm:$0xff] }
  0x44   : > { %430 = vst [vmem:[%s8553_s26 + $0x190] sm:$0xff] %v429_v50  ;;  %v435_v53 = vld [vmem:[%s8548_s10 + $0x4f8] sm:$0xff]  ;;  %432 = vst [vmem:[%s8553_s26 + $0x198] sm:$0xff] %v431_v51  ;;  %v437_v54 = vld [vmem:[%s8548_s10 + $0x510] sm:$0xff] }
  0x45   : > { %434 = vst [vmem:[%s8553_s26 + $0x1a0] sm:$0xff] %v433_v52  ;;  %436 = vst [vmem:[%s8553_s26 + $0x1a8] sm:$0xff] %v435_v53  ;;  %v439_v55 = vld [vmem:[%s8548_s10 + $0x528] sm:$0xff]  ;;  %v441_v56 = vld [vmem:[%s8548_s10 + $0x540] sm:$0xff] }
  0x46   : > { %438 = vst [vmem:[%s8553_s26 + $0x1b0] sm:$0xff] %v437_v54  ;;  %440 = vst [vmem:[%s8553_s26 + $0x1b8] sm:$0xff] %v439_v55  ;;  %v443_v57 = vld [vmem:[%s8548_s10 + $0x558] sm:$0xff]  ;;  %v445_v58 = vld [vmem:[%s8548_s10 + $0x570] sm:$0xff] }
  0x47   : > { %442 = vst [vmem:[%s8553_s26 + $0x1c0] sm:$0xff] %v441_v56  ;;  %v447_v59 = vld [vmem:[%s8548_s10 + $0x588] sm:$0xff]  ;;  %444 = vst [vmem:[%s8553_s26 + $0x1c8] sm:$0xff] %v443_v57  ;;  %v449_v60 = vld [vmem:[%s8548_s10 + $0x5a0] sm:$0xff] }
  0x48   : > { %446 = vst [vmem:[%s8553_s26 + $0x1d0] sm:$0xff] %v445_v58  ;;  %448 = vst [vmem:[%s8553_s26 + $0x1d8] sm:$0xff] %v447_v59  ;;  %v451_v61 = vld [vmem:[%s8548_s10 + $0x5b8] sm:$0xff]  ;;  %v453_v62 = vld [vmem:[%s8548_s10 + $0x5d0] sm:$0xff] }
  0x49   : > { %450 = vst [vmem:[%s8553_s26 + $0x1e0] sm:$0xff] %v449_v60  ;;  %452 = vst [vmem:[%s8553_s26 + $0x1e8] sm:$0xff] %v451_v61  ;;  %v455_v63 = vld [vmem:[%s8548_s10 + $0x5e8] sm:$0xff] }
  0x4a   : > { %454 = vst [vmem:[%s8553_s26 + $0x1f0] sm:$0xff] %v453_v62  ;;  %456 = vst [vmem:[%s8553_s26 + $0x1f8] sm:$0xff] %v455_v63 }
  0x4b PF: > { %462 = sbr.rel (!%p8511_p6) target bundleno = 115 (0x73), region = 58  ;;  %s464_s28 = sand.u32 (%p8511_p6), 1, %s8357_s14  }
  0x4c   : > { %s6810_s4 = smul.u32 (%p8511_p6), 192, %s8381_s20  ;;  %s6920_s8 = sshll.u32 (%p8511_p6), %s464_s28, 9 }
  0x4d   : > { %s6811_s11 = smul.u32 (%p8511_p6), 384, %s8389_s22  ;;  %s8693_s10 = scalar_lea.vmem (%p8511_p6), [#allocation6], %s6920_s8 }
  0x4f   : > { %s6812_s5 = sadd.s32 (%p8511_p6), %s6811_s11, %s6810_s4 }
  0x50   : > { %s6921_s30 = sshll.u32 %s6812_s5, 3 }
  0x51   : > { %s8688_s29 = scalar_lea.vmem %s12504_s1, %s6921_s30 }
  0x52   : > { %v6922_v0 = vld [vmem:[%s8688_s29 + $0x8] sm:$0xff]  ;;  %v6923_v1 = vld [vmem:[%s8688_s29 + $0x20] sm:$0xff]  ;;  %v6924_v2 = vld [vmem:[%s8688_s29 + $0x38] sm:$0xff] }
  0x53   : > { %629 = vst [vmem:[%s8693_s10] sm:$0xff] %v6922_v0  ;;  %631 = vst [vmem:[%s8693_s10 + $0x8] sm:$0xff] %v6923_v1  ;;  %v6925_v3 = vld [vmem:[%s8688_s29 + $0x50] sm:$0xff]  ;;  %v6926_v4 = vld [vmem:[%s8688_s29 + $0x68] sm:$0xff] }
  0x54   : > { %633 = vst [vmem:[%s8693_s10 + $0x10] sm:$0xff] %v6924_v2  ;;  %v6927_v5 = vld [vmem:[%s8688_s29 + $0x80] sm:$0xff]  ;;  %635 = vst [vmem:[%s8693_s10 + $0x18] sm:$0xff] %v6925_v3  ;;  %v6928_v6 = vld [vmem:[%s8688_s29 + $0x98] sm:$0xff] }
  0x55   : > { %637 = vst [vmem:[%s8693_s10 + $0x20] sm:$0xff] %v6926_v4  ;;  %639 = vst [vmem:[%s8693_s10 + $0x28] sm:$0xff] %v6927_v5  ;;  %v6929_v7 = vld [vmem:[%s8688_s29 + $0xb0] sm:$0xff]  ;;  %v6930_v8 = vld [vmem:[%s8688_s29 + $0xc8] sm:$0xff] }
  0x56   : > { %641 = vst [vmem:[%s8693_s10 + $0x30] sm:$0xff] %v6928_v6  ;;  %643 = vst [vmem:[%s8693_s10 + $0x38] sm:$0xff] %v6929_v7  ;;  %v6931_v9 = vld [vmem:[%s8688_s29 + $0xe0] sm:$0xff]  ;;  %v6932_v10 = vld [vmem:[%s8688_s29 + $0xf8] sm:$0xff] }
  0x57   : > { %645 = vst [vmem:[%s8693_s10 + $0x40] sm:$0xff] %v6930_v8  ;;  %v6933_v11 = vld [vmem:[%s8688_s29 + $0x110] sm:$0xff]  ;;  %647 = vst [vmem:[%s8693_s10 + $0x48] sm:$0xff] %v6931_v9  ;;  %v6934_v12 = vld [vmem:[%s8688_s29 + $0x128] sm:$0xff] }
  0x58   : > { %649 = vst [vmem:[%s8693_s10 + $0x50] sm:$0xff] %v6932_v10  ;;  %651 = vst [vmem:[%s8693_s10 + $0x58] sm:$0xff] %v6933_v11  ;;  %v6935_v13 = vld [vmem:[%s8688_s29 + $0x140] sm:$0xff]  ;;  %v6936_v14 = vld [vmem:[%s8688_s29 + $0x158] sm:$0xff] }
  0x59   : > { %653 = vst [vmem:[%s8693_s10 + $0x60] sm:$0xff] %v6934_v12  ;;  %655 = vst [vmem:[%s8693_s10 + $0x68] sm:$0xff] %v6935_v13  ;;  %v6937_v15 = vld [vmem:[%s8688_s29 + $0x170] sm:$0xff]  ;;  %v6938_v16 = vld [vmem:[%s8688_s29 + $0x188] sm:$0xff] }
  0x5a   : > { %657 = vst [vmem:[%s8693_s10 + $0x70] sm:$0xff] %v6936_v14  ;;  %v6939_v17 = vld [vmem:[%s8688_s29 + $0x1a0] sm:$0xff]  ;;  %659 = vst [vmem:[%s8693_s10 + $0x78] sm:$0xff] %v6937_v15  ;;  %v6940_v18 = vld [vmem:[%s8688_s29 + $0x1b8] sm:$0xff] }
  0x5b   : > { %661 = vst [vmem:[%s8693_s10 + $0x80] sm:$0xff] %v6938_v16  ;;  %663 = vst [vmem:[%s8693_s10 + $0x88] sm:$0xff] %v6939_v17  ;;  %v6941_v19 = vld [vmem:[%s8688_s29 + $0x1d0] sm:$0xff]  ;;  %v6942_v20 = vld [vmem:[%s8688_s29 + $0x1e8] sm:$0xff] }
  0x5c   : > { %665 = vst [vmem:[%s8693_s10 + $0x90] sm:$0xff] %v6940_v18  ;;  %667 = vst [vmem:[%s8693_s10 + $0x98] sm:$0xff] %v6941_v19  ;;  %v6943_v21 = vld [vmem:[%s8688_s29 + $0x200] sm:$0xff]  ;;  %v6944_v22 = vld [vmem:[%s8688_s29 + $0x218] sm:$0xff] }
  0x5d   : > { %669 = vst [vmem:[%s8693_s10 + $0xa0] sm:$0xff] %v6942_v20  ;;  %v6945_v23 = vld [vmem:[%s8688_s29 + $0x230] sm:$0xff]  ;;  %671 = vst [vmem:[%s8693_s10 + $0xa8] sm:$0xff] %v6943_v21  ;;  %v6946_v24 = vld [vmem:[%s8688_s29 + $0x248] sm:$0xff] }
  0x5e   : > { %673 = vst [vmem:[%s8693_s10 + $0xb0] sm:$0xff] %v6944_v22  ;;  %675 = vst [vmem:[%s8693_s10 + $0xb8] sm:$0xff] %v6945_v23  ;;  %v6947_v25 = vld [vmem:[%s8688_s29 + $0x260] sm:$0xff]  ;;  %v6948_v26 = vld [vmem:[%s8688_s29 + $0x278] sm:$0xff] }
  0x5f   : > { %677 = vst [vmem:[%s8693_s10 + $0xc0] sm:$0xff] %v6946_v24  ;;  %679 = vst [vmem:[%s8693_s10 + $0xc8] sm:$0xff] %v6947_v25  ;;  %v6949_v27 = vld [vmem:[%s8688_s29 + $0x290] sm:$0xff]  ;;  %v6950_v28 = vld [vmem:[%s8688_s29 + $0x2a8] sm:$0xff] }
  0x60   : > { %681 = vst [vmem:[%s8693_s10 + $0xd0] sm:$0xff] %v6948_v26  ;;  %v6951_v29 = vld [vmem:[%s8688_s29 + $0x2c0] sm:$0xff]  ;;  %683 = vst [vmem:[%s8693_s10 + $0xd8] sm:$0xff] %v6949_v27  ;;  %v6952_v30 = vld [vmem:[%s8688_s29 + $0x2d8] sm:$0xff] }
  0x61   : > { %685 = vst [vmem:[%s8693_s10 + $0xe0] sm:$0xff] %v6950_v28  ;;  %687 = vst [vmem:[%s8693_s10 + $0xe8] sm:$0xff] %v6951_v29  ;;  %v6953_v31 = vld [vmem:[%s8688_s29 + $0x2f0] sm:$0xff]  ;;  %v6954_v32 = vld [vmem:[%s8688_s29 + $0x308] sm:$0xff] }
  0x62   : > { %689 = vst [vmem:[%s8693_s10 + $0xf0] sm:$0xff] %v6952_v30  ;;  %691 = vst [vmem:[%s8693_s10 + $0xf8] sm:$0xff] %v6953_v31  ;;  %v6955_v33 = vld [vmem:[%s8688_s29 + $0x320] sm:$0xff]  ;;  %v6956_v34 = vld [vmem:[%s8688_s29 + $0x338] sm:$0xff] }
  0x63   : > { %693 = vst [vmem:[%s8693_s10 + $0x100] sm:$0xff] %v6954_v32  ;;  %v6957_v35 = vld [vmem:[%s8688_s29 + $0x350] sm:$0xff]  ;;  %695 = vst [vmem:[%s8693_s10 + $0x108] sm:$0xff] %v6955_v33  ;;  %v6958_v36 = vld [vmem:[%s8688_s29 + $0x368] sm:$0xff] }
  0x64   : > { %697 = vst [vmem:[%s8693_s10 + $0x110] sm:$0xff] %v6956_v34  ;;  %699 = vst [vmem:[%s8693_s10 + $0x118] sm:$0xff] %v6957_v35  ;;  %v6959_v37 = vld [vmem:[%s8688_s29 + $0x380] sm:$0xff]  ;;  %v6960_v38 = vld [vmem:[%s8688_s29 + $0x398] sm:$0xff] }
  0x65   : > { %701 = vst [vmem:[%s8693_s10 + $0x120] sm:$0xff] %v6958_v36  ;;  %703 = vst [vmem:[%s8693_s10 + $0x128] sm:$0xff] %v6959_v37  ;;  %v6961_v39 = vld [vmem:[%s8688_s29 + $0x3b0] sm:$0xff]  ;;  %v6962_v40 = vld [vmem:[%s8688_s29 + $0x3c8] sm:$0xff] }
  0x66   : > { %705 = vst [vmem:[%s8693_s10 + $0x130] sm:$0xff] %v6960_v38  ;;  %v6963_v41 = vld [vmem:[%s8688_s29 + $0x3e0] sm:$0xff]  ;;  %707 = vst [vmem:[%s8693_s10 + $0x138] sm:$0xff] %v6961_v39  ;;  %v6964_v42 = vld [vmem:[%s8688_s29 + $0x3f8] sm:$0xff] }
  0x67   : > { %709 = vst [vmem:[%s8693_s10 + $0x140] sm:$0xff] %v6962_v40  ;;  %711 = vst [vmem:[%s8693_s10 + $0x148] sm:$0xff] %v6963_v41  ;;  %v6965_v43 = vld [vmem:[%s8688_s29 + $0x410] sm:$0xff]  ;;  %v6966_v44 = vld [vmem:[%s8688_s29 + $0x428] sm:$0xff] }
  0x68   : > { %713 = vst [vmem:[%s8693_s10 + $0x150] sm:$0xff] %v6964_v42  ;;  %715 = vst [vmem:[%s8693_s10 + $0x158] sm:$0xff] %v6965_v43  ;;  %v6967_v45 = vld [vmem:[%s8688_s29 + $0x440] sm:$0xff]  ;;  %v6968_v46 = vld [vmem:[%s8688_s29 + $0x458] sm:$0xff] }
  0x69   : > { %717 = vst [vmem:[%s8693_s10 + $0x160] sm:$0xff] %v6966_v44  ;;  %v6969_v47 = vld [vmem:[%s8688_s29 + $0x470] sm:$0xff]  ;;  %719 = vst [vmem:[%s8693_s10 + $0x168] sm:$0xff] %v6967_v45  ;;  %v6970_v48 = vld [vmem:[%s8688_s29 + $0x488] sm:$0xff] }
  0x6a   : > { %721 = vst [vmem:[%s8693_s10 + $0x170] sm:$0xff] %v6968_v46  ;;  %723 = vst [vmem:[%s8693_s10 + $0x178] sm:$0xff] %v6969_v47  ;;  %v6971_v49 = vld [vmem:[%s8688_s29 + $0x4a0] sm:$0xff]  ;;  %v6972_v50 = vld [vmem:[%s8688_s29 + $0x4b8] sm:$0xff] }
  0x6b   : > { %725 = vst [vmem:[%s8693_s10 + $0x180] sm:$0xff] %v6970_v48  ;;  %727 = vst [vmem:[%s8693_s10 + $0x188] sm:$0xff] %v6971_v49  ;;  %v6973_v51 = vld [vmem:[%s8688_s29 + $0x4d0] sm:$0xff]  ;;  %v6974_v52 = vld [vmem:[%s8688_s29 + $0x4e8] sm:$0xff] }
  0x6c   : > { %729 = vst [vmem:[%s8693_s10 + $0x190] sm:$0xff] %v6972_v50  ;;  %v6975_v53 = vld [vmem:[%s8688_s29 + $0x500] sm:$0xff]  ;;  %731 = vst [vmem:[%s8693_s10 + $0x198] sm:$0xff] %v6973_v51  ;;  %v6976_v54 = vld [vmem:[%s8688_s29 + $0x518] sm:$0xff] }
  0x6d   : > { %733 = vst [vmem:[%s8693_s10 + $0x1a0] sm:$0xff] %v6974_v52  ;;  %735 = vst [vmem:[%s8693_s10 + $0x1a8] sm:$0xff] %v6975_v53  ;;  %v6977_v55 = vld [vmem:[%s8688_s29 + $0x530] sm:$0xff]  ;;  %v6978_v56 = vld [vmem:[%s8688_s29 + $0x548] sm:$0xff] }
  0x6e   : > { %737 = vst [vmem:[%s8693_s10 + $0x1b0] sm:$0xff] %v6976_v54  ;;  %739 = vst [vmem:[%s8693_s10 + $0x1b8] sm:$0xff] %v6977_v55  ;;  %v6979_v57 = vld [vmem:[%s8688_s29 + $0x560] sm:$0xff]  ;;  %v6980_v58 = vld [vmem:[%s8688_s29 + $0x578] sm:$0xff] }
  0x6f   : > { %741 = vst [vmem:[%s8693_s10 + $0x1c0] sm:$0xff] %v6978_v56  ;;  %v6981_v59 = vld [vmem:[%s8688_s29 + $0x590] sm:$0xff]  ;;  %743 = vst [vmem:[%s8693_s10 + $0x1c8] sm:$0xff] %v6979_v57  ;;  %v6982_v60 = vld [vmem:[%s8688_s29 + $0x5a8] sm:$0xff] }
  0x70   : > { %745 = vst [vmem:[%s8693_s10 + $0x1d0] sm:$0xff] %v6980_v58  ;;  %747 = vst [vmem:[%s8693_s10 + $0x1d8] sm:$0xff] %v6981_v59  ;;  %v6983_v61 = vld [vmem:[%s8688_s29 + $0x5c0] sm:$0xff]  ;;  %v6984_v62 = vld [vmem:[%s8688_s29 + $0x5d8] sm:$0xff] }
  0x71   : > { %749 = vst [vmem:[%s8693_s10 + $0x1e0] sm:$0xff] %v6982_v60  ;;  %751 = vst [vmem:[%s8693_s10 + $0x1e8] sm:$0xff] %v6983_v61  ;;  %v6985_v63 = vld [vmem:[%s8688_s29 + $0x5f0] sm:$0xff] }
  0x72   : > { %753 = vst [vmem:[%s8693_s10 + $0x1f0] sm:$0xff] %v6984_v62  ;;  %755 = vst [vmem:[%s8693_s10 + $0x1f8] sm:$0xff] %v6985_v63 }
  0x73 PF: > { %761 = sbr.rel (!%p8511_p6) target bundleno = 155 (0x9b), region = 96  ;;  %s763_s26 = sand.u32 (%p8511_p6), 1, %s8357_s14  }
  0x74   : > { %s6818_s28 = smul.u32 (%p8511_p6), 192, %s8381_s20  ;;  %s6986_s4 = sshll.u32 (%p8511_p6), %s763_s26, 9 }
  0x75   : > { %s6819_s8 = smul.u32 (%p8511_p6), 384, %s8389_s22  ;;  %s8833_s6 = scalar_lea.vmem (%p8511_p6), [#allocation7], %s6986_s4 }
  0x77   : > { %s6820_s11 = sadd.s32 (%p8511_p6), %s6819_s8, %s6818_s28 }
  0x78   : > { %s6987_s5 = sshll.u32 %s6820_s11, 3 }
  0x79   : > { %s8828_s27 = scalar_lea.vmem %s12505_s2, %s6987_s5 }
  0x7a   : > { %v6988_v0 = vld [vmem:[%s8828_s27 + $0x10] sm:$0xff]  ;;  %v6989_v1 = vld [vmem:[%s8828_s27 + $0x28] sm:$0xff]  ;;  %v6990_v2 = vld [vmem:[%s8828_s27 + $0x40] sm:$0xff] }
  0x7b   : > { %928 = vst [vmem:[%s8833_s6] sm:$0xff] %v6988_v0  ;;  %930 = vst [vmem:[%s8833_s6 + $0x8] sm:$0xff] %v6989_v1  ;;  %v6991_v3 = vld [vmem:[%s8828_s27 + $0x58] sm:$0xff]  ;;  %v6992_v4 = vld [vmem:[%s8828_s27 + $0x70] sm:$0xff] }
  0x7c   : > { %932 = vst [vmem:[%s8833_s6 + $0x10] sm:$0xff] %v6990_v2  ;;  %v6993_v5 = vld [vmem:[%s8828_s27 + $0x88] sm:$0xff]  ;;  %934 = vst [vmem:[%s8833_s6 + $0x18] sm:$0xff] %v6991_v3  ;;  %v6994_v6 = vld [vmem:[%s8828_s27 + $0xa0] sm:$0xff] }
  0x7d   : > { %936 = vst [vmem:[%s8833_s6 + $0x20] sm:$0xff] %v6992_v4  ;;  %938 = vst [vmem:[%s8833_s6 + $0x28] sm:$0xff] %v6993_v5  ;;  %v6995_v7 = vld [vmem:[%s8828_s27 + $0xb8] sm:$0xff]  ;;  %v6996_v8 = vld [vmem:[%s8828_s27 + $0xd0] sm:$0xff] }
  0x7e   : > { %940 = vst [vmem:[%s8833_s6 + $0x30] sm:$0xff] %v6994_v6  ;;  %942 = vst [vmem:[%s8833_s6 + $0x38] sm:$0xff] %v6995_v7  ;;  %v6997_v9 = vld [vmem:[%s8828_s27 + $0xe8] sm:$0xff]  ;;  %v6998_v10 = vld [vmem:[%s8828_s27 + $0x100] sm:$0xff] }
  0x7f   : > { %944 = vst [vmem:[%s8833_s6 + $0x40] sm:$0xff] %v6996_v8  ;;  %v6999_v11 = vld [vmem:[%s8828_s27 + $0x118] sm:$0xff]  ;;  %946 = vst [vmem:[%s8833_s6 + $0x48] sm:$0xff] %v6997_v9  ;;  %v7000_v12 = vld [vmem:[%s8828_s27 + $0x130] sm:$0xff] }
  0x80   : > { %948 = vst [vmem:[%s8833_s6 + $0x50] sm:$0xff] %v6998_v10  ;;  %950 = vst [vmem:[%s8833_s6 + $0x58] sm:$0xff] %v6999_v11  ;;  %v7001_v13 = vld [vmem:[%s8828_s27 + $0x148] sm:$0xff]  ;;  %v7002_v14 = vld [vmem:[%s8828_s27 + $0x160] sm:$0xff] }
  0x81   : > { %952 = vst [vmem:[%s8833_s6 + $0x60] sm:$0xff] %v7000_v12  ;;  %954 = vst [vmem:[%s8833_s6 + $0x68] sm:$0xff] %v7001_v13  ;;  %v7003_v15 = vld [vmem:[%s8828_s27 + $0x178] sm:$0xff]  ;;  %v7004_v16 = vld [vmem:[%s8828_s27 + $0x190] sm:$0xff] }
  0x82   : > { %956 = vst [vmem:[%s8833_s6 + $0x70] sm:$0xff] %v7002_v14  ;;  %v7005_v17 = vld [vmem:[%s8828_s27 + $0x1a8] sm:$0xff]  ;;  %958 = vst [vmem:[%s8833_s6 + $0x78] sm:$0xff] %v7003_v15  ;;  %v7006_v18 = vld [vmem:[%s8828_s27 + $0x1c0] sm:$0xff] }
  0x83   : > { %960 = vst [vmem:[%s8833_s6 + $0x80] sm:$0xff] %v7004_v16  ;;  %962 = vst [vmem:[%s8833_s6 + $0x88] sm:$0xff] %v7005_v17  ;;  %v7007_v19 = vld [vmem:[%s8828_s27 + $0x1d8] sm:$0xff]  ;;  %v7008_v20 = vld [vmem:[%s8828_s27 + $0x1f0] sm:$0xff] }
  0x84   : > { %964 = vst [vmem:[%s8833_s6 + $0x90] sm:$0xff] %v7006_v18  ;;  %966 = vst [vmem:[%s8833_s6 + $0x98] sm:$0xff] %v7007_v19  ;;  %v7009_v21 = vld [vmem:[%s8828_s27 + $0x208] sm:$0xff]  ;;  %v7010_v22 = vld [vmem:[%s8828_s27 + $0x220] sm:$0xff] }
  0x85   : > { %968 = vst [vmem:[%s8833_s6 + $0xa0] sm:$0xff] %v7008_v20  ;;  %v7011_v23 = vld [vmem:[%s8828_s27 + $0x238] sm:$0xff]  ;;  %970 = vst [vmem:[%s8833_s6 + $0xa8] sm:$0xff] %v7009_v21  ;;  %v7012_v24 = vld [vmem:[%s8828_s27 + $0x250] sm:$0xff] }
  0x86   : > { %972 = vst [vmem:[%s8833_s6 + $0xb0] sm:$0xff] %v7010_v22  ;;  %974 = vst [vmem:[%s8833_s6 + $0xb8] sm:$0xff] %v7011_v23  ;;  %v7013_v25 = vld [vmem:[%s8828_s27 + $0x268] sm:$0xff]  ;;  %v7014_v26 = vld [vmem:[%s8828_s27 + $0x280] sm:$0xff] }
  0x87   : > { %976 = vst [vmem:[%s8833_s6 + $0xc0] sm:$0xff] %v7012_v24  ;;  %978 = vst [vmem:[%s8833_s6 + $0xc8] sm:$0xff] %v7013_v25  ;;  %v7015_v27 = vld [vmem:[%s8828_s27 + $0x298] sm:$0xff]  ;;  %v7016_v28 = vld [vmem:[%s8828_s27 + $0x2b0] sm:$0xff] }
  0x88   : > { %980 = vst [vmem:[%s8833_s6 + $0xd0] sm:$0xff] %v7014_v26  ;;  %v7017_v29 = vld [vmem:[%s8828_s27 + $0x2c8] sm:$0xff]  ;;  %982 = vst [vmem:[%s8833_s6 + $0xd8] sm:$0xff] %v7015_v27  ;;  %v7018_v30 = vld [vmem:[%s8828_s27 + $0x2e0] sm:$0xff] }
  0x89   : > { %984 = vst [vmem:[%s8833_s6 + $0xe0] sm:$0xff] %v7016_v28  ;;  %986 = vst [vmem:[%s8833_s6 + $0xe8] sm:$0xff] %v7017_v29  ;;  %v7019_v31 = vld [vmem:[%s8828_s27 + $0x2f8] sm:$0xff]  ;;  %v7020_v32 = vld [vmem:[%s8828_s27 + $0x310] sm:$0xff] }
  0x8a   : > { %988 = vst [vmem:[%s8833_s6 + $0xf0] sm:$0xff] %v7018_v30  ;;  %990 = vst [vmem:[%s8833_s6 + $0xf8] sm:$0xff] %v7019_v31  ;;  %v7021_v33 = vld [vmem:[%s8828_s27 + $0x328] sm:$0xff]  ;;  %v7022_v34 = vld [vmem:[%s8828_s27 + $0x340] sm:$0xff] }
  0x8b   : > { %992 = vst [vmem:[%s8833_s6 + $0x100] sm:$0xff] %v7020_v32  ;;  %v7023_v35 = vld [vmem:[%s8828_s27 + $0x358] sm:$0xff]  ;;  %994 = vst [vmem:[%s8833_s6 + $0x108] sm:$0xff] %v7021_v33  ;;  %v7024_v36 = vld [vmem:[%s8828_s27 + $0x370] sm:$0xff] }
  0x8c   : > { %996 = vst [vmem:[%s8833_s6 + $0x110] sm:$0xff] %v7022_v34  ;;  %998 = vst [vmem:[%s8833_s6 + $0x118] sm:$0xff] %v7023_v35  ;;  %v7025_v37 = vld [vmem:[%s8828_s27 + $0x388] sm:$0xff]  ;;  %v7026_v38 = vld [vmem:[%s8828_s27 + $0x3a0] sm:$0xff] }
  0x8d   : > { %1000 = vst [vmem:[%s8833_s6 + $0x120] sm:$0xff] %v7024_v36  ;;  %1002 = vst [vmem:[%s8833_s6 + $0x128] sm:$0xff] %v7025_v37  ;;  %v7027_v39 = vld [vmem:[%s8828_s27 + $0x3b8] sm:$0xff]  ;;  %v7028_v40 = vld [vmem:[%s8828_s27 + $0x3d0] sm:$0xff] }
  0x8e   : > { %1004 = vst [vmem:[%s8833_s6 + $0x130] sm:$0xff] %v7026_v38  ;;  %v7029_v41 = vld [vmem:[%s8828_s27 + $0x3e8] sm:$0xff]  ;;  %1006 = vst [vmem:[%s8833_s6 + $0x138] sm:$0xff] %v7027_v39  ;;  %v7030_v42 = vld [vmem:[%s8828_s27 + $0x400] sm:$0xff] }
  0x8f   : > { %1008 = vst [vmem:[%s8833_s6 + $0x140] sm:$0xff] %v7028_v40  ;;  %1010 = vst [vmem:[%s8833_s6 + $0x148] sm:$0xff] %v7029_v41  ;;  %v7031_v43 = vld [vmem:[%s8828_s27 + $0x418] sm:$0xff]  ;;  %v7032_v44 = vld [vmem:[%s8828_s27 + $0x430] sm:$0xff] }
  0x90   : > { %1012 = vst [vmem:[%s8833_s6 + $0x150] sm:$0xff] %v7030_v42  ;;  %1014 = vst [vmem:[%s8833_s6 + $0x158] sm:$0xff] %v7031_v43  ;;  %v7033_v45 = vld [vmem:[%s8828_s27 + $0x448] sm:$0xff]  ;;  %v7034_v46 = vld [vmem:[%s8828_s27 + $0x460] sm:$0xff] }
  0x91   : > { %1016 = vst [vmem:[%s8833_s6 + $0x160] sm:$0xff] %v7032_v44  ;;  %v7035_v47 = vld [vmem:[%s8828_s27 + $0x478] sm:$0xff]  ;;  %1018 = vst [vmem:[%s8833_s6 + $0x168] sm:$0xff] %v7033_v45  ;;  %v7036_v48 = vld [vmem:[%s8828_s27 + $0x490] sm:$0xff] }
  0x92   : > { %1020 = vst [vmem:[%s8833_s6 + $0x170] sm:$0xff] %v7034_v46  ;;  %1022 = vst [vmem:[%s8833_s6 + $0x178] sm:$0xff] %v7035_v47  ;;  %v7037_v49 = vld [vmem:[%s8828_s27 + $0x4a8] sm:$0xff]  ;;  %v7038_v50 = vld [vmem:[%s8828_s27 + $0x4c0] sm:$0xff] }
  0x93   : > { %1024 = vst [vmem:[%s8833_s6 + $0x180] sm:$0xff] %v7036_v48  ;;  %1026 = vst [vmem:[%s8833_s6 + $0x188] sm:$0xff] %v7037_v49  ;;  %v7039_v51 = vld [vmem:[%s8828_s27 + $0x4d8] sm:$0xff]  ;;  %v7040_v52 = vld [vmem:[%s8828_s27 + $0x4f0] sm:$0xff] }
  0x94   : > { %1028 = vst [vmem:[%s8833_s6 + $0x190] sm:$0xff] %v7038_v50  ;;  %v7041_v53 = vld [vmem:[%s8828_s27 + $0x508] sm:$0xff]  ;;  %1030 = vst [vmem:[%s8833_s6 + $0x198] sm:$0xff] %v7039_v51  ;;  %v7042_v54 = vld [vmem:[%s8828_s27 + $0x520] sm:$0xff] }
  0x95   : > { %1032 = vst [vmem:[%s8833_s6 + $0x1a0] sm:$0xff] %v7040_v52  ;;  %1034 = vst [vmem:[%s8833_s6 + $0x1a8] sm:$0xff] %v7041_v53  ;;  %v7043_v55 = vld [vmem:[%s8828_s27 + $0x538] sm:$0xff]  ;;  %v7044_v56 = vld [vmem:[%s8828_s27 + $0x550] sm:$0xff] }
  0x96   : > { %1036 = vst [vmem:[%s8833_s6 + $0x1b0] sm:$0xff] %v7042_v54  ;;  %1038 = vst [vmem:[%s8833_s6 + $0x1b8] sm:$0xff] %v7043_v55  ;;  %v7045_v57 = vld [vmem:[%s8828_s27 + $0x568] sm:$0xff]  ;;  %v7046_v58 = vld [vmem:[%s8828_s27 + $0x580] sm:$0xff] }
  0x97   : > { %1040 = vst [vmem:[%s8833_s6 + $0x1c0] sm:$0xff] %v7044_v56  ;;  %v7047_v59 = vld [vmem:[%s8828_s27 + $0x598] sm:$0xff]  ;;  %1042 = vst [vmem:[%s8833_s6 + $0x1c8] sm:$0xff] %v7045_v57  ;;  %v7048_v60 = vld [vmem:[%s8828_s27 + $0x5b0] sm:$0xff] }
  0x98   : > { %1044 = vst [vmem:[%s8833_s6 + $0x1d0] sm:$0xff] %v7046_v58  ;;  %1046 = vst [vmem:[%s8833_s6 + $0x1d8] sm:$0xff] %v7047_v59  ;;  %v7049_v61 = vld [vmem:[%s8828_s27 + $0x5c8] sm:$0xff]  ;;  %v7050_v62 = vld [vmem:[%s8828_s27 + $0x5e0] sm:$0xff] }
  0x99   : > { %1048 = vst [vmem:[%s8833_s6 + $0x1e0] sm:$0xff] %v7048_v60  ;;  %1050 = vst [vmem:[%s8833_s6 + $0x1e8] sm:$0xff] %v7049_v61  ;;  %v7051_v63 = vld [vmem:[%s8828_s27 + $0x5f8] sm:$0xff] }
  0x9a   : > { %1052 = vst [vmem:[%s8833_s6 + $0x1f0] sm:$0xff] %v7050_v62  ;;  %1054 = vst [vmem:[%s8833_s6 + $0x1f8] sm:$0xff] %v7051_v63 }
  0x9b PF: > { %p7052_p1 = scmp.ge.s32.totalorder %s8393_s23, 1  ;;  %p1059_p3 = scmp.lt.s32.totalorder %s8393_s23, 9 }
  0x9d   : > { %p1060_p4 = pnand %p7052_p1, %p1059_p3 }
  0x9f   : > { %1063 = sbr.rel (%p1060_p4) target bundleno = 2874 (0xb3a), region = 134 }
  0xa4   : > { %s1066_s29 = sand.u32 1, %s8361_s15   ;;  %s1073_s10 = sand.u32 1, %s8353_s13  }
  0xa5   : > { %s7053_s26 = sshll.u32 %s1066_s29, 9  ;;  %s7054_s28 = sshll.u32 %s1073_s10, 9 }
  0xa6   : > { %s8966_s4 = scalar_lea.vmem [#allocation5], %s7053_s26  ;;  %s8968_s8 = scalar_lea.vmem [#allocation6], %s7054_s28 }
  0xa7   : > { %s8970_s11 = scalar_lea.vmem [#allocation7], %s7054_s28  ;;  %s8972_s5 = scalar_lea.vmem [#allocation8], %s7053_s26 }
  0xa8   : > { %p7057_p5 = scmp.ne.s32.totalorder %s8369_s17, 0 }
  0xaa   : > { %1118 = sbr.rel (%p7057_p5) target bundleno = 272 (0x110), region = 150 }
  0xaf   : > { %vm1119_vm0 = vcmask 7168   ;;  %v8395_v0 = vmov -inf   ;;  %v8396_v1 = vmov 0.0  }
  0xb0   : > { %1120 = vst.msk [vmem:[#allocation2] sm:$0xff] %vm1119_vm0, %v8395_v0  ;;  %1121 = vst.msk [vmem:[#allocation2 + $0x8] sm:$0xff] %vm1119_vm0, %v8395_v0 }
  0xb1   : > { %1122 = vst.msk [vmem:[#allocation2 + $0x10] sm:$0xff] %vm1119_vm0, %v8395_v0  ;;  %1123 = vst.msk [vmem:[#allocation2 + $0x18] sm:$0xff] %vm1119_vm0, %v8395_v0 }
  0xb2   : > { %1124 = vst.msk [vmem:[#allocation2 + $0x20] sm:$0xff] %vm1119_vm0, %v8395_v0  ;;  %1125 = vst.msk [vmem:[#allocation2 + $0x28] sm:$0xff] %vm1119_vm0, %v8395_v0 }
  0xb3   : > { %1126 = vst.msk [vmem:[#allocation2 + $0x30] sm:$0xff] %vm1119_vm0, %v8395_v0  ;;  %1127 = vst.msk [vmem:[#allocation2 + $0x38] sm:$0xff] %vm1119_vm0, %v8395_v0 }
  0xb4   : > { %1128 = vst.msk [vmem:[#allocation2 + $0x40] sm:$0xff] %vm1119_vm0, %v8395_v0  ;;  %1129 = vst.msk [vmem:[#allocation2 + $0x48] sm:$0xff] %vm1119_vm0, %v8395_v0 }
  0xb5   : > { %1130 = vst.msk [vmem:[#allocation2 + $0x50] sm:$0xff] %vm1119_vm0, %v8395_v0  ;;  %1131 = vst.msk [vmem:[#allocation2 + $0x58] sm:$0xff] %vm1119_vm0, %v8395_v0 }
  0xb6   : > { %1132 = vst.msk [vmem:[#allocation2 + $0x60] sm:$0xff] %vm1119_vm0, %v8395_v0  ;;  %1133 = vst.msk [vmem:[#allocation2 + $0x68] sm:$0xff] %vm1119_vm0, %v8395_v0 }
  0xb7   : > { %1134 = vst.msk [vmem:[#allocation2 + $0x70] sm:$0xff] %vm1119_vm0, %v8395_v0  ;;  %1135 = vst.msk [vmem:[#allocation2 + $0x78] sm:$0xff] %vm1119_vm0, %v8395_v0 }
  0xb8   : > { %1136 = vst.msk [vmem:[#allocation2 + $0x80] sm:$0xff] %vm1119_vm0, %v8395_v0  ;;  %1137 = vst.msk [vmem:[#allocation2 + $0x88] sm:$0xff] %vm1119_vm0, %v8395_v0 }
  0xb9   : > { %1138 = vst.msk [vmem:[#allocation2 + $0x90] sm:$0xff] %vm1119_vm0, %v8395_v0  ;;  %1139 = vst.msk [vmem:[#allocation2 + $0x98] sm:$0xff] %vm1119_vm0, %v8395_v0 }
  0xba   : > { %1140 = vst.msk [vmem:[#allocation2 + $0xa0] sm:$0xff] %vm1119_vm0, %v8395_v0  ;;  %1141 = vst.msk [vmem:[#allocation2 + $0xa8] sm:$0xff] %vm1119_vm0, %v8395_v0 }
  0xbb   : > { %1142 = vst.msk [vmem:[#allocation2 + $0xb0] sm:$0xff] %vm1119_vm0, %v8395_v0  ;;  %1143 = vst.msk [vmem:[#allocation2 + $0xb8] sm:$0xff] %vm1119_vm0, %v8395_v0 }
  0xbc   : > { %1144 = vst.msk [vmem:[#allocation2 + $0xc0] sm:$0xff] %vm1119_vm0, %v8395_v0  ;;  %1145 = vst.msk [vmem:[#allocation2 + $0xc8] sm:$0xff] %vm1119_vm0, %v8395_v0 }
  0xbd   : > { %1146 = vst.msk [vmem:[#allocation2 + $0xd0] sm:$0xff] %vm1119_vm0, %v8395_v0  ;;  %1147 = vst.msk [vmem:[#allocation2 + $0xd8] sm:$0xff] %vm1119_vm0, %v8395_v0 }
  0xbe   : > { %1148 = vst.msk [vmem:[#allocation2 + $0xe0] sm:$0xff] %vm1119_vm0, %v8395_v0  ;;  %1149 = vst.msk [vmem:[#allocation2 + $0xe8] sm:$0xff] %vm1119_vm0, %v8395_v0 }
  0xbf   : > { %1150 = vst.msk [vmem:[#allocation2 + $0xf0] sm:$0xff] %vm1119_vm0, %v8395_v0  ;;  %1151 = vst.msk [vmem:[#allocation2 + $0xf8] sm:$0xff] %vm1119_vm0, %v8395_v0 }
  0xc0   : > { %1152 = vst.msk [vmem:[#allocation2 + $0x100] sm:$0xff] %vm1119_vm0, %v8395_v0  ;;  %1153 = vst.msk [vmem:[#allocation2 + $0x108] sm:$0xff] %vm1119_vm0, %v8395_v0 }
  0xc1   : > { %1154 = vst.msk [vmem:[#allocation2 + $0x110] sm:$0xff] %vm1119_vm0, %v8395_v0  ;;  %1155 = vst.msk [vmem:[#allocation2 + $0x118] sm:$0xff] %vm1119_vm0, %v8395_v0 }
  0xc2   : > { %1156 = vst.msk [vmem:[#allocation2 + $0x120] sm:$0xff] %vm1119_vm0, %v8395_v0  ;;  %1157 = vst.msk [vmem:[#allocation2 + $0x128] sm:$0xff] %vm1119_vm0, %v8395_v0 }
  0xc3   : > { %1158 = vst.msk [vmem:[#allocation2 + $0x130] sm:$0xff] %vm1119_vm0, %v8395_v0  ;;  %1159 = vst.msk [vmem:[#allocation2 + $0x138] sm:$0xff] %vm1119_vm0, %v8395_v0 }
  0xc4   : > { %1160 = vst.msk [vmem:[#allocation2 + $0x140] sm:$0xff] %vm1119_vm0, %v8395_v0  ;;  %1161 = vst.msk [vmem:[#allocation2 + $0x148] sm:$0xff] %vm1119_vm0, %v8395_v0 }
  0xc5   : > { %1162 = vst.msk [vmem:[#allocation2 + $0x150] sm:$0xff] %vm1119_vm0, %v8395_v0  ;;  %1163 = vst.msk [vmem:[#allocation2 + $0x158] sm:$0xff] %vm1119_vm0, %v8395_v0 }
  0xc6   : > { %1164 = vst.msk [vmem:[#allocation2 + $0x160] sm:$0xff] %vm1119_vm0, %v8395_v0  ;;  %1165 = vst.msk [vmem:[#allocation2 + $0x168] sm:$0xff] %vm1119_vm0, %v8395_v0 }
  0xc7   : > { %1166 = vst.msk [vmem:[#allocation2 + $0x170] sm:$0xff] %vm1119_vm0, %v8395_v0  ;;  %1167 = vst.msk [vmem:[#allocation2 + $0x178] sm:$0xff] %vm1119_vm0, %v8395_v0 }
  0xc8   : > { %1168 = vst.msk [vmem:[#allocation2 + $0x180] sm:$0xff] %vm1119_vm0, %v8395_v0  ;;  %1169 = vst.msk [vmem:[#allocation2 + $0x188] sm:$0xff] %vm1119_vm0, %v8395_v0 }
  0xc9   : > { %1170 = vst.msk [vmem:[#allocation2 + $0x190] sm:$0xff] %vm1119_vm0, %v8395_v0  ;;  %1171 = vst.msk [vmem:[#allocation2 + $0x198] sm:$0xff] %vm1119_vm0, %v8395_v0 }
  0xca   : > { %1172 = vst.msk [vmem:[#allocation2 + $0x1a0] sm:$0xff] %vm1119_vm0, %v8395_v0  ;;  %1173 = vst.msk [vmem:[#allocation2 + $0x1a8] sm:$0xff] %vm1119_vm0, %v8395_v0 }
  0xcb   : > { %1174 = vst.msk [vmem:[#allocation2 + $0x1b0] sm:$0xff] %vm1119_vm0, %v8395_v0  ;;  %1175 = vst.msk [vmem:[#allocation2 + $0x1b8] sm:$0xff] %vm1119_vm0, %v8395_v0 }
  0xcc   : > { %1176 = vst.msk [vmem:[#allocation2 + $0x1c0] sm:$0xff] %vm1119_vm0, %v8395_v0  ;;  %1177 = vst.msk [vmem:[#allocation2 + $0x1c8] sm:$0xff] %vm1119_vm0, %v8395_v0 }
  0xcd   : > { %1178 = vst.msk [vmem:[#allocation2 + $0x1d0] sm:$0xff] %vm1119_vm0, %v8395_v0  ;;  %1179 = vst.msk [vmem:[#allocation2 + $0x1d8] sm:$0xff] %vm1119_vm0, %v8395_v0 }
  0xce   : > { %1180 = vst.msk [vmem:[#allocation2 + $0x1e0] sm:$0xff] %vm1119_vm0, %v8395_v0  ;;  %1181 = vst.msk [vmem:[#allocation2 + $0x1e8] sm:$0xff] %vm1119_vm0, %v8395_v0 }
  0xcf   : > { %1182 = vst.msk [vmem:[#allocation2 + $0x1f0] sm:$0xff] %vm1119_vm0, %v8395_v0  ;;  %1183 = vst.msk [vmem:[#allocation2 + $0x1f8] sm:$0xff] %vm1119_vm0, %v8395_v0 }
  0xd0   : > { %1184 = vst.msk [vmem:[#allocation3] sm:$0xff] %vm1119_vm0, %v8396_v1  ;;  %1185 = vst.msk [vmem:[#allocation3 + $0x8] sm:$0xff] %vm1119_vm0, %v8396_v1 }
  0xd1   : > { %1186 = vst.msk [vmem:[#allocation3 + $0x10] sm:$0xff] %vm1119_vm0, %v8396_v1  ;;  %1187 = vst.msk [vmem:[#allocation3 + $0x18] sm:$0xff] %vm1119_vm0, %v8396_v1 }
  0xd2   : > { %1188 = vst.msk [vmem:[#allocation3 + $0x20] sm:$0xff] %vm1119_vm0, %v8396_v1  ;;  %1189 = vst.msk [vmem:[#allocation3 + $0x28] sm:$0xff] %vm1119_vm0, %v8396_v1 }
  0xd3   : > { %1190 = vst.msk [vmem:[#allocation3 + $0x30] sm:$0xff] %vm1119_vm0, %v8396_v1  ;;  %1191 = vst.msk [vmem:[#allocation3 + $0x38] sm:$0xff] %vm1119_vm0, %v8396_v1 }
  0xd4   : > { %1192 = vst.msk [vmem:[#allocation3 + $0x40] sm:$0xff] %vm1119_vm0, %v8396_v1  ;;  %1193 = vst.msk [vmem:[#allocation3 + $0x48] sm:$0xff] %vm1119_vm0, %v8396_v1 }
  0xd5   : > { %1194 = vst.msk [vmem:[#allocation3 + $0x50] sm:$0xff] %vm1119_vm0, %v8396_v1  ;;  %1195 = vst.msk [vmem:[#allocation3 + $0x58] sm:$0xff] %vm1119_vm0, %v8396_v1 }
  0xd6   : > { %1196 = vst.msk [vmem:[#allocation3 + $0x60] sm:$0xff] %vm1119_vm0, %v8396_v1  ;;  %1197 = vst.msk [vmem:[#allocation3 + $0x68] sm:$0xff] %vm1119_vm0, %v8396_v1 }
  0xd7   : > { %1198 = vst.msk [vmem:[#allocation3 + $0x70] sm:$0xff] %vm1119_vm0, %v8396_v1  ;;  %1199 = vst.msk [vmem:[#allocation3 + $0x78] sm:$0xff] %vm1119_vm0, %v8396_v1 }
  0xd8   : > { %1200 = vst.msk [vmem:[#allocation3 + $0x80] sm:$0xff] %vm1119_vm0, %v8396_v1  ;;  %1201 = vst.msk [vmem:[#allocation3 + $0x88] sm:$0xff] %vm1119_vm0, %v8396_v1 }
  0xd9   : > { %1202 = vst.msk [vmem:[#allocation3 + $0x90] sm:$0xff] %vm1119_vm0, %v8396_v1  ;;  %1203 = vst.msk [vmem:[#allocation3 + $0x98] sm:$0xff] %vm1119_vm0, %v8396_v1 }
  0xda   : > { %1204 = vst.msk [vmem:[#allocation3 + $0xa0] sm:$0xff] %vm1119_vm0, %v8396_v1  ;;  %1205 = vst.msk [vmem:[#allocation3 + $0xa8] sm:$0xff] %vm1119_vm0, %v8396_v1 }
  0xdb   : > { %1206 = vst.msk [vmem:[#allocation3 + $0xb0] sm:$0xff] %vm1119_vm0, %v8396_v1  ;;  %1207 = vst.msk [vmem:[#allocation3 + $0xb8] sm:$0xff] %vm1119_vm0, %v8396_v1 }
  0xdc   : > { %1208 = vst.msk [vmem:[#allocation3 + $0xc0] sm:$0xff] %vm1119_vm0, %v8396_v1  ;;  %1209 = vst.msk [vmem:[#allocation3 + $0xc8] sm:$0xff] %vm1119_vm0, %v8396_v1 }
  0xdd   : > { %1210 = vst.msk [vmem:[#allocation3 + $0xd0] sm:$0xff] %vm1119_vm0, %v8396_v1  ;;  %1211 = vst.msk [vmem:[#allocation3 + $0xd8] sm:$0xff] %vm1119_vm0, %v8396_v1 }
  0xde   : > { %1212 = vst.msk [vmem:[#allocation3 + $0xe0] sm:$0xff] %vm1119_vm0, %v8396_v1  ;;  %1213 = vst.msk [vmem:[#allocation3 + $0xe8] sm:$0xff] %vm1119_vm0, %v8396_v1 }
  0xdf   : > { %1214 = vst.msk [vmem:[#allocation3 + $0xf0] sm:$0xff] %vm1119_vm0, %v8396_v1  ;;  %1215 = vst.msk [vmem:[#allocation3 + $0xf8] sm:$0xff] %vm1119_vm0, %v8396_v1 }
  0xe0   : > { %1216 = vst.msk [vmem:[#allocation3 + $0x100] sm:$0xff] %vm1119_vm0, %v8396_v1  ;;  %1217 = vst.msk [vmem:[#allocation3 + $0x108] sm:$0xff] %vm1119_vm0, %v8396_v1 }
  0xe1   : > { %1218 = vst.msk [vmem:[#allocation3 + $0x110] sm:$0xff] %vm1119_vm0, %v8396_v1  ;;  %1219 = vst.msk [vmem:[#allocation3 + $0x118] sm:$0xff] %vm1119_vm0, %v8396_v1 }
  0xe2   : > { %1220 = vst.msk [vmem:[#allocation3 + $0x120] sm:$0xff] %vm1119_vm0, %v8396_v1  ;;  %1221 = vst.msk [vmem:[#allocation3 + $0x128] sm:$0xff] %vm1119_vm0, %v8396_v1 }
  0xe3   : > { %1222 = vst.msk [vmem:[#allocation3 + $0x130] sm:$0xff] %vm1119_vm0, %v8396_v1  ;;  %1223 = vst.msk [vmem:[#allocation3 + $0x138] sm:$0xff] %vm1119_vm0, %v8396_v1 }
  0xe4   : > { %1224 = vst.msk [vmem:[#allocation3 + $0x140] sm:$0xff] %vm1119_vm0, %v8396_v1  ;;  %1225 = vst.msk [vmem:[#allocation3 + $0x148] sm:$0xff] %vm1119_vm0, %v8396_v1 }
  0xe5   : > { %1226 = vst.msk [vmem:[#allocation3 + $0x150] sm:$0xff] %vm1119_vm0, %v8396_v1  ;;  %1227 = vst.msk [vmem:[#allocation3 + $0x158] sm:$0xff] %vm1119_vm0, %v8396_v1 }
  0xe6   : > { %1228 = vst.msk [vmem:[#allocation3 + $0x160] sm:$0xff] %vm1119_vm0, %v8396_v1  ;;  %1229 = vst.msk [vmem:[#allocation3 + $0x168] sm:$0xff] %vm1119_vm0, %v8396_v1 }
  0xe7   : > { %1230 = vst.msk [vmem:[#allocation3 + $0x170] sm:$0xff] %vm1119_vm0, %v8396_v1  ;;  %1231 = vst.msk [vmem:[#allocation3 + $0x178] sm:$0xff] %vm1119_vm0, %v8396_v1 }
  0xe8   : > { %1232 = vst.msk [vmem:[#allocation3 + $0x180] sm:$0xff] %vm1119_vm0, %v8396_v1  ;;  %1233 = vst.msk [vmem:[#allocation3 + $0x188] sm:$0xff] %vm1119_vm0, %v8396_v1 }
  0xe9   : > { %1234 = vst.msk [vmem:[#allocation3 + $0x190] sm:$0xff] %vm1119_vm0, %v8396_v1  ;;  %1235 = vst.msk [vmem:[#allocation3 + $0x198] sm:$0xff] %vm1119_vm0, %v8396_v1 }
  0xea   : > { %1236 = vst.msk [vmem:[#allocation3 + $0x1a0] sm:$0xff] %vm1119_vm0, %v8396_v1  ;;  %1237 = vst.msk [vmem:[#allocation3 + $0x1a8] sm:$0xff] %vm1119_vm0, %v8396_v1 }
  0xeb   : > { %1238 = vst.msk [vmem:[#allocation3 + $0x1b0] sm:$0xff] %vm1119_vm0, %v8396_v1  ;;  %1239 = vst.msk [vmem:[#allocation3 + $0x1b8] sm:$0xff] %vm1119_vm0, %v8396_v1 }
  0xec   : > { %1240 = vst.msk [vmem:[#allocation3 + $0x1c0] sm:$0xff] %vm1119_vm0, %v8396_v1  ;;  %1241 = vst.msk [vmem:[#allocation3 + $0x1c8] sm:$0xff] %vm1119_vm0, %v8396_v1 }
  0xed   : > { %1242 = vst.msk [vmem:[#allocation3 + $0x1d0] sm:$0xff] %vm1119_vm0, %v8396_v1  ;;  %1243 = vst.msk [vmem:[#allocation3 + $0x1d8] sm:$0xff] %vm1119_vm0, %v8396_v1 }
  0xee   : > { %1244 = vst.msk [vmem:[#allocation3 + $0x1e0] sm:$0xff] %vm1119_vm0, %v8396_v1  ;;  %1245 = vst.msk [vmem:[#allocation3 + $0x1e8] sm:$0xff] %vm1119_vm0, %v8396_v1 }
  0xef   : > { %1246 = vst.msk [vmem:[#allocation3 + $0x1f0] sm:$0xff] %vm1119_vm0, %v8396_v1  ;;  %1247 = vst.msk [vmem:[#allocation3 + $0x1f8] sm:$0xff] %vm1119_vm0, %v8396_v1 }
  0xf0   : > { %1248 = vst [vmem:[#allocation4 + $0xb0] sm:$0xff] %v8396_v1  ;;  %1249 = vst [vmem:[#allocation4 + $0x1b0] sm:$0xff] %v8396_v1 }
  0xf1   : > { %1250 = vst [vmem:[#allocation4 + $0xd8] sm:$0xff] %v8396_v1  ;;  %1251 = vst [vmem:[#allocation4 + $0x18] sm:$0xff] %v8396_v1 }
  0xf2   : > { %1252 = vst [vmem:[#allocation4 + $0x50] sm:$0xff] %v8396_v1  ;;  %1253 = vst [vmem:[#allocation4 + $0x168] sm:$0xff] %v8396_v1 }
  0xf3   : > { %1254 = vst [vmem:[#allocation4 + $0x130] sm:$0xff] %v8396_v1  ;;  %1255 = vst [vmem:[#allocation4 + $0x48] sm:$0xff] %v8396_v1 }
  0xf4   : > { %1256 = vst [vmem:[#allocation4 + $0x180] sm:$0xff] %v8396_v1  ;;  %1257 = vst [vmem:[#allocation4 + $0x110] sm:$0xff] %v8396_v1 }
  0xf5   : > { %1258 = vst [vmem:[#allocation4 + $0x118] sm:$0xff] %v8396_v1  ;;  %1259 = vst [vmem:[#allocation4 + $0x98] sm:$0xff] %v8396_v1 }
  0xf6   : > { %1260 = vst [vmem:[#allocation4 + $0x120] sm:$0xff] %v8396_v1  ;;  %1261 = vst [vmem:[#allocation4 + $0x150] sm:$0xff] %v8396_v1 }
  0xf7   : > { %1262 = vst [vmem:[#allocation4 + $0x108] sm:$0xff] %v8396_v1  ;;  %1263 = vst [vmem:[#allocation4 + $0x60] sm:$0xff] %v8396_v1 }
  0xf8   : > { %1264 = vst [vmem:[#allocation4 + $0xe0] sm:$0xff] %v8396_v1  ;;  %1265 = vst [vmem:[#allocation4 + $0x188] sm:$0xff] %v8396_v1 }
  0xf9   : > { %1266 = vst [vmem:[#allocation4 + $0x138] sm:$0xff] %v8396_v1  ;;  %1267 = vst [vmem:[#allocation4 + $0x140] sm:$0xff] %v8396_v1 }
  0xfa   : > { %1268 = vst [vmem:[#allocation4 + $0x80] sm:$0xff] %v8396_v1  ;;  %1269 = vst [vmem:[#allocation4 + $0x1a8] sm:$0xff] %v8396_v1 }
  0xfb   : > { %1270 = vst [vmem:[#allocation4 + $0x1b8] sm:$0xff] %v8396_v1  ;;  %1271 = vst [vmem:[#allocation4 + $0x28] sm:$0xff] %v8396_v1 }
  0xfc   : > { %1272 = vst [vmem:[#allocation4 + $0x1e8] sm:$0xff] %v8396_v1  ;;  %1273 = vst [vmem:[#allocation4 + $0xf8] sm:$0xff] %v8396_v1 }
  0xfd   : > { %1274 = vst [vmem:[#allocation4 + $0x160] sm:$0xff] %v8396_v1  ;;  %1275 = vst [vmem:[#allocation4 + $0x30] sm:$0xff] %v8396_v1 }
  0xfe   : > { %1276 = vst [vmem:[#allocation4 + $0x1e0] sm:$0xff] %v8396_v1  ;;  %1277 = vst [vmem:[#allocation4] sm:$0xff] %v8396_v1 }
  0xff   : > { %1278 = vst [vmem:[#allocation4 + $0xf0] sm:$0xff] %v8396_v1  ;;  %1279 = vst [vmem:[#allocation4 + $0x8] sm:$0xff] %v8396_v1 }
 0x100   : > { %1280 = vst [vmem:[#allocation4 + $0x148] sm:$0xff] %v8396_v1  ;;  %1281 = vst [vmem:[#allocation4 + $0x1d0] sm:$0xff] %v8396_v1 }
 0x101   : > { %1282 = vst [vmem:[#allocation4 + $0x100] sm:$0xff] %v8396_v1  ;;  %1283 = vst [vmem:[#allocation4 + $0xc8] sm:$0xff] %v8396_v1 }
 0x102   : > { %1284 = vst [vmem:[#allocation4 + $0x40] sm:$0xff] %v8396_v1  ;;  %1285 = vst [vmem:[#allocation4 + $0x1f8] sm:$0xff] %v8396_v1 }
 0x103   : > { %1286 = vst [vmem:[#allocation4 + $0x20] sm:$0xff] %v8396_v1  ;;  %1287 = vst [vmem:[#allocation4 + $0x128] sm:$0xff] %v8396_v1 }
 0x104   : > { %1288 = vst [vmem:[#allocation4 + $0x1a0] sm:$0xff] %v8396_v1  ;;  %1289 = vst [vmem:[#allocation4 + $0x1f0] sm:$0xff] %v8396_v1 }
 0x105   : > { %1290 = vst [vmem:[#allocation4 + $0xe8] sm:$0xff] %v8396_v1  ;;  %1291 = vst [vmem:[#allocation4 + $0x78] sm:$0xff] %v8396_v1 }
 0x106   : > { %1292 = vst [vmem:[#allocation4 + $0x70] sm:$0xff] %v8396_v1  ;;  %1293 = vst [vmem:[#allocation4 + $0x90] sm:$0xff] %v8396_v1 }
 0x107   : > { %1294 = vst [vmem:[#allocation4 + $0x1d8] sm:$0xff] %v8396_v1  ;;  %1295 = vst [vmem:[#allocation4 + $0xd0] sm:$0xff] %v8396_v1 }
 0x108   : > { %1296 = vst [vmem:[#allocation4 + $0xb8] sm:$0xff] %v8396_v1  ;;  %1297 = vst [vmem:[#allocation4 + $0x88] sm:$0xff] %v8396_v1 }
 0x109   : > { %1298 = vst [vmem:[#allocation4 + $0xa8] sm:$0xff] %v8396_v1  ;;  %1299 = vst [vmem:[#allocation4 + $0x1c8] sm:$0xff] %v8396_v1 }
 0x10a   : > { %1300 = vst [vmem:[#allocation4 + $0x170] sm:$0xff] %v8396_v1  ;;  %1301 = vst [vmem:[#allocation4 + $0x178] sm:$0xff] %v8396_v1 }
 0x10b   : > { %1302 = vst [vmem:[#allocation4 + $0x68] sm:$0xff] %v8396_v1  ;;  %1303 = vst [vmem:[#allocation4 + $0x190] sm:$0xff] %v8396_v1 }
 0x10c   : > { %1304 = vst [vmem:[#allocation4 + $0x198] sm:$0xff] %v8396_v1  ;;  %1305 = vst [vmem:[#allocation4 + $0x38] sm:$0xff] %v8396_v1 }
 0x10d   : > { %1306 = vst [vmem:[#allocation4 + $0xc0] sm:$0xff] %v8396_v1  ;;  %1307 = vst [vmem:[#allocation4 + $0x1c0] sm:$0xff] %v8396_v1 }
 0x10e   : > { %1308 = vst [vmem:[#allocation4 + $0x158] sm:$0xff] %v8396_v1  ;;  %1309 = vst [vmem:[#allocation4 + $0x10] sm:$0xff] %v8396_v1 }
 0x10f   : > { %1310 = vst [vmem:[#allocation4 + $0x58] sm:$0xff] %v8396_v1  ;;  %1311 = vst [vmem:[#allocation4 + $0xa0] sm:$0xff] %v8396_v1 }
 0x110 PF: > { %v1407_v2 = vld [vmem:[%s8968_s8 + $0xf8] sm:$0xff]  ;;  %v1406_v6 = vld [vmem:[%s8968_s8 + $0xf0] sm:$0xff]  ;;  %v1405_v10 = vld [vmem:[%s8968_s8 + $0xe8] sm:$0xff]  ;;  %vm4642_vm1 = vcmask 7168   ;;  %p7058_p6 = scmp.ne.s32.totalorder %s8369_s17, 1 }
 0x111   : > { %v1391_v3 = vld [vmem:[%s8968_s8 + $0x78] sm:$0xff]  ;;  %7065 = vmatprep.subr.mxu0 %v1407_v2  ;;  %v1438_v7 = vld [vmem:[%s8968_s8 + $0x1f0] sm:$0xff]  ;;  %v1437_v11 = vld [vmem:[%s8968_s8 + $0x1e8] sm:$0xff] }
 0x112   : > { %v1439_v4 = vld [vmem:[%s8968_s8 + $0x1f8] sm:$0xff]  ;;  %7066 = vmatpush3.xpose.msra.mxu0 %v1391_v3  ;;  %v1390_v8 = vld [vmem:[%s8968_s8 + $0x70] sm:$0xff]  ;;  %v1389_v12 = vld [vmem:[%s8968_s8 + $0x68] sm:$0xff] }
 0x113   : > { %7225 = vmatprep.subr.mxu1 %v1439_v4  ;;  %v1423_v5 = vld [vmem:[%s8968_s8 + $0x178] sm:$0xff]  ;;  %7067 = vmatprep.subr.mxu0 %v1406_v6  ;;  %v1422_v9 = vld [vmem:[%s8968_s8 + $0x170] sm:$0xff]  ;;  %v1421_v13 = vld [vmem:[%s8968_s8 + $0x168] sm:$0xff] }
 0x114   : > { %7226 = vmatpush3.xpose.msra.mxu1 %v1423_v5  ;;  %v1404_v14 = vld [vmem:[%s8968_s8 + $0xe0] sm:$0xff]  ;;  %v1403_v18 = vld [vmem:[%s8968_s8 + $0xd8] sm:$0xff]  ;;  %v1402_v22 = vld [vmem:[%s8968_s8 + $0xd0] sm:$0xff] }
 0x115   : > { %7227 = vmatprep.subr.mxu1 %v1438_v7  ;;  %v1436_v15 = vld [vmem:[%s8968_s8 + $0x1e0] sm:$0xff]  ;;  %v1435_v19 = vld [vmem:[%s8968_s8 + $0x1d8] sm:$0xff]  ;;  %v1434_v23 = vld [vmem:[%s8968_s8 + $0x1d0] sm:$0xff] }
 0x116   : > { %7068 = vmatpush3.xpose.msra.mxu0 %v1390_v8  ;;  %v1388_v16 = vld [vmem:[%s8968_s8 + $0x60] sm:$0xff]  ;;  %v1387_v20 = vld [vmem:[%s8968_s8 + $0x58] sm:$0xff]  ;;  %v1386_v24 = vld [vmem:[%s8968_s8 + $0x50] sm:$0xff] }
 0x117   : > { %7069 = vmatprep.subr.mxu0 %v1405_v10  ;;  %v1420_v17 = vld [vmem:[%s8968_s8 + $0x160] sm:$0xff]  ;;  %v1419_v21 = vld [vmem:[%s8968_s8 + $0x158] sm:$0xff]  ;;  %v1418_v25 = vld [vmem:[%s8968_s8 + $0x150] sm:$0xff] }
 0x118   : > { %7228 = vmatpush3.xpose.msra.mxu1 %v1422_v9  ;;  %v1401_v26 = vld [vmem:[%s8968_s8 + $0xc8] sm:$0xff]  ;;  %v9322_v28 = vld [vmem:[%s8966_s4] sm:$0xff]  ;;  %v1399_v35 = vld [vmem:[%s8968_s8 + $0xb8] sm:$0xff] }
 0x119   : > { %7229 = vmatprep.subr.mxu1 %v1437_v11  ;;  %v1433_v27 = vld [vmem:[%s8968_s8 + $0x1c8] sm:$0xff]  ;;  %v1400_v31 = vld [vmem:[%s8968_s8 + $0xc0] sm:$0xff]  ;;  %7097 = vmatprep.mubr.f32.mxu0 %v9322_v28  ;;  %v1431_v36 = vld [vmem:[%s8968_s8 + $0x1b8] sm:$0xff] }
 0x11a   : > { %7070 = vmatpush3.xpose.msra.mxu0 %v1389_v12  ;;  %v1385_v29 = vld [vmem:[%s8968_s8 + $0x48] sm:$0xff]  ;;  %v1432_v32 = vld [vmem:[%s8968_s8 + $0x1c0] sm:$0xff]  ;;  %7257 = vmatprep.mubr.f32.mxu1 %v9322_v28  ;;  %v1383_v37 = vld [vmem:[%s8968_s8 + $0x38] sm:$0xff] }
 0x11b   : > { %7071 = vmatprep.subr.mxu0 %v1404_v14  ;;  %v1417_v30 = vld [vmem:[%s8968_s8 + $0x148] sm:$0xff]  ;;  %v1384_v33 = vld [vmem:[%s8968_s8 + $0x40] sm:$0xff]  ;;  %v1415_v38 = vld [vmem:[%s8968_s8 + $0x138] sm:$0xff] }
 0x11c   : > { %7230 = vmatpush3.xpose.msra.mxu1 %v1421_v13  ;;  %v1416_v34 = vld [vmem:[%s8968_s8 + $0x140] sm:$0xff]  ;;  %v1398_v39 = vld [vmem:[%s8968_s8 + $0xb0] sm:$0xff]  ;;  %v1397_v43 = vld [vmem:[%s8968_s8 + $0xa8] sm:$0xff] }
 0x11d   : > { %7231 = vmatprep.subr.mxu1 %v1436_v15  ;;  %v1430_v40 = vld [vmem:[%s8968_s8 + $0x1b0] sm:$0xff]  ;;  %v1429_v44 = vld [vmem:[%s8968_s8 + $0x1a8] sm:$0xff]  ;;  %v1396_v47 = vld [vmem:[%s8968_s8 + $0xa0] sm:$0xff] }
 0x11e   : > { %7072 = vmatpush3.xpose.msra.mxu0 %v1388_v16  ;;  %v1382_v41 = vld [vmem:[%s8968_s8 + $0x30] sm:$0xff]  ;;  %v1381_v45 = vld [vmem:[%s8968_s8 + $0x28] sm:$0xff]  ;;  %v1428_v48 = vld [vmem:[%s8968_s8 + $0x1a0] sm:$0xff] }
 0x11f   : > { %7073 = vmatprep.subr.mxu0 %v1403_v18  ;;  %v1414_v42 = vld [vmem:[%s8968_s8 + $0x130] sm:$0xff]  ;;  %v1413_v46 = vld [vmem:[%s8968_s8 + $0x128] sm:$0xff]  ;;  %v1380_v49 = vld [vmem:[%s8968_s8 + $0x20] sm:$0xff] }
 0x120   : > { %7232 = vmatpush3.xpose.msra.mxu1 %v1420_v17  ;;  %v1412_v50 = vld [vmem:[%s8968_s8 + $0x120] sm:$0xff]  ;;  %v1395_v51 = vld [vmem:[%s8968_s8 + $0x98] sm:$0xff]  ;;  %v1394_v55 = vld [vmem:[%s8968_s8 + $0x90] sm:$0xff] }
 0x121   : > { %7233 = vmatprep.subr.mxu1 %v1435_v19  ;;  %v1427_v52 = vld [vmem:[%s8968_s8 + $0x198] sm:$0xff]  ;;  %v1426_v56 = vld [vmem:[%s8968_s8 + $0x190] sm:$0xff]  ;;  %v1393_v59 = vld [vmem:[%s8968_s8 + $0x88] sm:$0xff] }
 0x122   : > { %7074 = vmatpush3.xpose.msra.mxu0 %v1387_v20  ;;  %v1379_v53 = vld [vmem:[%s8968_s8 + $0x18] sm:$0xff]  ;;  %v1378_v57 = vld [vmem:[%s8968_s8 + $0x10] sm:$0xff]  ;;  %v1425_v60 = vld [vmem:[%s8968_s8 + $0x188] sm:$0xff] }
 0x123   : > { %7075 = vmatprep.subr.mxu0 %v1402_v22  ;;  %v1411_v54 = vld [vmem:[%s8968_s8 + $0x118] sm:$0xff]  ;;  %v1410_v58 = vld [vmem:[%s8968_s8 + $0x110] sm:$0xff]  ;;  %v1377_v61 = vld [vmem:[%s8968_s8 + $0x8] sm:$0xff] }
 0x124   : > { %7234 = vmatpush3.xpose.msra.mxu1 %v1419_v21  ;;  %v1409_v62 = vld [vmem:[%s8968_s8 + $0x108] sm:$0xff]  ;;  %v1392_v63 = vld [vmem:[%s8968_s8 + $0x80] sm:$0xff]  ;;  %v1314_v4 = vld [vmem:[%s8966_s4 + $0x10] sm:$0xff] }
 0x125   : > { %7235 = vmatprep.subr.mxu1 %v1434_v23  ;;  %v1424_v0 = vld [vmem:[%s8968_s8 + $0x180] sm:$0xff]  ;;  %v1313_v3 = vld [vmem:[%s8966_s4 + $0x8] sm:$0xff]  ;;  %v1315_v5 = vld [vmem:[%s8966_s4 + $0x18] sm:$0xff] }
 0x126   : > { %7076 = vmatpush3.xpose.msra.mxu0 %v1386_v24  ;;  %v1376_v1 = vld [vmem:[%s8968_s8] sm:$0xff]  ;;  %v1317_v7 = vld [vmem:[%s8966_s4 + $0x28] sm:$0xff]  ;;  %v1318_v8 = vld [vmem:[%s8966_s4 + $0x30] sm:$0xff] }
 0x127   : > { %7077 = vmatprep.subr.mxu0 %v1401_v26  ;;  %v1408_v2 = vld [vmem:[%s8968_s8 + $0x100] sm:$0xff]  ;;  %v1319_v9 = vld [vmem:[%s8966_s4 + $0x38] sm:$0xff]  ;;  %v1321_v11 = vld [vmem:[%s8966_s4 + $0x48] sm:$0xff] }
 0x128   : > { %7236 = vmatpush3.xpose.msra.mxu1 %v1418_v25  ;;  %v1316_v6 = vld [vmem:[%s8966_s4 + $0x20] sm:$0xff]  ;;  %v1322_v12 = vld [vmem:[%s8966_s4 + $0x50] sm:$0xff]  ;;  %v1323_v13 = vld [vmem:[%s8966_s4 + $0x58] sm:$0xff] }
 0x129   : > { %7237 = vmatprep.subr.mxu1 %v1433_v27  ;;  %v1320_v10 = vld [vmem:[%s8966_s4 + $0x40] sm:$0xff]  ;;  %v1325_v15 = vld [vmem:[%s8966_s4 + $0x68] sm:$0xff]  ;;  %v1326_v16 = vld [vmem:[%s8966_s4 + $0x70] sm:$0xff] }
 0x12a   : > { %7078 = vmatpush3.xpose.msra.mxu0 %v1385_v29  ;;  %v1324_v14 = vld [vmem:[%s8966_s4 + $0x60] sm:$0xff]  ;;  %v1327_v17 = vld [vmem:[%s8966_s4 + $0x78] sm:$0xff]  ;;  %v1329_v19 = vld [vmem:[%s8966_s4 + $0x88] sm:$0xff] }
 0x12b   : > { %7079 = vmatprep.subr.mxu0 %v1400_v31  ;;  %v1328_v18 = vld [vmem:[%s8966_s4 + $0x80] sm:$0xff]  ;;  %v1330_v20 = vld [vmem:[%s8966_s4 + $0x90] sm:$0xff]  ;;  %v1331_v21 = vld [vmem:[%s8966_s4 + $0x98] sm:$0xff] }
 0x12c   : > { %7238 = vmatpush3.xpose.msra.mxu1 %v1417_v30  ;;  %v1332_v22 = vld [vmem:[%s8966_s4 + $0xa0] sm:$0xff]  ;;  %v1333_v23 = vld [vmem:[%s8966_s4 + $0xa8] sm:$0xff]  ;;  %v1334_v24 = vld [vmem:[%s8966_s4 + $0xb0] sm:$0xff] }
 0x12d   : > { %7239 = vmatprep.subr.mxu1 %v1432_v32  ;;  %v1335_v25 = vld [vmem:[%s8966_s4 + $0xb8] sm:$0xff]  ;;  %v1336_v26 = vld [vmem:[%s8966_s4 + $0xc0] sm:$0xff]  ;;  %v1337_v27 = vld [vmem:[%s8966_s4 + $0xc8] sm:$0xff] }
 0x12e   : > { %7080 = vmatpush3.xpose.msra.mxu0 %v1384_v33  ;;  %v1339_v29 = vld [vmem:[%s8966_s4 + $0xd8] sm:$0xff]  ;;  %v1340_v30 = vld [vmem:[%s8966_s4 + $0xe0] sm:$0xff]  ;;  %v1341_v31 = vld [vmem:[%s8966_s4 + $0xe8] sm:$0xff] }
 0x12f   : > { %7081 = vmatprep.subr.mxu0 %v1399_v35  ;;  %v1342_v32 = vld [vmem:[%s8966_s4 + $0xf0] sm:$0xff]  ;;  %v1343_v33 = vld [vmem:[%s8966_s4 + $0xf8] sm:$0xff]  ;;  %v1345_v35 = vld [vmem:[%s8966_s4 + $0x108] sm:$0xff] }
 0x130   : > { %7240 = vmatpush3.xpose.msra.mxu1 %v1416_v34  ;;  %v1344_v34 = vld [vmem:[%s8966_s4 + $0x100] sm:$0xff] }
 0x131   : > { %7241 = vmatprep.subr.mxu1 %v1431_v36  ;;  %v1346_v36 = vld [vmem:[%s8966_s4 + $0x110] sm:$0xff] }
 0x132   : > { %7082 = vmatpush3.xpose.msra.mxu0 %v1383_v37  ;;  %v1347_v37 = vld [vmem:[%s8966_s4 + $0x118] sm:$0xff] }
 0x133   : > { %7083 = vmatprep.subr.mxu0 %v1398_v39  ;;  %v1349_v39 = vld [vmem:[%s8966_s4 + $0x128] sm:$0xff] }
 0x134   : > { %7242 = vmatpush3.xpose.msra.mxu1 %v1415_v38  ;;  %v1348_v38 = vld [vmem:[%s8966_s4 + $0x120] sm:$0xff] }
 0x135   : > { %7243 = vmatprep.subr.mxu1 %v1430_v40  ;;  %v1350_v40 = vld [vmem:[%s8966_s4 + $0x130] sm:$0xff] }
 0x136   : > { %7084 = vmatpush3.xpose.msra.mxu0 %v1382_v41  ;;  %v1351_v41 = vld [vmem:[%s8966_s4 + $0x138] sm:$0xff] }
 0x137   : > { %7085 = vmatprep.subr.mxu0 %v1397_v43  ;;  %v1353_v43 = vld [vmem:[%s8966_s4 + $0x148] sm:$0xff] }
 0x138   : > { %7244 = vmatpush3.xpose.msra.mxu1 %v1414_v42  ;;  %v1352_v42 = vld [vmem:[%s8966_s4 + $0x140] sm:$0xff] }
 0x139   : > { %7245 = vmatprep.subr.mxu1 %v1429_v44  ;;  %v1354_v44 = vld [vmem:[%s8966_s4 + $0x150] sm:$0xff] }
 0x13a   : > { %7086 = vmatpush3.xpose.msra.mxu0 %v1381_v45  ;;  %v1355_v45 = vld [vmem:[%s8966_s4 + $0x158] sm:$0xff] }
 0x13b   : > { %7087 = vmatprep.subr.mxu0 %v1396_v47 }
 0x13c   : > { %7246 = vmatpush3.xpose.msra.mxu1 %v1413_v46  ;;  %v1356_v46 = vld [vmem:[%s8966_s4 + $0x160] sm:$0xff] }
 0x13d   : > { %7247 = vmatprep.subr.mxu1 %v1428_v48 }
 0x13e   : > { %7088 = vmatpush3.xpose.msra.mxu0 %v1380_v49 }
 0x13f   : > { %7089 = vmatprep.subr.mxu0 %v1395_v51 }
 0x140   : > { %7248 = vmatpush3.xpose.msra.mxu1 %v1412_v50 }
 0x141   : > { %7249 = vmatprep.subr.mxu1 %v1427_v52 }
 0x142   : > { %7090 = vmatpush3.xpose.msra.mxu0 %v1379_v53 }
 0x143   : > { %7091 = vmatprep.subr.mxu0 %v1394_v55 }
 0x144   : > { %7250 = vmatpush3.xpose.msra.mxu1 %v1411_v54 }
 0x145   : > { %7251 = vmatprep.subr.mxu1 %v1426_v56 }
 0x146   : > { %7092 = vmatpush3.xpose.msra.mxu0 %v1378_v57 }
 0x147   : > { %7093 = vmatprep.subr.mxu0 %v1393_v59 }
 0x148   : > { %7252 = vmatpush3.xpose.msra.mxu1 %v1410_v58 }
 0x149   : > { %7253 = vmatprep.subr.mxu1 %v1425_v60 }
 0x14a   : > { %7094 = vmatpush3.xpose.msra.mxu0 %v1377_v61 }
 0x14b   : > { %7095 = vmatprep.subr.mxu0 %v1392_v63 }
 0x14c   : > { %7254 = vmatpush3.xpose.msra.mxu1 %v1409_v62 }
 0x14d   : > { %7255 = vmatprep.subr.mxu1 %v1424_v0 }
 0x14e   : > { %7096 = vmatpush3.xpose.msra.mxu0 %v1376_v1 }
 0x150   : > { %7256 = vmatpush3.xpose.msra.mxu1 %v1408_v2 }
 0x151   : > { %7098 = vmatmul.mubr.f32.vlgmr.msra.gmra.mxu0 %v9322_v28 }
 0x152   : > { %7099 = vmatprep.mubr.f32.mxu0 %v1313_v3 }
 0x153   : > { %7258 = vmatmul.mubr.f32.vlgmr.msra.gmra.mxu1 %v9322_v28  ;;  %v1338_v28 = vld [vmem:[%s8966_s4 + $0xd0] sm:$0xff] }
 0x154   : > { %7259 = vmatprep.mubr.f32.mxu1 %v1313_v3 }
 0x155   : > { %7100 = vmatmul.mubr.f32.gmra.mxu0 %v1313_v3 }
 0x156   : > { %7101 = vmatprep.mubr.f32.mxu0 %v1314_v4 }
 0x157   : > { %7260 = vmatmul.mubr.f32.gmra.mxu1 %v1313_v3 }
 0x158   : > { %7261 = vmatprep.mubr.f32.mxu1 %v1314_v4 }
 0x159   : > { %7102 = vmatmul.mubr.f32.gmra.mxu0 %v1314_v4 }
 0x15a   : > { %7103 = vmatprep.mubr.f32.mxu0 %v1315_v5 }
 0x15b   : > { %7262 = vmatmul.mubr.f32.gmra.mxu1 %v1314_v4 }
 0x15c   : > { %7263 = vmatprep.mubr.f32.mxu1 %v1315_v5 }
 0x15d   : > { %7104 = vmatmul.mubr.f32.gmra.mxu0 %v1315_v5 }
 0x15e   : > { %7105 = vmatprep.mubr.f32.mxu0 %v1316_v6 }
 0x15f   : > { %7264 = vmatmul.mubr.f32.gmra.mxu1 %v1315_v5 }
 0x160   : > { %7265 = vmatprep.mubr.f32.mxu1 %v1316_v6 }
 0x161   : > { %7106 = vmatmul.mubr.f32.gmra.mxu0 %v1316_v6 }
 0x162   : > { %7107 = vmatprep.mubr.f32.mxu0 %v1317_v7 }
 0x163   : > { %7266 = vmatmul.mubr.f32.gmra.mxu1 %v1316_v6 }
 0x164   : > { %7267 = vmatprep.mubr.f32.mxu1 %v1317_v7 }
 0x165   : > { %7108 = vmatmul.mubr.f32.gmra.mxu0 %v1317_v7 }
 0x166   : > { %7109 = vmatprep.mubr.f32.mxu0 %v1318_v8 }
 0x167   : > { %7268 = vmatmul.mubr.f32.gmra.mxu1 %v1317_v7 }
 0x168   : > { %7269 = vmatprep.mubr.f32.mxu1 %v1318_v8 }
 0x169   : > { %7110 = vmatmul.mubr.f32.gmra.mxu0 %v1318_v8 }
 0x16a   : > { %7111 = vmatprep.mubr.f32.mxu0 %v1319_v9 }
 0x16b   : > { %7270 = vmatmul.mubr.f32.gmra.mxu1 %v1318_v8 }
 0x16c   : > { %7271 = vmatprep.mubr.f32.mxu1 %v1319_v9 }
 0x16d   : > { %7112 = vmatmul.mubr.f32.gmra.mxu0 %v1319_v9 }
 0x16e   : > { %7113 = vmatprep.mubr.f32.mxu0 %v1320_v10 }
 0x16f   : > { %7272 = vmatmul.mubr.f32.gmra.mxu1 %v1319_v9 }
 0x170   : > { %7273 = vmatprep.mubr.f32.mxu1 %v1320_v10 }
 0x171   : > { %7114 = vmatmul.mubr.f32.gmra.mxu0 %v1320_v10 }
 0x172   : > { %7115 = vmatprep.mubr.f32.mxu0 %v1321_v11 }
 0x173   : > { %7274 = vmatmul.mubr.f32.gmra.mxu1 %v1320_v10 }
 0x174   : > { %7275 = vmatprep.mubr.f32.mxu1 %v1321_v11 }
 0x175   : > { %7116 = vmatmul.mubr.f32.gmra.mxu0 %v1321_v11 }
 0x176   : > { %7117 = vmatprep.mubr.f32.mxu0 %v1322_v12 }
 0x177   : > { %7276 = vmatmul.mubr.f32.gmra.mxu1 %v1321_v11 }
 0x178   : > { %7277 = vmatprep.mubr.f32.mxu1 %v1322_v12 }
 0x179   : > { %7118 = vmatmul.mubr.f32.gmra.mxu0 %v1322_v12 }
 0x17a   : > { %7119 = vmatprep.mubr.f32.mxu0 %v1323_v13 }
 0x17b   : > { %7278 = vmatmul.mubr.f32.gmra.mxu1 %v1322_v12 }
 0x17c   : > { %7279 = vmatprep.mubr.f32.mxu1 %v1323_v13 }
 0x17d   : > { %7120 = vmatmul.mubr.f32.gmra.mxu0 %v1323_v13 }
 0x17e   : > { %7121 = vmatprep.mubr.f32.mxu0 %v1324_v14 }
 0x17f   : > { %7280 = vmatmul.mubr.f32.gmra.mxu1 %v1323_v13 }
 0x180   : > { %7281 = vmatprep.mubr.f32.mxu1 %v1324_v14 }
 0x181   : > { %7122 = vmatmul.mubr.f32.gmra.mxu0 %v1324_v14 }
 0x182   : > { %7123 = vmatprep.mubr.f32.mxu0 %v1325_v15 }
 0x183   : > { %7282 = vmatmul.mubr.f32.gmra.mxu1 %v1324_v14 }
 0x184   : > { %7283 = vmatprep.mubr.f32.mxu1 %v1325_v15 }
 0x185   : > { %7124 = vmatmul.mubr.f32.gmra.mxu0 %v1325_v15 }
 0x186   : > { %7125 = vmatprep.mubr.f32.mxu0 %v1326_v16 }
 0x187   : > { %7284 = vmatmul.mubr.f32.gmra.mxu1 %v1325_v15 }
 0x188   : > { %7285 = vmatprep.mubr.f32.mxu1 %v1326_v16 }
 0x189   : > { %7126 = vmatmul.mubr.f32.gmra.mxu0 %v1326_v16 }
 0x18a   : > { %7127 = vmatprep.mubr.f32.mxu0 %v1327_v17 }
 0x18b   : > { %7286 = vmatmul.mubr.f32.gmra.mxu1 %v1326_v16 }
 0x18c   : > { %7287 = vmatprep.mubr.f32.mxu1 %v1327_v17 }
 0x18d   : > { %7128 = vmatmul.mubr.f32.gmra.mxu0 %v1327_v17 }
 0x18e   : > { %7129 = vmatprep.mubr.f32.mxu0 %v1328_v18 }
 0x18f   : > { %7288 = vmatmul.mubr.f32.gmra.mxu1 %v1327_v17 }
 0x190   : > { %7289 = vmatprep.mubr.f32.mxu1 %v1328_v18 }
 0x191   : > { %7130 = vmatmul.mubr.f32.gmra.mxu0 %v1328_v18 }
 0x192   : > { %7131 = vmatprep.mubr.f32.mxu0 %v1329_v19 }
 0x193   : > { %7290 = vmatmul.mubr.f32.gmra.mxu1 %v1328_v18 }
 0x194   : > { %7291 = vmatprep.mubr.f32.mxu1 %v1329_v19 }
 0x195   : > { %7132 = vmatmul.mubr.f32.gmra.mxu0 %v1329_v19 }
 0x196   : > { %7133 = vmatprep.mubr.f32.mxu0 %v1330_v20 }
 0x197   : > { %7292 = vmatmul.mubr.f32.gmra.mxu1 %v1329_v19 }
 0x198   : > { %7293 = vmatprep.mubr.f32.mxu1 %v1330_v20 }
 0x199   : > { %7134 = vmatmul.mubr.f32.gmra.mxu0 %v1330_v20 }
 0x19a   : > { %7135 = vmatprep.mubr.f32.mxu0 %v1331_v21 }
 0x19b   : > { %7294 = vmatmul.mubr.f32.gmra.mxu1 %v1330_v20 }
 0x19c   : > { %7295 = vmatprep.mubr.f32.mxu1 %v1331_v21 }
 0x19d   : > { %7136 = vmatmul.mubr.f32.gmra.mxu0 %v1331_v21 }
 0x19e   : > { %7137 = vmatprep.mubr.f32.mxu0 %v1332_v22 }
 0x19f   : > { %7296 = vmatmul.mubr.f32.gmra.mxu1 %v1331_v21 }
 0x1a0   : > { %7297 = vmatprep.mubr.f32.mxu1 %v1332_v22 }
 0x1a1   : > { %7138 = vmatmul.mubr.f32.gmra.mxu0 %v1332_v22 }
 0x1a2   : > { %7139 = vmatprep.mubr.f32.mxu0 %v1333_v23 }
 0x1a3   : > { %7298 = vmatmul.mubr.f32.gmra.mxu1 %v1332_v22 }
 0x1a4   : > { %7299 = vmatprep.mubr.f32.mxu1 %v1333_v23 }
 0x1a5   : > { %7140 = vmatmul.mubr.f32.gmra.mxu0 %v1333_v23 }
 0x1a6   : > { %7141 = vmatprep.mubr.f32.mxu0 %v1334_v24 }
 0x1a7   : > { %7300 = vmatmul.mubr.f32.gmra.mxu1 %v1333_v23 }
 0x1a8   : > { %7301 = vmatprep.mubr.f32.mxu1 %v1334_v24 }
 0x1a9   : > { %7142 = vmatmul.mubr.f32.gmra.mxu0 %v1334_v24 }
 0x1aa   : > { %7143 = vmatprep.mubr.f32.mxu0 %v1335_v25 }
 0x1ab   : > { %7302 = vmatmul.mubr.f32.gmra.mxu1 %v1334_v24 }
 0x1ac   : > { %7303 = vmatprep.mubr.f32.mxu1 %v1335_v25 }
 0x1ad   : > { %7144 = vmatmul.mubr.f32.gmra.mxu0 %v1335_v25 }
 0x1ae   : > { %7145 = vmatprep.mubr.f32.mxu0 %v1336_v26 }
 0x1af   : > { %7304 = vmatmul.mubr.f32.gmra.mxu1 %v1335_v25 }
 0x1b0   : > { %7305 = vmatprep.mubr.f32.mxu1 %v1336_v26 }
 0x1b1   : > { %7146 = vmatmul.mubr.f32.gmra.mxu0 %v1336_v26 }
 0x1b2   : > { %7147 = vmatprep.mubr.f32.mxu0 %v1337_v27 }
 0x1b3   : > { %7306 = vmatmul.mubr.f32.gmra.mxu1 %v1336_v26 }
 0x1b4   : > { %7307 = vmatprep.mubr.f32.mxu1 %v1337_v27 }
 0x1b5   : > { %7148 = vmatmul.mubr.f32.gmra.mxu0 %v1337_v27 }
 0x1b6   : > { %7149 = vmatprep.mubr.f32.mxu0 %v1338_v28 }
 0x1b7   : > { %7308 = vmatmul.mubr.f32.gmra.mxu1 %v1337_v27 }
 0x1b8   : > { %7309 = vmatprep.mubr.f32.mxu1 %v1338_v28 }
 0x1b9   : > { %7150 = vmatmul.mubr.f32.gmra.mxu0 %v1338_v28 }
 0x1ba   : > { %7151 = vmatprep.mubr.f32.mxu0 %v1339_v29 }
 0x1bb   : > { %7310 = vmatmul.mubr.f32.gmra.mxu1 %v1338_v28 }
 0x1bc   : > { %7311 = vmatprep.mubr.f32.mxu1 %v1339_v29 }
 0x1bd   : > { %7152 = vmatmul.mubr.f32.gmra.mxu0 %v1339_v29 }
 0x1be   : > { %7153 = vmatprep.mubr.f32.mxu0 %v1340_v30 }
 0x1bf   : > { %7312 = vmatmul.mubr.f32.gmra.mxu1 %v1339_v29 }
 0x1c0   : > { %7313 = vmatprep.mubr.f32.mxu1 %v1340_v30 }
 0x1c1   : > { %7154 = vmatmul.mubr.f32.gmra.mxu0 %v1340_v30 }
 0x1c2   : > { %7155 = vmatprep.mubr.f32.mxu0 %v1341_v31 }
 0x1c3   : > { %7314 = vmatmul.mubr.f32.gmra.mxu1 %v1340_v30 }
 0x1c4   : > { %7315 = vmatprep.mubr.f32.mxu1 %v1341_v31 }
 0x1c5   : > { %7156 = vmatmul.mubr.f32.gmra.mxu0 %v1341_v31 }
 0x1c6   : > { %7157 = vmatprep.mubr.f32.mxu0 %v1342_v32 }
 0x1c7   : > { %7316 = vmatmul.mubr.f32.gmra.mxu1 %v1341_v31 }
 0x1c8   : > { %7317 = vmatprep.mubr.f32.mxu1 %v1342_v32 }
 0x1c9   : > { %7158 = vmatmul.mubr.f32.gmra.mxu0 %v1342_v32 }
 0x1ca   : > { %7159 = vmatprep.mubr.f32.mxu0 %v1343_v33 }
 0x1cb   : > { %7318 = vmatmul.mubr.f32.gmra.mxu1 %v1342_v32 }
 0x1cc   : > { %7319 = vmatprep.mubr.f32.mxu1 %v1343_v33 }
 0x1cd   : > { %7160 = vmatmul.mubr.f32.gmra.mxu0 %v1343_v33 }
 0x1ce   : > { %7161 = vmatprep.mubr.f32.mxu0 %v1344_v34 }
 0x1cf   : > { %7320 = vmatmul.mubr.f32.gmra.mxu1 %v1343_v33 }
 0x1d0   : > { %7321 = vmatprep.mubr.f32.mxu1 %v1344_v34 }
 0x1d1   : > { %7162 = vmatmul.mubr.f32.gmra.mxu0 %v1344_v34 }
 0x1d2   : > { %7163 = vmatprep.mubr.f32.mxu0 %v1345_v35 }
 0x1d3   : > { %7322 = vmatmul.mubr.f32.gmra.mxu1 %v1344_v34 }
 0x1d4   : > { %7323 = vmatprep.mubr.f32.mxu1 %v1345_v35 }
 0x1d5   : > { %7164 = vmatmul.mubr.f32.gmra.mxu0 %v1345_v35 }
 0x1d6   : > { %7165 = vmatprep.mubr.f32.mxu0 %v1346_v36 }
 0x1d7   : > { %7324 = vmatmul.mubr.f32.gmra.mxu1 %v1345_v35 }
 0x1d8   : > { %7325 = vmatprep.mubr.f32.mxu1 %v1346_v36 }
 0x1d9   : > { %7166 = vmatmul.mubr.f32.gmra.mxu0 %v1346_v36 }
 0x1da   : > { %7167 = vmatprep.mubr.f32.mxu0 %v1347_v37 }
 0x1db   : > { %7326 = vmatmul.mubr.f32.gmra.mxu1 %v1346_v36 }
 0x1dc   : > { %7327 = vmatprep.mubr.f32.mxu1 %v1347_v37 }
 0x1dd   : > { %7168 = vmatmul.mubr.f32.gmra.mxu0 %v1347_v37 }
 0x1de   : > { %7169 = vmatprep.mubr.f32.mxu0 %v1348_v38 }
 0x1df   : > { %7328 = vmatmul.mubr.f32.gmra.mxu1 %v1347_v37 }
 0x1e0   : > { %7329 = vmatprep.mubr.f32.mxu1 %v1348_v38 }
 0x1e1   : > { %7170 = vmatmul.mubr.f32.gmra.mxu0 %v1348_v38 }
 0x1e2   : > { %7171 = vmatprep.mubr.f32.mxu0 %v1349_v39 }
 0x1e3   : > { %7330 = vmatmul.mubr.f32.gmra.mxu1 %v1348_v38 }
 0x1e4   : > { %7331 = vmatprep.mubr.f32.mxu1 %v1349_v39 }
 0x1e5   : > { %7172 = vmatmul.mubr.f32.gmra.mxu0 %v1349_v39 }
 0x1e6   : > { %7173 = vmatprep.mubr.f32.mxu0 %v1350_v40 }
 0x1e7   : > { %7332 = vmatmul.mubr.f32.gmra.mxu1 %v1349_v39 }
 0x1e8   : > { %7333 = vmatprep.mubr.f32.mxu1 %v1350_v40 }
 0x1e9   : > { %7174 = vmatmul.mubr.f32.gmra.mxu0 %v1350_v40 }
 0x1ea   : > { %7175 = vmatprep.mubr.f32.mxu0 %v1351_v41 }
 0x1eb   : > { %7334 = vmatmul.mubr.f32.gmra.mxu1 %v1350_v40 }
 0x1ec   : > { %7335 = vmatprep.mubr.f32.mxu1 %v1351_v41 }
 0x1ed   : > { %7176 = vmatmul.mubr.f32.gmra.mxu0 %v1351_v41 }
 0x1ee   : > { %7177 = vmatprep.mubr.f32.mxu0 %v1352_v42 }
 0x1ef   : > { %7336 = vmatmul.mubr.f32.gmra.mxu1 %v1351_v41 }
 0x1f0   : > { %7337 = vmatprep.mubr.f32.mxu1 %v1352_v42 }
 0x1f1   : > { %7178 = vmatmul.mubr.f32.gmra.mxu0 %v1352_v42 }
 0x1f2   : > { %7179 = vmatprep.mubr.f32.mxu0 %v1353_v43 }
 0x1f3   : > { %7338 = vmatmul.mubr.f32.gmra.mxu1 %v1352_v42  ;;  %v1357_v42 = vld [vmem:[%s8966_s4 + $0x168] sm:$0xff] }
 0x1f4   : > { %7339 = vmatprep.mubr.f32.mxu1 %v1353_v43 }
 0x1f5   : > { %7180 = vmatmul.mubr.f32.gmra.mxu0 %v1353_v43 }
 0x1f6   : > { %7181 = vmatprep.mubr.f32.mxu0 %v1354_v44 }
 0x1f7   : > { %7340 = vmatmul.mubr.f32.gmra.mxu1 %v1353_v43 }
 0x1f8   : > { %7341 = vmatprep.mubr.f32.mxu1 %v1354_v44 }
 0x1f9   : > { %7182 = vmatmul.mubr.f32.gmra.mxu0 %v1354_v44 }
 0x1fa   : > { %7183 = vmatprep.mubr.f32.mxu0 %v1355_v45 }
 0x1fb   : > { %7342 = vmatmul.mubr.f32.gmra.mxu1 %v1354_v44 }
 0x1fc   : > { %7343 = vmatprep.mubr.f32.mxu1 %v1355_v45 }
 0x1fd   : > { %7184 = vmatmul.mubr.f32.gmra.mxu0 %v1355_v45 }
 0x1fe   : > { %7185 = vmatprep.mubr.f32.mxu0 %v1356_v46 }
 0x1ff   : > { %7344 = vmatmul.mubr.f32.gmra.mxu1 %v1355_v45 }
 0x200   : > { %7345 = vmatprep.mubr.f32.mxu1 %v1356_v46 }
 0x201   : > { %7186 = vmatmul.mubr.f32.gmra.mxu0 %v1356_v46 }
 0x202   : > { %7187 = vmatprep.mubr.f32.mxu0 %v1357_v42 }
 0x203   : > { %7346 = vmatmul.mubr.f32.gmra.mxu1 %v1356_v46 }
 0x204   : > { %7347 = vmatprep.mubr.f32.mxu1 %v1357_v42 }
 0x205   : > { %7188 = vmatmul.mubr.f32.gmra.mxu0 %v1357_v42 }
 0x207   : > { %7348 = vmatmul.mubr.f32.gmra.mxu1 %v1357_v42 }
 0x211   : > { %v9410_v47 = vpop.f32.mrf.mxu0 }
 0x213   : > { %v9412_v48 = vpop.f32.mrf.mxu1  ;;  %v9414_v49 = vpop.f32.mrf.mxu0 }
 0x214   : > { %v2466_v51 = vmax.f32 %v9410_v47, %v9414_v49 }
 0x215   : > { %v9416_v50 = vpop.f32.mrf.mxu1  ;;  %v9420_v52 = vpop.f32.mrf.mxu0 }
 0x216   : > { %v2467_v54 = vmax.f32 %v2466_v51, %v9412_v48 }
 0x217   : > { %v9422_v53 = vpop.f32.mrf.mxu1  ;;  %v9425_v55 = vpop.f32.mrf.mxu0 }
 0x218   : > { %v2471_v57 = vmax.f32 %v9420_v52, %v9425_v55  ;;  %v2468_v58 = vmax.f32 %v2467_v54, %v9416_v50  ;;  %v8397_v54 = vmov 0  }
 0x219   : > { %v9427_v56 = vpop.f32.mrf.mxu1  ;;  %v9432_v59 = vpop.f32.mrf.mxu0  ;;  %7497 = vset.pattern.permute.xlu0 %v8397_v54  ;;  %7498 = vset.pattern.permute.xlu1 %v8397_v54 }
 0x21a   : > { %v2472_v61 = vmax.f32 %v2471_v57, %v9422_v53  ;;  %2469 = vmax.xlane.f32.xlu0 %v2468_v58 }
 0x21b   : > { %v9434_v60 = vpop.f32.mrf.mxu1  ;;  %v9437_v62 = vpop.f32.mrf.mxu0 }
 0x21c   : > { %v2476_v0 = vmax.f32 %v9432_v59, %v9437_v62  ;;  %v2473_v1 = vmax.f32 %v2472_v61, %v9427_v56  ;;  %v1358_v61 = vld [vmem:[%s8966_s4 + $0x170] sm:$0xff] }
 0x21d   : > { %v9439_v63 = vpop.f32.mrf.mxu1  ;;  %v9444_v2 = vpop.f32.mrf.mxu0  ;;  %7189 = vmatprep.mubr.f32.mxu0 %v1358_v61  ;;  %7349 = vmatprep.mubr.f32.mxu1 %v1358_v61 }
 0x21e   : > { %v2477_v4 = vmax.f32 %v2476_v0, %v9434_v60  ;;  %2474 = vmax.xlane.f32.xlu0 %v2473_v1  ;;  %7190 = vmatmul.mubr.f32.gmra.mxu0 %v1358_v61 }
 0x21f   : > { %v9446_v3 = vpop.f32.mrf.mxu1  ;;  %v9449_v5 = vpop.f32.mrf.mxu0  ;;  %7350 = vmatmul.mubr.f32.gmra.mxu1 %v1358_v61 }
 0x220   : > { %v2481_v7 = vmax.f32 %v9444_v2, %v9449_v5  ;;  %v2478_v8 = vmax.f32 %v2477_v4, %v9439_v63 }
 0x221   : > { %v9451_v6 = vpop.f32.mrf.mxu1  ;;  %v9456_v9 = vpop.f32.mrf.mxu0 }
 0x222   : > { %v2482_v11 = vmax.f32 %v2481_v7, %v9446_v3  ;;  %2479 = vmax.xlane.f32.xlu1 %v2478_v8 }
 0x223   : > { %v9458_v10 = vpop.f32.mrf.mxu1  ;;  %v9461_v12 = vpop.f32.mrf.mxu0 }
 0x224   : > { %v2486_v14 = vmax.f32 %v9456_v9, %v9461_v12  ;;  %v2483_v15 = vmax.f32 %v2482_v11, %v9451_v6 }
 0x225   : > { %v9463_v13 = vpop.f32.mrf.mxu1  ;;  %v9468_v16 = vpop.f32.mrf.mxu0 }
 0x226   : > { %v2487_v18 = vmax.f32 %v2486_v14, %v9458_v10  ;;  %2484 = vmax.xlane.f32.xlu1 %v2483_v15 }
 0x227   : > { %v9470_v17 = vpop.f32.mrf.mxu1  ;;  %v9473_v19 = vpop.f32.mrf.mxu0 }
 0x228   : > { %v2491_v21 = vmax.f32 %v9468_v16, %v9473_v19  ;;  %v2488_v22 = vmax.f32 %v2487_v18, %v9463_v13 }
 0x229   : > { %v9475_v20 = vpop.f32.mrf.mxu1  ;;  %v9480_v23 = vpop.f32.mrf.mxu0 }
 0x22a   : > { %13043 = vst [vmem:[#allocation15_spill] sm:$0xff] %v9480_v23  ;;  %v2492_v25 = vmax.f32 %v2491_v21, %v9470_v17  ;;  %2489 = vmax.xlane.f32.xlu0 %v2488_v22 }
 0x22b   : > { %v9482_v24 = vpop.f32.mrf.mxu1  ;;  %v9485_v26 = vpop.f32.mrf.mxu0 }
 0x22c   : > { %13044 = vst [vmem:[#allocation16_spill] sm:$0xff] %v9482_v24  ;;  %13045 = vst [vmem:[#allocation17_spill] sm:$0xff] %v9485_v26  ;;  %v2496_v28 = vmax.f32 %v9480_v23, %v9485_v26  ;;  %v2493_v29 = vmax.f32 %v2492_v25, %v9475_v20  ;;  %v10052_v23 = vld [vmem:[#allocation2 + $0x58] sm:$0xff] }
 0x22d   : > { %v9487_v27 = vpop.f32.mrf.mxu1  ;;  %v9492_v30 = vpop.f32.mrf.mxu0  ;;  %13178 = vst [vmem:[#allocation149_spill] sm:$0xff] %v10052_v23 }
 0x22e   : > { %13046 = vst [vmem:[#allocation18_spill] sm:$0xff] %v9487_v27  ;;  %13047 = vst [vmem:[#allocation19_spill] sm:$0xff] %v9492_v30  ;;  %v2497_v32 = vmax.f32 %v2496_v28, %v9482_v24  ;;  %2494 = vmax.xlane.f32.xlu1 %v2493_v29  ;;  %v1497_v24 = vld [vmem:[%s8970_s11 + $0x1c8] sm:$0xff] }
 0x22f   : > { %v9494_v31 = vpop.f32.mrf.mxu1  ;;  %v9497_v33 = vpop.f32.mrf.mxu0 }
 0x230   : > { %13048 = vst [vmem:[#allocation20_spill] sm:$0xff] %v9494_v31  ;;  %13049 = vst [vmem:[#allocation21_spill] sm:$0xff] %v9497_v33  ;;  %v2501_v35 = vmax.f32 %v9492_v30, %v9497_v33  ;;  %v2498_v36 = vmax.f32 %v2497_v32, %v9487_v27  ;;  %v10033_v33 = vld [vmem:[#allocation2 + $0x50] sm:$0xff] }
 0x231   : > { %v9499_v34 = vpop.f32.mrf.mxu1  ;;  %v9504_v37 = vpop.f32.mrf.mxu0  ;;  %13174 = vst [vmem:[#allocation145_spill] sm:$0xff] %v10033_v33 }
 0x232   : > { %13050 = vst [vmem:[#allocation22_spill] sm:$0xff] %v9499_v34  ;;  %13051 = vst [vmem:[#allocation23_spill] sm:$0xff] %v9504_v37  ;;  %v2502_v39 = vmax.f32 %v2501_v35, %v9494_v31  ;;  %2499 = vmax.xlane.f32.xlu0 %v2498_v36 }
 0x233   : > { %v9506_v38 = vpop.f32.mrf.mxu1  ;;  %v9509_v40 = vpop.f32.mrf.mxu0 }
 0x234   : > { %13052 = vst [vmem:[#allocation24_spill] sm:$0xff] %v9506_v38  ;;  %13053 = vst [vmem:[#allocation25_spill] sm:$0xff] %v9509_v40  ;;  %v2506_v43 = vmax.f32 %v9504_v37, %v9509_v40  ;;  %v2503_v44 = vmax.f32 %v2502_v39, %v9499_v34 }
 0x235   : > { %v9511_v41 = vpop.f32.mrf.mxu1  ;;  %v9517_v45 = vpop.f32.mrf.mxu0 }
 0x236   : > { %13054 = vst [vmem:[#allocation26_spill] sm:$0xff] %v9511_v41  ;;  %13055 = vst [vmem:[#allocation27_spill] sm:$0xff] %v9517_v45  ;;  %v2507_v51 = vmax.f32 %v2506_v43, %v9506_v38  ;;  %2504 = vmax.xlane.f32.xlu1 %v2503_v44 }
 0x237   : > { %v9519_v46 = vpop.f32.mrf.mxu1  ;;  %v9522_v57 = vpop.f32.mrf.mxu0 }
 0x238   : > { %13056 = vst [vmem:[#allocation28_spill] sm:$0xff] %v9519_v46  ;;  %13057 = vst [vmem:[#allocation29_spill] sm:$0xff] %v9522_v57  ;;  %v2511_v0 = vmax.f32 %v9517_v45, %v9522_v57  ;;  %v2508_v1 = vmax.f32 %v2507_v51, %v9511_v41  ;;  %v1501_v41 = vld [vmem:[%s8970_s11 + $0x1e8] sm:$0xff] }
 0x239   : > { %v9524_v58 = vpop.f32.mrf.mxu1  ;;  %v9530_v4 = vpop.f32.mrf.mxu0  ;;  %v10017_v57 = vld [vmem:[#allocation2 + $0x48] sm:$0xff] }
 0x23a   : > { %13058 = vst [vmem:[#allocation30_spill] sm:$0xff] %v9524_v58  ;;  %13059 = vst [vmem:[#allocation31_spill] sm:$0xff] %v9530_v4  ;;  %v2512_v8 = vmax.f32 %v2511_v0, %v9519_v46  ;;  %2509 = vmax.xlane.f32.xlu0 %v2508_v1  ;;  %v9982_v46 = vld [vmem:[#allocation2 + $0x38] sm:$0xff] }
 0x23b   : > { %v9532_v7 = vpop.f32.mrf.mxu1  ;;  %v9535_v11 = vpop.f32.mrf.mxu0 }
 0x23c   : > { %13060 = vst [vmem:[#allocation32_spill] sm:$0xff] %v9532_v7  ;;  %13061 = vst [vmem:[#allocation33_spill] sm:$0xff] %v9535_v11  ;;  %v2516_v15 = vmax.f32 %v9530_v4, %v9535_v11  ;;  %v2513_v18 = vmax.f32 %v2512_v8, %v9524_v58  ;;  %v9999_v58 = vld [vmem:[#allocation2 + $0x40] sm:$0xff] }
 0x23d   : > { %v9537_v14 = vpop.f32.mrf.mxu1  ;;  %v9542_v21 = vpop.f32.mrf.mxu0  ;;  %13169 = vst [vmem:[#allocation140_spill] sm:$0xff] %v9999_v58 }
 0x23e   : > { %13062 = vst [vmem:[#allocation34_spill] sm:$0xff] %v9537_v14  ;;  %13063 = vst [vmem:[#allocation35_spill] sm:$0xff] %v9542_v21  ;;  %v2517_v25 = vmax.f32 %v2516_v15, %v9532_v7  ;;  %2514 = vmax.xlane.f32.xlu1 %v2513_v18 }
 0x23f   : > { %v9544_v22 = vpop.f32.mrf.mxu1  ;;  %v9547_v28 = vpop.f32.mrf.mxu0 }
 0x240   : > { %13064 = vst [vmem:[#allocation36_spill] sm:$0xff] %v9544_v22  ;;  %13065 = vst [vmem:[#allocation37_spill] sm:$0xff] %v9547_v28  ;;  %v2521_v32 = vmax.f32 %v9542_v21, %v9547_v28  ;;  %v2518_v35 = vmax.f32 %v2517_v25, %v9537_v14  ;;  %v9950_v14 = vld [vmem:[#allocation2 + $0x28] sm:$0xff] }
 0x241   : > { %v9549_v29 = vpop.f32.mrf.mxu1  ;;  %v9554_v36 = vpop.f32.mrf.mxu0  ;;  %v1369_v28 = vld [vmem:[%s8966_s4 + $0x1c8] sm:$0xff] }
 0x242   : > { %13066 = vst [vmem:[#allocation38_spill] sm:$0xff] %v9549_v29  ;;  %13067 = vst [vmem:[#allocation39_spill] sm:$0xff] %v9554_v36  ;;  %v2522_v42 = vmax.f32 %v2521_v32, %v9544_v22  ;;  %2519 = vmax.xlane.f32.xlu0 %v2518_v35 }
 0x243   : > { %v9556_v39 = vpop.f32.mrf.mxu1  ;;  %v9559_v43 = vpop.f32.mrf.mxu0 }
 0x244   : > { %13068 = vst [vmem:[#allocation40_spill] sm:$0xff] %v9556_v39  ;;  %13069 = vst [vmem:[#allocation41_spill] sm:$0xff] %v9559_v43  ;;  %v2526_v51 = vmax.f32 %v9554_v36, %v9559_v43  ;;  %v2523_v54 = vmax.f32 %v2522_v42, %v9549_v29 }
 0x245   : > { %v9561_v44 = vpop.f32.mrf.mxu1  ;;  %v9566_v61 = vpop.f32.mrf.mxu0 }
 0x246   : > { %13070 = vst [vmem:[#allocation42_spill] sm:$0xff] %v9561_v44  ;;  %13071 = vst [vmem:[#allocation43_spill] sm:$0xff] %v9566_v61  ;;  %v2527_v1 = vmax.f32 %v2526_v51, %v9556_v39  ;;  %2524 = vmax.xlane.f32.xlu1 %v2523_v54 }
 0x247   : > { %v9568_v0 = vpop.f32.mrf.mxu1  ;;  %v9571_v8 = vpop.f32.mrf.mxu0 }
 0x248   : > { %13072 = vst [vmem:[#allocation44_spill] sm:$0xff] %v9568_v0  ;;  %13073 = vst [vmem:[#allocation45_spill] sm:$0xff] %v9571_v8  ;;  %v2531_v18 = vmax.f32 %v9566_v61, %v9571_v8  ;;  %v2528_v25 = vmax.f32 %v2527_v1, %v9561_v44 }
 0x249   : > { %v9573_v15 = vpop.f32.mrf.mxu1  ;;  %v9578_v32 = vpop.f32.mrf.mxu0 }
 0x24a   : > { %13074 = vst [vmem:[#allocation46_spill] sm:$0xff] %v9573_v15  ;;  %13075 = vst [vmem:[#allocation47_spill] sm:$0xff] %v9578_v32  ;;  %v2532_v42 = vmax.f32 %v2531_v18, %v9568_v0  ;;  %2529 = vmax.xlane.f32.xlu0 %v2528_v25 }
 0x24b   : > { %v9580_v35 = vpop.f32.mrf.mxu1  ;;  %v9583_v43 = vpop.f32.mrf.mxu0 }
 0x24c   : > { %13076 = vst [vmem:[#allocation48_spill] sm:$0xff] %v9580_v35  ;;  %13077 = vst [vmem:[#allocation49_spill] sm:$0xff] %v9583_v43  ;;  %v2536_v54 = vmax.f32 %v9578_v32, %v9583_v43  ;;  %v2533_v39 = vmax.f32 %v2532_v42, %v9573_v15 }
 0x24d   : > { %v9585_v51 = vpop.f32.mrf.mxu1  ;;  %v9590_v36 = vpop.f32.mrf.mxu0 }
 0x24e   : > { %13078 = vst [vmem:[#allocation50_spill] sm:$0xff] %v9585_v51  ;;  %13079 = vst [vmem:[#allocation51_spill] sm:$0xff] %v9590_v36  ;;  %v2537_v1 = vmax.f32 %v2536_v54, %v9580_v35  ;;  %2534 = vmax.xlane.f32.xlu1 %v2533_v39 }
 0x24f   : > { %v9592_v61 = vpop.f32.mrf.mxu1  ;;  %v9595_v44 = vpop.f32.mrf.mxu0 }
 0x250   : > { %13080 = vst [vmem:[#allocation52_spill] sm:$0xff] %v9592_v61  ;;  %13081 = vst [vmem:[#allocation53_spill] sm:$0xff] %v9595_v44  ;;  %v2541_v25 = vmax.f32 %v9590_v36, %v9595_v44  ;;  %v2538_v0 = vmax.f32 %v2537_v1, %v9585_v51 }
 0x251   : > { %v9597_v18 = vpop.f32.mrf.mxu1  ;;  %v9602_v8 = vpop.f32.mrf.mxu0 }
 0x252   : > { %13082 = vst [vmem:[#allocation54_spill] sm:$0xff] %v9597_v18  ;;  %13083 = vst [vmem:[#allocation55_spill] sm:$0xff] %v9602_v8  ;;  %v2542_v42 = vmax.f32 %v2541_v25, %v9592_v61  ;;  %2539 = vmax.xlane.f32.xlu0 %v2538_v0 }
 0x253   : > { %v9604_v43 = vpop.f32.mrf.mxu1  ;;  %v9607_v32 = vpop.f32.mrf.mxu0 }
 0x254   : > { %13084 = vst [vmem:[#allocation56_spill] sm:$0xff] %v9604_v43  ;;  %13085 = vst [vmem:[#allocation57_spill] sm:$0xff] %v9607_v32  ;;  %v2546_v39 = vmax.f32 %v9602_v8, %v9607_v32  ;;  %v2543_v35 = vmax.f32 %v2542_v42, %v9597_v18 }
 0x255   : > { %v9609_v54 = vpop.f32.mrf.mxu1  ;;  %v9614_v15 = vpop.f32.mrf.mxu0 }
 0x256   : > { %13086 = vst [vmem:[#allocation58_spill] sm:$0xff] %v9609_v54  ;;  %13087 = vst [vmem:[#allocation59_spill] sm:$0xff] %v9614_v15  ;;  %v2547_v1 = vmax.f32 %v2546_v39, %v9604_v43  ;;  %2544 = vmax.xlane.f32.xlu1 %v2543_v35 }
 0x257   : > { %v9616_v36 = vpop.f32.mrf.mxu1  ;;  %v9619_v51 = vpop.f32.mrf.mxu0 }
 0x258   : > { %13088 = vst [vmem:[#allocation60_spill] sm:$0xff] %v9616_v36  ;;  %13089 = vst [vmem:[#allocation61_spill] sm:$0xff] %v9619_v51  ;;  %v2551_v0 = vmax.f32 %v9614_v15, %v9619_v51  ;;  %v2548_v61 = vmax.f32 %v2547_v1, %v9609_v54 }
 0x259   : > { %v9621_v25 = vpop.f32.mrf.mxu1  ;;  %v9626_v44 = vpop.f32.mrf.mxu0 }
 0x25a   : > { %13090 = vst [vmem:[#allocation62_spill] sm:$0xff] %v9621_v25  ;;  %13091 = vst [vmem:[#allocation63_spill] sm:$0xff] %v9626_v44  ;;  %v2552_v42 = vmax.f32 %v2551_v0, %v9616_v36  ;;  %2549 = vmax.xlane.f32.xlu0 %v2548_v61 }
 0x25b   : > { %v9628_v32 = vpop.f32.mrf.mxu1  ;;  %v9631_v8 = vpop.f32.mrf.mxu0 }
 0x25c   : > { %13092 = vst [vmem:[#allocation64_spill] sm:$0xff] %v9628_v32  ;;  %13093 = vst [vmem:[#allocation65_spill] sm:$0xff] %v9631_v8  ;;  %v2556_v35 = vmax.f32 %v9626_v44, %v9631_v8  ;;  %v2553_v43 = vmax.f32 %v2552_v42, %v9621_v25 }
 0x25d   : > { %v9633_v39 = vpop.f32.mrf.mxu1  ;;  %v9638_v18 = vpop.f32.mrf.mxu0 }
 0x25e   : > { %13094 = vst [vmem:[#allocation66_spill] sm:$0xff] %v9633_v39  ;;  %13095 = vst [vmem:[#allocation67_spill] sm:$0xff] %v9638_v18  ;;  %v2557_v1 = vmax.f32 %v2556_v35, %v9628_v32  ;;  %2554 = vmax.xlane.f32.xlu1 %v2553_v43 }
 0x25f   : > { %v9640_v15 = vpop.f32.mrf.mxu1  ;;  %v9643_v54 = vpop.f32.mrf.mxu0 }
 0x260   : > { %13096 = vst [vmem:[#allocation68_spill] sm:$0xff] %v9640_v15  ;;  %13097 = vst [vmem:[#allocation69_spill] sm:$0xff] %v9643_v54  ;;  %v2561_v61 = vmax.f32 %v9638_v18, %v9643_v54  ;;  %v2558_v36 = vmax.f32 %v2557_v1, %v9633_v39 }
 0x261   : > { %v9645_v0 = vpop.f32.mrf.mxu1  ;;  %v9650_v51 = vpop.f32.mrf.mxu0 }
 0x262   : > { %13098 = vst [vmem:[#allocation70_spill] sm:$0xff] %v9645_v0  ;;  %13099 = vst [vmem:[#allocation71_spill] sm:$0xff] %v9650_v51  ;;  %v2562_v42 = vmax.f32 %v2561_v61, %v9640_v15  ;;  %2559 = vmax.xlane.f32.xlu0 %v2558_v36 }
 0x263   : > { %v9652_v8 = vpop.f32.mrf.mxu1  ;;  %v9655_v44 = vpop.f32.mrf.mxu0 }
 0x264   : > { %13100 = vst [vmem:[#allocation72_spill] sm:$0xff] %v9652_v8  ;;  %13101 = vst [vmem:[#allocation73_spill] sm:$0xff] %v9655_v44  ;;  %v2566_v43 = vmax.f32 %v9650_v51, %v9655_v44  ;;  %v2563_v32 = vmax.f32 %v2562_v42, %v9645_v0 }
 0x265   : > { %v9657_v35 = vpop.f32.mrf.mxu1  ;;  %v9662_v25 = vpop.f32.mrf.mxu0 }
 0x266   : > { %13102 = vst [vmem:[#allocation74_spill] sm:$0xff] %v9657_v35  ;;  %13103 = vst [vmem:[#allocation75_spill] sm:$0xff] %v9662_v25  ;;  %v2567_v18 = vmax.f32 %v2566_v43, %v9652_v8  ;;  %2564 = vmax.xlane.f32.xlu1 %v2563_v32 }
 0x267   : > { %v9664_v1 = vpop.f32.mrf.mxu1  ;;  %v9667_v39 = vpop.f32.mrf.mxu0 }
 0x268   : > { %13104 = vst [vmem:[#allocation76_spill] sm:$0xff] %v9664_v1  ;;  %13105 = vst [vmem:[#allocation77_spill] sm:$0xff] %v9667_v39  ;;  %v2571_v61 = vmax.f32 %v9662_v25, %v9667_v39  ;;  %v2568_v15 = vmax.f32 %v2567_v18, %v9657_v35  ;;  %v1359_v25 = vld [vmem:[%s8966_s4 + $0x178] sm:$0xff] }
 0x269   : > { %v9669_v36 = vpop.f32.mrf.mxu1  ;;  %v9674_v44 = vpop.f32.mrf.mxu0  ;;  %7191 = vmatprep.mubr.f32.mxu0 %v1359_v25  ;;  %7351 = vmatprep.mubr.f32.mxu1 %v1359_v25 }
 0x26a   : > { %13106 = vst [vmem:[#allocation78_spill] sm:$0xff] %v9669_v36  ;;  %13107 = vst [vmem:[#allocation79_spill] sm:$0xff] %v9674_v44  ;;  %v2572_v51 = vmax.f32 %v2571_v61, %v9664_v1  ;;  %2569 = vmax.xlane.f32.xlu0 %v2568_v15  ;;  %7192 = vmatmul.mubr.f32.gmra.mxu0 %v1359_v25 }
 0x26b   : > { %v9676_v42 = vpop.f32.mrf.mxu1  ;;  %v9679_v0 = vpop.f32.mrf.mxu0  ;;  %7352 = vmatmul.mubr.f32.gmra.mxu1 %v1359_v25 }
 0x26c   : > { %13108 = vst [vmem:[#allocation80_spill] sm:$0xff] %v9676_v42  ;;  %13109 = vst [vmem:[#allocation81_spill] sm:$0xff] %v9679_v0  ;;  %v2576_v32 = vmax.f32 %v9674_v44, %v9679_v0  ;;  %v2573_v8 = vmax.f32 %v2572_v51, %v9669_v36  ;;  %v1360_v44 = vld [vmem:[%s8966_s4 + $0x180] sm:$0xff] }
 0x26d   : > { %v9681_v43 = vpop.f32.mrf.mxu1  ;;  %v9687_v39 = vpop.f32.mrf.mxu0  ;;  %7193 = vmatprep.mubr.f32.mxu0 %v1360_v44  ;;  %7353 = vmatprep.mubr.f32.mxu1 %v1360_v44 }
 0x26e   : > { %13110 = vst [vmem:[#allocation82_spill] sm:$0xff] %v9681_v43  ;;  %13111 = vst [vmem:[#allocation83_spill] sm:$0xff] %v9687_v39  ;;  %v2577_v61 = vmax.f32 %v2576_v32, %v9676_v42  ;;  %2574 = vmax.xlane.f32.xlu1 %v2573_v8  ;;  %7194 = vmatmul.mubr.f32.gmra.mxu0 %v1360_v44 }
 0x26f   : > { %v9689_v18 = vpop.f32.mrf.mxu1  ;;  %v9692_v15 = vpop.f32.mrf.mxu0  ;;  %7354 = vmatmul.mubr.f32.gmra.mxu1 %v1360_v44 }
 0x270   : > { %13112 = vst [vmem:[#allocation84_spill] sm:$0xff] %v9689_v18  ;;  %13113 = vst [vmem:[#allocation85_spill] sm:$0xff] %v9692_v15  ;;  %v2581_v0 = vmax.f32 %v9687_v39, %v9692_v15  ;;  %v2578_v51 = vmax.f32 %v2577_v61, %v9681_v43 }
 0x271   : > { %v9694_v1 = vpop.f32.mrf.mxu1  ;;  %v9700_v35 = vpop.f32.mrf.mxu0 }
 0x272   : > { %13114 = vst [vmem:[#allocation86_spill] sm:$0xff] %v9694_v1  ;;  %13115 = vst [vmem:[#allocation87_spill] sm:$0xff] %v9700_v35  ;;  %v2582_v8 = vmax.f32 %v2581_v0, %v9689_v18  ;;  %2579 = vmax.xlane.f32.xlu0 %v2578_v51 }
 0x273   : > { %v9702_v36 = vpop.f32.mrf.mxu1  ;;  %v9705_v32 = vpop.f32.mrf.mxu0 }
 0x274   : > { %13116 = vst [vmem:[#allocation88_spill] sm:$0xff] %v9702_v36  ;;  %13117 = vst [vmem:[#allocation89_spill] sm:$0xff] %v9705_v32  ;;  %v2586_v25 = vmax.f32 %v9700_v35, %v9705_v32  ;;  %v2583_v61 = vmax.f32 %v2582_v8, %v9694_v1 }
 0x275   : > { %v9707_v42 = vpop.f32.mrf.mxu1  ;;  %v9712_v39 = vpop.f32.mrf.mxu0 }
 0x276   : > { %13118 = vst [vmem:[#allocation90_spill] sm:$0xff] %v9707_v42  ;;  %13119 = vst [vmem:[#allocation91_spill] sm:$0xff] %v9712_v39  ;;  %v2587_v15 = vmax.f32 %v2586_v25, %v9702_v36  ;;  %2584 = vmax.xlane.f32.xlu1 %v2583_v61 }
 0x277   : > { %v9714_v43 = vpop.f32.mrf.mxu1  ;;  %v9717_v0 = vpop.f32.mrf.mxu0 }
 0x278   : > { %13120 = vst [vmem:[#allocation92_spill] sm:$0xff] %v9714_v43  ;;  %13121 = vst [vmem:[#allocation93_spill] sm:$0xff] %v9717_v0  ;;  %v2591_v18 = vmax.f32 %v9712_v39, %v9717_v0  ;;  %v2588_v44 = vmax.f32 %v2587_v15, %v9707_v42 }
 0x279   : > { %v9719_v51 = vpop.f32.mrf.mxu1  ;;  %v9724_v54 = vpop.f32.mrf.mxu0 }
 0x27a   : > { %13122 = vst [vmem:[#allocation94_spill] sm:$0xff] %v9719_v51  ;;  %13123 = vst [vmem:[#allocation95_spill] sm:$0xff] %v9724_v54  ;;  %v2592_v8 = vmax.f32 %v2591_v18, %v9714_v43  ;;  %2589 = vmax.xlane.f32.xlu0 %v2588_v44 }
 0x27b   : > { %v9726_v32 = vpop.f32.mrf.mxu1  ;;  %v9729_v35 = vpop.f32.mrf.mxu0 }
 0x27c   : > { %13124 = vst [vmem:[#allocation96_spill] sm:$0xff] %v9726_v32  ;;  %13125 = vst [vmem:[#allocation97_spill] sm:$0xff] %v9729_v35  ;;  %v2596_v61 = vmax.f32 %v9724_v54, %v9729_v35  ;;  %v2593_v36 = vmax.f32 %v2592_v8, %v9719_v51  ;;  %v1486_v51 = vld [vmem:[%s8970_s11 + $0x170] sm:$0xff] }
 0x27d   : > { %v9731_v25 = vpop.f32.mrf.mxu1  ;;  %v9736_v1 = vpop.f32.mrf.mxu0 }
 0x27e   : > { %13126 = vst [vmem:[#allocation98_spill] sm:$0xff] %v9731_v25  ;;  %13127 = vst [vmem:[#allocation99_spill] sm:$0xff] %v9736_v1  ;;  %v2597_v15 = vmax.f32 %v2596_v61, %v9726_v32  ;;  %2594 = vmax.xlane.f32.xlu1 %v2593_v36 }
 0x27f   : > { %v9738_v39 = vpop.f32.mrf.mxu1  ;;  %v9741_v42 = vpop.f32.mrf.mxu0 }
 0x280   : > { %13128 = vst [vmem:[#allocation100_spill] sm:$0xff] %v9738_v39  ;;  %13129 = vst [vmem:[#allocation101_spill] sm:$0xff] %v9741_v42  ;;  %v2601_v44 = vmax.f32 %v9736_v1, %v9741_v42  ;;  %v2598_v43 = vmax.f32 %v2597_v15, %v9731_v25  ;;  %v1454_v42 = vld [vmem:[%s8970_s11 + $0x70] sm:$0xff] }
 0x281   : > { %v9743_v18 = vpop.f32.mrf.mxu1  ;;  %v9748_v0 = vpop.f32.mrf.mxu0 }
 0x282   : > { %13130 = vst [vmem:[#allocation102_spill] sm:$0xff] %v9743_v18  ;;  %13131 = vst [vmem:[#allocation103_spill] sm:$0xff] %v9748_v0  ;;  %v2602_v8 = vmax.f32 %v2601_v44, %v9738_v39  ;;  %2599 = vmax.xlane.f32.xlu0 %v2598_v43  ;;  %v12579_v39 = vmov 0.0  }
 0x283   : > { %v9750_v35 = vpop.f32.mrf.mxu1  ;;  %v9753_v61 = vpop.f32.mrf.mxu0  ;;  %5155 = vmatprep.subr.mxu0 %v12579_v39  ;;  %5540 = vmatprep.subr.mxu1 %v12579_v39 }
 0x284   : > { %13132 = vst [vmem:[#allocation104_spill] sm:$0xff] %v9750_v35  ;;  %13133 = vst [vmem:[#allocation105_spill] sm:$0xff] %v9753_v61  ;;  %v2606_v32 = vmax.f32 %v9748_v0, %v9753_v61  ;;  %v2603_v1 = vmax.f32 %v2602_v8, %v9743_v18  ;;  %v1455_v8 = vld [vmem:[%s8970_s11 + $0x78] sm:$0xff]  ;;  %v1361_v18 = vld [vmem:[%s8966_s4 + $0x188] sm:$0xff] }
 0x285   : > { %v9755_v36 = vpop.f32.mrf.mxu1  ;;  %v9760_v54 = vpop.f32.mrf.mxu0  ;;  %v1487_v61 = vld [vmem:[%s8970_s11 + $0x178] sm:$0xff]  ;;  %5156 = vmatpush1.msra.mxu0 %v1455_v8  ;;  %7195 = vmatprep.mubr.f32.mxu0 %v1361_v18 }
 0x286   : > { %13134 = vst [vmem:[#allocation106_spill] sm:$0xff] %v9755_v36  ;;  %13135 = vst [vmem:[#allocation107_spill] sm:$0xff] %v9760_v54  ;;  %v2607_v25 = vmax.f32 %v2606_v32, %v9750_v35  ;;  %2604 = vmax.xlane.f32.xlu1 %v2603_v1  ;;  %5541 = vmatpush1.msra.mxu1 %v1487_v61 }
 0x287   : > { %v9762_v15 = vpop.f32.mrf.mxu1  ;;  %v9765_v44 = vpop.f32.mrf.mxu0  ;;  %5157 = vmatprep.subr.mxu0 %v12579_v39  ;;  %5542 = vmatprep.subr.mxu1 %v12579_v39 }
 0x288   : > { %13136 = vst [vmem:[#allocation108_spill] sm:$0xff] %v9762_v15  ;;  %13137 = vst [vmem:[#allocation109_spill] sm:$0xff] %v9765_v44  ;;  %v2611_v0 = vmax.f32 %v9760_v54, %v9765_v44  ;;  %v2608_v32 = vmax.f32 %v2607_v25, %v9755_v36  ;;  %7355 = vmatprep.mubr.f32.mxu1 %v1361_v18  ;;  %5158 = vmatpush1.msra.mxu0 %v1454_v42  ;;  %v1453_v36 = vld [vmem:[%s8970_s11 + $0x68] sm:$0xff] }
 0x289   : > { %v9767_v43 = vpop.f32.mrf.mxu1  ;;  %v9776_v1 = vpop.f32.mrf.mxu0  ;;  %5543 = vmatpush1.msra.mxu1 %v1486_v51  ;;  %7196 = vmatmul.mubr.f32.gmra.mxu0 %v1361_v18  ;;  %v1485_v44 = vld [vmem:[%s8970_s11 + $0x168] sm:$0xff] }
 0x28a   : > { %13138 = vst [vmem:[#allocation110_spill] sm:$0xff] %v9767_v43  ;;  %13139 = vst [vmem:[#allocation111_spill] sm:$0xff] %v9776_v1  ;;  %v2612_v22 = vmax.f32 %v2611_v0, %v9762_v15  ;;  %2609 = vmax.xlane.f32.xlu0 %v2608_v32  ;;  %7356 = vmatmul.mubr.f32.gmra.mxu1 %v1361_v18  ;;  %v13145_v15 = vmov 0.0  }
 0x28b   : > { %v9778_v35 = vpop.f32.mrf.mxu1  ;;  %v9786_v25 = vpop.f32.mrf.mxu0  ;;  %5159 = vmatprep.subr.mxu0 %v13145_v15  ;;  %5544 = vmatprep.subr.mxu1 %v13145_v15 }
 0x28c   : > { %13140 = vst [vmem:[#allocation112_spill] sm:$0xff] %v9778_v35  ;;  %13141 = vst [vmem:[#allocation113_spill] sm:$0xff] %v9786_v25  ;;  %v2616_v8 = vmax.f32 %v9776_v1, %v9786_v25  ;;  %v2613_v39 = vmax.f32 %v2612_v22, %v9767_v43  ;;  %v1362_v25 = vld [vmem:[%s8966_s4 + $0x190] sm:$0xff]  ;;  %5160 = vmatpush1.msra.mxu0 %v1453_v36  ;;  %5545 = vmatpush1.msra.mxu1 %v1485_v44  ;;  %v1452_v1 = vld [vmem:[%s8970_s11 + $0x60] sm:$0xff] }
 0x28d   : > { %v9788_v61 = vpop.f32.mrf.mxu1  ;;  %v9795_v0 = vpop.f32.mrf.mxu0  ;;  %5161 = vmatprep.subr.mxu0 %v13145_v15  ;;  %5546 = vmatprep.subr.mxu1 %v13145_v15  ;;  %v1451_v44 = vld [vmem:[%s8970_s11 + $0x58] sm:$0xff] }
 0x28e   : > { %13142 = vst [vmem:[#allocation114_spill] sm:$0xff] %v9788_v61  ;;  %13143 = vst [vmem:[#allocation115_spill] sm:$0xff] %v9795_v0  ;;  %v2617_v42 = vmax.f32 %v2616_v8, %v9778_v35  ;;  %2614 = vmax.xlane.f32.xlu1 %v2613_v39  ;;  %v1484_v39 = vld [vmem:[%s8970_s11 + $0x160] sm:$0xff]  ;;  %7197 = vmatprep.mubr.f32.mxu0 %v1362_v25 }
 0x28f   : > { %v9797_v32 = vpop.f32.mrf.mxu1  ;;  %v9803_v22 = vpop.f32.mrf.mxu0  ;;  %7357 = vmatprep.mubr.f32.mxu1 %v1362_v25  ;;  %5162 = vmatpush1.msra.mxu0 %v1452_v1 }
 0x290   : > { %13144 = vst [vmem:[#allocation116_spill] sm:$0xff] %v9797_v32  ;;  %13146 = vst [vmem:[#allocation117_spill] sm:$0xff] %v9803_v22  ;;  %v2621_v43 = vmax.f32 %v9795_v0, %v9803_v22  ;;  %v2618_v18 = vmax.f32 %v2617_v42, %v9788_v61  ;;  %5547 = vmatpush1.msra.mxu1 %v1484_v39  ;;  %7198 = vmatmul.mubr.f32.gmra.mxu0 %v1362_v25  ;;  %v1483_v61 = vld [vmem:[%s8970_s11 + $0x158] sm:$0xff] }
 0x291   : > { %v9805_v51 = vpop.f32.mrf.mxu1  ;;  %v9814_v8 = vpop.f32.mrf.mxu0  ;;  %7358 = vmatmul.mubr.f32.gmra.mxu1 %v1362_v25  ;;  %5163 = vmatprep.subr.mxu0 %v13145_v15 }
 0x292   : > { %13147 = vst [vmem:[#allocation118_spill] sm:$0xff] %v9805_v51  ;;  %13148 = vst [vmem:[#allocation119_spill] sm:$0xff] %v9814_v8  ;;  %v2622_v36 = vmax.f32 %v2621_v43, %v9797_v32  ;;  %2619 = vmax.xlane.f32.xlu0 %v2618_v18  ;;  %5548 = vmatprep.subr.mxu1 %v13145_v15  ;;  %v1363_v18 = vld [vmem:[%s8966_s4 + $0x198] sm:$0xff]  ;;  %v1450_v32 = vld [vmem:[%s8970_s11 + $0x50] sm:$0xff] }
 0x293   : > { %v9816_v35 = vpop.f32.mrf.mxu1  ;;  %v9820_v22 = vpop.f32.mrf.mxu0  ;;  %5164 = vmatpush1.msra.mxu0 %v1451_v44  ;;  %5549 = vmatpush1.msra.mxu1 %v1483_v61 }
 0x294   : > { %13149 = vst [vmem:[#allocation120_spill] sm:$0xff] %v9816_v35  ;;  %13150 = vst [vmem:[#allocation121_spill] sm:$0xff] %v9820_v22  ;;  %v2626_v0 = vmax.f32 %v9814_v8, %v9820_v22  ;;  %v2623_v54 = vmax.f32 %v2622_v36, %v9805_v51  ;;  %v1482_v22 = vld [vmem:[%s8970_s11 + $0x150] sm:$0xff]  ;;  %5165 = vmatprep.subr.mxu0 %v13145_v15  ;;  %5550 = vmatprep.subr.mxu1 %v13145_v15  ;;  %v1481_v51 = vld [vmem:[%s8970_s11 + $0x148] sm:$0xff] }
 0x295   : > { %v9822_v42 = vpop.f32.mrf.mxu1  ;;  %v9829_v43 = vpop.f32.mrf.mxu0  ;;  %7199 = vmatprep.mubr.f32.mxu0 %v1363_v18  ;;  %7359 = vmatprep.mubr.f32.mxu1 %v1363_v18 }
 0x296   : > { %13151 = vst [vmem:[#allocation122_spill] sm:$0xff] %v9822_v42  ;;  %13152 = vst [vmem:[#allocation123_spill] sm:$0xff] %v9829_v43  ;;  %v2627_v39 = vmax.f32 %v2626_v0, %v9816_v35  ;;  %2624 = vmax.xlane.f32.xlu1 %v2623_v54  ;;  %5166 = vmatpush1.msra.mxu0 %v1450_v32  ;;  %v1449_v0 = vld [vmem:[%s8970_s11 + $0x48] sm:$0xff] }
 0x297   : > { %v9831_v1 = vpop.f32.mrf.mxu1  ;;  %v9838_v8 = vpop.f32.mrf.mxu0  ;;  %5551 = vmatpush1.msra.mxu1 %v1482_v22  ;;  %7200 = vmatmul.mubr.f32.gmra.mxu0 %v1363_v18  ;;  %v1364_v22 = vld [vmem:[%s8966_s4 + $0x1a0] sm:$0xff] }
 0x298   : > { %13153 = vst [vmem:[#allocation124_spill] sm:$0xff] %v9831_v1  ;;  %13154 = vst [vmem:[#allocation125_spill] sm:$0xff] %v9838_v8  ;;  %v2631_v36 = vmax.f32 %v9829_v43, %v9838_v8  ;;  %v2628_v44 = vmax.f32 %v2627_v39, %v9822_v42  ;;  %7360 = vmatmul.mubr.f32.gmra.mxu1 %v1363_v18  ;;  %5167 = vmatprep.subr.mxu0 %v13145_v15 }
 0x299   : > { %v9840_v25 = vpop.f32.mrf.mxu1  ;;  %v9847_v54 = vpop.f32.mrf.mxu0  ;;  %5552 = vmatprep.subr.mxu1 %v13145_v15  ;;  %5168 = vmatpush1.msra.mxu0 %v1449_v0 }
 0x29a   : > { %13155 = vst [vmem:[#allocation126_spill] sm:$0xff] %v9840_v25  ;;  %13156 = vst [vmem:[#allocation127_spill] sm:$0xff] %v9847_v54  ;;  %v2632_v35 = vmax.f32 %v2631_v36, %v9831_v1  ;;  %2629 = vmax.xlane.f32.xlu0 %v2628_v44  ;;  %5553 = vmatpush1.msra.mxu1 %v1481_v51  ;;  %v1448_v44 = vld [vmem:[%s8970_s11 + $0x40] sm:$0xff] }
 0x29b   : > { %v9849_v61 = vpop.f32.mrf.mxu1  ;;  %v9854_v8 = vpop.f32.mrf.mxu0  ;;  %5169 = vmatprep.subr.mxu0 %v13145_v15  ;;  %v1480_v1 = vld [vmem:[%s8970_s11 + $0x140] sm:$0xff]  ;;  %5554 = vmatprep.subr.mxu1 %v13145_v15 }
 0x29c   : > { %13157 = vst [vmem:[#allocation128_spill] sm:$0xff] %v9849_v61  ;;  %13158 = vst [vmem:[#allocation129_spill] sm:$0xff] %v9854_v8  ;;  %v2636_v42 = vmax.f32 %v9847_v54, %v9854_v8  ;;  %v2633_v32 = vmax.f32 %v2632_v35, %v9840_v25  ;;  %7201 = vmatprep.mubr.f32.mxu0 %v1364_v22  ;;  %7361 = vmatprep.mubr.f32.mxu1 %v1364_v22  ;;  %v1447_v54 = vld [vmem:[%s8970_s11 + $0x38] sm:$0xff]  ;;  %v9879_v25 = vld [vmem:[#allocation2] sm:$0xff] }
 0x29d   : > { %v9856_v39 = vpop.f32.mrf.mxu1  ;;  %v9864_v36 = vpop.f32.mrf.mxu0  ;;  %5170 = vmatpush1.msra.mxu0 %v1448_v44  ;;  %5555 = vmatpush1.msra.mxu1 %v1480_v1  ;;  %v1446_v44 = vld [vmem:[%s8970_s11 + $0x30] sm:$0xff] }
 0x29e   : > { %13159 = vst [vmem:[#allocation130_spill] sm:$0xff] %v9856_v39  ;;  %13160 = vst [vmem:[#allocation131_spill] sm:$0xff] %v9864_v36  ;;  %v2637_v18 = vmax.f32 %v2636_v42, %v9849_v61  ;;  %2634 = vmax.xlane.f32.xlu1 %v2633_v32  ;;  %7202 = vmatmul.mubr.f32.gmra.mxu0 %v1364_v22  ;;  %v1479_v42 = vld [vmem:[%s8970_s11 + $0x138] sm:$0xff]  ;;  %v1365_v61 = vld [vmem:[%s8966_s4 + $0x1a8] sm:$0xff] }
 0x29f   : > { %v9871_v8 = vpop.f32.mrf.mxu0  ;;  %v9873_v35 = vpop.f32.mrf.mxu1  ;;  %7362 = vmatmul.mubr.f32.gmra.mxu1 %v1364_v22  ;;  %5171 = vmatprep.subr.mxu0 %v13145_v15 }
 0x2a0   : > { %13161 = vst [vmem:[#allocation132_spill] sm:$0xff] %v9871_v8  ;;  %13162 = vst [vmem:[#allocation133_spill] sm:$0xff] %v9873_v35  ;;  %v2641_v51 = vmax.f32 %v9864_v36, %v9871_v8  ;;  %v2638_v0 = vmax.f32 %v2637_v18, %v9856_v39  ;;  %5556 = vmatprep.subr.mxu1 %v13145_v15  ;;  %5172 = vmatpush1.msra.mxu0 %v1447_v54  ;;  %v1367_v39 = vld [vmem:[%s8966_s4 + $0x1b8] sm:$0xff]  ;;  %v9937_v8 = vld [vmem:[#allocation2 + $0x20] sm:$0xff] }
 0x2a1   : > { %v9885_v43 = vpop.f32.mrf.mxu1  ;;  %5557 = vmatpush1.msra.mxu1 %v1479_v42  ;;  %5173 = vmatprep.subr.mxu0 %v13145_v15  ;;  %v1445_v42 = vld [vmem:[%s8970_s11 + $0x28] sm:$0xff]  ;;  %v9965_v29 = vpop.f32.mrf.mxu0 }
 0x2a2   : > { %v2642_v32 = vmax.f32 %v2641_v51, %v9873_v35  ;;  %2639 = vmax.xlane.f32.xlu0 %v2638_v0  ;;  %13163 = vst [vmem:[#allocation134_spill] sm:$0xff] %v9885_v43  ;;  %v1478_v51 = vld [vmem:[%s8970_s11 + $0x130] sm:$0xff]  ;;  %v9895_v0 = vld [vmem:[#allocation2 + $0x8] sm:$0xff]  ;;  %5558 = vmatprep.subr.mxu1 %v13145_v15  ;;  %13164 = vst [vmem:[#allocation135_spill] sm:$0xff] %v9965_v29 }
 0x2a3   : > { %v2470_v18 = vpop.xlane.xlu0 %2469  ;;  %7203 = vmatprep.mubr.f32.mxu0 %v1365_v61  ;;  %7363 = vmatprep.mubr.f32.mxu1 %v1365_v61  ;;  %v9905_v35 = vld [vmem:[#allocation2 + $0x10] sm:$0xff]  ;;  %v9977_v4 = vpop.f32.mrf.mxu0 }
 0x2a4   : > { %v9889_v1 = vmax.f32 %v9879_v25, %v2470_v18  ;;  %v2643_v22 = vmax.f32 %v2642_v32, %v9885_v43  ;;  %5174 = vmatpush1.msra.mxu0 %v1446_v44  ;;  %5559 = vmatpush1.msra.mxu1 %v1478_v51  ;;  %v1477_v32 = vld [vmem:[%s8970_s11 + $0x128] sm:$0xff]  ;;  %v1444_v51 = vld [vmem:[%s8970_s11 + $0x20] sm:$0xff]  ;;  %v9921_v44 = vld [vmem:[#allocation2 + $0x18] sm:$0xff]  ;;  %13166 = vst [vmem:[#allocation137_spill] sm:$0xff] %v9977_v4 }
 0x2a5   : > { %7204 = vmatmul.mubr.f32.gmra.mxu0 %v1365_v61  ;;  %7364 = vmatmul.mubr.f32.gmra.mxu1 %v1365_v61  ;;  %v1474_v43 = vld [vmem:[%s8970_s11 + $0x110] sm:$0xff]  ;;  %v9993_v45 = vpop.f32.mrf.mxu0  ;;  %v2646_v26 = vmax.f32 %v9965_v29, %v9977_v4  ;;  %v1464_v4 = vld [vmem:[%s8970_s11 + $0xc0] sm:$0xff] }
 0x2a6   : > { %6053 = vst.msk [vmem:[#allocation2] sm:$0xff] %vm4642_vm1, %v9889_v1  ;;  %2644 = vmax.xlane.f32.xlu1 %v2643_v22  ;;  %5175 = vmatprep.subr.mxu0 %v13145_v15  ;;  %v1366_v22 = vld [vmem:[%s8966_s4 + $0x1b0] sm:$0xff]  ;;  %13167 = vst [vmem:[#allocation138_spill] sm:$0xff] %v9993_v45  ;;  %v1496_v29 = vld [vmem:[%s8970_s11 + $0x1c0] sm:$0xff] }
 0x2a7   : > { %v2475_v54 = vpop.xlane.xlu0 %2474  ;;  %5560 = vmatprep.subr.mxu1 %v13145_v15  ;;  %5176 = vmatpush1.msra.mxu0 %v1445_v42  ;;  %v1443_v42 = vld [vmem:[%s8970_s11 + $0x18] sm:$0xff]  ;;  %v10011_v37 = vpop.f32.mrf.mxu0 }
 0x2a8   : > { %v9903_v18 = vmax.f32 %v9895_v0, %v2475_v54  ;;  %5561 = vmatpush1.msra.mxu1 %v1477_v32  ;;  %v1476_v54 = vld [vmem:[%s8970_s11 + $0x120] sm:$0xff]  ;;  %5177 = vmatprep.subr.mxu0 %v13145_v15  ;;  %v1475_v32 = vld [vmem:[%s8970_s11 + $0x118] sm:$0xff]  ;;  %13170 = vst [vmem:[#allocation141_spill] sm:$0xff] %v10011_v37 }
 0x2a9   : > { %5562 = vmatprep.subr.mxu1 %v13145_v15  ;;  %7205 = vmatprep.mubr.f32.mxu0 %v1366_v22  ;;  %v10026_v34 = vpop.f32.mrf.mxu0 }
 0x2aa   : > { %6054 = vst.msk [vmem:[#allocation2 + $0x8] sm:$0xff] %vm4642_vm1, %v9903_v18  ;;  %7365 = vmatprep.mubr.f32.mxu1 %v1366_v22  ;;  %5178 = vmatpush1.msra.mxu0 %v1444_v51  ;;  %13172 = vst [vmem:[#allocation143_spill] sm:$0xff] %v10026_v34 }
 0x2ab   : > { %v2480_v61 = vpop.xlane.xlu1 %2479  ;;  %5563 = vmatpush1.msra.mxu1 %v1476_v54  ;;  %7206 = vmatmul.mubr.f32.gmra.mxu0 %v1366_v22  ;;  %v1442_v54 = vld [vmem:[%s8970_s11 + $0x10] sm:$0xff]  ;;  %v10044_v27 = vpop.f32.mrf.mxu0 }
 0x2ac   : > { %v9919_v36 = vmax.f32 %v9905_v35, %v2480_v61  ;;  %7366 = vmatmul.mubr.f32.gmra.mxu1 %v1366_v22  ;;  %5179 = vmatprep.subr.mxu0 %v13145_v15  ;;  %13176 = vst [vmem:[#allocation147_spill] sm:$0xff] %v10044_v27 }
 0x2ad   : > { %5564 = vmatprep.subr.mxu1 %v13145_v15  ;;  %5180 = vmatpush1.msra.mxu0 %v1443_v42  ;;  %v1441_v42 = vld [vmem:[%s8970_s11 + $0x8] sm:$0xff] }
 0x2ae   : > { %6055 = vst.msk [vmem:[#allocation2 + $0x10] sm:$0xff] %vm4642_vm1, %v9919_v36  ;;  %5565 = vmatpush1.msra.mxu1 %v1475_v32  ;;  %5181 = vmatprep.subr.mxu0 %v13145_v15  ;;  %v1473_v32 = vld [vmem:[%s8970_s11 + $0x108] sm:$0xff] }
 0x2af   : > { %v2485_v61 = vpop.xlane.xlu1 %2484  ;;  %5566 = vmatprep.subr.mxu1 %v13145_v15  ;;  %7207 = vmatprep.mubr.f32.mxu0 %v1367_v39 }
 0x2b0   : > { %v9933_v51 = vmax.f32 %v9921_v44, %v2485_v61  ;;  %7367 = vmatprep.mubr.f32.mxu1 %v1367_v39  ;;  %5182 = vmatpush1.msra.mxu0 %v1442_v54 }
 0x2b1   : > { %5567 = vmatpush1.msra.mxu1 %v1474_v43  ;;  %7208 = vmatmul.mubr.f32.gmra.mxu0 %v1367_v39  ;;  %v1368_v43 = vld [vmem:[%s8966_s4 + $0x1c0] sm:$0xff] }
 0x2b2   : > { %6056 = vst.msk [vmem:[#allocation2 + $0x18] sm:$0xff] %vm4642_vm1, %v9933_v51  ;;  %7368 = vmatmul.mubr.f32.gmra.mxu1 %v1367_v39  ;;  %5183 = vmatprep.subr.mxu0 %v13145_v15  ;;  %v1440_v39 = vld [vmem:[%s8970_s11] sm:$0xff] }
 0x2b3   : > { %v2490_v61 = vpop.xlane.xlu0 %2489  ;;  %5568 = vmatprep.subr.mxu1 %v13145_v15  ;;  %5184 = vmatpush1.msra.mxu0 %v1441_v42  ;;  %v9968_v42 = vld [vmem:[#allocation2 + $0x30] sm:$0xff] }
 0x2b4   : > { %v9948_v21 = vmax.f32 %v9937_v8, %v2490_v61  ;;  %5569 = vmatpush1.msra.mxu1 %v1473_v32  ;;  %5185 = vmatprep.subr.mxu0 %v13145_v15  ;;  %v1472_v61 = vld [vmem:[%s8970_s11 + $0x100] sm:$0xff]  ;;  %13165 = vst [vmem:[#allocation136_spill] sm:$0xff] %v9968_v42  ;;  %v1471_v32 = vld [vmem:[%s8970_s11 + $0xf8] sm:$0xff] }
 0x2b5   : > { %5570 = vmatprep.subr.mxu1 %v13145_v15  ;;  %7209 = vmatprep.mubr.f32.mxu0 %v1368_v43 }
 0x2b6   : > { %6057 = vst.msk [vmem:[#allocation2 + $0x20] sm:$0xff] %vm4642_vm1, %v9948_v21  ;;  %7369 = vmatprep.mubr.f32.mxu1 %v1368_v43  ;;  %5186 = vmatpush1.msra.mxu0 %v1440_v39  ;;  %v1470_v39 = vld [vmem:[%s8970_s11 + $0xf0] sm:$0xff] }
 0x2b7   : > { %v2495_v54 = vpop.xlane.xlu1 %2494  ;;  %3049 = vperm.xlu1 %7498, %v9903_v18   ;;  %5571 = vmatpush1.msra.mxu1 %v1472_v61  ;;  %v1502_v61 = vld [vmem:[%s8970_s11 + $0x1f0] sm:$0xff] }
 0x2b8   : > { %v9962_v22 = vmax.f32 %v9950_v14, %v2495_v54  ;;  %3044 = vperm.xlu0 %7497, %v9889_v1   ;;  %v1503_v54 = vld [vmem:[%s8970_s11 + $0x1f8] sm:$0xff]  ;;  %7210 = vmatmul.mubr.f32.gmra.mxu0 %v1368_v43 }
 0x2b9   : > { %7370 = vmatmul.mubr.f32.gmra.mxu1 %v1368_v43  ;;  %5187 = vmatprep.subr.mxu0 %v13145_v15 }
 0x2ba   : > { %6058 = vst.msk [vmem:[#allocation2 + $0x28] sm:$0xff] %vm4642_vm1, %v9962_v22  ;;  %5572 = vmatprep.subr.mxu1 %v13145_v15  ;;  %5188 = vmatpush2.msra.mxu0 %v1471_v32  ;;  %v9995_v32 = vpop.f32.mrf.mxu1 }
 0x2bb   : > { %v2500_v7 = vpop.xlane.xlu0 %2499  ;;  %5573 = vmatpush2.msra.mxu1 %v1503_v54  ;;  %5189 = vmatprep.subr.mxu0 %v13145_v15  ;;  %13168 = vst [vmem:[#allocation139_spill] sm:$0xff] %v9995_v32  ;;  %v1469_v54 = vld [vmem:[%s8970_s11 + $0xe8] sm:$0xff] }
 0x2bc   : > { %v9975_v11 = vmax.f32 %v9968_v42, %v2500_v7  ;;  %5574 = vmatprep.subr.mxu1 %v13145_v15  ;;  %7211 = vmatprep.mubr.f32.mxu0 %v1369_v28 }
 0x2bd   : > { %7371 = vmatprep.mubr.f32.mxu1 %v1369_v28  ;;  %5190 = vmatpush2.msra.mxu0 %v1470_v39  ;;  %v1468_v39 = vld [vmem:[%s8970_s11 + $0xe0] sm:$0xff] }
 0x2be   : > { %6059 = vst.msk [vmem:[#allocation2 + $0x30] sm:$0xff] %vm4642_vm1, %v9975_v11  ;;  %5575 = vmatpush2.msra.mxu1 %v1502_v61  ;;  %7212 = vmatmul.mubr.f32.gmra.mxu0 %v1369_v28  ;;  %v1500_v61 = vld [vmem:[%s8970_s11 + $0x1e0] sm:$0xff] }
 0x2bf   : > { %v2505_v7 = vpop.xlane.xlu1 %2504  ;;  %7372 = vmatmul.mubr.f32.gmra.mxu1 %v1369_v28  ;;  %5191 = vmatprep.subr.mxu0 %v13145_v15  ;;  %v10013_v28 = vpop.f32.mrf.mxu1 }
 0x2c0   : > { %v9991_v43 = vmax.f32 %v9982_v46, %v2505_v7  ;;  %5576 = vmatprep.subr.mxu1 %v13145_v15  ;;  %v1370_v7 = vld [vmem:[%s8966_s4 + $0x1d0] sm:$0xff]  ;;  %5192 = vmatpush2.msra.mxu0 %v1469_v54  ;;  %13171 = vst [vmem:[#allocation142_spill] sm:$0xff] %v10013_v28 }
 0x2c1   : > { %5577 = vmatpush2.msra.mxu1 %v1501_v41  ;;  %5193 = vmatprep.subr.mxu0 %v13145_v15  ;;  %v1499_v41 = vld [vmem:[%s8970_s11 + $0x1d8] sm:$0xff]  ;;  %v10028_v31 = vpop.f32.mrf.mxu1 }
 0x2c2   : > { %6060 = vst.msk [vmem:[#allocation2 + $0x38] sm:$0xff] %vm4642_vm1, %v9991_v43  ;;  %5578 = vmatprep.subr.mxu1 %v13145_v15  ;;  %7213 = vmatprep.mubr.f32.mxu0 %v1370_v7  ;;  %13173 = vst [vmem:[#allocation144_spill] sm:$0xff] %v10028_v31 }
 0x2c3   : > { %v2510_v38 = vpop.xlane.xlu0 %2509  ;;  %7373 = vmatprep.mubr.f32.mxu1 %v1370_v7  ;;  %5194 = vmatpush2.msra.mxu0 %v1468_v39  ;;  %v1371_v39 = vld [vmem:[%s8966_s4 + $0x1d8] sm:$0xff] }
 0x2c4   : > { %v10009_v40 = vmax.f32 %v9999_v58, %v2510_v38  ;;  %5579 = vmatpush2.msra.mxu1 %v1500_v61  ;;  %v1467_v38 = vld [vmem:[%s8970_s11 + $0xd8] sm:$0xff]  ;;  %7214 = vmatmul.mubr.f32.gmra.mxu0 %v1370_v7  ;;  %v1466_v61 = vld [vmem:[%s8970_s11 + $0xd0] sm:$0xff] }
 0x2c5   : > { %7374 = vmatmul.mubr.f32.gmra.mxu1 %v1370_v7  ;;  %5195 = vmatprep.subr.mxu0 %v13145_v15  ;;  %v1498_v7 = vld [vmem:[%s8970_s11 + $0x1d0] sm:$0xff] }
 0x2c6   : > { %6061 = vst.msk [vmem:[#allocation2 + $0x40] sm:$0xff] %vm4642_vm1, %v10009_v40  ;;  %5580 = vmatprep.subr.mxu1 %v13145_v15  ;;  %5196 = vmatpush2.msra.mxu0 %v1467_v38  ;;  %v10046_v38 = vpop.f32.mrf.mxu1 }
 0x2c7   : > { %v2515_v54 = vpop.xlane.xlu1 %2514  ;;  %5581 = vmatpush2.msra.mxu1 %v1499_v41  ;;  %5197 = vmatprep.subr.mxu0 %v13145_v15  ;;  %13177 = vst [vmem:[#allocation148_spill] sm:$0xff] %v10046_v38  ;;  %v1465_v41 = vld [vmem:[%s8970_s11 + $0xc8] sm:$0xff] }
 0x2c8   : > { %v10024_v58 = vmax.f32 %v10017_v57, %v2515_v54  ;;  %5582 = vmatprep.subr.mxu1 %v13145_v15  ;;  %7215 = vmatprep.mubr.f32.mxu0 %v1371_v39 }
 0x2c9   : > { %7375 = vmatprep.mubr.f32.mxu1 %v1371_v39  ;;  %5198 = vmatpush2.msra.mxu0 %v1466_v61  ;;  %v1372_v61 = vld [vmem:[%s8966_s4 + $0x1e0] sm:$0xff] }
 0x2ca   : > { %6062 = vst.msk [vmem:[#allocation2 + $0x48] sm:$0xff] %vm4642_vm1, %v10024_v58  ;;  %5583 = vmatpush2.msra.mxu1 %v1498_v7  ;;  %7216 = vmatmul.mubr.f32.gmra.mxu0 %v1371_v39  ;;  %v2656_v7 = vmax.f32 %v10026_v34, %v10044_v27  ;;  %v2651_v27 = vmax.f32 %v9993_v45, %v10011_v37 }
 0x2cb   : > { %v2520_v54 = vpop.xlane.xlu0 %2519  ;;  %7376 = vmatmul.mubr.f32.gmra.mxu1 %v1371_v39  ;;  %5199 = vmatprep.subr.mxu0 %v13145_v15 }
 0x2cc   : > { %v10042_v30 = vmax.f32 %v10033_v33, %v2520_v54  ;;  %5584 = vmatprep.subr.mxu1 %v13145_v15  ;;  %5200 = vmatpush2.msra.mxu0 %v1465_v41  ;;  %v10066_v33 = vpop.f32.mrf.mxu1  ;;  %v10073_v41 = vld [vmem:[#allocation2 + $0x60] sm:$0xff] }
 0x2cd   : > { %5585 = vmatpush2.msra.mxu1 %v1497_v24  ;;  %13179 = vst [vmem:[#allocation150_spill] sm:$0xff] %v10066_v33  ;;  %5201 = vmatprep.subr.mxu0 %v13145_v15  ;;  %13180 = vst [vmem:[#allocation151_spill] sm:$0xff] %v10073_v41  ;;  %v1463_v24 = vld [vmem:[%s8970_s11 + $0xb8] sm:$0xff] }
 0x2ce   : > { %13175 = vst [vmem:[#allocation146_spill] sm:$0xff] %v10042_v30  ;;  %6063 = vst.msk [vmem:[#allocation2 + $0x50] sm:$0xff] %vm4642_vm1, %v10042_v30  ;;  %5586 = vmatprep.subr.mxu1 %v13145_v15  ;;  %v2647_v30 = vmax.f32 %v2646_v26, %v9995_v32  ;;  %7217 = vmatprep.mubr.f32.mxu0 %v1372_v61  ;;  %v10083_v45 = vpop.f32.mrf.mxu1  ;;  %v10089_v32 = vld [vmem:[#allocation2 + $0x68] sm:$0xff] }
 0x2cf   : > { %v2525_v54 = vpop.xlane.xlu1 %2524  ;;  %7377 = vmatprep.mubr.f32.mxu1 %v1372_v61  ;;  %5202 = vmatpush2.msra.mxu0 %v1464_v4  ;;  %13182 = vst [vmem:[#allocation153_spill] sm:$0xff] %v10083_v45  ;;  %v1373_v4 = vld [vmem:[%s8966_s4 + $0x1e8] sm:$0xff]  ;;  %13183 = vst [vmem:[#allocation154_spill] sm:$0xff] %v10089_v32 }
 0x2d0   : > { %v10064_v39 = vmax.f32 %v10052_v23, %v2525_v54  ;;  %5587 = vmatpush2.msra.mxu1 %v1496_v29  ;;  %v1495_v54 = vld [vmem:[%s8970_s11 + $0x1b8] sm:$0xff]  ;;  %v2657_v23 = vmax.f32 %v2656_v7, %v10066_v33  ;;  %7218 = vmatmul.mubr.f32.gmra.mxu0 %v1372_v61  ;;  %v2652_v29 = vmax.f32 %v2651_v27, %v10028_v31  ;;  %v1462_v7 = vld [vmem:[%s8970_s11 + $0xb0] sm:$0xff]  ;;  %v1461_v33 = vld [vmem:[%s8970_s11 + $0xa8] sm:$0xff] }
 0x2d1   : > { %7378 = vmatmul.mubr.f32.gmra.mxu1 %v1372_v61  ;;  %5203 = vmatprep.subr.mxu0 %v13145_v15  ;;  %v2648_v37 = vmax.f32 %v2647_v30, %v10013_v28  ;;  %v10159_v28 = vpop.f32.mrf.mxu0 }
 0x2d2   : > { %6064 = vst.msk [vmem:[#allocation2 + $0x58] sm:$0xff] %vm4642_vm1, %v10064_v39  ;;  %5588 = vmatprep.subr.mxu1 %v13145_v15  ;;  %5204 = vmatpush2.msra.mxu0 %v1463_v24  ;;  %v2658_v27 = vmax.f32 %v2657_v23, %v10083_v45  ;;  %v10102_v24 = vld [vmem:[#allocation2 + $0x70] sm:$0xff]  ;;  %v1493_v23 = vld [vmem:[%s8970_s11 + $0x1a8] sm:$0xff]  ;;  %v1492_v45 = vld [vmem:[%s8970_s11 + $0x1a0] sm:$0xff] }
 0x2d3   : > { %v2530_v34 = vpop.xlane.xlu0 %2529  ;;  %5589 = vmatpush2.msra.mxu1 %v1495_v54  ;;  %5205 = vmatprep.subr.mxu0 %v13145_v15  ;;  %13185 = vst [vmem:[#allocation156_spill] sm:$0xff] %v10102_v24  ;;  %v2653_v54 = vmax.f32 %v2652_v29, %v10046_v38  ;;  %v1488_v38 = vld [vmem:[%s8970_s11 + $0x180] sm:$0xff]  ;;  %13194 = vst [vmem:[#allocation165_spill] sm:$0xff] %v10159_v28 }
 0x2d4   : > { %v10081_v26 = vmax.f32 %v10073_v41, %v2530_v34  ;;  %5590 = vmatprep.subr.mxu1 %v13145_v15  ;;  %v1494_v34 = vld [vmem:[%s8970_s11 + $0x1b0] sm:$0xff]  ;;  %7219 = vmatprep.mubr.f32.mxu0 %v1373_v4 }
 0x2d5   : > { %7379 = vmatprep.mubr.f32.mxu1 %v1373_v4  ;;  %5206 = vmatpush2.msra.mxu0 %v1462_v7 }
 0x2d6   : > { %13181 = vst [vmem:[#allocation152_spill] sm:$0xff] %v10081_v26  ;;  %6065 = vst.msk [vmem:[#allocation2 + $0x60] sm:$0xff] %vm4642_vm1, %v10081_v26  ;;  %5591 = vmatpush2.msra.mxu1 %v1494_v34  ;;  %7220 = vmatmul.mubr.f32.gmra.mxu0 %v1373_v4  ;;  %v1460_v34 = vld [vmem:[%s8970_s11 + $0xa0] sm:$0xff]  ;;  %v10239_v26 = vld [vmem:[#allocation2 + $0xc8] sm:$0xff] }
 0x2d7   : > { %v2535_v61 = vpop.xlane.xlu1 %2534  ;;  %2649 = vmax.xlane.f32.xlu0 %v2648_v37  ;;  %7380 = vmatmul.mubr.f32.gmra.mxu1 %v1373_v4  ;;  %v2850_v37 = vsub.f32 %v9879_v25, %v9889_v1  ;;  %v10118_v4 = vld [vmem:[#allocation2 + $0x78] sm:$0xff]  ;;  %13220 = vst [vmem:[#allocation191_spill] sm:$0xff] %v10239_v26 }
 0x2d8   : > { %v10100_v30 = vmax.f32 %v10089_v32, %v2535_v61  ;;  %5207 = vmatprep.subr.mxu0 %v13145_v15  ;;  %v1374_v61 = vld [vmem:[%s8966_s4 + $0x1f0] sm:$0xff]  ;;  %5592 = vmatprep.subr.mxu1 %v13145_v15  ;;  %13187 = vst [vmem:[#allocation158_spill] sm:$0xff] %v10118_v4 }
 0x2d9   : > { %5208 = vmatpush2.msra.mxu0 %v1461_v33  ;;  %5593 = vmatpush2.msra.mxu1 %v1493_v23  ;;  %v2914_v25 = vmul.f32 1.442695, %v2850_v37  ;;  %v1459_v33 = vld [vmem:[%s8970_s11 + $0x98] sm:$0xff]  ;;  %v10130_v23 = vld [vmem:[#allocation2 + $0x80] sm:$0xff]  ;;  %v1458_v37 = vld [vmem:[%s8970_s11 + $0x90] sm:$0xff] }
 0x2da   : > { %13184 = vst [vmem:[#allocation155_spill] sm:$0xff] %v10100_v30  ;;  %6066 = vst.msk [vmem:[#allocation2 + $0x68] sm:$0xff] %vm4642_vm1, %v10100_v30  ;;  %5209 = vmatprep.subr.mxu0 %v13145_v15  ;;  %5594 = vmatprep.subr.mxu1 %v13145_v15 }
 0x2db   : > { %v2540_v7 = vpop.xlane.xlu0 %2539  ;;  %2654 = vmax.xlane.f32.xlu1 %v2653_v54  ;;  %2659 = vmax.xlane.f32.xlu0 %v2658_v27  ;;  %v1491_v54 = vld [vmem:[%s8970_s11 + $0x198] sm:$0xff]  ;;  %13189 = vst [vmem:[#allocation160_spill] sm:$0xff] %v10130_v23  ;;  %7499 = vpow2.f32 %v2914_v25  ;;  %v1489_v25 = vld [vmem:[%s8970_s11 + $0x188] sm:$0xff] }
 0x2dc   : > { %v10114_v29 = vmax.f32 %v10102_v24, %v2540_v7  ;;  %7221 = vmatprep.mubr.f32.mxu0 %v1374_v61  ;;  %7381 = vmatprep.mubr.f32.mxu1 %v1374_v61  ;;  %v1375_v7 = vld [vmem:[%s8966_s4 + $0x1f8] sm:$0xff]  ;;  %v10193_v24 = vld [vmem:[#allocation2 + $0xa8] sm:$0xff] }
 0x2dd   : > { %5210 = vmatpush2.msra.mxu0 %v1460_v34  ;;  %5595 = vmatpush2.msra.mxu1 %v1492_v45  ;;  %v1490_v45 = vld [vmem:[%s8970_s11 + $0x190] sm:$0xff]  ;;  %13204 = vst [vmem:[#allocation175_spill] sm:$0xff] %v10193_v24 }
 0x2de   : > { %13186 = vst [vmem:[#allocation157_spill] sm:$0xff] %v10114_v29  ;;  %6067 = vst.msk [vmem:[#allocation2 + $0x70] sm:$0xff] %vm4642_vm1, %v10114_v29  ;;  %7222 = vmatmul.mubr.f32.gmra.mxu0 %v1374_v61  ;;  %7382 = vmatmul.mubr.f32.gmra.mxu1 %v1374_v61 }
 0x2df   : > { %v2545_v1 = vpop.xlane.xlu1 %2544  ;;  %5211 = vmatprep.subr.mxu0 %v13145_v15  ;;  %5596 = vmatprep.subr.mxu1 %v13145_v15 }
 0x2e0   : > { %v10127_v27 = vmax.f32 %v10118_v4, %v2545_v1  ;;  %5212 = vmatpush2.msra.mxu0 %v1459_v33  ;;  %5597 = vmatpush2.msra.mxu1 %v1491_v54  ;;  %v10144_v1 = vld [vmem:[#allocation2 + $0x88] sm:$0xff]  ;;  %v10215_v4 = vld [vmem:[#allocation2 + $0xb8] sm:$0xff] }
 0x2e1   : > { %5213 = vmatprep.subr.mxu0 %v13145_v15  ;;  %5598 = vmatprep.subr.mxu1 %v13145_v15  ;;  %13191 = vst [vmem:[#allocation162_spill] sm:$0xff] %v10144_v1  ;;  %v1457_v33 = vld [vmem:[%s8970_s11 + $0x88] sm:$0xff]  ;;  %13212 = vst [vmem:[#allocation183_spill] sm:$0xff] %v10215_v4 }
 0x2e2   : > { %13188 = vst [vmem:[#allocation159_spill] sm:$0xff] %v10127_v27  ;;  %6068 = vst.msk [vmem:[#allocation2 + $0x78] sm:$0xff] %vm4642_vm1, %v10127_v27  ;;  %7223 = vmatprep.mubr.f32.mxu0 %v1375_v7  ;;  %7383 = vmatprep.mubr.f32.mxu1 %v1375_v7 }
 0x2e3   : > { %v2550_v34 = vpop.xlane.xlu0 %2549  ;;  %5214 = vmatpush2.msra.mxu0 %v1458_v37  ;;  %5599 = vmatpush2.msra.mxu1 %v1490_v45  ;;  %v10157_v37 = vld [vmem:[#allocation2 + $0x90] sm:$0xff] }
 0x2e4   : > { %v10141_v61 = vmax.f32 %v10130_v23, %v2550_v34  ;;  %7224 = vmatmul.mubr.f32.gmra.mxu0 %v1375_v7  ;;  %7384 = vmatmul.mubr.f32.gmra.mxu1 %v1375_v7  ;;  %v1456_v34 = vld [vmem:[%s8970_s11 + $0x80] sm:$0xff]  ;;  %13193 = vst [vmem:[#allocation164_spill] sm:$0xff] %v10157_v37 }
 0x2e5   : > { %5215 = vmatprep.subr.mxu0 %v13145_v15  ;;  %5600 = vmatprep.subr.mxu1 %v13145_v15 }
 0x2e6   : > { %13190 = vst [vmem:[#allocation161_spill] sm:$0xff] %v10141_v61  ;;  %6069 = vst.msk [vmem:[#allocation2 + $0x80] sm:$0xff] %vm4642_vm1, %v10141_v61  ;;  %5216 = vmatpush2.msra.mxu0 %v1457_v33  ;;  %5601 = vmatpush2.msra.mxu1 %v1489_v25  ;;  %v10169_v33 = vld [vmem:[#allocation2 + $0x98] sm:$0xff]  ;;  %v10204_v61 = vld [vmem:[#allocation2 + $0xb0] sm:$0xff] }
 0x2e7   : > { %v2555_v54 = vpop.xlane.xlu1 %2554  ;;  %5217 = vmatprep.subr.mxu0 %v13145_v15  ;;  %5602 = vmatprep.subr.mxu1 %v13145_v15  ;;  %13196 = vst [vmem:[#allocation167_spill] sm:$0xff] %v10169_v33  ;;  %13208 = vst [vmem:[#allocation179_spill] sm:$0xff] %v10204_v61 }
 0x2e8   : > { %v10153_v31 = vmax.f32 %v10144_v1, %v2555_v54  ;;  %5218 = vmatpush2.msra.mxu0 %v1456_v34  ;;  %5603 = vmatpush2.msra.mxu1 %v1488_v38  ;;  %v10171_v54 = vpop.f32.mrf.mxu0  ;;  %v10175_v23 = vpop.eup %7499  ;;  %v10182_v38 = vld [vmem:[#allocation2 + $0xa0] sm:$0xff] }
 0x2e9   : > { %13197 = vst [vmem:[#allocation168_spill] sm:$0xff] %v10171_v54  ;;  %13198 = vst [vmem:[#allocation169_spill] sm:$0xff] %v10175_v23  ;;  %v10184_v34 = vpop.f32.mrf.mxu1 }
 0x2ea   : > { %13192 = vst [vmem:[#allocation163_spill] sm:$0xff] %v10153_v31  ;;  %6070 = vst.msk [vmem:[#allocation2 + $0x88] sm:$0xff] %vm4642_vm1, %v10153_v31  ;;  %v10226_v31 = vld [vmem:[#allocation2 + $0xc0] sm:$0xff] }
 0x2eb   : > { %v2560_v7 = vpop.xlane.xlu0 %2559  ;;  %13200 = vst [vmem:[#allocation171_spill] sm:$0xff] %v10182_v38  ;;  %13201 = vst [vmem:[#allocation172_spill] sm:$0xff] %v10184_v34 }
 0x2ec   : > { %v10166_v45 = vmax.f32 %v10157_v37, %v2560_v7  ;;  %3054 = vperm.xlu1 %7498, %v9919_v36   ;;  %v10186_v7 = vpop.f32.mrf.mxu0  ;;  %13216 = vst [vmem:[#allocation187_spill] sm:$0xff] %v10226_v31 }
 0x2ed   : > { %13202 = vst [vmem:[#allocation173_spill] sm:$0xff] %v10186_v7 }
 0x2ee   : > { %13195 = vst [vmem:[#allocation166_spill] sm:$0xff] %v10166_v45  ;;  %6071 = vst.msk [vmem:[#allocation2 + $0x90] sm:$0xff] %vm4642_vm1, %v10166_v45 }
 0x2ef   : > { %v2565_v25 = vpop.xlane.xlu1 %2564 }
 0x2f0   : > { %v10178_v15 = vmax.f32 %v10169_v33, %v2565_v25  ;;  %3059 = vperm.xlu1 %7498, %v9933_v51   ;;  %v10195_v25 = vpop.f32.mrf.mxu0  ;;  %v10197_v33 = vpop.f32.mrf.mxu1 }
 0x2f1   : > { %4773 = vperm.xlu0 %7497, %v10175_v23   ;;  %13205 = vst [vmem:[#allocation176_spill] sm:$0xff] %v10195_v25  ;;  %13206 = vst [vmem:[#allocation177_spill] sm:$0xff] %v10197_v33 }
 0x2f2   : > { %13199 = vst [vmem:[#allocation170_spill] sm:$0xff] %v10178_v15  ;;  %6072 = vst.msk [vmem:[#allocation2 + $0x98] sm:$0xff] %vm4642_vm1, %v10178_v15  ;;  %v10206_v15 = vpop.f32.mrf.mxu1  ;;  %v10208_v41 = vpop.f32.mrf.mxu0 }
 0x2f3   : > { %v2570_v37 = vpop.xlane.xlu0 %2569  ;;  %13209 = vst [vmem:[#allocation180_spill] sm:$0xff] %v10206_v15  ;;  %13210 = vst [vmem:[#allocation181_spill] sm:$0xff] %v10208_v41 }
 0x2f4   : > { %v10191_v45 = vmax.f32 %v10182_v38, %v2570_v37  ;;  %v10219_v29 = vpop.f32.mrf.mxu1 }
 0x2f5   : > { %13214 = vst [vmem:[#allocation185_spill] sm:$0xff] %v10219_v29 }
 0x2f6   : > { %13203 = vst [vmem:[#allocation174_spill] sm:$0xff] %v10191_v45  ;;  %6073 = vst.msk [vmem:[#allocation2 + $0xa0] sm:$0xff] %vm4642_vm1, %v10191_v45  ;;  %v10217_v45 = vpop.f32.mrf.mxu0 }
 0x2f7   : > { %v2575_v23 = vpop.xlane.xlu1 %2574  ;;  %13213 = vst [vmem:[#allocation184_spill] sm:$0xff] %v10217_v45 }
 0x2f8   : > { %v10202_v1 = vmax.f32 %v10193_v24, %v2575_v23  ;;  %v10230_v32 = vpop.f32.mrf.mxu0 }
 0x2f9   : > { %13218 = vst [vmem:[#allocation189_spill] sm:$0xff] %v10230_v32 }
 0x2fa   : > { %13207 = vst [vmem:[#allocation178_spill] sm:$0xff] %v10202_v1  ;;  %6074 = vst.msk [vmem:[#allocation2 + $0xa8] sm:$0xff] %vm4642_vm1, %v10202_v1  ;;  %v10228_v1 = vpop.f32.mrf.mxu1 }
 0x2fb   : > { %v2580_v37 = vpop.xlane.xlu0 %2579  ;;  %13217 = vst [vmem:[#allocation188_spill] sm:$0xff] %v10228_v1 }
 0x2fc   : > { %v10213_v38 = vmax.f32 %v10204_v61, %v2580_v37 }
 0x2fe   : > { %13211 = vst [vmem:[#allocation182_spill] sm:$0xff] %v10213_v38  ;;  %6075 = vst.msk [vmem:[#allocation2 + $0xb0] sm:$0xff] %vm4642_vm1, %v10213_v38  ;;  %v2666_v38 = vmax.f32 %v10186_v7, %v10195_v25  ;;  %v2661_v7 = vmax.f32 %v10159_v28, %v10171_v54 }
 0x2ff   : > { %v2585_v23 = vpop.xlane.xlu1 %2584 }
 0x300   : > { %v10224_v24 = vmax.f32 %v10215_v4, %v2585_v23  ;;  %v10241_v23 = vpop.f32.mrf.mxu0  ;;  %v10243_v4 = vpop.f32.mrf.mxu1  ;;  %v2667_v30 = vmax.f32 %v2666_v38, %v10206_v15  ;;  %v10266_v15 = vld [vmem:[#allocation2 + $0xd8] sm:$0xff] }
 0x301   : > { %13221 = vst [vmem:[#allocation192_spill] sm:$0xff] %v10241_v23  ;;  %13222 = vst [vmem:[#allocation193_spill] sm:$0xff] %v10243_v4 }
 0x302   : > { %13215 = vst [vmem:[#allocation186_spill] sm:$0xff] %v10224_v24  ;;  %6076 = vst.msk [vmem:[#allocation2 + $0xb8] sm:$0xff] %vm4642_vm1, %v10224_v24  ;;  %v10255_v25 = vpop.f32.mrf.mxu1  ;;  %v2668_v38 = vmax.f32 %v2667_v30, %v10219_v29 }
 0x303   : > { %v2590_v37 = vpop.xlane.xlu0 %2589  ;;  %13225 = vst [vmem:[#allocation196_spill] sm:$0xff] %v10255_v25  ;;  %13227 = vst [vmem:[#allocation198_spill] sm:$0xff] %v10266_v15 }
 0x304   : > { %v10235_v61 = vmax.f32 %v10226_v31, %v2590_v37  ;;  %v2676_v37 = vmax.f32 %v10230_v32, %v10241_v23  ;;  %v10253_v31 = vld [vmem:[#allocation2 + $0xd0] sm:$0xff]  ;;  %v10268_v23 = vpop.f32.mrf.mxu1  ;;  %v2662_v32 = vmax.f32 %v2661_v7, %v10184_v34  ;;  %v10305_v34 = vld [vmem:[#allocation2 + $0xf8] sm:$0xff] }
 0x305   : > { %13224 = vst [vmem:[#allocation195_spill] sm:$0xff] %v10253_v31  ;;  %13228 = vst [vmem:[#allocation199_spill] sm:$0xff] %v10268_v23 }
 0x306   : > { %13219 = vst [vmem:[#allocation190_spill] sm:$0xff] %v10235_v61  ;;  %6077 = vst.msk [vmem:[#allocation2 + $0xc0] sm:$0xff] %vm4642_vm1, %v10235_v61  ;;  %v2663_v30 = vmax.f32 %v2662_v32, %v10197_v33  ;;  %v10295_v32 = vld [vmem:[#allocation2 + $0xf0] sm:$0xff] }
 0x307   : > { %v2595_v27 = vpop.xlane.xlu1 %2594  ;;  %13235 = vst [vmem:[#allocation205_spill] sm:$0xff] %v10295_v32  ;;  %13238 = vst [vmem:[#allocation207_spill] sm:$0xff] %v10305_v34 }
 0x308   : > { %v10249_v24 = vmax.f32 %v10239_v26, %v2595_v27  ;;  %v2677_v27 = vmax.f32 %v2676_v37, %v10255_v25  ;;  %v10285_v25 = vld [vmem:[#allocation2 + $0xe8] sm:$0xff]  ;;  %v13349_v26 = vld [vmem:[#allocation18_spill] sm:$0xff] }
 0x309   : > { %13232 = vst [vmem:[#allocation203_spill] sm:$0xff] %v10285_v25 }
 0x30a   : > { %13223 = vst [vmem:[#allocation194_spill] sm:$0xff] %v10249_v24  ;;  %6078 = vst.msk [vmem:[#allocation2 + $0xc8] sm:$0xff] %vm4642_vm1, %v10249_v24 }
 0x30b   : > { %v2600_v61 = vpop.xlane.xlu0 %2599 }
 0x30c   : > { %v10262_v42 = vmax.f32 %v10253_v31, %v2600_v61  ;;  %v2678_v61 = vmax.f32 %v2677_v27, %v10268_v23  ;;  %v10277_v31 = vld [vmem:[#allocation2 + $0xe0] sm:$0xff]  ;;  %v13233_v27 = vsub.f32 %v9921_v44, %v9933_v51 }
 0x30d   : > { %13230 = vst [vmem:[#allocation201_spill] sm:$0xff] %v10277_v31 }
 0x30e   : > { %13226 = vst [vmem:[#allocation197_spill] sm:$0xff] %v10262_v42  ;;  %6079 = vst.msk [vmem:[#allocation2 + $0xd0] sm:$0xff] %vm4642_vm1, %v10262_v42 }
 0x30f   : > { %v2605_v54 = vpop.xlane.xlu1 %2604 }
 0x310   : > { %v10274_v28 = vmax.f32 %v10266_v15, %v2605_v54  ;;  %2669 = vmax.xlane.f32.xlu0 %v2668_v38  ;;  %v2920_v38 = vmul.f32 1.442695, %v13233_v27  ;;  %v10320_v27 = vld [vmem:[#allocation2 + $0x108] sm:$0xff] }
 0x311   : > { %13242 = vst [vmem:[#allocation211_spill] sm:$0xff] %v10320_v27  ;;  %v13348_v15 = vld [vmem:[#allocation16_spill] sm:$0xff] }
 0x312   : > { %13229 = vst [vmem:[#allocation200_spill] sm:$0xff] %v10274_v28  ;;  %6080 = vst.msk [vmem:[#allocation2 + $0xd8] sm:$0xff] %vm4642_vm1, %v10274_v28  ;;  %7501 = vpow2.f32 %v2920_v38 }
 0x313   : > { %v2610_v37 = vpop.xlane.xlu0 %2609 }
 0x314   : > { %v10283_v7 = vmax.f32 %v10277_v31, %v2610_v37  ;;  %2664 = vmax.xlane.f32.xlu1 %v2663_v30  ;;  %2679 = vmax.xlane.f32.xlu0 %v2678_v61  ;;  %v13236_v61 = vsub.f32 %v9895_v0, %v9903_v18 }
 0x316   : > { %13231 = vst [vmem:[#allocation202_spill] sm:$0xff] %v10283_v7  ;;  %6081 = vst.msk [vmem:[#allocation2 + $0xe0] sm:$0xff] %vm4642_vm1, %v10283_v7  ;;  %v2916_v30 = vmul.f32 1.442695, %v13236_v61 }
 0x317   : > { %v2615_v54 = vpop.xlane.xlu1 %2614 }
 0x318   : > { %v10293_v23 = vmax.f32 %v10285_v25, %v2615_v54  ;;  %7503 = vpow2.f32 %v2916_v30  ;;  %v10312_v54 = vld [vmem:[#allocation2 + $0x100] sm:$0xff]  ;;  %v13347_v25 = vld [vmem:[#allocation17_spill] sm:$0xff] }
 0x319   : > { %13240 = vst [vmem:[#allocation209_spill] sm:$0xff] %v10312_v54 }
 0x31a   : > { %13234 = vst [vmem:[#allocation204_spill] sm:$0xff] %v10293_v23  ;;  %6082 = vst.msk [vmem:[#allocation2 + $0xe8] sm:$0xff] %vm4642_vm1, %v10293_v23 }
 0x31b   : > { %v2620_v37 = vpop.xlane.xlu0 %2619 }
 0x31c   : > { %v10303_v29 = vmax.f32 %v10295_v32, %v2620_v37  ;;  %v10330_v37 = vld [vmem:[#allocation2 + $0x110] sm:$0xff] }
 0x31d   : > { %13245 = vst [vmem:[#allocation214_spill] sm:$0xff] %v10330_v37 }
 0x31e   : > { %13237 = vst [vmem:[#allocation206_spill] sm:$0xff] %v10303_v29  ;;  %6083 = vst.msk [vmem:[#allocation2 + $0xf0] sm:$0xff] %vm4642_vm1, %v10303_v29 }
 0x31f   : > { %v2625_v44 = vpop.xlane.xlu1 %2624  ;;  %v10327_v30 = vpop.eup %7501 }
 0x320   : > { %v10310_v51 = vmax.f32 %v10305_v34, %v2625_v44  ;;  %13244 = vst [vmem:[#allocation213_spill] sm:$0xff] %v10327_v30  ;;  %v10363_v34 = vpop.f32.mrf.mxu1 }
 0x321   : > { %13253 = vst [vmem:[#allocation222_spill] sm:$0xff] %v10363_v34 }
 0x322   : > { %13239 = vst [vmem:[#allocation208_spill] sm:$0xff] %v10310_v51  ;;  %6084 = vst.msk [vmem:[#allocation2 + $0xf8] sm:$0xff] %vm4642_vm1, %v10310_v51 }
 0x323   : > { %v2630_v0 = vpop.xlane.xlu0 %2629 }
 0x324   : > { %v10317_v18 = vmax.f32 %v10312_v54, %v2630_v0  ;;  %v10345_v54 = vpop.f32.mrf.mxu0 }
 0x325   : > { %3064 = vperm.xlu1 %7498, %v9948_v21   ;;  %v10335_v0 = vpop.eup %7503  ;;  %13249 = vst [vmem:[#allocation218_spill] sm:$0xff] %v10345_v54 }
 0x326   : > { %13241 = vst [vmem:[#allocation210_spill] sm:$0xff] %v10317_v18  ;;  %6085 = vst.msk [vmem:[#allocation2 + $0x100] sm:$0xff] %vm4642_vm1, %v10317_v18 }
 0x327   : > { %v2635_v38 = vpop.xlane.xlu1 %2634  ;;  %13246 = vst [vmem:[#allocation215_spill] sm:$0xff] %v10335_v0 }
 0x328   : > { %v10325_v61 = vmax.f32 %v10320_v27, %v2635_v38  ;;  %v10341_v38 = vld [vmem:[#allocation2 + $0x118] sm:$0xff] }
 0x329   : > { %3069 = vperm.xlu1 %7498, %v9962_v22   ;;  %13248 = vst [vmem:[#allocation217_spill] sm:$0xff] %v10341_v38 }
 0x32a   : > { %13243 = vst [vmem:[#allocation212_spill] sm:$0xff] %v10325_v61  ;;  %6086 = vst.msk [vmem:[#allocation2 + $0x108] sm:$0xff] %vm4642_vm1, %v10325_v61  ;;  %4788 = vperm.xlu0 %7497, %v10327_v30   ;;  %v10352_v30 = vpop.f32.mrf.mxu0 }
 0x32b   : > { %v2640_v44 = vpop.xlane.xlu0 %2639  ;;  %13251 = vst [vmem:[#allocation220_spill] sm:$0xff] %v10352_v30 }
 0x32c   : > { %v10338_v33 = vmax.f32 %v10330_v37, %v2640_v44  ;;  %v10361_v61 = vpop.f32.mrf.mxu0 }
 0x32d   : > { %4778 = vperm.xlu1 %7498, %v10335_v0   ;;  %13252 = vst [vmem:[#allocation221_spill] sm:$0xff] %v10361_v61 }
 0x32e   : > { %13247 = vst [vmem:[#allocation216_spill] sm:$0xff] %v10338_v33  ;;  %6087 = vst.msk [vmem:[#allocation2 + $0x110] sm:$0xff] %vm4642_vm1, %v10338_v33 }
 0x32f   : > { %v2645_v18 = vpop.xlane.xlu1 %2644 }
 0x330   : > { %v10348_v32 = vmax.f32 %v10341_v38, %v2645_v18 }
 0x332   : > { %13250 = vst [vmem:[#allocation219_spill] sm:$0xff] %v10348_v32  ;;  %6088 = vst.msk [vmem:[#allocation2 + $0x118] sm:$0xff] %vm4642_vm1, %v10348_v32 }
 0x333   : > { %v3045_v44 = vpop.permute.xlu0 %3044  ;;  %v3050_v37 = vpop.permute.xlu1 %3049 }
 0x334   : > { %v3362_v0 = vsub.f32 %v9410_v47, %v3045_v44  ;;  %v3363_v29 = vsub.f32 %v9414_v49, %v3045_v44  ;;  %v3364_v31 = vsub.f32 %v9412_v48, %v3045_v44  ;;  %v3365_v33 = vsub.f32 %v9416_v50, %v3045_v44  ;;  %v10366_v44 = vpop.f32.mrf.mxu0 }
 0x335   : > { %v3366_v7 = vsub.f32 %v9420_v52, %v3050_v37  ;;  %v3367_v18 = vsub.f32 %v9425_v55, %v3050_v37  ;;  %v3368_v32 = vsub.f32 %v9422_v53, %v3050_v37  ;;  %v3369_v49 = vsub.f32 %v9427_v56, %v3050_v37  ;;  %13254 = vst [vmem:[#allocation223_spill] sm:$0xff] %v10366_v44  ;;  %v10368_v55 = vpop.f32.mrf.mxu1 }
 0x336   : > { %v3618_v38 = vmul.f32 1.442695, %v3362_v0  ;;  %v3620_v42 = vmul.f32 1.442695, %v3363_v29  ;;  %v3622_v27 = vmul.f32 1.442695, %v3364_v31  ;;  %v2686_v53 = vmax.f32 %v10361_v61, %v10366_v44 }
 0x337   : > { %v3624_v47 = vmul.f32 1.442695, %v3365_v33  ;;  %v3626_v48 = vmul.f32 1.442695, %v3366_v7  ;;  %v3628_v50 = vmul.f32 1.442695, %v3367_v18  ;;  %v10372_v29 = vpop.f32.mrf.mxu1  ;;  %v2671_v37 = vmax.f32 %v10208_v41, %v10217_v45 }
 0x338   : > { %7505 = vpow2.f32 %v3618_v38  ;;  %v3630_v52 = vmul.f32 1.442695, %v3368_v32  ;;  %13255 = vst [vmem:[#allocation224_spill] sm:$0xff] %v10368_v55  ;;  %v3632_v31 = vmul.f32 1.442695, %v3369_v49  ;;  %13256 = vst [vmem:[#allocation225_spill] sm:$0xff] %v10372_v29  ;;  %v2687_v56 = vmax.f32 %v2686_v53, %v10372_v29 }
 0x339   : > { %7507 = vpow2.f32 %v3620_v42  ;;  %v10375_v42 = vpop.f32.mrf.mxu1  ;;  %v10487_v61 = vld [vmem:[#allocation2 + $0x140] sm:$0xff] }
 0x33a   : > { %7509 = vpow2.f32 %v3622_v27  ;;  %13257 = vst [vmem:[#allocation226_spill] sm:$0xff] %v10375_v42  ;;  %v2688_v7 = vmax.f32 %v2687_v56, %v10375_v42  ;;  %v2855_v56 = vsub.f32 %v9950_v14, %v9962_v22  ;;  %13291 = vst [vmem:[#allocation259_spill] sm:$0xff] %v10487_v61 }
 0x33b   : > { %7511 = vpow2.f32 %v3624_v47 }
 0x33c   : > { %7513 = vpow2.f32 %v3626_v48 }
 0x33d   : > { %7515 = vpow2.f32 %v3628_v50  ;;  %v2672_v50 = vmax.f32 %v2671_v37, %v10228_v1  ;;  %v13260_v37 = vsub.f32 %v9905_v35, %v9919_v36 }
 0x33e   : > { %7517 = vpow2.f32 %v3630_v52 }
 0x33f   : > { %7519 = vpow2.f32 %v3632_v31 }
 0x345   : > { %v7506_v33 = vpop.eup %7505 }
 0x346   : > { %v7508_v32 = vpop.eup %7507 }
 0x347   : > { %v7510_v27 = vpop.eup %7509  ;;  %5219 = vmatprep.mubr.f32.mxu0 %v7508_v32  ;;  %v4258_v0 = vadd.f32 %v7508_v32, %v7506_v33 }
 0x348   : > { %v7512_v38 = vpop.eup %7511  ;;  %5220 = vmatmul.mubr.f32.vlgmr.msra.gmra.mxu0 %v7506_v33 }
 0x349   : > { %v7514_v18 = vpop.eup %7513  ;;  %5604 = vmatprep.mubr.f32.mxu1 %v7512_v38  ;;  %2689 = vmax.xlane.f32.xlu0 %v2688_v7  ;;  %v4259_v47 = vadd.f32 %v7510_v27, %v4258_v0  ;;  %v2673_v7 = vmax.f32 %v2672_v50, %v10243_v4  ;;  %v2918_v0 = vmul.f32 1.442695, %v13260_v37 }
 0x34a   : > { %v7516_v49 = vpop.eup %7515  ;;  %5605 = vmatmul.mubr.f32.vlgmr.msra.gmra.mxu1 %v7510_v27  ;;  %v2924_v27 = vmul.f32 1.442695, %v2855_v56 }
 0x34b   : > { %v7518_v48 = vpop.eup %7517  ;;  %5224 = vmatprep.mubr.f32.mxu0 %v7516_v49  ;;  %v4263_v52 = vadd.f32 %v7516_v49, %v7514_v18  ;;  %v10381_v31 = vadd.f32 %v7512_v38, %v4259_v47  ;;  %v10391_v38 = vld [vmem:[#allocation2 + $0x120] sm:$0xff]  ;;  %v10400_v47 = vld [vmem:[#allocation2 + $0x128] sm:$0xff]  ;;  %v10402_v49 = vld [vmem:[#allocation2 + $0x130] sm:$0xff] }
 0x34c   : > { %v7520_v53 = vpop.eup %7519  ;;  %5225 = vmatmul.mubr.f32.gmra.mxu0 %v7514_v18  ;;  %7521 = vpow2.f32 %v2924_v27  ;;  %13261 = vst [vmem:[#allocation229_spill] sm:$0xff] %v10391_v38  ;;  %13264 = vst [vmem:[#allocation232_spill] sm:$0xff] %v10400_v47 }
 0x34d   : > { %13258 = vst [vmem:[#allocation227_spill] sm:$0xff] %v10381_v31  ;;  %5609 = vmatprep.mubr.f32.mxu1 %v7520_v53  ;;  %v4264_v33 = vadd.f32 %v7518_v48, %v4263_v52  ;;  %7523 = vpow2.f32 %v2918_v0  ;;  %13265 = vst [vmem:[#allocation233_spill] sm:$0xff] %v10402_v49 }
 0x34e   : > { %5610 = vmatmul.mubr.f32.gmra.mxu1 %v7518_v48 }
 0x34f   : > { %v10386_v32 = vadd.f32 %v7520_v53, %v4264_v33  ;;  %v10420_v53 = vpop.f32.mrf.mxu0 }
 0x350   : > { %13269 = vst [vmem:[#allocation237_spill] sm:$0xff] %v10420_v53 }
 0x351   : > { %13259 = vst [vmem:[#allocation228_spill] sm:$0xff] %v10386_v32  ;;  %2674 = vmax.xlane.f32.xlu1 %v2673_v7 }
 0x359   : > { %v10397_v18 = vpop.eup %7521 }
 0x35a   : > { %13263 = vst [vmem:[#allocation231_spill] sm:$0xff] %v10397_v18  ;;  %v10407_v48 = vpop.eup %7523 }
 0x35b   : > { %13266 = vst [vmem:[#allocation234_spill] sm:$0xff] %v10407_v48 }
 0x35f   : > { %3089 = vperm.xlu0 %7497, %v10024_v58  }
 0x360   : > { %v2650_v14 = vpop.xlane.xlu0 %2649 }
 0x361   : > { %v10395_v22 = vmax.f32 %v10391_v38, %v2650_v14 }
 0x362   : > { %3074 = vperm.xlu1 %7498, %v9975_v11  }
 0x363   : > { %13262 = vst [vmem:[#allocation230_spill] sm:$0xff] %v10395_v22  ;;  %6089 = vst.msk [vmem:[#allocation2 + $0x120] sm:$0xff] %vm4642_vm1, %v10395_v22  ;;  %4798 = vperm.xlu0 %7497, %v10397_v18   ;;  %v10499_v18 = vld [vmem:[#allocation2 + $0x138] sm:$0xff] }
 0x364   : > { %v2655_v36 = vpop.xlane.xlu1 %2654  ;;  %v2660_v35 = vpop.xlane.xlu0 %2659  ;;  %13296 = vst [vmem:[#allocation264_spill] sm:$0xff] %v10499_v18 }
 0x365   : > { %v10410_v50 = vmax.f32 %v10400_v47, %v2655_v36  ;;  %v10413_v52 = vmax.f32 %v10402_v49, %v2660_v35  ;;  %v10427_v35 = vpop.f32.mrf.mxu0  ;;  %v10620_v47 = vld [vmem:[#allocation2 + $0x148] sm:$0xff] }
 0x366   : > { %4783 = vperm.xlu1 %7498, %v10407_v48   ;;  %13270 = vst [vmem:[#allocation238_spill] sm:$0xff] %v10427_v35 }
 0x367   : > { %13267 = vst [vmem:[#allocation235_spill] sm:$0xff] %v10410_v50  ;;  %13268 = vst [vmem:[#allocation236_spill] sm:$0xff] %v10413_v52 }
 0x368   : > { %6090 = vst.msk [vmem:[#allocation2 + $0x128] sm:$0xff] %vm4642_vm1, %v10410_v50  ;;  %6091 = vst.msk [vmem:[#allocation2 + $0x130] sm:$0xff] %vm4642_vm1, %v10413_v52  ;;  %v3055_v56 = vpop.permute.xlu1 %3054  ;;  %v13346_v50 = vld [vmem:[#allocation15_spill] sm:$0xff] }
 0x369   : > { %v3370_v33 = vsub.f32 %v9432_v59, %v3055_v56  ;;  %v3371_v7 = vsub.f32 %v9437_v62, %v3055_v56  ;;  %v3372_v27 = vsub.f32 %v9434_v60, %v3055_v56  ;;  %v3373_v37 = vsub.f32 %v9439_v63, %v3055_v56 }
 0x36a   : > { %3079 = vperm.xlu1 %7498, %v9991_v43  }
 0x36b   : > { %v3634_v0 = vmul.f32 1.442695, %v3370_v33  ;;  %v3636_v14 = vmul.f32 1.442695, %v3371_v7  ;;  %v3638_v36 = vmul.f32 1.442695, %v3372_v27  ;;  %v10433_v7 = vpop.f32.mrf.mxu0  ;;  %v10435_v27 = vpop.f32.mrf.mxu1 }
 0x36c   : > { %v3640_v42 = vmul.f32 1.442695, %v3373_v37  ;;  %v3060_v29 = vpop.permute.xlu1 %3059  ;;  %13271 = vst [vmem:[#allocation239_spill] sm:$0xff] %v10433_v7  ;;  %13272 = vst [vmem:[#allocation240_spill] sm:$0xff] %v10435_v27 }
 0x36d   : > { %7525 = vpow2.f32 %v3634_v0  ;;  %v3374_v44 = vsub.f32 %v9444_v2, %v3060_v29  ;;  %v3375_v59 = vsub.f32 %v9449_v5, %v3060_v29  ;;  %v3376_v62 = vsub.f32 %v9446_v3, %v3060_v29  ;;  %v10437_v2 = vpop.f32.mrf.mxu0  ;;  %v10439_v5 = vpop.f32.mrf.mxu1 }
 0x36e   : > { %7527 = vpow2.f32 %v3636_v14  ;;  %v3377_v60 = vsub.f32 %v9451_v6, %v3060_v29  ;;  %13273 = vst [vmem:[#allocation241_spill] sm:$0xff] %v10437_v2  ;;  %13274 = vst [vmem:[#allocation242_spill] sm:$0xff] %v10439_v5  ;;  %v2696_v3 = vmax.f32 %v10433_v7, %v10437_v2 }
 0x36f   : > { %7529 = vpow2.f32 %v3638_v36  ;;  %v3642_v63 = vmul.f32 1.442695, %v3374_v44  ;;  %v3644_v56 = vmul.f32 1.442695, %v3375_v59  ;;  %v3646_v33 = vmul.f32 1.442695, %v3376_v62  ;;  %v10443_v6 = vpop.f32.mrf.mxu1  ;;  %v10451_v2 = vpop.f32.mrf.mxu0 }
 0x370   : > { %7531 = vpow2.f32 %v3640_v42  ;;  %v3648_v37 = vmul.f32 1.442695, %v3377_v60  ;;  %13275 = vst [vmem:[#allocation243_spill] sm:$0xff] %v10443_v6  ;;  %v2697_v29 = vmax.f32 %v2696_v3, %v10443_v6  ;;  %13278 = vst [vmem:[#allocation246_spill] sm:$0xff] %v10451_v2 }
 0x371   : > { %7533 = vpow2.f32 %v3642_v63  ;;  %v10446_v14 = vpop.f32.mrf.mxu1 }
 0x372   : > { %7535 = vpow2.f32 %v3644_v56  ;;  %13276 = vst [vmem:[#allocation244_spill] sm:$0xff] %v10446_v14  ;;  %v2698_v60 = vmax.f32 %v2697_v29, %v10446_v14 }
 0x373   : > { %7537 = vpow2.f32 %v3646_v33  ;;  %v10455_v29 = vpop.f32.mrf.mxu1 }
 0x374   : > { %7539 = vpow2.f32 %v3648_v37  ;;  %13279 = vst [vmem:[#allocation247_spill] sm:$0xff] %v10455_v29 }
 0x37a   : > { %v7526_v44 = vpop.eup %7525 }
 0x37b   : > { %v7528_v0 = vpop.eup %7527 }
 0x37c   : > { %v7530_v42 = vpop.eup %7529  ;;  %5229 = vmatprep.mubr.f32.mxu0 %v7528_v0  ;;  %v4268_v36 = vadd.f32 %v7528_v0, %v7526_v44 }
 0x37d   : > { %v7532_v59 = vpop.eup %7531  ;;  %5230 = vmatmul.mubr.f32.gmra.mxu0 %v7526_v44  ;;  %v2681_v44 = vmax.f32 %v10345_v54, %v10352_v30 }
 0x37e   : > { %v7534_v62 = vpop.eup %7533  ;;  %5614 = vmatprep.mubr.f32.mxu1 %v7532_v59  ;;  %v4269_v63 = vadd.f32 %v7530_v42, %v4268_v36 }
 0x37f   : > { %v7536_v56 = vpop.eup %7535  ;;  %5615 = vmatmul.mubr.f32.gmra.mxu1 %v7530_v42  ;;  %v2857_v42 = vsub.f32 %v9982_v46, %v9991_v43 }
 0x380   : > { %v7538_v33 = vpop.eup %7537  ;;  %5234 = vmatprep.mubr.f32.mxu0 %v7536_v56  ;;  %v10449_v37 = vadd.f32 %v7532_v59, %v4269_v63  ;;  %v4273_v3 = vadd.f32 %v7536_v56, %v7534_v62  ;;  %v10461_v59 = vpop.f32.mrf.mxu0 }
 0x381   : > { %v7540_v6 = vpop.eup %7539  ;;  %5235 = vmatmul.mubr.f32.gmra.mxu0 %v7534_v62  ;;  %13281 = vst [vmem:[#allocation249_spill] sm:$0xff] %v10461_v59  ;;  %v2682_v62 = vmax.f32 %v2681_v44, %v10363_v34  ;;  %v10464_v63 = vpop.f32.mrf.mxu1 }
 0x382   : > { %13277 = vst [vmem:[#allocation245_spill] sm:$0xff] %v10449_v37  ;;  %5619 = vmatprep.mubr.f32.mxu1 %v7540_v6  ;;  %2699 = vmax.xlane.f32.xlu0 %v2698_v60  ;;  %v4274_v0 = vadd.f32 %v7538_v33, %v4273_v3  ;;  %13282 = vst [vmem:[#allocation250_spill] sm:$0xff] %v10464_v63  ;;  %v2928_v60 = vmul.f32 1.442695, %v2857_v42  ;;  %v10466_v56 = vpop.f32.mrf.mxu0 }
 0x383   : > { %5620 = vmatmul.mubr.f32.gmra.mxu1 %v7538_v33  ;;  %13283 = vst [vmem:[#allocation251_spill] sm:$0xff] %v10466_v56  ;;  %v2683_v33 = vmax.f32 %v2682_v62, %v10368_v55  ;;  %v10469_v3 = vpop.f32.mrf.mxu1  ;;  %v10483_v62 = vpop.permute.xlu0 %4773 }
 0x384   : > { %v10457_v36 = vadd.f32 %v7540_v6, %v4274_v0  ;;  %13284 = vst [vmem:[#allocation252_spill] sm:$0xff] %v10469_v3  ;;  %v2854_v6 = vsub.f32 %v9937_v8, %v9948_v21  ;;  %7541 = vpow2.f32 %v2928_v60  ;;  %v10473_v0 = vpop.f32.mrf.mxu0 }
 0x385   : > { %13285 = vst [vmem:[#allocation253_spill] sm:$0xff] %v10473_v0  ;;  %v10475_v46 = vpop.f32.mrf.mxu1 }
 0x386   : > { %13280 = vst [vmem:[#allocation248_spill] sm:$0xff] %v10457_v36  ;;  %13286 = vst [vmem:[#allocation254_spill] sm:$0xff] %v10475_v46  ;;  %v10477_v43 = vpop.f32.mrf.mxu0  ;;  %v2922_v44 = vmul.f32 1.442695, %v2854_v6 }
 0x387   : > { %13287 = vst [vmem:[#allocation255_spill] sm:$0xff] %v10477_v43  ;;  %v10479_v14 = vpop.f32.mrf.mxu1 }
 0x388   : > { %13288 = vst [vmem:[#allocation256_spill] sm:$0xff] %v10479_v14  ;;  %v10481_v42 = vpop.f32.mrf.mxu0  ;;  %7543 = vpow2.f32 %v2922_v44  ;;  %v10501_v44 = vld [vmem:[#allocation2 + $0x150] sm:$0xff] }
 0x389   : > { %13289 = vst [vmem:[#allocation257_spill] sm:$0xff] %v10481_v42  ;;  %v10485_v7 = vpop.f32.mrf.mxu1  ;;  %13297 = vst [vmem:[#allocation265_spill] sm:$0xff] %v10501_v44 }
 0x38a   : > { %13290 = vst [vmem:[#allocation258_spill] sm:$0xff] %v10485_v7  ;;  %v10490_v21 = vpop.f32.mrf.mxu0 }
 0x38b   : > { %13292 = vst [vmem:[#allocation260_spill] sm:$0xff] %v10490_v21 }
 0x38c   : > { %v10506_v34 = vpop.f32.mrf.mxu0 }
 0x38d   : > { %13298 = vst [vmem:[#allocation266_spill] sm:$0xff] %v10506_v34 }
 0x38e   : > { %2684 = vmax.xlane.f32.xlu1 %v2683_v33  ;;  %v10495_v33 = vpop.f32.mrf.mxu1 }
 0x38f   : > { %13294 = vst [vmem:[#allocation262_spill] sm:$0xff] %v10495_v33 }
 0x391   : > { %v10497_v6 = vpop.eup %7541 }
 0x392   : > { %13295 = vst [vmem:[#allocation263_spill] sm:$0xff] %v10497_v6 }
 0x395   : > { %v10523_v41 = vpop.eup %7543 }
 0x396   : > { %13303 = vst [vmem:[#allocation271_spill] sm:$0xff] %v10523_v41 }
 0x398   : > { %3099 = vperm.xlu0 %7497, %v10064_v39  }
 0x399   : > { %v2670_v8 = vpop.xlane.xlu0 %2669 }
 0x39a   : > { %v10493_v60 = vmax.f32 %v10487_v61, %v2670_v8  ;;  %v10514_v61 = vpop.f32.mrf.mxu1 }
 0x39b   : > { %13301 = vst [vmem:[#allocation269_spill] sm:$0xff] %v10514_v61 }
 0x39c   : > { %13293 = vst [vmem:[#allocation261_spill] sm:$0xff] %v10493_v60  ;;  %4808 = vperm.xlu0 %7497, %v10497_v6   ;;  %6093 = vst.msk [vmem:[#allocation2 + $0x140] sm:$0xff] %vm4642_vm1, %v10493_v60  ;;  %v10521_v6 = vpop.f32.mrf.mxu0  ;;  %v10528_v4 = vpop.f32.mrf.mxu1 }
 0x39d   : > { %v2665_v54 = vpop.xlane.xlu1 %2664  ;;  %v2680_v55 = vpop.xlane.xlu0 %2679  ;;  %13302 = vst [vmem:[#allocation270_spill] sm:$0xff] %v10521_v6  ;;  %13304 = vst [vmem:[#allocation272_spill] sm:$0xff] %v10528_v4 }
 0x39e   : > { %v10509_v8 = vmax.f32 %v10499_v18, %v2665_v54  ;;  %v10512_v30 = vmax.f32 %v10501_v44, %v2680_v55  ;;  %v10532_v36 = vpop.f32.mrf.mxu0  ;;  %v10537_v60 = vpop.f32.mrf.mxu1 }
 0x39f   : > { %3084 = vperm.xlu1 %7498, %v10009_v40   ;;  %13305 = vst [vmem:[#allocation273_spill] sm:$0xff] %v10532_v36  ;;  %13306 = vst [vmem:[#allocation274_spill] sm:$0xff] %v10537_v60 }
 0x3a0   : > { %13299 = vst [vmem:[#allocation267_spill] sm:$0xff] %v10509_v8  ;;  %13300 = vst [vmem:[#allocation268_spill] sm:$0xff] %v10512_v30 }
 0x3a1   : > { %6092 = vst.msk [vmem:[#allocation2 + $0x138] sm:$0xff] %vm4642_vm1, %v10509_v8  ;;  %6095 = vst.msk [vmem:[#allocation2 + $0x150] sm:$0xff] %vm4642_vm1, %v10512_v30  ;;  %v3065_v1 = vpop.permute.xlu1 %3064 }
 0x3a2   : > { %v3378_v54 = vsub.f32 %v9456_v9, %v3065_v1  ;;  %v3379_v55 = vsub.f32 %v9461_v12, %v3065_v1  ;;  %v3380_v44 = vsub.f32 %v9458_v10, %v3065_v1  ;;  %v3381_v45 = vsub.f32 %v9463_v13, %v3065_v1 }
 0x3a3   : > { %4793 = vperm.xlu1 %7498, %v10523_v41  }
 0x3a4   : > { %v3650_v49 = vmul.f32 1.442695, %v3378_v54  ;;  %v3652_v48 = vmul.f32 1.442695, %v3379_v55  ;;  %v3654_v30 = vmul.f32 1.442695, %v3380_v44  ;;  %v10540_v55 = vpop.f32.mrf.mxu0 }
 0x3a5   : > { %v3656_v18 = vmul.f32 1.442695, %v3381_v45  ;;  %v3070_v38 = vpop.permute.xlu1 %3069  ;;  %13307 = vst [vmem:[#allocation275_spill] sm:$0xff] %v10540_v55 }
 0x3a6   : > { %7545 = vpow2.f32 %v3650_v49  ;;  %v3382_v9 = vsub.f32 %v9468_v16, %v3070_v38  ;;  %v3383_v12 = vsub.f32 %v9473_v19, %v3070_v38  ;;  %v3384_v10 = vsub.f32 %v9470_v17, %v3070_v38  ;;  %v10542_v49 = vpop.f32.mrf.mxu1  ;;  %v10544_v16 = vpop.f32.mrf.mxu0 }
 0x3a7   : > { %7547 = vpow2.f32 %v3652_v48  ;;  %v3385_v13 = vsub.f32 %v9475_v20, %v3070_v38  ;;  %13308 = vst [vmem:[#allocation276_spill] sm:$0xff] %v10542_v49  ;;  %13309 = vst [vmem:[#allocation277_spill] sm:$0xff] %v10544_v16  ;;  %v2706_v19 = vmax.f32 %v10466_v56, %v10473_v0 }
 0x3a8   : > { %7549 = vpow2.f32 %v3654_v30  ;;  %v3658_v1 = vmul.f32 1.442695, %v3382_v9  ;;  %v3660_v54 = vmul.f32 1.442695, %v3383_v12  ;;  %v3662_v44 = vmul.f32 1.442695, %v3384_v10  ;;  %v10546_v17 = vpop.f32.mrf.mxu1  ;;  %v10550_v20 = vpop.f32.mrf.mxu0 }
 0x3a9   : > { %7551 = vpow2.f32 %v3656_v18  ;;  %v3664_v45 = vmul.f32 1.442695, %v3385_v13  ;;  %13310 = vst [vmem:[#allocation278_spill] sm:$0xff] %v10546_v17  ;;  %13311 = vst [vmem:[#allocation279_spill] sm:$0xff] %v10550_v20  ;;  %v2707_v18 = vmax.f32 %v2706_v19, %v10469_v3 }
 0x3aa   : > { %7553 = vpow2.f32 %v3658_v1  ;;  %v10552_v30 = vpop.f32.mrf.mxu1  ;;  %v10555_v9 = vpop.f32.mrf.mxu0 }
 0x3ab   : > { %7555 = vpow2.f32 %v3660_v54  ;;  %13312 = vst [vmem:[#allocation280_spill] sm:$0xff] %v10552_v30  ;;  %13313 = vst [vmem:[#allocation281_spill] sm:$0xff] %v10555_v9 }
 0x3ac   : > { %7557 = vpow2.f32 %v3662_v44  ;;  %v10557_v1 = vpop.f32.mrf.mxu1  ;;  %v2708_v44 = vmax.f32 %v2707_v18, %v10475_v46  ;;  %v10560_v56 = vpop.f32.mrf.mxu0  ;;  %v2691_v18 = vmax.f32 %v10420_v53, %v10427_v35  ;;  %v13324_v46 = vld [vmem:[#allocation136_spill] sm:$0xff] }
 0x3ad   : > { %7559 = vpow2.f32 %v3664_v45  ;;  %13314 = vst [vmem:[#allocation282_spill] sm:$0xff] %v10557_v1  ;;  %13315 = vst [vmem:[#allocation283_spill] sm:$0xff] %v10560_v56 }
 0x3ae   : > { %v10566_v31 = vpop.f32.mrf.mxu0 }
 0x3af   : > { %13318 = vst [vmem:[#allocation286_spill] sm:$0xff] %v10566_v31 }
 0x3b3   : > { %v7546_v38 = vpop.eup %7545 }
 0x3b4   : > { %v7548_v48 = vpop.eup %7547 }
 0x3b5   : > { %v7550_v12 = vpop.eup %7549  ;;  %5239 = vmatprep.mubr.f32.mxu0 %v7548_v48  ;;  %v4278_v10 = vadd.f32 %v7548_v48, %v7546_v38  ;;  %v10564_v48 = vpop.f32.mrf.mxu1 }
 0x3b6   : > { %v7552_v13 = vpop.eup %7551  ;;  %5240 = vmatmul.mubr.f32.gmra.mxu0 %v7546_v38  ;;  %13317 = vst [vmem:[#allocation285_spill] sm:$0xff] %v10564_v48 }
 0x3b7   : > { %v7554_v54 = vpop.eup %7553  ;;  %5624 = vmatprep.mubr.f32.mxu1 %v7552_v13  ;;  %v4279_v45 = vadd.f32 %v7550_v12, %v4278_v10  ;;  %v10572_v10 = vpop.f32.mrf.mxu1 }
 0x3b8   : > { %v7556_v0 = vpop.eup %7555  ;;  %5625 = vmatmul.mubr.f32.gmra.mxu1 %v7550_v12  ;;  %13320 = vst [vmem:[#allocation288_spill] sm:$0xff] %v10572_v10 }
 0x3b9   : > { %v7558_v19 = vpop.eup %7557  ;;  %5244 = vmatprep.mubr.f32.mxu0 %v7556_v0  ;;  %v10562_v3 = vadd.f32 %v7552_v13, %v4279_v45  ;;  %v4283_v41 = vadd.f32 %v7556_v0, %v7554_v54  ;;  %v2859_v0 = vsub.f32 %v10017_v57, %v10024_v58  ;;  %v10576_v13 = vpop.f32.mrf.mxu0 }
 0x3ba   : > { %v7560_v52 = vpop.eup %7559  ;;  %5245 = vmatmul.mubr.f32.gmra.mxu0 %v7554_v54  ;;  %13321 = vst [vmem:[#allocation289_spill] sm:$0xff] %v10576_v13  ;;  %v2692_v54 = vmax.f32 %v2691_v18, %v10435_v27  ;;  %v10579_v45 = vpop.f32.mrf.mxu1 }
 0x3bb   : > { %13316 = vst [vmem:[#allocation284_spill] sm:$0xff] %v10562_v3  ;;  %5629 = vmatprep.mubr.f32.mxu1 %v7560_v52  ;;  %2709 = vmax.xlane.f32.xlu0 %v2708_v44  ;;  %v4284_v38 = vadd.f32 %v7558_v19, %v4283_v41  ;;  %13322 = vst [vmem:[#allocation290_spill] sm:$0xff] %v10579_v45  ;;  %v2932_v41 = vmul.f32 1.442695, %v2859_v0  ;;  %v10581_v44 = vpop.f32.mrf.mxu0  ;;  %v10594_v0 = vpop.permute.xlu0 %4788  ;;  %v13338_v3 = vld [vmem:[#allocation146_spill] sm:$0xff] }
 0x3bc   : > { %5630 = vmatmul.mubr.f32.gmra.mxu1 %v7558_v19  ;;  %13323 = vst [vmem:[#allocation291_spill] sm:$0xff] %v10581_v44  ;;  %v2693_v19 = vmax.f32 %v2692_v54, %v10439_v5  ;;  %v10598_v54 = vld [vmem:[#allocation2 + $0x160] sm:$0xff]  ;;  %13339 = vst [vmem:[#allocation146_spill] sm:$0xff] %v10620_v47 }
 0x3bd   : > { %v10570_v12 = vadd.f32 %v7560_v52, %v4284_v38  ;;  %v2856_v52 = vsub.f32 %v13324_v46, %v9975_v11  ;;  %v10586_v38 = vpop.f32.mrf.mxu1  ;;  %7561 = vpow2.f32 %v2932_v41  ;;  %v10588_v53 = vpop.f32.mrf.mxu0  ;;  %13330 = vst [vmem:[#allocation296_spill] sm:$0xff] %v10598_v54  ;;  %v13332_v11 = vld [vmem:[#allocation155_spill] sm:$0xff] }
 0x3be   : > { %13325 = vst [vmem:[#allocation136_spill] sm:$0xff] %v10586_v38  ;;  %13326 = vst [vmem:[#allocation292_spill] sm:$0xff] %v10588_v53 }
 0x3bf   : > { %13319 = vst [vmem:[#allocation287_spill] sm:$0xff] %v10570_v12  ;;  %v2926_v57 = vmul.f32 1.442695, %v2856_v52  ;;  %v10590_v58 = vpop.f32.mrf.mxu1  ;;  %v10592_v18 = vpop.f32.mrf.mxu0 }
 0x3c0   : > { %13327 = vst [vmem:[#allocation293_spill] sm:$0xff] %v10590_v58  ;;  %13328 = vst [vmem:[#allocation294_spill] sm:$0xff] %v10592_v18 }
 0x3c1   : > { %7563 = vpow2.f32 %v2926_v57  ;;  %v10596_v27 = vpop.f32.mrf.mxu1  ;;  %v10600_v5 = vpop.f32.mrf.mxu0 }
 0x3c2   : > { %13329 = vst [vmem:[#allocation295_spill] sm:$0xff] %v10596_v27  ;;  %13331 = vst [vmem:[#allocation297_spill] sm:$0xff] %v10600_v5  ;;  %v10615_v57 = vpop.permute.xlu1 %4778 }
 0x3c3   : > { %v10603_v41 = vpop.f32.mrf.mxu1  ;;  %v10610_v35 = vpop.f32.mrf.mxu0 }
 0x3c4   : > { %13333 = vst [vmem:[#allocation155_spill] sm:$0xff] %v10603_v41  ;;  %13336 = vst [vmem:[#allocation300_spill] sm:$0xff] %v10610_v35 }
 0x3c5   : > { %v10617_v12 = vpop.f32.mrf.mxu1  ;;  %v10622_v22 = vpop.f32.mrf.mxu0 }
 0x3c6   : > { %13337 = vst [vmem:[#allocation301_spill] sm:$0xff] %v10617_v12  ;;  %13340 = vst [vmem:[#allocation302_spill] sm:$0xff] %v10622_v22 }
 0x3c7   : > { %2694 = vmax.xlane.f32.xlu1 %v2693_v19 }
 0x3ca   : > { %v10608_v52 = vpop.eup %7561 }
 0x3cb   : > { %13335 = vst [vmem:[#allocation299_spill] sm:$0xff] %v10608_v52 }
 0x3ce   : > { %v10626_v37 = vpop.eup %7563 }
 0x3cf   : > { %13342 = vst [vmem:[#allocation304_spill] sm:$0xff] %v10626_v37 }
 0x3d1   : > { %3109 = vperm.xlu0 %7497, %v13332_v11  }
 0x3d2   : > { %v2690_v46 = vpop.xlane.xlu0 %2689 }
 0x3d3   : > { %v10606_v19 = vmax.f32 %v10598_v54, %v2690_v46  ;;  %v10624_v54 = vpop.f32.mrf.mxu1 }
 0x3d4   : > { %13341 = vst [vmem:[#allocation303_spill] sm:$0xff] %v10624_v54 }
 0x3d5   : > { %13334 = vst [vmem:[#allocation298_spill] sm:$0xff] %v10606_v19  ;;  %4818 = vperm.xlu0 %7497, %v10608_v52   ;;  %6097 = vst.msk [vmem:[#allocation2 + $0x160] sm:$0xff] %vm4642_vm1, %v10606_v19  ;;  %v10632_v19 = vpop.f32.mrf.mxu0  ;;  %v10636_v32 = vpop.f32.mrf.mxu1 }
 0x3d6   : > { %13344 = vst [vmem:[#allocation306_spill] sm:$0xff] %v10632_v19  ;;  %13345 = vst [vmem:[#allocation307_spill] sm:$0xff] %v10636_v32 }
 0x3d7   : > { %v10646_v5 = vpop.f32.mrf.mxu1 }
 0x3d8   : > { %3094 = vperm.xlu1 %7498, %v13338_v3   ;;  %13351 = vst [vmem:[#allocation17_spill] sm:$0xff] %v10646_v5  ;;  %v13357_v5 = vld [vmem:[#allocation22_spill] sm:$0xff] }
 0x3da   : > { %v2675_v46 = vpop.xlane.xlu1 %2674 }
 0x3db   : > { %v10629_v52 = vmax.f32 %v10620_v47, %v2675_v46  ;;  %v10642_v46 = vpop.f32.mrf.mxu0 }
 0x3dc   : > { %4803 = vperm.xlu1 %7498, %v10626_v37   ;;  %13350 = vst [vmem:[#allocation15_spill] sm:$0xff] %v10642_v46  ;;  %v2716_v46 = vmax.f32 %v10490_v21, %v10506_v34 }
 0x3dd   : > { %13343 = vst [vmem:[#allocation305_spill] sm:$0xff] %v10629_v52  ;;  %6094 = vst.msk [vmem:[#allocation2 + $0x148] sm:$0xff] %vm4642_vm1, %v10629_v52  ;;  %v10648_v35 = vpop.f32.mrf.mxu0 }
 0x3de   : > { %v3075_v8 = vpop.permute.xlu1 %3074  ;;  %13352 = vst [vmem:[#allocation16_spill] sm:$0xff] %v10648_v35 }
 0x3df   : > { %v3386_v51 = vsub.f32 %v13346_v50, %v3075_v8  ;;  %v3387_v23 = vsub.f32 %v13347_v25, %v3075_v8  ;;  %v3388_v28 = vsub.f32 %v13348_v15, %v3075_v8  ;;  %v3389_v24 = vsub.f32 %v13349_v26, %v3075_v8  ;;  %v10650_v50 = vpop.f32.mrf.mxu1  ;;  %v13354_v26 = vld [vmem:[#allocation19_spill] sm:$0xff]  ;;  %v13355_v8 = vld [vmem:[#allocation21_spill] sm:$0xff] }
 0x3e0   : > { %13353 = vst [vmem:[#allocation18_spill] sm:$0xff] %v10650_v50 }
 0x3e1   : > { %v3666_v47 = vmul.f32 1.442695, %v3386_v51  ;;  %v3668_v37 = vmul.f32 1.442695, %v3387_v23  ;;  %v3670_v12 = vmul.f32 1.442695, %v3388_v28  ;;  %v10660_v45 = vpop.f32.mrf.mxu1 }
 0x3e2   : > { %v10644_v41 = vpop.permute.xlu1 %4783  ;;  %v3672_v52 = vmul.f32 1.442695, %v3389_v24  ;;  %v13356_v23 = vld [vmem:[#allocation20_spill] sm:$0xff]  ;;  %13359 = vst [vmem:[#allocation21_spill] sm:$0xff] %v10660_v45 }
 0x3e3   : > { %7565 = vpow2.f32 %v3666_v47  ;;  %v10658_v47 = vpop.f32.mrf.mxu0 }
 0x3e4   : > { %7567 = vpow2.f32 %v3668_v37  ;;  %13358 = vst [vmem:[#allocation19_spill] sm:$0xff] %v10658_v47 }
 0x3e5   : > { %7569 = vpow2.f32 %v3670_v12 }
 0x3e6   : > { %v3080_v25 = vpop.permute.xlu1 %3079  ;;  %7571 = vpow2.f32 %v3672_v52  ;;  %v2717_v52 = vmax.f32 %v2716_v46, %v10495_v33  ;;  %v13367_v33 = vld [vmem:[#allocation149_spill] sm:$0xff] }
 0x3e7   : > { %v3390_v15 = vsub.f32 %v13354_v26, %v3080_v25  ;;  %v3391_v51 = vsub.f32 %v13355_v8, %v3080_v25  ;;  %v3392_v28 = vsub.f32 %v13356_v23, %v3080_v25  ;;  %v3393_v24 = vsub.f32 %v13357_v5, %v3080_v25  ;;  %v10663_v26 = vpop.f32.mrf.mxu0  ;;  %v10665_v8 = vpop.f32.mrf.mxu1 }
 0x3e8   : > { %13360 = vst [vmem:[#allocation20_spill] sm:$0xff] %v10663_v26  ;;  %13361 = vst [vmem:[#allocation22_spill] sm:$0xff] %v10665_v8  ;;  %v2718_v5 = vmax.f32 %v2717_v52, %v10514_v61  ;;  %v2861_v34 = vsub.f32 %v13367_v33, %v10064_v39 }
 0x3e9   : > { %v3674_v35 = vmul.f32 1.442695, %v3390_v15  ;;  %v3676_v37 = vmul.f32 1.442695, %v3391_v51  ;;  %v3678_v12 = vmul.f32 1.442695, %v3392_v28  ;;  %v10668_v25 = vpop.f32.mrf.mxu0  ;;  %v10670_v23 = vpop.f32.mrf.mxu1 }
 0x3ea   : > { %v3680_v38 = vmul.f32 1.442695, %v3393_v24  ;;  %13362 = vst [vmem:[#allocation308_spill] sm:$0xff] %v10668_v25  ;;  %13363 = vst [vmem:[#allocation309_spill] sm:$0xff] %v10670_v23 }
 0x3eb   : > { %7573 = vpow2.f32 %v3674_v35  ;;  %v10672_v46 = vpop.f32.mrf.mxu0 }
 0x3ec   : > { %7575 = vpow2.f32 %v3676_v37  ;;  %13364 = vst [vmem:[#allocation310_spill] sm:$0xff] %v10672_v46  ;;  %v2701_v37 = vmax.f32 %v10451_v2, %v10461_v59 }
 0x3ed   : > { %7577 = vpow2.f32 %v3678_v12  ;;  %v10676_v12 = vpop.f32.mrf.mxu1 }
 0x3ee   : > { %7579 = vpow2.f32 %v3680_v38  ;;  %13365 = vst [vmem:[#allocation311_spill] sm:$0xff] %v10676_v12  ;;  %v2702_v21 = vmax.f32 %v2701_v37, %v10455_v29  ;;  %v13373_v37 = vld [vmem:[#allocation140_spill] sm:$0xff] }
 0x3ef   : > { %v2858_v29 = vsub.f32 %v13373_v37, %v10009_v40 }
 0x3f0   : > { %v7566_v15 = vpop.eup %7565  ;;  %v2703_v39 = vmax.f32 %v2702_v21, %v10464_v63 }
 0x3f1   : > { %v7568_v51 = vpop.eup %7567 }
 0x3f2   : > { %v7570_v28 = vpop.eup %7569  ;;  %5249 = vmatprep.mubr.f32.mxu0 %v7568_v51  ;;  %v4288_v35 = vadd.f32 %v7568_v51, %v7566_v15  ;;  %v10682_v51 = vpop.f32.mrf.mxu0 }
 0x3f3   : > { %v7572_v24 = vpop.eup %7571  ;;  %5250 = vmatmul.mubr.f32.gmra.mxu0 %v7566_v15  ;;  %13368 = vst [vmem:[#allocation149_spill] sm:$0xff] %v10682_v51 }
 0x3f4   : > { %2719 = vmax.xlane.f32.xlu0 %v2718_v5  ;;  %5634 = vmatprep.mubr.f32.mxu1 %v7572_v24  ;;  %v4289_v38 = vadd.f32 %v7570_v28, %v4288_v35  ;;  %v10685_v35 = vpop.f32.mrf.mxu1 }
 0x3f5   : > { %5635 = vmatmul.mubr.f32.gmra.mxu1 %v7570_v28  ;;  %13369 = vst [vmem:[#allocation313_spill] sm:$0xff] %v10685_v35  ;;  %v2936_v28 = vmul.f32 1.442695, %v2861_v34 }
 0x3f6   : > { %v10678_v52 = vadd.f32 %v7572_v24, %v4289_v38  ;;  %v10687_v24 = vpop.f32.mrf.mxu0  ;;  %v10690_v33 = vpop.f32.mrf.mxu1 }
 0x3f7   : > { %13370 = vst [vmem:[#allocation314_spill] sm:$0xff] %v10687_v24  ;;  %13371 = vst [vmem:[#allocation315_spill] sm:$0xff] %v10690_v33  ;;  %7581 = vpow2.f32 %v2936_v28 }
 0x3f8   : > { %13366 = vst [vmem:[#allocation312_spill] sm:$0xff] %v10678_v52  ;;  %v7574_v61 = vpop.eup %7573  ;;  %v10698_v34 = vpop.f32.mrf.mxu1  ;;  %v2930_v52 = vmul.f32 1.442695, %v2858_v29  ;;  %v4708_v29 = vld [vmem:[#allocation4 + $0x1b0] sm:$0xff] }
 0x3f9   : > { %v7576_v15 = vpop.eup %7575  ;;  %13375 = vst [vmem:[#allocation317_spill] sm:$0xff] %v10698_v34 }
 0x3fa   : > { %v7578_v5 = vpop.eup %7577  ;;  %5254 = vmatprep.mubr.f32.mxu0 %v7576_v15  ;;  %v4293_v23 = vadd.f32 %v7576_v15, %v7574_v61  ;;  %v10696_v15 = vpop.f32.mrf.mxu0  ;;  %7583 = vpow2.f32 %v2930_v52 }
 0x3fb   : > { %v7580_v2 = vpop.eup %7579  ;;  %5255 = vmatmul.mubr.f32.gmra.mxu0 %v7574_v61  ;;  %13374 = vst [vmem:[#allocation140_spill] sm:$0xff] %v10696_v15  ;;  %v3090_v61 = vpop.permute.xlu0 %3089 }
 0x3fc   : > { %5639 = vmatprep.mubr.f32.mxu1 %v7580_v2  ;;  %v4294_v38 = vadd.f32 %v7578_v5, %v4293_v23  ;;  %v10700_v12 = vpop.f32.mrf.mxu0  ;;  %v10702_v23 = vpop.f32.mrf.mxu1 }
 0x3fd   : > { %5640 = vmatmul.mubr.f32.gmra.mxu1 %v7578_v5  ;;  %13376 = vst [vmem:[#allocation318_spill] sm:$0xff] %v10700_v12  ;;  %13377 = vst [vmem:[#allocation319_spill] sm:$0xff] %v10702_v23 }
 0x3fe   : > { %v10692_v59 = vadd.f32 %v7580_v2, %v4294_v38  ;;  %v4707_v2 = vld [vmem:[#allocation4 + $0xb0] sm:$0xff] }
 0x3ff   : > { %v10704_v21 = vpop.permute.xlu0 %4798  ;;  %v10706_v38 = vld [vmem:[#allocation2 + $0x170] sm:$0xff]  ;;  %v5091_v37 = vmul.f32 %v10483_v62, %v4707_v2  ;;  %v5092_v62 = vmul.f32 %v10615_v57, %v4708_v29 }
 0x400   : > { %13372 = vst [vmem:[#allocation316_spill] sm:$0xff] %v10692_v59  ;;  %2704 = vmax.xlane.f32.xlu1 %v2703_v39  ;;  %13378 = vst [vmem:[#allocation320_spill] sm:$0xff] %v10706_v38  ;;  %v13379_v39 = vld [vmem:[#allocation159_spill] sm:$0xff]  ;;  %v13388_v29 = vld [vmem:[#allocation25_spill] sm:$0xff] }
 0x404   : > { %v10713_v52 = vpop.eup %7581 }
 0x405   : > { %13381 = vst [vmem:[#allocation321_spill] sm:$0xff] %v10713_v52 }
 0x408   : > { %v5221_v5 = vpop.f32.mrf.mxu0 }
 0x40a   : > { %v5606_v40 = vpop.f32.mrf.mxu1  ;;  %v5223_v28 = vpop.f32.mrf.mxu0  ;;  %3119 = vperm.xlu0 %7497, %v13379_v39  }
 0x40b   : > { %v5607_v63 = vadd.f32 %v5606_v40, %v5221_v5  ;;  %v2700_v59 = vpop.xlane.xlu0 %2699  ;;  %v13382_v40 = vld [vmem:[#allocation152_spill] sm:$0xff] }
 0x40c   : > { %v5608_v34 = vpop.f32.mrf.mxu1  ;;  %v5226_v15 = vpop.f32.mrf.mxu0  ;;  %v10711_v23 = vmax.f32 %v10706_v38, %v2700_v59 }
 0x40d   : > { %v5925_v12 = vadd.f32 %v5607_v63, %v5091_v37  ;;  %v10720_v59 = vpop.eup %7583  ;;  %v10723_v63 = vld [vmem:[#allocation2 + $0x158] sm:$0xff] }
 0x40e   : > { %13380 = vst [vmem:[#allocation159_spill] sm:$0xff] %v10711_v23  ;;  %v5611_v25 = vpop.f32.mrf.mxu1  ;;  %v5228_v46 = vpop.f32.mrf.mxu0  ;;  %4828 = vperm.xlu0 %7497, %v10713_v52   ;;  %6099 = vst.msk [vmem:[#allocation2 + $0x170] sm:$0xff] %vm4642_vm1, %v10711_v23 }
 0x40f   : > { %5989 = vst [vmem:[#allocation4 + $0xb0] sm:$0xff] %v5925_v12  ;;  %v5612_v2 = vadd.f32 %v5611_v25, %v5226_v15  ;;  %13383 = vst [vmem:[#allocation152_spill] sm:$0xff] %v10720_v59  ;;  %v13385_v46 = vld [vmem:[#allocation29_spill] sm:$0xff]  ;;  %v13387_v12 = vld [vmem:[#allocation23_spill] sm:$0xff] }
 0x410   : > { %v5613_v5 = vpop.f32.mrf.mxu1  ;;  %13384 = vst [vmem:[#allocation322_spill] sm:$0xff] %v10723_v63  ;;  %v3399_v28 = vsub.f32 %v13385_v46, %v3090_v61  ;;  %v13392_v46 = vld [vmem:[#allocation27_spill] sm:$0xff] }
 0x411   : > { %v5926_v34 = vadd.f32 %v5612_v2, %v5092_v62  ;;  %3104 = vperm.xlu1 %7498, %v13382_v40   ;;  %v13389_v2 = vld [vmem:[#allocation24_spill] sm:$0xff]  ;;  %v3398_v50 = vsub.f32 %v13392_v46, %v3090_v61 }
 0x412   : > { %v3692_v57 = vmul.f32 1.442695, %v3399_v28 }
 0x413   : > { %5990 = vst [vmem:[#allocation4 + $0x1b0] sm:$0xff] %v5926_v34  ;;  %v13390_v34 = vld [vmem:[#allocation30_spill] sm:$0xff] }
 0x414   : > { %v3401_v38 = vsub.f32 %v13390_v34, %v3090_v61  ;;  %7585 = vpow2.f32 %v3692_v57 }
 0x415   : > { %4813 = vperm.xlu1 %7498, %v10720_v59   ;;  %v13391_v59 = vld [vmem:[#allocation26_spill] sm:$0xff] }
 0x417   : > { %v2685_v37 = vpop.xlane.xlu1 %2684 }
 0x418   : > { %v10727_v52 = vmax.f32 %v10723_v63, %v2685_v37 }
 0x41a   : > { %13386 = vst [vmem:[#allocation29_spill] sm:$0xff] %v10727_v52  ;;  %6096 = vst.msk [vmem:[#allocation2 + $0x158] sm:$0xff] %vm4642_vm1, %v10727_v52  ;;  %v13393_v52 = vld [vmem:[#allocation28_spill] sm:$0xff] }
 0x41b   : > { %v3085_v25 = vpop.permute.xlu1 %3084  ;;  %v3400_v28 = vsub.f32 %v13393_v52, %v3090_v61 }
 0x41c   : > { %v3394_v15 = vsub.f32 %v13387_v12, %v3085_v25  ;;  %v3395_v62 = vsub.f32 %v13388_v29, %v3085_v25  ;;  %v3396_v5 = vsub.f32 %v13389_v2, %v3085_v25  ;;  %v3397_v23 = vsub.f32 %v13391_v59, %v3085_v25 }
 0x41d   : > { %v2726_v12 = vmax.f32 %v10540_v55, %v10544_v16  ;;  %v3696_v29 = vmul.f32 1.442695, %v3401_v38  ;;  %v3690_v2 = vmul.f32 1.442695, %v3398_v50  ;;  %v3694_v34 = vmul.f32 1.442695, %v3400_v28 }
 0x41e   : > { %v3682_v33 = vmul.f32 1.442695, %v3394_v15  ;;  %v3684_v37 = vmul.f32 1.442695, %v3395_v62  ;;  %v3686_v63 = vmul.f32 1.442695, %v3396_v5  ;;  %v2711_v38 = vmax.f32 %v10477_v43, %v10481_v42 }
 0x41f   : > { %v3688_v35 = vmul.f32 1.442695, %v3397_v23  ;;  %v2727_v59 = vmax.f32 %v2726_v12, %v10542_v49  ;;  %v13405_v16 = vld [vmem:[#allocation38_spill] sm:$0xff] }
 0x420   : > { %7587 = vpow2.f32 %v3682_v33  ;;  %v2712_v46 = vmax.f32 %v2711_v38, %v10479_v14 }
 0x421   : > { %7589 = vpow2.f32 %v3684_v37  ;;  %v2728_v57 = vmax.f32 %v2727_v59, %v10546_v17  ;;  %v10742_v23 = vpop.eup %7585  ;;  %v10767_v17 = vld [vmem:[#allocation2 + $0x180] sm:$0xff] }
 0x422   : > { %7591 = vpow2.f32 %v3686_v63  ;;  %v13394_v63 = vld [vmem:[#allocation154_spill] sm:$0xff]  ;;  %v2713_v12 = vmax.f32 %v2712_v46, %v10485_v7  ;;  %13396 = vst [vmem:[#allocation23_spill] sm:$0xff] %v10767_v17 }
 0x423   : > { %7593 = vpow2.f32 %v3688_v35  ;;  %v2863_v25 = vsub.f32 %v13394_v63, %v13332_v11  ;;  %v4710_v63 = vld [vmem:[#allocation4 + $0x18] sm:$0xff] }
 0x424   : > { %7595 = vpow2.f32 %v3696_v29  ;;  %v13395_v29 = vld [vmem:[#allocation145_spill] sm:$0xff] }
 0x425   : > { %7597 = vpow2.f32 %v3690_v2  ;;  %v2940_v11 = vmul.f32 1.442695, %v2863_v25  ;;  %v2860_v2 = vsub.f32 %v13395_v29, %v13338_v3  ;;  %v5094_v29 = vmul.f32 %v10594_v0, %v4710_v63  ;;  %v13401_v63 = vld [vmem:[#allocation37_spill] sm:$0xff] }
 0x426   : > { %7599 = vpow2.f32 %v3694_v34  ;;  %v3100_v34 = vpop.permute.xlu0 %3099 }
 0x427   : > { %7601 = vpow2.f32 %v2940_v11  ;;  %v2934_v59 = vmul.f32 1.442695, %v2860_v2  ;;  %v3409_v55 = vsub.f32 %v13405_v16, %v3100_v34 }
 0x429   : > { %7603 = vpow2.f32 %v2934_v59 }
 0x42d   : > { %v7588_v61 = vpop.eup %7587  ;;  %2729 = vmax.xlane.f32.xlu0 %v2728_v57  ;;  %v4709_v57 = vld [vmem:[#allocation4 + $0xd8] sm:$0xff] }
 0x42e   : > { %v7590_v33 = vpop.eup %7589  ;;  %v5093_v38 = vmul.f32 %v10644_v41, %v4709_v57 }
 0x42f   : > { %v7592_v52 = vpop.eup %7591  ;;  %5259 = vmatprep.mubr.f32.mxu0 %v7590_v33  ;;  %v4298_v50 = vadd.f32 %v7590_v33, %v7588_v61 }
 0x430   : > { %v7594_v35 = vpop.eup %7593  ;;  %5260 = vmatmul.mubr.f32.gmra.mxu0 %v7588_v61 }
 0x431   : > { %5644 = vmatprep.mubr.f32.mxu1 %v7594_v35  ;;  %5264 = vmatprep.mubr.f32.mxu0 %v10742_v23  ;;  %v4299_v15 = vadd.f32 %v7592_v52, %v4298_v50  ;;  %v10749_v62 = vpop.eup %7595  ;;  %v10765_v50 = vpop.permute.xlu0 %4808 }
 0x432   : > { %5645 = vmatmul.mubr.f32.gmra.mxu1 %v7592_v52  ;;  %v10751_v5 = vpop.eup %7597 }
 0x433   : > { %5649 = vmatprep.mubr.f32.mxu1 %v10749_v62  ;;  %v10755_v37 = vadd.f32 %v7594_v35, %v4299_v15  ;;  %v10758_v28 = vpop.eup %7599 }
 0x434   : > { %5265 = vmatmul.mubr.f32.gmra.mxu0 %v10751_v5  ;;  %v10774_v57 = vpop.eup %7601 }
 0x435   : > { %13398 = vst [vmem:[#allocation25_spill] sm:$0xff] %v10774_v57 }
 0x436   : > { %5650 = vmatmul.mubr.f32.gmra.mxu1 %v10758_v28  ;;  %v10782_v0 = vpop.eup %7603 }
 0x437   : > { %13400 = vst [vmem:[#allocation24_spill] sm:$0xff] %v10782_v0 }
 0x439   : > { %2714 = vmax.xlane.f32.xlu1 %v2713_v12  ;;  %v13397_v12 = vld [vmem:[#allocation163_spill] sm:$0xff] }
 0x43d   : > { %v5231_v61 = vpop.f32.mrf.mxu0 }
 0x43f   : > { %v5616_v33 = vpop.f32.mrf.mxu1  ;;  %v5233_v52 = vpop.f32.mrf.mxu0 }
 0x440   : > { %v5617_v35 = vadd.f32 %v5616_v33, %v5231_v61  ;;  %v13399_v33 = vld [vmem:[#allocation157_spill] sm:$0xff] }
 0x441   : > { %v5618_v25 = vpop.f32.mrf.mxu1  ;;  %v5236_v15 = vpop.f32.mrf.mxu0 }
 0x442   : > { %v5927_v46 = vadd.f32 %v5617_v35, %v5093_v38  ;;  %v10780_v38 = vpop.permute.xlu1 %4793  ;;  %v10785_v35 = vld [vmem:[#allocation2 + $0x168] sm:$0xff]  ;;  %v3407_v25 = vsub.f32 %v13401_v63, %v3100_v34  ;;  %v13407_v63 = vld [vmem:[#allocation35_spill] sm:$0xff] }
 0x443   : > { %v5621_v3 = vpop.f32.mrf.mxu1  ;;  %v5238_v11 = vpop.f32.mrf.mxu0  ;;  %3129 = vperm.xlu0 %7497, %v13397_v12   ;;  %v3406_v14 = vsub.f32 %v13407_v63, %v3100_v34 }
 0x444   : > { %5991 = vst [vmem:[#allocation4 + $0xd8] sm:$0xff] %v5927_v46  ;;  %v5622_v2 = vadd.f32 %v5621_v3, %v5236_v15  ;;  %v2710_v59 = vpop.xlane.xlu0 %2709  ;;  %v3708_v3 = vmul.f32 1.442695, %v3407_v25 }
 0x445   : > { %v5623_v52 = vpop.f32.mrf.mxu1  ;;  %v10772_v41 = vmax.f32 %v10767_v17, %v2710_v59  ;;  %v13403_v59 = vld [vmem:[#allocation33_spill] sm:$0xff] }
 0x446   : > { %v5928_v61 = vadd.f32 %v5622_v2, %v5094_v29  ;;  %v13402_v29 = vld [vmem:[#allocation31_spill] sm:$0xff]  ;;  %7605 = vpow2.f32 %v3708_v3 }
 0x447   : > { %4838 = vperm.xlu0 %7497, %v10774_v57   ;;  %6101 = vst.msk [vmem:[#allocation2 + $0x180] sm:$0xff] %vm4642_vm1, %v10772_v41  ;;  %v13406_v57 = vld [vmem:[#allocation34_spill] sm:$0xff] }
 0x448   : > { %5992 = vst [vmem:[#allocation4 + $0x18] sm:$0xff] %v5928_v61  ;;  %v13404_v61 = vld [vmem:[#allocation32_spill] sm:$0xff] }
 0x44a   : > { %3114 = vperm.xlu1 %7498, %v13399_v33  }
 0x44e   : > { %4823 = vperm.xlu1 %7498, %v10782_v0   ;;  %v13408_v0 = vld [vmem:[#allocation36_spill] sm:$0xff] }
 0x44f   : > { %v3408_v25 = vsub.f32 %v13408_v0, %v3100_v34 }
 0x450   : > { %v2695_v15 = vpop.xlane.xlu1 %2694 }
 0x451   : > { %v10789_v46 = vmax.f32 %v10785_v35, %v2695_v15  ;;  %v3710_v16 = vmul.f32 1.442695, %v3408_v25 }
 0x453   : > { %6098 = vst.msk [vmem:[#allocation2 + $0x168] sm:$0xff] %vm4642_vm1, %v10789_v46 }
 0x454   : > { %v3095_v11 = vpop.permute.xlu1 %3094 }
 0x455   : > { %v3402_v2 = vsub.f32 %v13402_v29, %v3095_v11  ;;  %v3403_v52 = vsub.f32 %v13403_v59, %v3095_v11  ;;  %v3404_v49 = vsub.f32 %v13404_v61, %v3095_v11  ;;  %v3405_v17 = vsub.f32 %v13406_v57, %v3095_v11 }
 0x456   : > { %v2736_v29 = vmax.f32 %v10560_v56, %v10566_v31  ;;  %v3712_v59 = vmul.f32 1.442695, %v3409_v55  ;;  %v3706_v61 = vmul.f32 1.442695, %v3406_v14  ;;  %v2721_v55 = vmax.f32 %v10521_v6, %v10532_v36  ;;  %v13423_v31 = vld [vmem:[#allocation46_spill] sm:$0xff] }
 0x457   : > { %v3698_v43 = vmul.f32 1.442695, %v3402_v2  ;;  %v3700_v15 = vmul.f32 1.442695, %v3403_v52  ;;  %v3702_v7 = vmul.f32 1.442695, %v3404_v49 }
 0x458   : > { %v3704_v42 = vmul.f32 1.442695, %v3405_v17  ;;  %v2737_v57 = vmax.f32 %v2736_v29, %v10564_v48  ;;  %v10804_v17 = vpop.eup %7605  ;;  %v2722_v63 = vmax.f32 %v2721_v55, %v10528_v4 }
 0x459   : > { %7607 = vpow2.f32 %v3698_v43 }
 0x45a   : > { %7609 = vpow2.f32 %v3700_v15  ;;  %v2738_v49 = vmax.f32 %v2737_v57, %v10572_v10  ;;  %v2723_v29 = vmax.f32 %v2722_v63, %v10537_v60  ;;  %v10829_v10 = vld [vmem:[#allocation2 + $0x190] sm:$0xff] }
 0x45b   : > { %7611 = vpow2.f32 %v3702_v7  ;;  %13413 = vst [vmem:[#allocation27_spill] sm:$0xff] %v10829_v10 }
 0x45c   : > { %7613 = vpow2.f32 %v3704_v42  ;;  %v13409_v42 = vld [vmem:[#allocation158_spill] sm:$0xff] }
 0x45d   : > { %7615 = vpow2.f32 %v3712_v59  ;;  %v2865_v3 = vsub.f32 %v13409_v42, %v13379_v39  ;;  %v13412_v59 = vld [vmem:[#allocation151_spill] sm:$0xff]  ;;  %v4712_v42 = vld [vmem:[#allocation4 + $0x168] sm:$0xff] }
 0x45e   : > { %7617 = vpow2.f32 %v3706_v61  ;;  %v2862_v61 = vsub.f32 %v13412_v59, %v13382_v40  ;;  %v5096_v59 = vmul.f32 %v10704_v21, %v4712_v42  ;;  %v13419_v42 = vld [vmem:[#allocation45_spill] sm:$0xff] }
 0x45f   : > { %7619 = vpow2.f32 %v3710_v16  ;;  %v2944_v39 = vmul.f32 1.442695, %v2865_v3  ;;  %v3110_v16 = vpop.permute.xlu0 %3109 }
 0x460   : > { %v2938_v57 = vmul.f32 1.442695, %v2862_v61  ;;  %v3417_v56 = vsub.f32 %v13423_v31, %v3110_v16 }
 0x461   : > { %7621 = vpow2.f32 %v2944_v39 }
 0x462   : > { %7623 = vpow2.f32 %v2938_v57 }
 0x466   : > { %v7608_v34 = vpop.eup %7607  ;;  %2739 = vmax.xlane.f32.xlu0 %v2738_v49  ;;  %v4711_v49 = vld [vmem:[#allocation4 + $0x50] sm:$0xff] }
 0x467   : > { %v7610_v43 = vpop.eup %7609  ;;  %v5095_v55 = vmul.f32 %v10780_v38, %v4711_v49 }
 0x468   : > { %v7612_v0 = vpop.eup %7611  ;;  %5269 = vmatprep.mubr.f32.mxu0 %v7610_v43  ;;  %v4308_v7 = vadd.f32 %v7610_v43, %v7608_v34 }
 0x469   : > { %v7614_v14 = vpop.eup %7613  ;;  %5270 = vmatmul.mubr.f32.gmra.mxu0 %v7608_v34 }
 0x46a   : > { %5654 = vmatprep.mubr.f32.mxu1 %v7614_v14  ;;  %5274 = vmatprep.mubr.f32.mxu0 %v10804_v17  ;;  %v4309_v11 = vadd.f32 %v7612_v0, %v4308_v7  ;;  %v10811_v2 = vpop.eup %7615  ;;  %v10827_v7 = vpop.permute.xlu0 %4818 }
 0x46b   : > { %13410 = vst [vmem:[#allocation30_spill] sm:$0xff] %v10811_v2  ;;  %5655 = vmatmul.mubr.f32.gmra.mxu1 %v7612_v0  ;;  %v10813_v52 = vpop.eup %7617 }
 0x46c   : > { %5659 = vmatprep.mubr.f32.mxu1 %v10811_v2  ;;  %v10817_v15 = vadd.f32 %v7614_v14, %v4309_v11  ;;  %v10820_v25 = vpop.eup %7619 }
 0x46d   : > { %5275 = vmatmul.mubr.f32.gmra.mxu0 %v10813_v52  ;;  %13411 = vst [vmem:[#allocation26_spill] sm:$0xff] %v10820_v25 }
 0x46e   : > { %v10836_v49 = vpop.eup %7621 }
 0x46f   : > { %5660 = vmatmul.mubr.f32.gmra.mxu1 %v10820_v25  ;;  %13416 = vst [vmem:[#allocation154_spill] sm:$0xff] %v10836_v49  ;;  %v10844_v21 = vpop.eup %7623 }
 0x470   : > { %13418 = vst [vmem:[#allocation145_spill] sm:$0xff] %v10844_v21 }
 0x472   : > { %2724 = vmax.xlane.f32.xlu1 %v2723_v29  ;;  %v13414_v29 = vld [vmem:[#allocation170_spill] sm:$0xff] }
 0x476   : > { %v5241_v34 = vpop.f32.mrf.mxu0 }
 0x478   : > { %v5626_v43 = vpop.f32.mrf.mxu1  ;;  %v5243_v0 = vpop.f32.mrf.mxu0 }
 0x479   : > { %v5627_v14 = vadd.f32 %v5626_v43, %v5241_v34  ;;  %v13417_v43 = vld [vmem:[#allocation161_spill] sm:$0xff] }
 0x47a   : > { %v5628_v3 = vpop.f32.mrf.mxu1  ;;  %v5246_v11 = vpop.f32.mrf.mxu0 }
 0x47b   : > { %v5929_v63 = vadd.f32 %v5627_v14, %v5095_v55  ;;  %v10842_v55 = vpop.permute.xlu1 %4803  ;;  %v10847_v14 = vld [vmem:[#allocation2 + $0x178] sm:$0xff]  ;;  %v3415_v3 = vsub.f32 %v13419_v42, %v3110_v16  ;;  %v13425_v42 = vld [vmem:[#allocation43_spill] sm:$0xff] }
 0x47c   : > { %v5631_v40 = vpop.f32.mrf.mxu1  ;;  %v5248_v39 = vpop.f32.mrf.mxu0  ;;  %3139 = vperm.xlu0 %7497, %v13414_v29   ;;  %v3414_v4 = vsub.f32 %v13425_v42, %v3110_v16 }
 0x47d   : > { %5993 = vst [vmem:[#allocation4 + $0x50] sm:$0xff] %v5929_v63  ;;  %v5632_v61 = vadd.f32 %v5631_v40, %v5246_v11  ;;  %v2720_v57 = vpop.xlane.xlu0 %2719  ;;  %v3724_v40 = vmul.f32 1.442695, %v3415_v3 }
 0x47e   : > { %v5633_v0 = vpop.f32.mrf.mxu1  ;;  %v10834_v38 = vmax.f32 %v10829_v10, %v2720_v57  ;;  %v13421_v57 = vld [vmem:[#allocation41_spill] sm:$0xff] }
 0x47f   : > { %v5930_v34 = vadd.f32 %v5632_v61, %v5096_v59  ;;  %v13420_v59 = vld [vmem:[#allocation39_spill] sm:$0xff]  ;;  %7625 = vpow2.f32 %v3724_v40 }
 0x480   : > { %13415 = vst [vmem:[#allocation28_spill] sm:$0xff] %v10834_v38  ;;  %4848 = vperm.xlu0 %7497, %v10836_v49   ;;  %6103 = vst.msk [vmem:[#allocation2 + $0x190] sm:$0xff] %vm4642_vm1, %v10834_v38  ;;  %v13424_v49 = vld [vmem:[#allocation42_spill] sm:$0xff] }
 0x481   : > { %5994 = vst [vmem:[#allocation4 + $0x168] sm:$0xff] %v5930_v34  ;;  %v13422_v34 = vld [vmem:[#allocation40_spill] sm:$0xff] }
 0x483   : > { %3124 = vperm.xlu1 %7498, %v13417_v43  }
 0x487   : > { %4833 = vperm.xlu1 %7498, %v10844_v21   ;;  %v13426_v21 = vld [vmem:[#allocation44_spill] sm:$0xff] }
 0x488   : > { %v3416_v3 = vsub.f32 %v13426_v21, %v3110_v16 }
 0x489   : > { %v2705_v11 = vpop.xlane.xlu1 %2704 }
 0x48a   : > { %v10851_v63 = vmax.f32 %v10847_v14, %v2705_v11  ;;  %v3726_v31 = vmul.f32 1.442695, %v3416_v3 }
 0x48c   : > { %6100 = vst.msk [vmem:[#allocation2 + $0x178] sm:$0xff] %vm4642_vm1, %v10851_v63 }
 0x48d   : > { %v3105_v39 = vpop.permute.xlu1 %3104 }
 0x48e   : > { %v3410_v61 = vsub.f32 %v13420_v59, %v3105_v39  ;;  %v3411_v0 = vsub.f32 %v13421_v57, %v3105_v39  ;;  %v3412_v48 = vsub.f32 %v13422_v34, %v3105_v39  ;;  %v3413_v10 = vsub.f32 %v13424_v49, %v3105_v39 }
 0x48f   : > { %v2746_v59 = vmax.f32 %v10588_v53, %v10592_v18  ;;  %v3728_v57 = vmul.f32 1.442695, %v3417_v56  ;;  %v3722_v34 = vmul.f32 1.442695, %v3414_v4  ;;  %v2731_v56 = vmax.f32 %v10550_v20, %v10555_v9  ;;  %v13444_v53 = vld [vmem:[#allocation54_spill] sm:$0xff] }
 0x490   : > { %v3714_v6 = vmul.f32 1.442695, %v3410_v61  ;;  %v3716_v11 = vmul.f32 1.442695, %v3411_v0  ;;  %v3718_v60 = vmul.f32 1.442695, %v3412_v48 }
 0x491   : > { %v3720_v36 = vmul.f32 1.442695, %v3413_v10  ;;  %v2747_v49 = vmax.f32 %v2746_v59, %v10590_v58  ;;  %v10866_v10 = vpop.eup %7625  ;;  %v2732_v42 = vmax.f32 %v2731_v56, %v10552_v30  ;;  %v10891_v56 = vld [vmem:[#allocation2 + $0x1a0] sm:$0xff] }
 0x492   : > { %7627 = vpow2.f32 %v3714_v6  ;;  %13427 = vst [vmem:[#allocation163_spill] sm:$0xff] %v10866_v10  ;;  %13434 = vst [vmem:[#allocation33_spill] sm:$0xff] %v10891_v56 }
 0x493   : > { %7629 = vpow2.f32 %v3716_v11  ;;  %v2748_v48 = vmax.f32 %v2747_v49, %v10596_v27  ;;  %v2733_v59 = vmax.f32 %v2732_v42, %v10557_v1  ;;  %v13440_v27 = vld [vmem:[#allocation53_spill] sm:$0xff] }
 0x494   : > { %7631 = vpow2.f32 %v3718_v60  ;;  %v13428_v60 = vld [vmem:[#allocation162_spill] sm:$0xff] }
 0x495   : > { %7633 = vpow2.f32 %v3720_v36  ;;  %v2867_v40 = vsub.f32 %v13428_v60, %v13397_v12 }
 0x496   : > { %7635 = vpow2.f32 %v3728_v57  ;;  %v13432_v57 = vld [vmem:[#allocation156_spill] sm:$0xff] }
 0x497   : > { %7637 = vpow2.f32 %v3722_v34  ;;  %v2948_v12 = vmul.f32 1.442695, %v2867_v40  ;;  %v2864_v34 = vsub.f32 %v13432_v57, %v13399_v33  ;;  %v4714_v57 = vld [vmem:[#allocation4 + $0x48] sm:$0xff] }
 0x498   : > { %7639 = vpow2.f32 %v3726_v31  ;;  %v3120_v31 = vpop.permute.xlu0 %3119 }
 0x499   : > { %7641 = vpow2.f32 %v2948_v12  ;;  %v2942_v49 = vmul.f32 1.442695, %v2864_v34 }
 0x49b   : > { %7643 = vpow2.f32 %v2942_v49  ;;  %v13437_v49 = vld [vmem:[#allocation166_spill] sm:$0xff] }
 0x49f   : > { %v7628_v16 = vpop.eup %7627  ;;  %2749 = vmax.xlane.f32.xlu0 %v2748_v48  ;;  %v10888_v48 = vpop.permute.xlu0 %4828 }
 0x4a0   : > { %v7630_v6 = vpop.eup %7629 }
 0x4a1   : > { %v7632_v21 = vpop.eup %7631  ;;  %5279 = vmatprep.mubr.f32.mxu0 %v7630_v6  ;;  %v4318_v4 = vadd.f32 %v7630_v6, %v7628_v16 }
 0x4a2   : > { %v7634_v36 = vpop.eup %7633  ;;  %5280 = vmatmul.mubr.f32.gmra.mxu0 %v7628_v16  ;;  %v4713_v16 = vld [vmem:[#allocation4 + $0x130] sm:$0xff] }
 0x4a3   : > { %5664 = vmatprep.mubr.f32.mxu1 %v7634_v36  ;;  %5284 = vmatprep.mubr.f32.mxu0 %v10866_v10  ;;  %v4319_v39 = vadd.f32 %v7632_v21, %v4318_v4  ;;  %v10873_v61 = vpop.eup %7635  ;;  %v5097_v60 = vmul.f32 %v10842_v55, %v4713_v16  ;;  %v13673_v10 = vld [vmem:[#allocation122_spill] sm:$0xff] }
 0x4a4   : > { %13429 = vst [vmem:[#allocation157_spill] sm:$0xff] %v10873_v61  ;;  %5665 = vmatmul.mubr.f32.gmra.mxu1 %v7632_v21  ;;  %v10875_v0 = vpop.eup %7637  ;;  %v13433_v21 = vld [vmem:[#allocation178_spill] sm:$0xff] }
 0x4a5   : > { %13430 = vst [vmem:[#allocation37_spill] sm:$0xff] %v10875_v0  ;;  %5669 = vmatprep.mubr.f32.mxu1 %v10873_v61  ;;  %v10879_v11 = vadd.f32 %v7634_v36, %v4319_v39  ;;  %v10882_v3 = vpop.eup %7639 }
 0x4a6   : > { %5285 = vmatmul.mubr.f32.gmra.mxu0 %v10875_v0  ;;  %13431 = vst [vmem:[#allocation31_spill] sm:$0xff] %v10882_v3  ;;  %v10894_v33 = vpop.eup %7641 }
 0x4a7   : > { %13435 = vst [vmem:[#allocation32_spill] sm:$0xff] %v10894_v33 }
 0x4a8   : > { %5670 = vmatmul.mubr.f32.gmra.mxu1 %v10882_v3  ;;  %v13671_v3 = vld [vmem:[#allocation121_spill] sm:$0xff] }
 0x4ab   : > { %2734 = vmax.xlane.f32.xlu1 %v2733_v59 }
 0x4b3   : > { %v5251_v6 = vpop.f32.mrf.mxu0 }
 0x4b5   : > { %3149 = vperm.xlu0 %7497, %v13433_v21   ;;  %v5636_v4 = vpop.f32.mrf.mxu1  ;;  %v5253_v36 = vpop.f32.mrf.mxu0 }
 0x4b6   : > { %v5637_v40 = vadd.f32 %v5636_v4, %v5251_v6  ;;  %v2730_v39 = vpop.xlane.xlu0 %2729  ;;  %v5098_v6 = vmul.f32 %v10765_v50, %v4714_v57  ;;  %v10904_v4 = vpop.permute.xlu1 %4813 }
 0x4b7   : > { %v5638_v42 = vpop.f32.mrf.mxu1  ;;  %v10897_v12 = vmax.f32 %v10891_v56, %v2730_v39  ;;  %v10906_v39 = vpop.eup %7643  ;;  %v13445_v56 = vld [vmem:[#allocation50_spill] sm:$0xff] }
 0x4b8   : > { %v5931_v59 = vadd.f32 %v5637_v40, %v5097_v60  ;;  %13438 = vst [vmem:[#allocation34_spill] sm:$0xff] %v10906_v39  ;;  %v10909_v42 = vld [vmem:[#allocation2 + $0x188] sm:$0xff] }
 0x4b9   : > { %13436 = vst [vmem:[#allocation38_spill] sm:$0xff] %v10897_v12  ;;  %4858 = vperm.xlu0 %7497, %v10894_v33   ;;  %6105 = vst.msk [vmem:[#allocation2 + $0x1a0] sm:$0xff] %vm4642_vm1, %v10897_v12  ;;  %v3425_v33 = vsub.f32 %v13444_v53, %v3120_v31 }
 0x4ba   : > { %5995 = vst [vmem:[#allocation4 + $0x130] sm:$0xff] %v5931_v59  ;;  %13439 = vst [vmem:[#allocation35_spill] sm:$0xff] %v10909_v42  ;;  %v3423_v59 = vsub.f32 %v13440_v27, %v3120_v31 }
 0x4bb   : > { %v5256_v34 = vpop.f32.mrf.mxu0 }
 0x4bc   : > { %3134 = vperm.xlu1 %7498, %v13437_v49   ;;  %v3740_v50 = vmul.f32 1.442695, %v3423_v59 }
 0x4bd   : > { %v5641_v55 = vpop.f32.mrf.mxu1  ;;  %v5258_v16 = vpop.f32.mrf.mxu0 }
 0x4be   : > { %v5642_v36 = vadd.f32 %v5641_v55, %v5256_v34  ;;  %v13441_v34 = vld [vmem:[#allocation47_spill] sm:$0xff]  ;;  %v13442_v16 = vld [vmem:[#allocation49_spill] sm:$0xff]  ;;  %7645 = vpow2.f32 %v3740_v50 }
 0x4bf   : > { %v5643_v60 = vpop.f32.mrf.mxu1 }
 0x4c0   : > { %v5932_v40 = vadd.f32 %v5642_v36, %v5098_v6  ;;  %4843 = vperm.xlu1 %7498, %v10906_v39   ;;  %v13443_v36 = vld [vmem:[#allocation48_spill] sm:$0xff] }
 0x4c1   : > { %v13447_v39 = vld [vmem:[#allocation52_spill] sm:$0xff] }
 0x4c2   : > { %5996 = vst [vmem:[#allocation4 + $0x48] sm:$0xff] %v5932_v40  ;;  %v2715_v58 = vpop.xlane.xlu1 %2714  ;;  %v13446_v40 = vld [vmem:[#allocation51_spill] sm:$0xff]  ;;  %v3424_v59 = vsub.f32 %v13447_v39, %v3120_v31 }
 0x4c3   : > { %v10913_v18 = vmax.f32 %v10909_v42, %v2715_v58  ;;  %v3422_v30 = vsub.f32 %v13446_v40, %v3120_v31  ;;  %v13452_v40 = vld [vmem:[#allocation290_spill] sm:$0xff] }
 0x4c4   : > { %v3742_v53 = vmul.f32 1.442695, %v3424_v59 }
 0x4c5   : > { %6102 = vst.msk [vmem:[#allocation2 + $0x188] sm:$0xff] %vm4642_vm1, %v10913_v18 }
 0x4c6   : > { %v3115_v57 = vpop.permute.xlu1 %3114 }
 0x4c7   : > { %v3418_v55 = vsub.f32 %v13441_v34, %v3115_v57  ;;  %v3419_v6 = vsub.f32 %v13442_v16, %v3115_v57  ;;  %v3420_v60 = vsub.f32 %v13443_v36, %v3115_v57  ;;  %v3421_v27 = vsub.f32 %v13445_v56, %v3115_v57 }
 0x4c8   : > { %v2756_v34 = vmax.f32 %v10622_v22, %v10632_v19  ;;  %v3744_v16 = vmul.f32 1.442695, %v3425_v33  ;;  %v3738_v36 = vmul.f32 1.442695, %v3422_v30  ;;  %v2741_v33 = vmax.f32 %v10576_v13, %v10581_v44 }
 0x4c9   : > { %v3730_v20 = vmul.f32 1.442695, %v3418_v55  ;;  %v3732_v58 = vmul.f32 1.442695, %v3419_v6  ;;  %v3734_v1 = vmul.f32 1.442695, %v3420_v60 }
 0x4ca   : > { %v3736_v9 = vmul.f32 1.442695, %v3421_v27  ;;  %v2757_v56 = vmax.f32 %v2756_v34, %v10624_v54  ;;  %v13460_v54 = vld [vmem:[#allocation174_spill] sm:$0xff] }
 0x4cb   : > { %7647 = vpow2.f32 %v3730_v20  ;;  %v10928_v57 = vpop.eup %7645 }
 0x4cc   : > { %7649 = vpow2.f32 %v3732_v58  ;;  %v2758_v50 = vmax.f32 %v2757_v56, %v10636_v32  ;;  %13448 = vst [vmem:[#allocation36_spill] sm:$0xff] %v10928_v57  ;;  %v2742_v58 = vmax.f32 %v2741_v33, %v13452_v40  ;;  %v13457_v33 = vld [vmem:[#allocation186_spill] sm:$0xff] }
 0x4cd   : > { %7651 = vpow2.f32 %v3734_v1  ;;  %v13449_v1 = vld [vmem:[#allocation167_spill] sm:$0xff] }
 0x4ce   : > { %7653 = vpow2.f32 %v3736_v9  ;;  %v2869_v55 = vsub.f32 %v13449_v1, %v13414_v29 }
 0x4cf   : > { %7655 = vpow2.f32 %v3744_v16  ;;  %v13454_v16 = vld [vmem:[#allocation136_spill] sm:$0xff] }
 0x4d0   : > { %7657 = vpow2.f32 %v3738_v36  ;;  %v2952_v29 = vmul.f32 1.442695, %v2869_v55  ;;  %v2743_v36 = vmax.f32 %v2742_v58, %v13454_v16 }
 0x4d1   : > { %7659 = vpow2.f32 %v3742_v53  ;;  %v13455_v53 = vld [vmem:[#allocation160_spill] sm:$0xff] }
 0x4d2   : > { %v2866_v56 = vsub.f32 %v13455_v53, %v13417_v43  ;;  %7661 = vpow2.f32 %v2952_v29  ;;  %v4716_v53 = vld [vmem:[#allocation4 + $0x110] sm:$0xff] }
 0x4d3   : > { %v5100_v22 = vmul.f32 %v10827_v7, %v4716_v53  ;;  %v13466_v53 = vld [vmem:[#allocation56_spill] sm:$0xff] }
 0x4d8   : > { %v7648_v31 = vpop.eup %7647  ;;  %2759 = vmax.xlane.f32.xlu0 %v2758_v50  ;;  %v3130_v50 = vpop.permute.xlu0 %3129 }
 0x4d9   : > { %v7650_v20 = vpop.eup %7649 }
 0x4da   : > { %v7652_v39 = vpop.eup %7651  ;;  %5289 = vmatprep.mubr.f32.mxu0 %v7650_v20  ;;  %v4328_v30 = vadd.f32 %v7650_v20, %v7648_v31 }
 0x4db   : > { %v7654_v9 = vpop.eup %7653  ;;  %5290 = vmatmul.mubr.f32.gmra.mxu0 %v7648_v31  ;;  %v2946_v31 = vmul.f32 1.442695, %v2866_v56 }
 0x4dc   : > { %5674 = vmatprep.mubr.f32.mxu1 %v7654_v9  ;;  %5294 = vmatprep.mubr.f32.mxu0 %v10928_v57  ;;  %v4329_v6 = vadd.f32 %v7652_v39, %v4328_v30  ;;  %v10935_v60 = vpop.eup %7655  ;;  %v10950_v20 = vpop.permute.xlu0 %4838 }
 0x4dd   : > { %13450 = vst [vmem:[#allocation158_spill] sm:$0xff] %v10935_v60  ;;  %5675 = vmatmul.mubr.f32.gmra.mxu1 %v7652_v39  ;;  %v10937_v27 = vpop.eup %7657  ;;  %7663 = vpow2.f32 %v2946_v31  ;;  %v10952_v39 = vld [vmem:[#allocation2 + $0x1b0] sm:$0xff] }
 0x4de   : > { %13451 = vst [vmem:[#allocation151_spill] sm:$0xff] %v10937_v27  ;;  %5679 = vmatprep.mubr.f32.mxu1 %v10935_v60  ;;  %v10941_v59 = vadd.f32 %v7654_v9, %v4329_v6  ;;  %v10944_v34 = vpop.eup %7659  ;;  %13456 = vst [vmem:[#allocation161_spill] sm:$0xff] %v10952_v39  ;;  %v4715_v9 = vld [vmem:[#allocation4 + $0x180] sm:$0xff]  ;;  %v13470_v60 = vld [vmem:[#allocation60_spill] sm:$0xff] }
 0x4df   : > { %5295 = vmatmul.mubr.f32.gmra.mxu0 %v10937_v27  ;;  %13453 = vst [vmem:[#allocation170_spill] sm:$0xff] %v10944_v34  ;;  %v10958_v6 = vpop.eup %7661  ;;  %v5099_v29 = vmul.f32 %v10904_v4, %v4715_v9  ;;  %v10971_v4 = vld [vmem:[#allocation2 + $0x198] sm:$0xff]  ;;  %v13463_v9 = vld [vmem:[#allocation61_spill] sm:$0xff] }
 0x4e0   : > { %13459 = vst [vmem:[#allocation39_spill] sm:$0xff] %v10958_v6  ;;  %13462 = vst [vmem:[#allocation40_spill] sm:$0xff] %v10971_v4 }
 0x4e1   : > { %5680 = vmatmul.mubr.f32.gmra.mxu1 %v10944_v34 }
 0x4e4   : > { %2744 = vmax.xlane.f32.xlu1 %v2743_v36 }
 0x4ee   : > { %3159 = vperm.xlu0 %7497, %v13457_v33  }
 0x4ef   : > { %v2740_v30 = vpop.xlane.xlu0 %2739 }
 0x4f0   : > { %v5261_v1 = vpop.f32.mrf.mxu0  ;;  %v10956_v55 = vmax.f32 %v10952_v39, %v2740_v30  ;;  %v10966_v39 = vpop.permute.xlu1 %4823 }
 0x4f2   : > { %13458 = vst [vmem:[#allocation45_spill] sm:$0xff] %v10956_v55  ;;  %v5646_v43 = vpop.f32.mrf.mxu1  ;;  %v5263_v58 = vpop.f32.mrf.mxu0  ;;  %4868 = vperm.xlu0 %7497, %v10958_v6   ;;  %6107 = vst.msk [vmem:[#allocation2 + $0x1b0] sm:$0xff] %vm4642_vm1, %v10956_v55 }
 0x4f3   : > { %v5647_v36 = vadd.f32 %v5646_v43, %v5261_v1  ;;  %v10968_v6 = vpop.eup %7663  ;;  %v3431_v1 = vsub.f32 %v13463_v9, %v3130_v50 }
 0x4f4   : > { %v5648_v56 = vpop.f32.mrf.mxu1  ;;  %v5266_v31 = vpop.f32.mrf.mxu0  ;;  %13461 = vst [vmem:[#allocation41_spill] sm:$0xff] %v10968_v6 }
 0x4f5   : > { %v5933_v32 = vadd.f32 %v5647_v36, %v5099_v29  ;;  %3144 = vperm.xlu1 %7498, %v13460_v54   ;;  %v13464_v29 = vld [vmem:[#allocation55_spill] sm:$0xff] }
 0x4f6   : > { %v5651_v30 = vpop.f32.mrf.mxu1  ;;  %v5268_v19 = vpop.f32.mrf.mxu0 }
 0x4f7   : > { %5997 = vst [vmem:[#allocation4 + $0x180] sm:$0xff] %v5933_v32  ;;  %v5652_v58 = vadd.f32 %v5651_v30, %v5266_v31  ;;  %v3756_v32 = vmul.f32 1.442695, %v3431_v1  ;;  %v13467_v31 = vld [vmem:[#allocation62_spill] sm:$0xff]  ;;  %v3432_v1 = vsub.f32 %v13470_v60, %v3130_v50 }
 0x4f8   : > { %v5653_v40 = vpop.f32.mrf.mxu1  ;;  %v3433_v30 = vsub.f32 %v13467_v31, %v3130_v50 }
 0x4f9   : > { %v5934_v13 = vadd.f32 %v5652_v58, %v5100_v22  ;;  %4853 = vperm.xlu1 %7498, %v10968_v6   ;;  %v13465_v40 = vld [vmem:[#allocation57_spill] sm:$0xff]  ;;  %v13468_v58 = vld [vmem:[#allocation58_spill] sm:$0xff]  ;;  %7665 = vpow2.f32 %v3756_v32  ;;  %v3758_v31 = vmul.f32 1.442695, %v3432_v1  ;;  %v13477_v1 = vld [vmem:[#allocation155_spill] sm:$0xff] }
 0x4fb   : > { %5998 = vst [vmem:[#allocation4 + $0x110] sm:$0xff] %v5934_v13  ;;  %v2725_v43 = vpop.xlane.xlu1 %2724  ;;  %v13469_v13 = vld [vmem:[#allocation59_spill] sm:$0xff] }
 0x4fc   : > { %v10975_v19 = vmax.f32 %v10971_v4, %v2725_v43  ;;  %v3430_v16 = vsub.f32 %v13469_v13, %v3130_v50  ;;  %v13626_v4 = vld [vmem:[#allocation227_spill] sm:$0xff] }
 0x4fe   : > { %6104 = vst.msk [vmem:[#allocation2 + $0x198] sm:$0xff] %vm4642_vm1, %v10975_v19 }
 0x4ff   : > { %v3125_v7 = vpop.permute.xlu1 %3124 }
 0x500   : > { %v3426_v36 = vsub.f32 %v13464_v29, %v3125_v7  ;;  %v3427_v22 = vsub.f32 %v13465_v40, %v3125_v7  ;;  %v3428_v56 = vsub.f32 %v13466_v53, %v3125_v7  ;;  %v3429_v9 = vsub.f32 %v13468_v58, %v3125_v7 }
 0x501   : > { %v2766_v29 = vmax.f32 %v10658_v47, %v10663_v26  ;;  %v3760_v40 = vmul.f32 1.442695, %v3433_v30  ;;  %v3754_v53 = vmul.f32 1.442695, %v3430_v16  ;;  %v13486_v47 = vld [vmem:[#allocation182_spill] sm:$0xff] }
 0x502   : > { %v3746_v44 = vmul.f32 1.442695, %v3426_v36  ;;  %v3748_v43 = vmul.f32 1.442695, %v3427_v22  ;;  %v3750_v6 = vmul.f32 1.442695, %v3428_v56 }
 0x503   : > { %v3752_v55 = vmul.f32 1.442695, %v3429_v9  ;;  %v2767_v7 = vmax.f32 %v2766_v29, %v10660_v45  ;;  %v13472_v22 = vld [vmem:[#allocation300_spill] sm:$0xff]  ;;  %v13473_v56 = vld [vmem:[#allocation297_spill] sm:$0xff] }
 0x504   : > { %7667 = vpow2.f32 %v3746_v44  ;;  %v2751_v30 = vmax.f32 %v13473_v56, %v13472_v22  ;;  %v11028_v56 = vpop.permute.xlu1 %4833 }
 0x505   : > { %7669 = vpow2.f32 %v3748_v43  ;;  %v2768_v32 = vmax.f32 %v2767_v7, %v10665_v8 }
 0x506   : > { %7671 = vpow2.f32 %v3750_v6  ;;  %v10990_v36 = vpop.eup %7665  ;;  %v13474_v6 = vld [vmem:[#allocation175_spill] sm:$0xff]  ;;  %v2752_v29 = vmax.f32 %v2751_v30, %v13477_v1 }
 0x507   : > { %7673 = vpow2.f32 %v3752_v55  ;;  %13471 = vst [vmem:[#allocation46_spill] sm:$0xff] %v10990_v36  ;;  %v2871_v58 = vsub.f32 %v13474_v6, %v13433_v21 }
 0x508   : > { %7675 = vpow2.f32 %v3760_v40 }
 0x509   : > { %7677 = vpow2.f32 %v3754_v53  ;;  %v2956_v21 = vmul.f32 1.442695, %v2871_v58  ;;  %v4717_v58 = vld [vmem:[#allocation4 + $0x118] sm:$0xff] }
 0x50a   : > { %7679 = vpow2.f32 %v3758_v31  ;;  %v13480_v31 = vld [vmem:[#allocation301_spill] sm:$0xff] }
 0x50b   : > { %v2753_v7 = vmax.f32 %v2752_v29, %v13480_v31  ;;  %7681 = vpow2.f32 %v2956_v21 }
 0x511   : > { %v7668_v60 = vpop.eup %7667  ;;  %2769 = vmax.xlane.f32.xlu0 %v2768_v32  ;;  %v13481_v32 = vld [vmem:[#allocation164_spill] sm:$0xff] }
 0x512   : > { %v7670_v44 = vpop.eup %7669 }
 0x513   : > { %v7672_v50 = vpop.eup %7671  ;;  %5299 = vmatprep.mubr.f32.mxu0 %v7670_v44  ;;  %v4338_v16 = vadd.f32 %v7670_v44, %v7668_v60  ;;  %v3140_v44 = vpop.permute.xlu0 %3139 }
 0x514   : > { %v7674_v55 = vpop.eup %7673  ;;  %5300 = vmatmul.mubr.f32.gmra.mxu0 %v7668_v60  ;;  %v2868_v60 = vsub.f32 %v13481_v32, %v13437_v49 }
 0x515   : > { %5684 = vmatprep.mubr.f32.mxu1 %v7674_v55  ;;  %5304 = vmatprep.mubr.f32.mxu0 %v10990_v36  ;;  %v4339_v9 = vadd.f32 %v7672_v50, %v4338_v16  ;;  %v10997_v13 = vpop.eup %7675  ;;  %v11014_v16 = vld [vmem:[#allocation2 + $0x1c0] sm:$0xff] }
 0x516   : > { %13475 = vst [vmem:[#allocation42_spill] sm:$0xff] %v10997_v13  ;;  %5685 = vmatmul.mubr.f32.gmra.mxu1 %v7672_v50  ;;  %v10999_v43 = vpop.eup %7677  ;;  %v2950_v50 = vmul.f32 1.442695, %v2868_v60  ;;  %13482 = vst [vmem:[#allocation156_spill] sm:$0xff] %v11014_v16  ;;  %v4718_v60 = vld [vmem:[#allocation4 + $0x98] sm:$0xff] }
 0x517   : > { %13476 = vst [vmem:[#allocation43_spill] sm:$0xff] %v10999_v43  ;;  %5689 = vmatprep.mubr.f32.mxu1 %v10997_v13  ;;  %v11003_v40 = vadd.f32 %v7674_v55, %v4339_v9  ;;  %v11006_v53 = vpop.eup %7679  ;;  %v11012_v30 = vpop.permute.xlu0 %4848  ;;  %v13483_v55 = vld [vmem:[#allocation194_spill] sm:$0xff]  ;;  %v5102_v1 = vmul.f32 %v10888_v48, %v4718_v60  ;;  %v13491_v48 = vld [vmem:[#allocation63_spill] sm:$0xff] }
 0x518   : > { %5305 = vmatmul.mubr.f32.gmra.mxu0 %v10999_v43  ;;  %13479 = vst [vmem:[#allocation162_spill] sm:$0xff] %v11006_v53  ;;  %7683 = vpow2.f32 %v2950_v50  ;;  %v11020_v29 = vpop.eup %7681  ;;  %v13497_v43 = vld [vmem:[#allocation68_spill] sm:$0xff] }
 0x519   : > { %13478 = vst [vmem:[#allocation44_spill] sm:$0xff] %v11003_v40  ;;  %13485 = vst [vmem:[#allocation166_spill] sm:$0xff] %v11020_v29 }
 0x51a   : > { %5690 = vmatmul.mubr.f32.gmra.mxu1 %v11006_v53 }
 0x51d   : > { %2754 = vmax.xlane.f32.xlu1 %v2753_v7  ;;  %v5101_v7 = vmul.f32 %v10966_v39, %v4717_v58  ;;  %v11033_v39 = vld [vmem:[#allocation2 + $0x1a8] sm:$0xff]  ;;  %v13489_v58 = vld [vmem:[#allocation69_spill] sm:$0xff] }
 0x51e   : > { %13488 = vst [vmem:[#allocation47_spill] sm:$0xff] %v11033_v39 }
 0x527   : > { %3169 = vperm.xlu0 %7497, %v13483_v55  }
 0x528   : > { %v2750_v6 = vpop.xlane.xlu0 %2749 }
 0x529   : > { %v5271_v9 = vpop.f32.mrf.mxu0  ;;  %v11018_v8 = vmax.f32 %v11014_v16, %v2750_v6 }
 0x52b   : > { %13484 = vst [vmem:[#allocation178_spill] sm:$0xff] %v11018_v8  ;;  %v5656_v49 = vpop.f32.mrf.mxu1  ;;  %v5273_v21 = vpop.f32.mrf.mxu0  ;;  %4878 = vperm.xlu0 %7497, %v11020_v29   ;;  %6109 = vst.msk [vmem:[#allocation2 + $0x1c0] sm:$0xff] %vm4642_vm1, %v11018_v8 }
 0x52c   : > { %v5657_v32 = vadd.f32 %v5656_v49, %v5271_v9  ;;  %v11030_v29 = vpop.eup %7683  ;;  %v3439_v9 = vsub.f32 %v13489_v58, %v3140_v44 }
 0x52d   : > { %v5658_v50 = vpop.f32.mrf.mxu1  ;;  %v5276_v45 = vpop.f32.mrf.mxu0  ;;  %13487 = vst [vmem:[#allocation53_spill] sm:$0xff] %v11030_v29 }
 0x52e   : > { %v5935_v26 = vadd.f32 %v5657_v32, %v5101_v7  ;;  %3154 = vperm.xlu1 %7498, %v13486_v47   ;;  %v13493_v32 = vld [vmem:[#allocation64_spill] sm:$0xff]  ;;  %v13494_v50 = vld [vmem:[#allocation70_spill] sm:$0xff] }
 0x52f   : > { %v5661_v6 = vpop.f32.mrf.mxu1  ;;  %v5278_v16 = vpop.f32.mrf.mxu0 }
 0x530   : > { %5999 = vst [vmem:[#allocation4 + $0x118] sm:$0xff] %v5935_v26  ;;  %v5662_v21 = vadd.f32 %v5661_v6, %v5276_v45  ;;  %v3772_v26 = vmul.f32 1.442695, %v3439_v9  ;;  %v3441_v6 = vsub.f32 %v13494_v50, %v3140_v44  ;;  %v3440_v9 = vsub.f32 %v13497_v43, %v3140_v44 }
 0x531   : > { %v5663_v31 = vpop.f32.mrf.mxu1 }
 0x532   : > { %v5936_v22 = vadd.f32 %v5662_v21, %v5102_v1  ;;  %4863 = vperm.xlu1 %7498, %v11030_v29   ;;  %v13492_v31 = vld [vmem:[#allocation65_spill] sm:$0xff]  ;;  %v13495_v21 = vld [vmem:[#allocation66_spill] sm:$0xff]  ;;  %7685 = vpow2.f32 %v3772_v26  ;;  %v3774_v50 = vmul.f32 1.442695, %v3440_v9 }
 0x534   : > { %6000 = vst [vmem:[#allocation4 + $0x98] sm:$0xff] %v5936_v22  ;;  %v2735_v49 = vpop.xlane.xlu1 %2734  ;;  %v13496_v22 = vld [vmem:[#allocation67_spill] sm:$0xff] }
 0x535   : > { %v11037_v16 = vmax.f32 %v11033_v39, %v2735_v49  ;;  %v3438_v29 = vsub.f32 %v13496_v22, %v3140_v44 }
 0x537   : > { %13490 = vst [vmem:[#allocation49_spill] sm:$0xff] %v11037_v16  ;;  %6106 = vst.msk [vmem:[#allocation2 + $0x1a8] sm:$0xff] %vm4642_vm1, %v11037_v16 }
 0x538   : > { %v3135_v45 = vpop.permute.xlu1 %3134 }
 0x539   : > { %v3434_v7 = vsub.f32 %v13491_v48, %v3135_v45  ;;  %v3435_v1 = vsub.f32 %v13492_v31, %v3135_v45  ;;  %v3436_v60 = vsub.f32 %v13493_v32, %v3135_v45  ;;  %v3437_v58 = vsub.f32 %v13495_v21, %v3135_v45  ;;  %v13498_v45 = vld [vmem:[#allocation313_spill] sm:$0xff] }
 0x53a   : > { %v2776_v48 = vmax.f32 %v10682_v51, %v10687_v24  ;;  %v3776_v31 = vmul.f32 1.442695, %v3441_v6  ;;  %v3770_v32 = vmul.f32 1.442695, %v3438_v29  ;;  %v13502_v6 = vld [vmem:[#allocation15_spill] sm:$0xff]  ;;  %v4720_v51 = vld [vmem:[#allocation4 + $0x150] sm:$0xff] }
 0x53b   : > { %v3762_v8 = vmul.f32 1.442695, %v3434_v7  ;;  %v3764_v49 = vmul.f32 1.442695, %v3435_v1  ;;  %v3766_v13 = vmul.f32 1.442695, %v3436_v60 }
 0x53c   : > { %v3768_v53 = vmul.f32 1.442695, %v3437_v58  ;;  %v2777_v21 = vmax.f32 %v2776_v48, %v13498_v45  ;;  %v13499_v7 = vld [vmem:[#allocation315_spill] sm:$0xff]  ;;  %v13501_v60 = vld [vmem:[#allocation16_spill] sm:$0xff]  ;;  %v13513_v45 = vld [vmem:[#allocation198_spill] sm:$0xff] }
 0x53d   : > { %7687 = vpow2.f32 %v3762_v8  ;;  %v2761_v58 = vmax.f32 %v13502_v6, %v13501_v60  ;;  %v13503_v29 = vld [vmem:[#allocation183_spill] sm:$0xff]  ;;  %v13519_v6 = vld [vmem:[#allocation190_spill] sm:$0xff]  ;;  %v11099_v60 = vpop.permute.xlu1 %4843 }
 0x53e   : > { %7689 = vpow2.f32 %v3764_v49  ;;  %v2778_v26 = vmax.f32 %v2777_v21, %v13499_v7  ;;  %v2873_v22 = vsub.f32 %v13503_v29, %v13457_v33  ;;  %v11076_v29 = vpop.permute.xlu0 %3149 }
 0x53f   : > { %7691 = vpow2.f32 %v3766_v13  ;;  %v11052_v1 = vpop.eup %7685 }
 0x540   : > { %7693 = vpow2.f32 %v3768_v53  ;;  %13500 = vst [vmem:[#allocation48_spill] sm:$0xff] %v11052_v1  ;;  %v2960_v33 = vmul.f32 1.442695, %v2873_v22  ;;  %v13512_v22 = vld [vmem:[#allocation200_spill] sm:$0xff] }
 0x541   : > { %7695 = vpow2.f32 %v3776_v31  ;;  %v13506_v31 = vld [vmem:[#allocation17_spill] sm:$0xff]  ;;  %v2877_v24 = vsub.f32 %v13513_v45, %v13512_v22 }
 0x542   : > { %7697 = vpow2.f32 %v3770_v32  ;;  %v2762_v32 = vmax.f32 %v2761_v58, %v13506_v31  ;;  %v11078_v7 = vpop.permute.xlu0 %4858 }
 0x543   : > { %7699 = vpow2.f32 %v3774_v50 }
 0x544   : > { %7701 = vpow2.f32 %v2960_v33  ;;  %v2968_v33 = vmul.f32 1.442695, %v2877_v24  ;;  %v13518_v24 = vld [vmem:[#allocation203_spill] sm:$0xff] }
 0x54a   : > { %v7688_v43 = vpop.eup %7687  ;;  %2779 = vmax.xlane.f32.xlu0 %v2778_v26  ;;  %v13509_v26 = vld [vmem:[#allocation18_spill] sm:$0xff] }
 0x54b   : > { %v7690_v8 = vpop.eup %7689 }
 0x54c   : > { %v7692_v44 = vpop.eup %7691  ;;  %5309 = vmatprep.mubr.f32.mxu0 %v7690_v8  ;;  %v4348_v13 = vadd.f32 %v7690_v8, %v7688_v43  ;;  %v13510_v8 = vld [vmem:[#allocation171_spill] sm:$0xff] }
 0x54d   : > { %v7694_v53 = vpop.eup %7693  ;;  %5310 = vmatmul.mubr.f32.gmra.mxu0 %v7688_v43  ;;  %v2763_v43 = vmax.f32 %v2762_v32, %v13509_v26  ;;  %v11082_v32 = vld [vmem:[#allocation2 + $0x1d0] sm:$0xff] }
 0x54e   : > { %5694 = vmatprep.mubr.f32.mxu1 %v7694_v53  ;;  %5314 = vmatprep.mubr.f32.mxu0 %v11052_v1  ;;  %v4349_v49 = vadd.f32 %v7692_v44, %v4348_v13  ;;  %v11059_v9 = vpop.eup %7695  ;;  %v13511_v13 = vld [vmem:[#allocation191_spill] sm:$0xff]  ;;  %13514 = vst [vmem:[#allocation167_spill] sm:$0xff] %v11082_v32 }
 0x54f   : > { %13504 = vst [vmem:[#allocation54_spill] sm:$0xff] %v11059_v9  ;;  %5695 = vmatmul.mubr.f32.gmra.mxu1 %v7692_v44  ;;  %v11061_v48 = vpop.eup %7697  ;;  %v2870_v44 = vsub.f32 %v13510_v8, %v13460_v54  ;;  %v2875_v58 = vsub.f32 %v13511_v13, %v13483_v55  ;;  %v4719_v8 = vld [vmem:[#allocation4 + $0x120] sm:$0xff] }
 0x550   : > { %13505 = vst [vmem:[#allocation50_spill] sm:$0xff] %v11061_v48  ;;  %5699 = vmatprep.mubr.f32.mxu1 %v11059_v9  ;;  %v11065_v50 = vadd.f32 %v7694_v53, %v4349_v49  ;;  %v11068_v21 = vpop.eup %7699  ;;  %v5103_v45 = vmul.f32 %v11028_v56, %v4719_v8 }
 0x551   : > { %5315 = vmatmul.mubr.f32.gmra.mxu0 %v11061_v48  ;;  %13508 = vst [vmem:[#allocation52_spill] sm:$0xff] %v11068_v21  ;;  %v2954_v53 = vmul.f32 1.442695, %v2870_v44  ;;  %v2964_v49 = vmul.f32 1.442695, %v2875_v58  ;;  %v11088_v44 = vpop.eup %7701 }
 0x552   : > { %13507 = vst [vmem:[#allocation51_spill] sm:$0xff] %v11065_v50  ;;  %13516 = vst [vmem:[#allocation186_spill] sm:$0xff] %v11088_v44 }
 0x553   : > { %5700 = vmatmul.mubr.f32.gmra.mxu1 %v11068_v21  ;;  %7703 = vpow2.f32 %v2954_v53 }
 0x554   : > { %7705 = vpow2.f32 %v2964_v49  ;;  %v13517_v49 = vld [vmem:[#allocation204_spill] sm:$0xff] }
 0x555   : > { %7707 = vpow2.f32 %v2968_v33 }
 0x556   : > { %2764 = vmax.xlane.f32.xlu1 %v2763_v43 }
 0x560   : > { %3179 = vperm.xlu0 %7497, %v13512_v22   ;;  %v2879_v22 = vsub.f32 %v13518_v24, %v13517_v49  ;;  %v11101_v33 = vpop.eup %7703 }
 0x561   : > { %v2760_v54 = vpop.xlane.xlu0 %2759  ;;  %13520 = vst [vmem:[#allocation174_spill] sm:$0xff] %v11101_v33 }
 0x562   : > { %v5281_v55 = vpop.f32.mrf.mxu0  ;;  %v11086_v43 = vmax.f32 %v11082_v32, %v2760_v54  ;;  %v2972_v8 = vmul.f32 1.442695, %v2879_v22 }
 0x564   : > { %13515 = vst [vmem:[#allocation160_spill] sm:$0xff] %v11086_v43  ;;  %v5666_v13 = vpop.f32.mrf.mxu1  ;;  %v5283_v58 = vpop.f32.mrf.mxu0  ;;  %4888 = vperm.xlu0 %7497, %v11088_v44   ;;  %6111 = vst.msk [vmem:[#allocation2 + $0x1d0] sm:$0xff] %vm4642_vm1, %v11086_v43  ;;  %v5104_v44 = vmul.f32 %v10950_v20, %v4720_v51  ;;  %v13525_v51 = vld [vmem:[#allocation77_spill] sm:$0xff]  ;;  %7709 = vpow2.f32 %v2972_v8  ;;  %v13531_v8 = vld [vmem:[#allocation78_spill] sm:$0xff] }
 0x565   : > { %v5667_v53 = vadd.f32 %v5666_v13, %v5281_v55  ;;  %v11103_v13 = vpop.eup %7705  ;;  %v3447_v20 = vsub.f32 %v13525_v51, %v11076_v29  ;;  %v13533_v43 = vld [vmem:[#allocation75_spill] sm:$0xff] }
 0x566   : > { %v5668_v31 = vpop.f32.mrf.mxu1  ;;  %v5286_v54 = vpop.f32.mrf.mxu0  ;;  %13521 = vst [vmem:[#allocation61_spill] sm:$0xff] %v11103_v13  ;;  %v3446_v9 = vsub.f32 %v13533_v43, %v11076_v29 }
 0x567   : > { %v5937_v32 = vadd.f32 %v5667_v53, %v5103_v45  ;;  %3164 = vperm.xlu1 %7498, %v13519_v6   ;;  %v13522_v31 = vld [vmem:[#allocation208_spill] sm:$0xff]  ;;  %v13523_v45 = vld [vmem:[#allocation207_spill] sm:$0xff] }
 0x568   : > { %v5671_v26 = vpop.f32.mrf.mxu1  ;;  %v5288_v58 = vpop.f32.mrf.mxu0  ;;  %3189 = vperm.xlu0 %7497, %v13517_v49   ;;  %v2881_v53 = vsub.f32 %v13523_v45, %v13522_v31 }
 0x569   : > { %6001 = vst [vmem:[#allocation4 + $0x120] sm:$0xff] %v5937_v32  ;;  %v5672_v56 = vadd.f32 %v5671_v26, %v5286_v54  ;;  %v11108_v58 = vld [vmem:[#allocation2 + $0x1b8] sm:$0xff]  ;;  %v13527_v54 = vld [vmem:[#allocation71_spill] sm:$0xff] }
 0x56a   : > { %v5673_v55 = vpop.f32.mrf.mxu1  ;;  %13524 = vst [vmem:[#allocation55_spill] sm:$0xff] %v11108_v58  ;;  %v2976_v49 = vmul.f32 1.442695, %v2881_v53  ;;  %v13532_v53 = vld [vmem:[#allocation74_spill] sm:$0xff] }
 0x56b   : > { %v5938_v24 = vadd.f32 %v5672_v56, %v5104_v44  ;;  %4873 = vperm.xlu1 %7498, %v11101_v33   ;;  %v3788_v44 = vmul.f32 1.442695, %v3447_v20  ;;  %v13528_v55 = vld [vmem:[#allocation73_spill] sm:$0xff] }
 0x56c   : > { %4898 = vperm.xlu0 %7497, %v11103_v13   ;;  %v13529_v13 = vld [vmem:[#allocation72_spill] sm:$0xff]  ;;  %7711 = vpow2.f32 %v2976_v49 }
 0x56d   : > { %6002 = vst [vmem:[#allocation4 + $0x150] sm:$0xff] %v5938_v24  ;;  %v2745_v26 = vpop.xlane.xlu1 %2744  ;;  %v11122_v24 = vpop.eup %7707  ;;  %7713 = vpow2.f32 %v3788_v44  ;;  %v13536_v49 = vld [vmem:[#allocation76_spill] sm:$0xff] }
 0x56e   : > { %v11114_v32 = vmax.f32 %v11108_v58, %v2745_v26  ;;  %13530 = vst [vmem:[#allocation56_spill] sm:$0xff] %v11122_v24  ;;  %v3449_v26 = vsub.f32 %v13531_v8, %v11076_v29  ;;  %v3448_v1 = vsub.f32 %v13536_v49, %v11076_v29  ;;  %v13539_v29 = vld [vmem:[#allocation219_spill] sm:$0xff]  ;;  %v13546_v49 = vld [vmem:[#allocation309_spill] sm:$0xff] }
 0x570   : > { %13526 = vst [vmem:[#allocation57_spill] sm:$0xff] %v11114_v32  ;;  %6108 = vst.msk [vmem:[#allocation2 + $0x1b8] sm:$0xff] %vm4642_vm1, %v11114_v32  ;;  %3199 = vperm.xlu0 %7497, %v13522_v31   ;;  %v3792_v8 = vmul.f32 1.442695, %v3449_v26 }
 0x571   : > { %v3145_v22 = vpop.permute.xlu1 %3144 }
 0x572   : > { %v3442_v56 = vsub.f32 %v13527_v54, %v3145_v22  ;;  %v3443_v45 = vsub.f32 %v13528_v55, %v3145_v22  ;;  %v3444_v51 = vsub.f32 %v13529_v13, %v3145_v22  ;;  %v3445_v33 = vsub.f32 %v13532_v53, %v3145_v22  ;;  %v13534_v54 = vld [vmem:[#allocation212_spill] sm:$0xff]  ;;  %v13535_v55 = vld [vmem:[#allocation211_spill] sm:$0xff] }
 0x573   : > { %v2883_v48 = vsub.f32 %v13535_v55, %v13534_v54  ;;  %v3786_v22 = vmul.f32 1.442695, %v3446_v9  ;;  %v13544_v55 = vld [vmem:[#allocation235_spill] sm:$0xff] }
 0x574   : > { %v3778_v31 = vmul.f32 1.442695, %v3442_v56  ;;  %v3780_v20 = vmul.f32 1.442695, %v3443_v45  ;;  %v3782_v21 = vmul.f32 1.442695, %v3444_v51  ;;  %4908 = vperm.xlu0 %7497, %v11122_v24   ;;  %v11135_v45 = vpop.eup %7709 }
 0x575   : > { %v3784_v13 = vmul.f32 1.442695, %v3445_v33  ;;  %v2980_v43 = vmul.f32 1.442695, %v2883_v48  ;;  %v3790_v56 = vmul.f32 1.442695, %v3448_v1 }
 0x576   : > { %7715 = vpow2.f32 %v3778_v31  ;;  %13537 = vst [vmem:[#allocation62_spill] sm:$0xff] %v11135_v45  ;;  %v13541_v1 = vld [vmem:[#allocation310_spill] sm:$0xff]  ;;  %v13542_v51 = vld [vmem:[#allocation308_spill] sm:$0xff] }
 0x577   : > { %7717 = vpow2.f32 %v3780_v20  ;;  %v2771_v26 = vmax.f32 %v13542_v51, %v13541_v1  ;;  %v4721_v24 = vld [vmem:[#allocation4 + $0x108] sm:$0xff] }
 0x578   : > { %7719 = vpow2.f32 %v3782_v21  ;;  %3209 = vperm.xlu0 %7497, %v13534_v54  }
 0x579   : > { %7721 = vpow2.f32 %v3784_v13  ;;  %v11138_v33 = vpop.eup %7711 }
 0x57a   : > { %7723 = vpow2.f32 %v3792_v8  ;;  %13538 = vst [vmem:[#allocation58_spill] sm:$0xff] %v11138_v33  ;;  %v11141_v44 = vpop.eup %7713  ;;  %v2772_v8 = vmax.f32 %v2771_v26, %v13546_v49  ;;  %v3160_v26 = vpop.permute.xlu0 %3159 }
 0x57b   : > { %7725 = vpow2.f32 %v3786_v22  ;;  %13540 = vst [vmem:[#allocation59_spill] sm:$0xff] %v11141_v44 }
 0x57c   : > { %4918 = vperm.xlu0 %7497, %v11135_v45   ;;  %7727 = vpow2.f32 %v2980_v43 }
 0x57d   : > { %7729 = vpow2.f32 %v3790_v56 }
 0x580   : > { %3219 = vperm.xlu0 %7497, %v13539_v29  }
 0x583   : > { %v7716_v9 = vpop.eup %7715 }
 0x584   : > { %v7718_v21 = vpop.eup %7717  ;;  %4928 = vperm.xlu0 %7497, %v11138_v33  }
 0x585   : > { %v7720_v48 = vpop.eup %7719  ;;  %5319 = vmatprep.mubr.f32.mxu0 %v7718_v21  ;;  %v4358_v53 = vadd.f32 %v7718_v21, %v7716_v9 }
 0x586   : > { %v7722_v31 = vpop.eup %7721  ;;  %5320 = vmatmul.mubr.f32.gmra.mxu0 %v7716_v9  ;;  %v13550_v9 = vld [vmem:[#allocation311_spill] sm:$0xff] }
 0x587   : > { %5704 = vmatprep.mubr.f32.mxu1 %v7722_v31  ;;  %5324 = vmatprep.mubr.f32.mxu0 %v11141_v44  ;;  %v4359_v20 = vadd.f32 %v7720_v48, %v4358_v53  ;;  %v11147_v54 = vpop.eup %7723  ;;  %v2773_v21 = vmax.f32 %v2772_v8, %v13550_v9  ;;  %v13554_v9 = vld [vmem:[#allocation197_spill] sm:$0xff] }
 0x588   : > { %13543 = vst [vmem:[#allocation60_spill] sm:$0xff] %v11147_v54  ;;  %5705 = vmatmul.mubr.f32.gmra.mxu1 %v7720_v48  ;;  %3229 = vperm.xlu0 %7497, %v13544_v55   ;;  %v11150_v13 = vpop.eup %7725  ;;  %v13551_v48 = vld [vmem:[#allocation179_spill] sm:$0xff] }
 0x589   : > { %13545 = vst [vmem:[#allocation175_spill] sm:$0xff] %v11150_v13  ;;  %5709 = vmatprep.mubr.f32.mxu1 %v11147_v54  ;;  %v11154_v22 = vadd.f32 %v7722_v31, %v4359_v20  ;;  %v11156_v43 = vpop.eup %7727  ;;  %v2872_v53 = vsub.f32 %v13551_v48, %v13486_v47  ;;  %v11166_v31 = vpop.permute.xlu0 %4868  ;;  %v11168_v20 = vld [vmem:[#allocation2 + $0x1e0] sm:$0xff]  ;;  %v5105_v47 = vmul.f32 %v11099_v60, %v4721_v24  ;;  %v11183_v60 = vld [vmem:[#allocation2 + $0x1c8] sm:$0xff]  ;;  %v13557_v24 = vld [vmem:[#allocation85_spill] sm:$0xff] }
 0x58a   : > { %13548 = vst [vmem:[#allocation194_spill] sm:$0xff] %v11156_v43  ;;  %5325 = vmatmul.mubr.f32.gmra.mxu0 %v11150_v13  ;;  %v11159_v56 = vpop.eup %7729  ;;  %13552 = vst [vmem:[#allocation69_spill] sm:$0xff] %v11168_v20 }
 0x58b   : > { %13547 = vst [vmem:[#allocation164_spill] sm:$0xff] %v11154_v22  ;;  %13549 = vst [vmem:[#allocation182_spill] sm:$0xff] %v11159_v56  ;;  %v2958_v33 = vmul.f32 1.442695, %v2872_v53  ;;  %v13566_v22 = vld [vmem:[#allocation84_spill] sm:$0xff] }
 0x58c   : > { %5710 = vmatmul.mubr.f32.gmra.mxu1 %v11159_v56  ;;  %4938 = vperm.xlu0 %7497, %v11156_v43   ;;  %13556 = vst [vmem:[#allocation64_spill] sm:$0xff] %v11183_v60  ;;  %v3456_v39 = vsub.f32 %v13566_v22, %v3160_v26 }
 0x58d   : > { %7731 = vpow2.f32 %v2958_v33 }
 0x58f   : > { %2774 = vmax.xlane.f32.xlu1 %v2773_v21  ;;  %v4722_v21 = vld [vmem:[#allocation4 + $0x60] sm:$0xff] }
 0x590   : > { %v5106_v13 = vmul.f32 %v11012_v30, %v4722_v21  ;;  %v13561_v21 = vld [vmem:[#allocation80_spill] sm:$0xff] }
 0x59a   : > { %v2770_v45 = vpop.xlane.xlu0 %2769 }
 0x59b   : > { %v5291_v49 = vpop.f32.mrf.mxu0  ;;  %v11171_v51 = vmax.f32 %v11168_v20, %v2770_v45  ;;  %v11178_v45 = vpop.permute.xlu1 %4853 }
 0x59c   : > { %v11180_v20 = vpop.eup %7731 }
 0x59d   : > { %13553 = vst [vmem:[#allocation63_spill] sm:$0xff] %v11171_v51  ;;  %v5676_v43 = vpop.f32.mrf.mxu1  ;;  %v5293_v1 = vpop.f32.mrf.mxu0  ;;  %6113 = vst.msk [vmem:[#allocation2 + $0x1e0] sm:$0xff] %vm4642_vm1, %v11171_v51 }
 0x59e   : > { %v5677_v8 = vadd.f32 %v5676_v43, %v5291_v49  ;;  %13555 = vst [vmem:[#allocation65_spill] sm:$0xff] %v11180_v20  ;;  %v3455_v49 = vsub.f32 %v13557_v24, %v3160_v26 }
 0x59f   : > { %v5678_v33 = vpop.f32.mrf.mxu1  ;;  %v5296_v48 = vpop.f32.mrf.mxu0 }
 0x5a0   : > { %v5939_v53 = vadd.f32 %v5677_v8, %v5105_v47  ;;  %3174 = vperm.xlu1 %7498, %v13554_v9   ;;  %v3804_v30 = vmul.f32 1.442695, %v3455_v49  ;;  %v13559_v47 = vld [vmem:[#allocation79_spill] sm:$0xff] }
 0x5a1   : > { %v5681_v54 = vpop.f32.mrf.mxu1  ;;  %v5298_v56 = vpop.f32.mrf.mxu0 }
 0x5a2   : > { %6003 = vst [vmem:[#allocation4 + $0x108] sm:$0xff] %v5939_v53  ;;  %v5682_v1 = vadd.f32 %v5681_v54, %v5296_v48  ;;  %v13562_v48 = vld [vmem:[#allocation228_spill] sm:$0xff]  ;;  %v13563_v53 = vld [vmem:[#allocation86_spill] sm:$0xff]  ;;  %7733 = vpow2.f32 %v3804_v30 }
 0x5a3   : > { %v5683_v51 = vpop.f32.mrf.mxu1  ;;  %v13569_v30 = vld [vmem:[#allocation140_spill] sm:$0xff] }
 0x5a4   : > { %v5940_v44 = vadd.f32 %v5682_v1, %v5106_v13  ;;  %4883 = vperm.xlu1 %7498, %v11180_v20   ;;  %v13560_v51 = vld [vmem:[#allocation81_spill] sm:$0xff]  ;;  %v3457_v1 = vsub.f32 %v13563_v53, %v3160_v26  ;;  %v13565_v20 = vld [vmem:[#allocation83_spill] sm:$0xff] }
 0x5a5   : > { %v13573_v53 = vld [vmem:[#allocation317_spill] sm:$0xff] }
 0x5a6   : > { %6004 = vst [vmem:[#allocation4 + $0x60] sm:$0xff] %v5940_v44  ;;  %v2755_v43 = vpop.xlane.xlu1 %2754  ;;  %v13564_v44 = vld [vmem:[#allocation82_spill] sm:$0xff] }
 0x5a7   : > { %v11187_v56 = vmax.f32 %v11183_v60, %v2755_v43  ;;  %v3454_v43 = vsub.f32 %v13565_v20, %v3160_v26 }
 0x5a9   : > { %13558 = vst [vmem:[#allocation70_spill] sm:$0xff] %v11187_v56  ;;  %6110 = vst.msk [vmem:[#allocation2 + $0x1c8] sm:$0xff] %vm4642_vm1, %v11187_v56 }
 0x5aa   : > { %v3155_v54 = vpop.permute.xlu1 %3154 }
 0x5ab   : > { %v3450_v8 = vsub.f32 %v13559_v47, %v3155_v54  ;;  %v3451_v13 = vsub.f32 %v13560_v51, %v3155_v54  ;;  %v3452_v33 = vsub.f32 %v13561_v21, %v3155_v54  ;;  %4266 = vadd.xlane.f32.xlu0 %v13562_v48  ;;  %v3453_v24 = vsub.f32 %v13564_v44, %v3155_v54 }
 0x5ac   : > { %v3808_v47 = vmul.f32 1.442695, %v3457_v1  ;;  %v3802_v51 = vmul.f32 1.442695, %v3454_v43  ;;  %v3806_v21 = vmul.f32 1.442695, %v3456_v39 }
 0x5ad   : > { %v3794_v60 = vmul.f32 1.442695, %v3450_v8  ;;  %v3796_v58 = vmul.f32 1.442695, %v3451_v13  ;;  %v3798_v36 = vmul.f32 1.442695, %v3452_v33 }
 0x5ae   : > { %v3800_v49 = vmul.f32 1.442695, %v3453_v24  ;;  %v13568_v33 = vld [vmem:[#allocation318_spill] sm:$0xff]  ;;  %v13576_v43 = vld [vmem:[#allocation319_spill] sm:$0xff] }
 0x5af   : > { %7735 = vpow2.f32 %v3794_v60  ;;  %v11199_v54 = vpop.eup %7733  ;;  %v2781_v48 = vmax.f32 %v13569_v30, %v13568_v33 }
 0x5b0   : > { %7737 = vpow2.f32 %v3796_v58  ;;  %13567 = vst [vmem:[#allocation66_spill] sm:$0xff] %v11199_v54  ;;  %v13571_v58 = vld [vmem:[#allocation267_spill] sm:$0xff] }
 0x5b1   : > { %7739 = vpow2.f32 %v3798_v36  ;;  %v2782_v1 = vmax.f32 %v2781_v48, %v13573_v53  ;;  %v4723_v53 = vld [vmem:[#allocation4 + $0xe0] sm:$0xff] }
 0x5b2   : > { %7741 = vpow2.f32 %v3800_v49 }
 0x5b3   : > { %7743 = vpow2.f32 %v3808_v47  ;;  %v2783_v49 = vmax.f32 %v2782_v1, %v13576_v43  ;;  %v13577_v47 = vld [vmem:[#allocation187_spill] sm:$0xff]  ;;  %v4724_v43 = vld [vmem:[#allocation4 + $0x188] sm:$0xff] }
 0x5b4   : > { %7745 = vpow2.f32 %v3802_v51  ;;  %v2874_v51 = vsub.f32 %v13577_v47, %v13519_v6  ;;  %v13581_v47 = vld [vmem:[#allocation202_spill] sm:$0xff] }
 0x5b5   : > { %7747 = vpow2.f32 %v3806_v21  ;;  %v11220_v21 = vpop.permute.xlu0 %3169 }
 0x5b9   : > { %v11224_v48 = vpop.permute.xlu0 %4878 }
 0x5bc   : > { %v7736_v20 = vpop.eup %7735 }
 0x5bd   : > { %v7738_v8 = vpop.eup %7737 }
 0x5be   : > { %v7740_v13 = vpop.eup %7739  ;;  %5329 = vmatprep.mubr.f32.mxu0 %v7738_v8  ;;  %v4368_v22 = vadd.f32 %v7738_v8, %v7736_v20  ;;  %v13578_v8 = vld [vmem:[#allocation195_spill] sm:$0xff] }
 0x5bf   : > { %v7742_v26 = vpop.eup %7741  ;;  %5330 = vmatmul.mubr.f32.gmra.mxu0 %v7736_v20  ;;  %v2962_v20 = vmul.f32 1.442695, %v2874_v51  ;;  %v13582_v51 = vld [vmem:[#allocation201_spill] sm:$0xff] }
 0x5c0   : > { %5714 = vmatprep.mubr.f32.mxu1 %v7742_v26  ;;  %5334 = vmatprep.mubr.f32.mxu0 %v11199_v54  ;;  %v4369_v36 = vadd.f32 %v7740_v13, %v4368_v22  ;;  %v11204_v39 = vpop.eup %7743  ;;  %v11226_v22 = vld [vmem:[#allocation2 + $0x1f0] sm:$0xff]  ;;  %v13598_v54 = vld [vmem:[#allocation210_spill] sm:$0xff] }
 0x5c1   : > { %13570 = vst [vmem:[#allocation67_spill] sm:$0xff] %v11204_v39  ;;  %5715 = vmatmul.mubr.f32.gmra.mxu1 %v7740_v13  ;;  %3239 = vperm.xlu0 %7497, %v13571_v58   ;;  %v11207_v60 = vpop.eup %7745  ;;  %7749 = vpow2.f32 %v2962_v20  ;;  %v2876_v13 = vsub.f32 %v13578_v8, %v13554_v9  ;;  %13579 = vst [vmem:[#allocation191_spill] sm:$0xff] %v11226_v22  ;;  %v2878_v9 = vsub.f32 %v13582_v51, %v13581_v47  ;;  %v13584_v51 = vld [vmem:[#allocation206_spill] sm:$0xff] }
 0x5c2   : > { %13572 = vst [vmem:[#allocation68_spill] sm:$0xff] %v11207_v60  ;;  %5719 = vmatprep.mubr.f32.mxu1 %v11204_v39  ;;  %v11211_v44 = vadd.f32 %v7742_v26, %v4369_v36  ;;  %v11214_v24 = vpop.eup %7747  ;;  %v5107_v20 = vmul.f32 %v11178_v45, %v4723_v53  ;;  %v13585_v45 = vld [vmem:[#allocation205_spill] sm:$0xff] }
 0x5c3   : > { %5335 = vmatmul.mubr.f32.gmra.mxu0 %v11207_v60  ;;  %13575 = vst [vmem:[#allocation171_spill] sm:$0xff] %v11214_v24  ;;  %v2966_v26 = vmul.f32 1.442695, %v2876_v13  ;;  %v11238_v60 = vpop.permute.xlu1 %4863 }
 0x5c4   : > { %13574 = vst [vmem:[#allocation183_spill] sm:$0xff] %v11211_v44 }
 0x5c5   : > { %5720 = vmatmul.mubr.f32.gmra.mxu1 %v11214_v24  ;;  %7751 = vpow2.f32 %v2966_v26  ;;  %v2970_v24 = vmul.f32 1.442695, %v2878_v9  ;;  %v13590_v9 = vld [vmem:[#allocation245_spill] sm:$0xff] }
 0x5c7   : > { %7753 = vpow2.f32 %v2970_v24 }
 0x5c8   : > { %2784 = vmax.xlane.f32.xlu1 %v2783_v49 }
 0x5d3   : > { %v2780_v36 = vpop.xlane.xlu0 %2779 }
 0x5d4   : > { %v5301_v33 = vpop.f32.mrf.mxu0  ;;  %v11229_v1 = vmax.f32 %v11226_v22, %v2780_v36 }
 0x5d6   : > { %13580 = vst [vmem:[#allocation200_spill] sm:$0xff] %v11229_v1  ;;  %v5686_v6 = vpop.f32.mrf.mxu1  ;;  %v5303_v49 = vpop.f32.mrf.mxu0  ;;  %6115 = vst.msk [vmem:[#allocation2 + $0x1f0] sm:$0xff] %vm4642_vm1, %v11229_v1 }
 0x5d7   : > { %v5687_v8 = vadd.f32 %v5686_v6, %v5301_v33  ;;  %v5108_v49 = vmul.f32 %v11078_v7, %v4724_v43  ;;  %v11240_v1 = vpop.eup %7749  ;;  %v2880_v33 = vsub.f32 %v13585_v45, %v13584_v51  ;;  %v13586_v6 = vld [vmem:[#allocation217_spill] sm:$0xff] }
 0x5d8   : > { %v5688_v13 = vpop.f32.mrf.mxu1  ;;  %v5306_v30 = vpop.f32.mrf.mxu0  ;;  %13583 = vst [vmem:[#allocation198_spill] sm:$0xff] %v11240_v1  ;;  %v13588_v7 = vld [vmem:[#allocation93_spill] sm:$0xff] }
 0x5d9   : > { %v5941_v39 = vadd.f32 %v5687_v8, %v5107_v20  ;;  %3184 = vperm.xlu1 %7498, %v13581_v47   ;;  %v2885_v20 = vsub.f32 %v13586_v6, %v13539_v29  ;;  %v3463_v43 = vsub.f32 %v13588_v7, %v11220_v21  ;;  %v11258_v24 = vpop.eup %7751  ;;  %v13593_v45 = vld [vmem:[#allocation89_spill] sm:$0xff]  ;;  %v13596_v7 = vld [vmem:[#allocation90_spill] sm:$0xff] }
 0x5da   : > { %v5691_v36 = vpop.f32.mrf.mxu1  ;;  %v5308_v22 = vpop.f32.mrf.mxu0  ;;  %13591 = vst [vmem:[#allocation190_spill] sm:$0xff] %v11258_v24 }
 0x5db   : > { %6005 = vst [vmem:[#allocation4 + $0xe0] sm:$0xff] %v5941_v39  ;;  %v5692_v26 = vadd.f32 %v5691_v36, %v5306_v30  ;;  %v11247_v22 = vld [vmem:[#allocation2 + $0x1d8] sm:$0xff]  ;;  %v2974_v39 = vmul.f32 1.442695, %v2880_v33  ;;  %v2984_v13 = vmul.f32 1.442695, %v2885_v20 }
 0x5dc   : > { %v5693_v53 = vpop.f32.mrf.mxu1  ;;  %13587 = vst [vmem:[#allocation204_spill] sm:$0xff] %v11247_v22  ;;  %v3820_v29 = vmul.f32 1.442695, %v3463_v43  ;;  %v13597_v43 = vld [vmem:[#allocation91_spill] sm:$0xff] }
 0x5dd   : > { %v5942_v8 = vadd.f32 %v5692_v26, %v5108_v49  ;;  %4893 = vperm.xlu1 %7498, %v11240_v1   ;;  %7755 = vpow2.f32 %v2974_v39  ;;  %v13592_v49 = vld [vmem:[#allocation87_spill] sm:$0xff]  ;;  %v13594_v53 = vld [vmem:[#allocation88_spill] sm:$0xff] }
 0x5de   : > { %7757 = vpow2.f32 %v2984_v13  ;;  %v13600_v13 = vld [vmem:[#allocation92_spill] sm:$0xff] }
 0x5df   : > { %6006 = vst [vmem:[#allocation4 + $0x188] sm:$0xff] %v5942_v8  ;;  %v2765_v30 = vpop.xlane.xlu1 %2764  ;;  %v13595_v8 = vld [vmem:[#allocation94_spill] sm:$0xff]  ;;  %7759 = vpow2.f32 %v3820_v29  ;;  %v11277_v29 = vpop.permute.xlu0 %3179 }
 0x5e0   : > { %v11252_v47 = vmax.f32 %v11247_v22, %v2765_v30  ;;  %4271 = vadd.xlane.f32.xlu0 %v13590_v9  ;;  %v3465_v20 = vsub.f32 %v13595_v8, %v11220_v21  ;;  %v3462_v30 = vsub.f32 %v13597_v43, %v11220_v21 }
 0x5e1   : > { %3194 = vperm.xlu1 %7498, %v13584_v51  }
 0x5e2   : > { %13589 = vst [vmem:[#allocation203_spill] sm:$0xff] %v11252_v47  ;;  %6112 = vst.msk [vmem:[#allocation2 + $0x1d8] sm:$0xff] %vm4642_vm1, %v11252_v47  ;;  %v3824_v8 = vmul.f32 1.442695, %v3465_v20 }
 0x5e3   : > { %v3165_v36 = vpop.permute.xlu1 %3164 }
 0x5e4   : > { %v3458_v26 = vsub.f32 %v13592_v49, %v3165_v36  ;;  %v3459_v33 = vsub.f32 %v13593_v45, %v3165_v36  ;;  %v3460_v6 = vsub.f32 %v13594_v53, %v3165_v36  ;;  %v3461_v51 = vsub.f32 %v13596_v7, %v3165_v36  ;;  %v13599_v49 = vld [vmem:[#allocation209_spill] sm:$0xff] }
 0x5e5   : > { %4903 = vperm.xlu1 %7498, %v11258_v24   ;;  %v2882_v22 = vsub.f32 %v13599_v49, %v13598_v54  ;;  %v3464_v53 = vsub.f32 %v13600_v13, %v11220_v21  ;;  %v3818_v36 = vmul.f32 1.442695, %v3462_v30  ;;  %v13607_v13 = vld [vmem:[#allocation230_spill] sm:$0xff]  ;;  %v4726_v24 = vld [vmem:[#allocation4 + $0x140] sm:$0xff] }
 0x5e6   : > { %v3810_v9 = vmul.f32 1.442695, %v3458_v26  ;;  %v3812_v1 = vmul.f32 1.442695, %v3459_v33  ;;  %v3814_v39 = vmul.f32 1.442695, %v3460_v6  ;;  %v11274_v26 = vpop.eup %7753  ;;  %v5110_v44 = vmul.f32 %v11166_v31, %v4726_v24 }
 0x5e7   : > { %v3816_v45 = vmul.f32 1.442695, %v3461_v51  ;;  %v2978_v7 = vmul.f32 1.442695, %v2882_v22  ;;  %13601 = vst [vmem:[#allocation208_spill] sm:$0xff] %v11274_v26  ;;  %v11286_v22 = vpop.permute.xlu0 %4888  ;;  %v11319_v47 = vpop.permute.xlu1 %4873 }
 0x5e8   : > { %7761 = vpow2.f32 %v3810_v9  ;;  %v3822_v33 = vmul.f32 1.442695, %v3464_v53 }
 0x5e9   : > { %7763 = vpow2.f32 %v3812_v1  ;;  %3204 = vperm.xlu1 %7498, %v13598_v54   ;;  %v13603_v1 = vld [vmem:[#allocation216_spill] sm:$0xff] }
 0x5ea   : > { %7765 = vpow2.f32 %v3814_v39  ;;  %v11279_v21 = vpop.eup %7755 }
 0x5eb   : > { %7767 = vpow2.f32 %v3816_v45  ;;  %13602 = vst [vmem:[#allocation207_spill] sm:$0xff] %v11279_v21  ;;  %v11282_v54 = vpop.eup %7757  ;;  %v11293_v45 = vpop.permute.xlu0 %3189 }
 0x5ec   : > { %7769 = vpow2.f32 %v3824_v8  ;;  %13604 = vst [vmem:[#allocation77_spill] sm:$0xff] %v11282_v54  ;;  %v11284_v6 = vpop.eup %7759  ;;  %v13609_v8 = vld [vmem:[#allocation305_spill] sm:$0xff] }
 0x5ed   : > { %4913 = vperm.xlu1 %7498, %v11274_v26   ;;  %7771 = vpow2.f32 %v3818_v36  ;;  %13605 = vst [vmem:[#allocation71_spill] sm:$0xff] %v11284_v6 }
 0x5ee   : > { %7773 = vpow2.f32 %v2978_v7 }
 0x5ef   : > { %7775 = vpow2.f32 %v3822_v33 }
 0x5f1   : > { %3214 = vperm.xlu1 %7498, %v13603_v1  }
 0x5f5   : > { %v7762_v20 = vpop.eup %7761  ;;  %4923 = vperm.xlu1 %7498, %v11279_v21  }
 0x5f6   : > { %v7764_v51 = vpop.eup %7763  ;;  %4948 = vperm.xlu0 %7497, %v11282_v54  }
 0x5f7   : > { %v7766_v43 = vpop.eup %7765  ;;  %5339 = vmatprep.mubr.f32.mxu0 %v7764_v51  ;;  %v4378_v30 = vadd.f32 %v7764_v51, %v7762_v20 }
 0x5f8   : > { %v7768_v9 = vpop.eup %7767  ;;  %5340 = vmatmul.mubr.f32.gmra.mxu0 %v7762_v20  ;;  %v11309_v20 = vpop.permute.xlu0 %4898 }
 0x5f9   : > { %5724 = vmatprep.mubr.f32.mxu1 %v7768_v9  ;;  %5344 = vmatprep.mubr.f32.mxu0 %v11284_v6  ;;  %v4379_v39 = vadd.f32 %v7766_v43, %v4378_v30  ;;  %v11291_v49 = vpop.eup %7769  ;;  %v4725_v30 = vld [vmem:[#allocation4 + $0x138] sm:$0xff] }
 0x5fa   : > { %13606 = vst [vmem:[#allocation73_spill] sm:$0xff] %v11291_v49  ;;  %5725 = vmatmul.mubr.f32.gmra.mxu1 %v7766_v43  ;;  %3224 = vperm.xlu1 %7498, %v13607_v13   ;;  %v11296_v53 = vpop.eup %7771  ;;  %v5109_v21 = vmul.f32 %v11238_v60, %v4725_v30 }
 0x5fb   : > { %13608 = vst [vmem:[#allocation72_spill] sm:$0xff] %v11296_v53  ;;  %5729 = vmatprep.mubr.f32.mxu1 %v11291_v49  ;;  %3249 = vperm.xlu0 %7497, %v13609_v8   ;;  %v11300_v36 = vadd.f32 %v7768_v9, %v4379_v39  ;;  %v11302_v7 = vpop.eup %7773 }
 0x5fc   : > { %13611 = vst [vmem:[#allocation74_spill] sm:$0xff] %v11302_v7  ;;  %5345 = vmatmul.mubr.f32.gmra.mxu0 %v11296_v53  ;;  %v11305_v33 = vpop.eup %7775  ;;  %v11311_v51 = vpop.permute.xlu0 %3199 }
 0x5fd   : > { %13610 = vst [vmem:[#allocation78_spill] sm:$0xff] %v11300_v36  ;;  %13612 = vst [vmem:[#allocation75_spill] sm:$0xff] %v11305_v33 }
 0x5fe   : > { %5730 = vmatmul.mubr.f32.gmra.mxu1 %v11305_v33  ;;  %4933 = vperm.xlu1 %7498, %v11302_v7  }
 0x600   : > { %v11313_v43 = vpop.permute.xlu0 %4908 }
 0x604   : > { %v11316_v6 = vpop.permute.xlu0 %3209 }
 0x60d   : > { %v5311_v54 = vpop.f32.mrf.mxu0 }
 0x60f   : > { %v5696_v9 = vpop.f32.mrf.mxu1  ;;  %v5313_v39 = vpop.f32.mrf.mxu0 }
 0x610   : > { %v5697_v26 = vadd.f32 %v5696_v9, %v5311_v54  ;;  %v13613_v39 = vld [vmem:[#allocation232_spill] sm:$0xff]  ;;  %v11327_v9 = vpop.permute.xlu0 %4918 }
 0x611   : > { %v5698_v49 = vpop.f32.mrf.mxu1  ;;  %v5316_v53 = vpop.f32.mrf.mxu0  ;;  %v2887_v27 = vsub.f32 %v13613_v39, %v13544_v55  ;;  %v11323_v54 = vld [vmem:[#allocation2 + $0x1e8] sm:$0xff]  ;;  %v13621_v39 = vld [vmem:[#allocation102_spill] sm:$0xff] }
 0x612   : > { %v5943_v33 = vadd.f32 %v5697_v26, %v5109_v21  ;;  %13614 = vst [vmem:[#allocation212_spill] sm:$0xff] %v11323_v54  ;;  %v13615_v49 = vld [vmem:[#allocation101_spill] sm:$0xff]  ;;  %v13617_v21 = vld [vmem:[#allocation284_spill] sm:$0xff] }
 0x613   : > { %v5701_v7 = vpop.f32.mrf.mxu1  ;;  %v5318_v36 = vpop.f32.mrf.mxu0  ;;  %v3471_v30 = vsub.f32 %v13615_v49, %v11277_v29  ;;  %v2988_v24 = vmul.f32 1.442695, %v2887_v27  ;;  %v13622_v27 = vld [vmem:[#allocation98_spill] sm:$0xff] }
 0x614   : > { %6007 = vst [vmem:[#allocation4 + $0x138] sm:$0xff] %v5943_v33  ;;  %v5702_v56 = vadd.f32 %v5701_v7, %v5316_v53  ;;  %v13619_v53 = vld [vmem:[#allocation97_spill] sm:$0xff]  ;;  %v13620_v7 = vld [vmem:[#allocation96_spill] sm:$0xff]  ;;  %v11340_v49 = vpop.permute.xlu0 %3219 }
 0x615   : > { %v5703_v34 = vpop.f32.mrf.mxu1  ;;  %7777 = vpow2.f32 %v2988_v24  ;;  %v13625_v24 = vld [vmem:[#allocation100_spill] sm:$0xff] }
 0x616   : > { %v5944_v60 = vadd.f32 %v5702_v56, %v5110_v44  ;;  %v3836_v34 = vmul.f32 1.442695, %v3471_v30  ;;  %v13618_v56 = vld [vmem:[#allocation95_spill] sm:$0xff] }
 0x618   : > { %6008 = vst [vmem:[#allocation4 + $0x140] sm:$0xff] %v5944_v60  ;;  %v2775_v26 = vpop.xlane.xlu1 %2774  ;;  %v3473_v60 = vsub.f32 %v13621_v39, %v11277_v29  ;;  %7779 = vpow2.f32 %v3836_v34 }
 0x619   : > { %v11330_v31 = vmax.f32 %v11323_v54, %v2775_v26 }
 0x61a   : > { %4281 = vadd.xlane.f32.xlu0 %v13617_v21  ;;  %v13623_v21 = vld [vmem:[#allocation99_spill] sm:$0xff]  ;;  %v3840_v39 = vmul.f32 1.442695, %v3473_v60 }
 0x61b   : > { %13616 = vst [vmem:[#allocation211_spill] sm:$0xff] %v11330_v31  ;;  %6114 = vst.msk [vmem:[#allocation2 + $0x1e8] sm:$0xff] %vm4642_vm1, %v11330_v31  ;;  %v3470_v54 = vsub.f32 %v13623_v21, %v11277_v29  ;;  %v11350_v21 = vpop.permute.xlu0 %4928 }
 0x61c   : > { %v3175_v55 = vpop.permute.xlu1 %3174 }
 0x61d   : > { %v3466_v44 = vsub.f32 %v13618_v56, %v3175_v55  ;;  %v3467_v36 = vsub.f32 %v13619_v53, %v3175_v55  ;;  %v3468_v33 = vsub.f32 %v13620_v7, %v3175_v55  ;;  %v3469_v26 = vsub.f32 %v13622_v27, %v3175_v55  ;;  %v13624_v56 = vld [vmem:[#allocation214_spill] sm:$0xff] }
 0x61e   : > { %v2884_v50 = vsub.f32 %v13624_v56, %v13603_v1  ;;  %v3472_v7 = vsub.f32 %v13625_v24, %v11277_v29  ;;  %v3834_v55 = vmul.f32 1.442695, %v3470_v54  ;;  %v13632_v56 = vld [vmem:[#allocation215_spill] sm:$0xff] }
 0x61f   : > { %v3826_v31 = vmul.f32 1.442695, %v3466_v44  ;;  %v3828_v30 = vmul.f32 1.442695, %v3467_v36  ;;  %v3830_v57 = vmul.f32 1.442695, %v3468_v33  ;;  %v11352_v1 = vpop.permute.xlu0 %3229 }
 0x620   : > { %v3832_v53 = vmul.f32 1.442695, %v3469_v26  ;;  %v2982_v27 = vmul.f32 1.442695, %v2884_v50  ;;  %v3838_v44 = vmul.f32 1.442695, %v3472_v7 }
 0x621   : > { %7781 = vpow2.f32 %v3826_v31  ;;  %v13634_v7 = vld [vmem:[#allocation29_spill] sm:$0xff] }
 0x622   : > { %7783 = vpow2.f32 %v3828_v30  ;;  %4261 = vadd.xlane.f32.xlu1 %v13626_v4  ;;  %v11354_v34 = vpop.eup %7777  ;;  %v13631_v30 = vld [vmem:[#allocation236_spill] sm:$0xff] }
 0x623   : > { %7785 = vpow2.f32 %v3830_v57  ;;  %13627 = vst [vmem:[#allocation76_spill] sm:$0xff] %v11354_v34  ;;  %v11358_v54 = vpop.permute.xlu0 %4938  ;;  %v4131_v57 = vld [vmem:[#allocation3 + $0x8] sm:$0xff] }
 0x624   : > { %7787 = vpow2.f32 %v3832_v53  ;;  %13629 = vst [vmem:[#allocation235_spill] sm:$0xff] %v11358_v54  ;;  %v4195_v53 = vmul.f32 %v13632_v56, %v4131_v57 }
 0x625   : > { %7789 = vpow2.f32 %v3840_v39  ;;  %v11356_v29 = vpop.eup %7779 }
 0x626   : > { %7791 = vpow2.f32 %v3834_v55  ;;  %13628 = vst [vmem:[#allocation219_spill] sm:$0xff] %v11356_v29 }
 0x627   : > { %7793 = vpow2.f32 %v2982_v27 }
 0x628   : > { %7795 = vpow2.f32 %v3838_v44 }
 0x62e   : > { %v7782_v31 = vpop.eup %7781 }
 0x62f   : > { %v7784_v36 = vpop.eup %7783 }
 0x630   : > { %v7786_v4 = vpop.eup %7785  ;;  %5349 = vmatprep.mubr.f32.mxu0 %v7784_v36  ;;  %4958 = vperm.xlu0 %7497, %v11354_v34   ;;  %v4388_v50 = vadd.f32 %v7784_v36, %v7782_v31  ;;  %v13638_v36 = vld [vmem:[#allocation261_spill] sm:$0xff] }
 0x631   : > { %v7788_v33 = vpop.eup %7787  ;;  %5350 = vmatmul.mubr.f32.gmra.mxu0 %v7782_v31  ;;  %v13639_v34 = vld [vmem:[#allocation229_spill] sm:$0xff] }
 0x632   : > { %5734 = vmatprep.mubr.f32.mxu1 %v7788_v33  ;;  %5354 = vmatprep.mubr.f32.mxu0 %v11356_v29  ;;  %v4389_v60 = vadd.f32 %v7786_v4, %v4388_v50  ;;  %v11362_v26 = vpop.eup %7789 }
 0x633   : > { %13630 = vst [vmem:[#allocation179_spill] sm:$0xff] %v11362_v26  ;;  %5735 = vmatmul.mubr.f32.gmra.mxu1 %v7786_v4  ;;  %3234 = vperm.xlu1 %7498, %v13631_v30   ;;  %v11366_v24 = vpop.eup %7791  ;;  %v4727_v4 = vld [vmem:[#allocation4 + $0x80] sm:$0xff] }
 0x634   : > { %13633 = vst [vmem:[#allocation197_spill] sm:$0xff] %v11366_v24  ;;  %5739 = vmatprep.mubr.f32.mxu1 %v11362_v26  ;;  %3259 = vperm.xlu0 %7497, %v13634_v7   ;;  %v4267_v39 = vpop.xlane.xlu0 %4266  ;;  %v11370_v55 = vadd.f32 %v7788_v33, %v4389_v60  ;;  %v11372_v27 = vpop.eup %7793  ;;  %v5111_v60 = vmul.f32 %v11319_v47, %v4727_v4  ;;  %v13642_v47 = vld [vmem:[#allocation109_spill] sm:$0xff] }
 0x635   : > { %13636 = vst [vmem:[#allocation79_spill] sm:$0xff] %v11372_v27  ;;  %5355 = vmatmul.mubr.f32.gmra.mxu0 %v11366_v24  ;;  %v4579_v44 = vadd.f32 %v4267_v39, %v4195_v53  ;;  %v11375_v31 = vpop.eup %7795  ;;  %v2886_v53 = vsub.f32 %v13639_v34, %v13607_v13  ;;  %v4728_v39 = vld [vmem:[#allocation4 + $0x1a8] sm:$0xff]  ;;  %v3479_v4 = vsub.f32 %v13642_v47, %v11293_v45 }
 0x636   : > { %13635 = vst [vmem:[#allocation85_spill] sm:$0xff] %v11370_v55  ;;  %13637 = vst [vmem:[#allocation81_spill] sm:$0xff] %v11375_v31 }
 0x637   : > { %5740 = vmatmul.mubr.f32.gmra.mxu1 %v11375_v31  ;;  %4644 = vst.msk [vmem:[#allocation3 + $0x8] sm:$0xff] %vm4642_vm1, %v4579_v44  ;;  %4943 = vperm.xlu1 %7498, %v11372_v27   ;;  %v13640_v31 = vld [vmem:[#allocation264_spill] sm:$0xff]  ;;  %v13641_v27 = vld [vmem:[#allocation107_spill] sm:$0xff]  ;;  %v2986_v34 = vmul.f32 1.442695, %v2886_v53 }
 0x638   : > { %v2889_v44 = vsub.f32 %v13640_v31, %v13571_v58  ;;  %v3478_v55 = vsub.f32 %v13641_v27, %v11293_v45  ;;  %v3852_v61 = vmul.f32 1.442695, %v3479_v4 }
 0x639   : > { %7797 = vpow2.f32 %v2986_v34  ;;  %v13651_v34 = vld [vmem:[#allocation105_spill] sm:$0xff] }
 0x63a   : > { %v2992_v31 = vmul.f32 1.442695, %v2889_v44 }
 0x63b   : > { %3244 = vperm.xlu1 %7498, %v13638_v36  }
 0x63c   : > { %7799 = vpow2.f32 %v2992_v31  ;;  %v13653_v31 = vld [vmem:[#allocation116_spill] sm:$0xff] }
 0x646   : > { %v5321_v57 = vpop.f32.mrf.mxu0 }
 0x648   : > { %v5706_v50 = vpop.f32.mrf.mxu1  ;;  %v5323_v33 = vpop.f32.mrf.mxu0 }
 0x649   : > { %v5707_v56 = vadd.f32 %v5706_v50, %v5321_v57  ;;  %v5112_v33 = vmul.f32 %v11224_v48, %v4728_v39  ;;  %v11391_v57 = vpop.permute.xlu1 %4883  ;;  %v3850_v48 = vmul.f32 1.442695, %v3478_v55  ;;  %v13646_v39 = vld [vmem:[#allocation115_spill] sm:$0xff] }
 0x64a   : > { %v5708_v26 = vpop.f32.mrf.mxu1  ;;  %v5326_v24 = vpop.f32.mrf.mxu0  ;;  %v3486_v47 = vsub.f32 %v13646_v39, %v11311_v51  ;;  %v13654_v39 = vld [vmem:[#allocation106_spill] sm:$0xff] }
 0x64b   : > { %v5945_v29 = vadd.f32 %v5707_v56, %v5111_v60  ;;  %v13643_v26 = vld [vmem:[#allocation108_spill] sm:$0xff]  ;;  %v13644_v60 = vld [vmem:[#allocation110_spill] sm:$0xff]  ;;  %7801 = vpow2.f32 %v3850_v48 }
 0x64c   : > { %v5711_v12 = vpop.f32.mrf.mxu1  ;;  %v5328_v32 = vpop.f32.mrf.mxu0  ;;  %v3480_v50 = vsub.f32 %v13643_v26, %v11293_v45  ;;  %v3481_v27 = vsub.f32 %v13644_v60, %v11293_v45  ;;  %v3866_v55 = vmul.f32 1.442695, %v3486_v47  ;;  %7803 = vpow2.f32 %v3852_v61  ;;  %v13650_v26 = vld [vmem:[#allocation103_spill] sm:$0xff]  ;;  %v13652_v60 = vld [vmem:[#allocation104_spill] sm:$0xff]  ;;  %v13655_v61 = vld [vmem:[#allocation118_spill] sm:$0xff] }
 0x64d   : > { %6009 = vst [vmem:[#allocation4 + $0x80] sm:$0xff] %v5945_v29  ;;  %v5712_v13 = vadd.f32 %v5711_v12, %v5326_v24  ;;  %v11397_v32 = vld [vmem:[#allocation2 + $0x1f8] sm:$0xff]  ;;  %v13647_v29 = vld [vmem:[#allocation117_spill] sm:$0xff] }
 0x64e   : > { %v5713_v58 = vpop.f32.mrf.mxu1  ;;  %13645 = vst [vmem:[#allocation80_spill] sm:$0xff] %v11397_v32  ;;  %v3487_v12 = vsub.f32 %v13647_v29, %v11311_v51  ;;  %v3854_v53 = vmul.f32 1.442695, %v3480_v50  ;;  %v3856_v45 = vmul.f32 1.442695, %v3481_v27  ;;  %v3488_v27 = vsub.f32 %v13653_v31, %v11311_v51  ;;  %v13659_v31 = vld [vmem:[#allocation114_spill] sm:$0xff] }
 0x64f   : > { %v5946_v56 = vadd.f32 %v5712_v13, %v5112_v33  ;;  %v13649_v33 = vld [vmem:[#allocation312_spill] sm:$0xff] }
 0x650   : > { %v3868_v4 = vmul.f32 1.442695, %v3487_v12  ;;  %7805 = vpow2.f32 %v3854_v53  ;;  %v3489_v12 = vsub.f32 %v13655_v61, %v11311_v51  ;;  %v11423_v51 = vpop.eup %7797 }
 0x651   : > { %6010 = vst [vmem:[#allocation4 + $0x1a8] sm:$0xff] %v5946_v56  ;;  %v2785_v24 = vpop.xlane.xlu1 %2784  ;;  %7807 = vpow2.f32 %v3856_v45  ;;  %13660 = vst [vmem:[#allocation86_spill] sm:$0xff] %v11423_v51 }
 0x652   : > { %v11404_v44 = vmax.f32 %v11397_v32, %v2785_v24  ;;  %7809 = vpow2.f32 %v3866_v55  ;;  %v3872_v45 = vmul.f32 1.442695, %v3489_v12  ;;  %v13657_v55 = vld [vmem:[#allocation113_spill] sm:$0xff]  ;;  %v11446_v32 = vpop.permute.xlu0 %3239 }
 0x653   : > { %4291 = vadd.xlane.f32.xlu0 %v13649_v33  ;;  %7811 = vpow2.f32 %v3868_v4  ;;  %v13661_v4 = vld [vmem:[#allocation123_spill] sm:$0xff] }
 0x654   : > { %13648 = vst [vmem:[#allocation228_spill] sm:$0xff] %v11404_v44  ;;  %6116 = vst.msk [vmem:[#allocation2 + $0x1f8] sm:$0xff] %vm4642_vm1, %v11404_v44  ;;  %v13670_v44 = vld [vmem:[#allocation119_spill] sm:$0xff] }
 0x655   : > { %v3185_v13 = vpop.permute.xlu1 %3184 }
 0x656   : > { %v3474_v58 = vsub.f32 %v13650_v26, %v3185_v13  ;;  %v3475_v50 = vsub.f32 %v13651_v34, %v3185_v13  ;;  %v3476_v56 = vsub.f32 %v13652_v60, %v3185_v13  ;;  %v3477_v48 = vsub.f32 %v13654_v39, %v3185_v13  ;;  %v13656_v60 = vld [vmem:[#allocation111_spill] sm:$0xff] }
 0x657   : > { %v3870_v26 = vmul.f32 1.442695, %v3488_v27  ;;  %v13662_v27 = vld [vmem:[#allocation248_spill] sm:$0xff] }
 0x658   : > { %v3842_v47 = vmul.f32 1.442695, %v3474_v58  ;;  %v3844_v29 = vmul.f32 1.442695, %v3475_v50  ;;  %v3846_v24 = vmul.f32 1.442695, %v3476_v56 }
 0x659   : > { %v3848_v53 = vmul.f32 1.442695, %v3477_v48  ;;  %v11417_v33 = vpop.permute.xlu1 %4893  ;;  %v13658_v50 = vld [vmem:[#allocation112_spill] sm:$0xff]  ;;  %v3494_v48 = vsub.f32 %v13661_v4, %v11316_v6 }
 0x65a   : > { %7813 = vpow2.f32 %v3842_v47  ;;  %v11428_v47 = vpop.eup %7799 }
 0x65b   : > { %7815 = vpow2.f32 %v3844_v29  ;;  %13663 = vst [vmem:[#allocation82_spill] sm:$0xff] %v11428_v47  ;;  %v13664_v29 = vld [vmem:[#allocation125_spill] sm:$0xff] }
 0x65c   : > { %7817 = vpow2.f32 %v3846_v24  ;;  %v3495_v24 = vsub.f32 %v13664_v29, %v11316_v6 }
 0x65d   : > { %7819 = vpow2.f32 %v3848_v53  ;;  %v3195_v34 = vpop.permute.xlu1 %3194 }
 0x65e   : > { %v3482_v13 = vsub.f32 %v13656_v60, %v3195_v34  ;;  %v3483_v58 = vsub.f32 %v13657_v55, %v3195_v34  ;;  %v3484_v56 = vsub.f32 %v13658_v50, %v3195_v34  ;;  %v3485_v39 = vsub.f32 %v13659_v31, %v3195_v34  ;;  %v11432_v60 = vpop.eup %7801  ;;  %v13665_v34 = vld [vmem:[#allocation124_spill] sm:$0xff] }
 0x65f   : > { %7821 = vpow2.f32 %v3870_v26  ;;  %4276 = vadd.xlane.f32.xlu1 %v13662_v27  ;;  %v3496_v55 = vsub.f32 %v13665_v34, %v11316_v6  ;;  %v11438_v31 = vpop.eup %7803  ;;  %v3882_v27 = vmul.f32 1.442695, %v3494_v48  ;;  %v13672_v48 = vld [vmem:[#allocation120_spill] sm:$0xff] }
 0x660   : > { %v3858_v61 = vmul.f32 1.442695, %v3482_v13  ;;  %v3860_v12 = vmul.f32 1.442695, %v3483_v58  ;;  %v3862_v53 = vmul.f32 1.442695, %v3484_v56  ;;  %7823 = vpow2.f32 %v3872_v45  ;;  %v11440_v4 = vpop.eup %7805 }
 0x661   : > { %v3864_v26 = vmul.f32 1.442695, %v3485_v39  ;;  %v11436_v50 = vpop.permute.xlu1 %4903  ;;  %13666 = vst [vmem:[#allocation83_spill] sm:$0xff] %v11440_v4  ;;  %v11442_v29 = vpop.eup %7807  ;;  %v3884_v13 = vmul.f32 1.442695, %v3495_v24  ;;  %v4132_v58 = vld [vmem:[#allocation3 + $0x10] sm:$0xff] }
 0x662   : > { %7825 = vpow2.f32 %v3858_v61  ;;  %13667 = vst [vmem:[#allocation84_spill] sm:$0xff] %v11442_v29  ;;  %v11444_v56 = vpop.eup %7809  ;;  %v3886_v45 = vmul.f32 1.442695, %v3496_v55  ;;  %v13675_v55 = vld [vmem:[#allocation234_spill] sm:$0xff] }
 0x663   : > { %7827 = vpow2.f32 %v3860_v12  ;;  %13668 = vst [vmem:[#allocation267_spill] sm:$0xff] %v11444_v56  ;;  %v11448_v34 = vpop.eup %7811  ;;  %v4196_v38 = vmul.f32 %v13675_v55, %v4132_v58 }
 0x664   : > { %7829 = vpow2.f32 %v3862_v53  ;;  %13669 = vst [vmem:[#allocation187_spill] sm:$0xff] %v11448_v34  ;;  %v13674_v53 = vld [vmem:[#allocation126_spill] sm:$0xff] }
 0x665   : > { %7831 = vpow2.f32 %v3864_v26  ;;  %v3205_v39 = vpop.permute.xlu1 %3204  ;;  %v3497_v42 = vsub.f32 %v13674_v53, %v11316_v6 }
 0x666   : > { %v3490_v61 = vsub.f32 %v13670_v44, %v3205_v39  ;;  %v3491_v0 = vsub.f32 %v13671_v3, %v3205_v39  ;;  %v3492_v12 = vsub.f32 %v13672_v48, %v3205_v39  ;;  %v3493_v40 = vsub.f32 %v13673_v10, %v3205_v39  ;;  %v13676_v3 = vld [vmem:[#allocation132_spill] sm:$0xff] }
 0x667   : > { %v7814_v24 = vpop.eup %7813  ;;  %7833 = vpow2.f32 %v3882_v27  ;;  %v3503_v44 = vsub.f32 %v13676_v3, %v11340_v49  ;;  %v13683_v3 = vld [vmem:[#allocation134_spill] sm:$0xff] }
 0x668   : > { %v7816_v16 = vpop.eup %7815  ;;  %7835 = vpow2.f32 %v3884_v13  ;;  %v3874_v26 = vmul.f32 1.442695, %v3490_v61  ;;  %v3876_v2 = vmul.f32 1.442695, %v3491_v0  ;;  %v3878_v54 = vmul.f32 1.442695, %v3492_v12 }
 0x669   : > { %v7818_v25 = vpop.eup %7817  ;;  %7837 = vpow2.f32 %v3886_v45  ;;  %v3880_v48 = vmul.f32 1.442695, %v3493_v40  ;;  %4968 = vperm.xlu0 %7497, %v11428_v47   ;;  %5359 = vmatprep.mubr.f32.mxu0 %v7816_v16  ;;  %v4272_v10 = vpop.xlane.xlu0 %4271  ;;  %v4398_v6 = vadd.f32 %v7816_v16, %v7814_v24  ;;  %v3888_v13 = vmul.f32 1.442695, %v3497_v42  ;;  %v13679_v42 = vld [vmem:[#allocation127_spill] sm:$0xff]  ;;  %v13680_v12 = vld [vmem:[#allocation129_spill] sm:$0xff] }
 0x66a   : > { %v11460_v39 = vpop.permute.xlu1 %4913  ;;  %v7820_v27 = vpop.eup %7819  ;;  %7839 = vpow2.f32 %v3874_v26  ;;  %v4580_v58 = vadd.f32 %v4272_v10, %v4196_v38  ;;  %5360 = vmatmul.mubr.f32.gmra.mxu0 %v7814_v24  ;;  %v3900_v40 = vmul.f32 1.442695, %v3503_v44  ;;  %v13681_v24 = vld [vmem:[#allocation128_spill] sm:$0xff]  ;;  %v3505_v44 = vsub.f32 %v13683_v3, %v11340_v49  ;;  %v13684_v10 = vld [vmem:[#allocation131_spill] sm:$0xff] }
 0x66b   : > { %7841 = vpow2.f32 %v3876_v2  ;;  %5744 = vmatprep.mubr.f32.mxu1 %v7820_v27  ;;  %5364 = vmatprep.mubr.f32.mxu0 %v11438_v31  ;;  %v4399_v0 = vadd.f32 %v7818_v25, %v4398_v6  ;;  %v3502_v6 = vsub.f32 %v13684_v10, %v11340_v49 }
 0x66c   : > { %v11463_v45 = vpop.eup %7821  ;;  %7843 = vpow2.f32 %v3878_v54  ;;  %4645 = vst.msk [vmem:[#allocation3 + $0x10] sm:$0xff] %vm4642_vm1, %v4580_v58  ;;  %5745 = vmatmul.mubr.f32.gmra.mxu1 %v7818_v25  ;;  %v13682_v25 = vld [vmem:[#allocation130_spill] sm:$0xff]  ;;  %v3904_v10 = vmul.f32 1.442695, %v3505_v44 }
 0x66d   : > { %13677 = vst [vmem:[#allocation195_spill] sm:$0xff] %v11463_v45  ;;  %7845 = vpow2.f32 %v3880_v48  ;;  %5749 = vmatprep.mubr.f32.mxu1 %v11442_v29  ;;  %3269 = vperm.xlu0 %7497, %v10789_v46   ;;  %v11468_v16 = vadd.f32 %v7820_v27, %v4399_v0  ;;  %v11470_v2 = vpop.eup %7823 }
 0x66e   : > { %v3215_v38 = vpop.permute.xlu1 %3214  ;;  %13678 = vst [vmem:[#allocation202_spill] sm:$0xff] %v11470_v2  ;;  %5365 = vmatmul.mubr.f32.gmra.mxu0 %v11432_v60  ;;  %7847 = vpow2.f32 %v3888_v13 }
 0x66f   : > { %v3498_v61 = vsub.f32 %v13679_v42, %v3215_v38  ;;  %v3499_v54 = vsub.f32 %v13680_v12, %v3215_v38  ;;  %v3500_v53 = vsub.f32 %v13681_v24, %v3215_v38  ;;  %v3501_v55 = vsub.f32 %v13682_v25, %v3215_v38  ;;  %v7826_v26 = vpop.eup %7825  ;;  %v13685_v25 = vld [vmem:[#allocation133_spill] sm:$0xff] }
 0x670   : > { %v7828_v48 = vpop.eup %7827  ;;  %5750 = vmatmul.mubr.f32.gmra.mxu1 %v11440_v4  ;;  %4953 = vperm.xlu1 %7498, %v11423_v51   ;;  %7849 = vpow2.f32 %v3900_v40  ;;  %v3504_v3 = vsub.f32 %v13685_v25, %v11340_v49  ;;  %v3898_v40 = vmul.f32 1.442695, %v3502_v6  ;;  %v13691_v6 = vld [vmem:[#allocation135_spill] sm:$0xff]  ;;  %v13694_v51 = vld [vmem:[#allocation142_spill] sm:$0xff] }
 0x671   : > { %v3890_v27 = vmul.f32 1.442695, %v3498_v61  ;;  %v3892_v58 = vmul.f32 1.442695, %v3499_v54  ;;  %v3894_v0 = vmul.f32 1.442695, %v3500_v53  ;;  %v7830_v42 = vpop.eup %7829  ;;  %5369 = vmatprep.mubr.f32.mxu0 %v7828_v48  ;;  %v4408_v13 = vadd.f32 %v7828_v48, %v7826_v26 }
 0x672   : > { %v3896_v12 = vmul.f32 1.442695, %v3501_v55  ;;  %v11483_v38 = vpop.permute.xlu1 %4923  ;;  %v7832_v24 = vpop.eup %7831  ;;  %5370 = vmatmul.mubr.f32.gmra.mxu0 %v7826_v26  ;;  %v13687_v53 = vld [vmem:[#allocation268_spill] sm:$0xff]  ;;  %v3902_v48 = vmul.f32 1.442695, %v3504_v3 }
 0x673   : > { %7851 = vpow2.f32 %v3890_v27  ;;  %5754 = vmatprep.mubr.f32.mxu1 %v7832_v24  ;;  %5374 = vmatprep.mubr.f32.mxu0 %v11448_v34  ;;  %v4409_v61 = vadd.f32 %v7830_v42, %v4408_v13  ;;  %v13690_v27 = vld [vmem:[#allocation141_spill] sm:$0xff] }
 0x674   : > { %7853 = vpow2.f32 %v3892_v58  ;;  %v11488_v54 = vpop.eup %7833  ;;  %5755 = vmatmul.mubr.f32.gmra.mxu1 %v7830_v42  ;;  %3254 = vperm.xlu1 %7498, %v13687_v53   ;;  %v3511_v58 = vsub.f32 %v13690_v27, %v11352_v1  ;;  %v13692_v13 = vld [vmem:[#allocation137_spill] sm:$0xff] }
 0x675   : > { %13686 = vst [vmem:[#allocation201_spill] sm:$0xff] %v11488_v54  ;;  %7855 = vpow2.f32 %v3894_v0  ;;  %v11491_v55 = vpop.eup %7835  ;;  %5759 = vmatprep.mubr.f32.mxu1 %v11470_v2  ;;  %v11494_v26 = vadd.f32 %v7832_v24, %v4409_v61  ;;  %v13693_v24 = vld [vmem:[#allocation139_spill] sm:$0xff] }
 0x676   : > { %13688 = vst [vmem:[#allocation206_spill] sm:$0xff] %v11491_v55  ;;  %7857 = vpow2.f32 %v3896_v12  ;;  %v3225_v49 = vpop.permute.xlu1 %3224  ;;  %v11496_v44 = vpop.eup %7837  ;;  %5375 = vmatmul.mubr.f32.gmra.mxu0 %v11444_v56  ;;  %v3916_v34 = vmul.f32 1.442695, %v3511_v58  ;;  %v4732_v56 = vld [vmem:[#allocation4 + $0xf8] sm:$0xff] }
 0x677   : > { %13689 = vst [vmem:[#allocation205_spill] sm:$0xff] %v11496_v44  ;;  %v3506_v0 = vsub.f32 %v13691_v6, %v3225_v49  ;;  %v7840_v42 = vpop.eup %7839  ;;  %7859 = vpow2.f32 %v3904_v10  ;;  %v3507_v25 = vsub.f32 %v13692_v13, %v3225_v49  ;;  %v3508_v61 = vsub.f32 %v13693_v24, %v3225_v49  ;;  %v13695_v10 = vld [vmem:[#allocation148_spill] sm:$0xff]  ;;  %v13697_v24 = vld [vmem:[#allocation138_spill] sm:$0xff] }
 0x678   : > { %v7842_v12 = vpop.eup %7841  ;;  %7861 = vpow2.f32 %v3898_v40  ;;  %5760 = vmatmul.mubr.f32.gmra.mxu1 %v11463_v45  ;;  %v3509_v3 = vsub.f32 %v13694_v51, %v3225_v49  ;;  %v3513_v6 = vsub.f32 %v13695_v10, %v11352_v1  ;;  %v3510_v51 = vsub.f32 %v13697_v24, %v11352_v1  ;;  %v4729_v10 = vld [vmem:[#allocation4 + $0x1b8] sm:$0xff] }
 0x679   : > { %v7844_v47 = vpop.eup %7843  ;;  %v3906_v2 = vmul.f32 1.442695, %v3506_v0  ;;  %5379 = vmatprep.mubr.f32.mxu0 %v7842_v12  ;;  %v4418_v27 = vadd.f32 %v7842_v12, %v7840_v42  ;;  %7863 = vpow2.f32 %v3902_v48  ;;  %v3908_v13 = vmul.f32 1.442695, %v3507_v25 }
 0x67a   : > { %v7846_v29 = vpop.eup %7845  ;;  %5380 = vmatmul.mubr.f32.gmra.mxu0 %v7840_v42  ;;  %v3910_v49 = vmul.f32 1.442695, %v3508_v61  ;;  %v3912_v0 = vmul.f32 1.442695, %v3509_v3  ;;  %v13699_v42 = vld [vmem:[#allocation144_spill] sm:$0xff] }
 0x67b   : > { %5764 = vmatprep.mubr.f32.mxu1 %v7846_v29  ;;  %5384 = vmatprep.mubr.f32.mxu0 %v11491_v55  ;;  %v4419_v40 = vadd.f32 %v7844_v47, %v4418_v27  ;;  %v11509_v45 = vpop.eup %7847  ;;  %7865 = vpow2.f32 %v3906_v2  ;;  %v3512_v25 = vsub.f32 %v13699_v42, %v11352_v1  ;;  %v3920_v27 = vmul.f32 1.442695, %v3513_v6  ;;  %v4730_v6 = vld [vmem:[#allocation4 + $0x28] sm:$0xff] }
 0x67c   : > { %13696 = vst [vmem:[#allocation217_spill] sm:$0xff] %v11509_v45  ;;  %5765 = vmatmul.mubr.f32.gmra.mxu1 %v7844_v47  ;;  %7867 = vpow2.f32 %v3916_v34  ;;  %v3914_v2 = vmul.f32 1.442695, %v3510_v51  ;;  %v5113_v42 = vmul.f32 %v11391_v57, %v4729_v10 }
 0x67d   : > { %5769 = vmatprep.mubr.f32.mxu1 %v11509_v45  ;;  %v11514_v48 = vadd.f32 %v7846_v29, %v4419_v40  ;;  %v11516_v58 = vpop.eup %7849  ;;  %7869 = vpow2.f32 %v3908_v13  ;;  %v3918_v34 = vmul.f32 1.442695, %v3512_v25 }
 0x67e   : > { %13698 = vst [vmem:[#allocation93_spill] sm:$0xff] %v11516_v58  ;;  %5385 = vmatmul.mubr.f32.gmra.mxu0 %v11488_v54  ;;  %7871 = vpow2.f32 %v3910_v49 }
 0x67f   : > { %v5331_v61 = vpop.f32.mrf.mxu0  ;;  %7873 = vpow2.f32 %v3912_v0 }
 0x680   : > { %v7852_v12 = vpop.eup %7851  ;;  %5770 = vmatmul.mubr.f32.gmra.mxu1 %v11496_v44  ;;  %7875 = vpow2.f32 %v3920_v27  ;;  %v5114_v27 = vmul.f32 %v11286_v22, %v4730_v6 }
 0x681   : > { %v7854_v47 = vpop.eup %7853  ;;  %v5716_v3 = vpop.f32.mrf.mxu1  ;;  %7877 = vpow2.f32 %v3914_v2 }
 0x682   : > { %v7856_v29 = vpop.eup %7855  ;;  %v5333_v40 = vpop.f32.mrf.mxu0  ;;  %5389 = vmatprep.mubr.f32.mxu0 %v7854_v47  ;;  %v4428_v24 = vadd.f32 %v7854_v47, %v7852_v12  ;;  %v5717_v45 = vadd.f32 %v5716_v3, %v5331_v61  ;;  %7879 = vpow2.f32 %v3918_v34 }
 0x683   : > { %v7858_v1 = vpop.eup %7857  ;;  %5390 = vmatmul.mubr.f32.gmra.mxu0 %v7852_v12  ;;  %v5718_v13 = vpop.f32.mrf.mxu1 }
 0x684   : > { %5774 = vmatprep.mubr.f32.mxu1 %v7858_v1  ;;  %v5336_v51 = vpop.f32.mrf.mxu0  ;;  %5394 = vmatprep.mubr.f32.mxu0 %v11516_v58  ;;  %v4429_v49 = vadd.f32 %v7856_v29, %v4428_v24  ;;  %v11524_v44 = vpop.eup %7859  ;;  %v5947_v0 = vadd.f32 %v5717_v45, %v5113_v42  ;;  %v13704_v24 = vld [vmem:[#allocation146_spill] sm:$0xff] }
 0x685   : > { %13700 = vst [vmem:[#allocation245_spill] sm:$0xff] %v11524_v44  ;;  %5775 = vmatmul.mubr.f32.gmra.mxu1 %v7856_v29  ;;  %v11526_v47 = vpop.eup %7861  ;;  %v5721_v25 = vpop.f32.mrf.mxu1 }
 0x686   : > { %13701 = vst [vmem:[#allocation87_spill] sm:$0xff] %v11526_v47  ;;  %5779 = vmatprep.mubr.f32.mxu1 %v11524_v44  ;;  %v5338_v57 = vpop.f32.mrf.mxu0  ;;  %v11529_v12 = vadd.f32 %v7858_v1, %v4429_v49  ;;  %6011 = vst [vmem:[#allocation4 + $0x1b8] sm:$0xff] %v5947_v0  ;;  %v5722_v10 = vadd.f32 %v5721_v25, %v5336_v51  ;;  %v11533_v61 = vpop.eup %7863  ;;  %v2891_v1 = vsub.f32 %v13704_v24, %v13609_v8  ;;  %v13708_v0 = vld [vmem:[#allocation233_spill] sm:$0xff] }
 0x687   : > { %5395 = vmatmul.mubr.f32.gmra.mxu0 %v11526_v47  ;;  %13702 = vst [vmem:[#allocation89_spill] sm:$0xff] %v11533_v61  ;;  %v5723_v2 = vpop.f32.mrf.mxu1  ;;  %v2888_v25 = vsub.f32 %v13708_v0, %v13631_v30  ;;  %v4731_v47 = vld [vmem:[#allocation4 + $0x1e8] sm:$0xff] }
 0x688   : > { %v5948_v45 = vadd.f32 %v5722_v10, %v5114_v27  ;;  %v7866_v29 = vpop.eup %7865  ;;  %v2996_v51 = vmul.f32 1.442695, %v2891_v1  ;;  %v13709_v27 = vld [vmem:[#allocation287_spill] sm:$0xff]  ;;  %v11556_v10 = vpop.permute.xlu0 %4948 }
 0x689   : > { %5780 = vmatmul.mubr.f32.gmra.mxu1 %v11533_v61  ;;  %v11536_v3 = vpop.eup %7867  ;;  %v2990_v57 = vmul.f32 1.442695, %v2888_v25 }
 0x68a   : > { %6012 = vst [vmem:[#allocation4 + $0x28] sm:$0xff] %v5948_v45  ;;  %13703 = vst [vmem:[#allocation88_spill] sm:$0xff] %v11536_v3  ;;  %v7870_v40 = vpop.eup %7869  ;;  %7881 = vpow2.f32 %v2996_v51  ;;  %v4134_v45 = vld [vmem:[#allocation3 + $0x20] sm:$0xff] }
 0x68b   : > { %v7872_v22 = vpop.eup %7871  ;;  %5399 = vmatprep.mubr.f32.mxu0 %v7870_v40  ;;  %v4438_v34 = vadd.f32 %v7870_v40, %v7866_v29  ;;  %7883 = vpow2.f32 %v2990_v57  ;;  %v13711_v40 = vld [vmem:[#allocation271_spill] sm:$0xff]  ;;  %v13714_v57 = vld [vmem:[#allocation165_spill] sm:$0xff] }
 0x68c   : > { %4301 = vadd.xlane.f32.xlu0 %v10755_v37  ;;  %v7874_v42 = vpop.eup %7873  ;;  %5400 = vmatmul.mubr.f32.gmra.mxu0 %v7866_v29  ;;  %v11558_v2 = vpop.permute.xlu0 %3249  ;;  %v4198_v24 = vmul.f32 %v13711_v40, %v4134_v45  ;;  %v13715_v45 = vld [vmem:[#allocation298_spill] sm:$0xff]  ;;  %v13716_v40 = vld [vmem:[#allocation168_spill] sm:$0xff] }
 0x68d   : > { %5784 = vmatprep.mubr.f32.mxu1 %v7874_v42  ;;  %5404 = vmatprep.mubr.f32.mxu0 %v11536_v3  ;;  %v4439_v6 = vadd.f32 %v7872_v22, %v4438_v34  ;;  %v11542_v13 = vpop.eup %7875  ;;  %v4130_v34 = vld [vmem:[#allocation3] sm:$0xff] }
 0x68e   : > { %13705 = vst [vmem:[#allocation94_spill] sm:$0xff] %v11542_v13  ;;  %5785 = vmatmul.mubr.f32.gmra.mxu1 %v7872_v22  ;;  %v11544_v49 = vpop.eup %7877  ;;  %v11566_v22 = vpop.permute.xlu1 %4933 }
 0x68f   : > { %13706 = vst [vmem:[#allocation90_spill] sm:$0xff] %v11544_v49  ;;  %5789 = vmatprep.mubr.f32.mxu1 %v11542_v13  ;;  %v11547_v8 = vadd.f32 %v7874_v42, %v4439_v6  ;;  %v11550_v37 = vpop.eup %7879  ;;  %v13713_v6 = vld [vmem:[#allocation169_spill] sm:$0xff] }
 0x690   : > { %5405 = vmatmul.mubr.f32.gmra.mxu0 %v11544_v49  ;;  %13707 = vst [vmem:[#allocation91_spill] sm:$0xff] %v11550_v37  ;;  %v4194_v51 = vmul.f32 %v13713_v6, %v4130_v34  ;;  %v13719_v34 = vld [vmem:[#allocation147_spill] sm:$0xff]  ;;  %v13721_v49 = vld [vmem:[#allocation153_spill] sm:$0xff] }
 0x692   : > { %5790 = vmatmul.mubr.f32.gmra.mxu1 %v11550_v37 }
 0x697   : > { %v11560_v29 = vpop.eup %7881 }
 0x698   : > { %4286 = vadd.xlane.f32.xlu1 %v13709_v27  ;;  %13710 = vst [vmem:[#allocation210_spill] sm:$0xff] %v11560_v29  ;;  %v11568_v42 = vpop.eup %7883  ;;  %v3518_v27 = vsub.f32 %v13714_v57, %v11446_v32 }
 0x699   : > { %13712 = vst [vmem:[#allocation209_spill] sm:$0xff] %v11568_v42 }
 0x69a   : > { %v3930_v13 = vmul.f32 1.442695, %v3518_v27  ;;  %v13722_v27 = vld [vmem:[#allocation172_spill] sm:$0xff] }
 0x69b   : > { %v3520_v58 = vsub.f32 %v13722_v27, %v11446_v32 }
 0x69c   : > { %7885 = vpow2.f32 %v3930_v13  ;;  %v5115_v13 = vmul.f32 %v11417_v33, %v4731_v47  ;;  %v13728_v47 = vld [vmem:[#allocation193_spill] sm:$0xff] }
 0x6a2   : > { %4978 = vperm.xlu0 %7497, %v11560_v29  }
 0x6a3   : > { %v4282_v1 = vpop.xlane.xlu0 %4281 }
 0x6a4   : > { %v4582_v30 = vadd.f32 %v4282_v1, %v4198_v24  ;;  %v3519_v24 = vsub.f32 %v13716_v40, %v11446_v32  ;;  %v13717_v1 = vld [vmem:[#allocation177_spill] sm:$0xff] }
 0x6a6   : > { %4647 = vst.msk [vmem:[#allocation3 + $0x20] sm:$0xff] %vm4642_vm1, %v4582_v30  ;;  %3279 = vperm.xlu0 %7497, %v10851_v63   ;;  %v3521_v30 = vsub.f32 %v13717_v1, %v11446_v32 }
 0x6a8   : > { %v3936_v57 = vmul.f32 1.442695, %v3521_v30  ;;  %v13724_v30 = vld [vmem:[#allocation176_spill] sm:$0xff] }
 0x6a9   : > { %4963 = vperm.xlu1 %7498, %v11568_v42   ;;  %v13718_v42 = vld [vmem:[#allocation143_spill] sm:$0xff] }
 0x6ab   : > { %v4262_v0 = vpop.xlane.xlu1 %4261 }
 0x6ac   : > { %v4578_v25 = vadd.f32 %v4262_v0, %v4194_v51  ;;  %v3932_v51 = vmul.f32 1.442695, %v3519_v24  ;;  %v13720_v0 = vld [vmem:[#allocation150_spill] sm:$0xff]  ;;  %v13723_v24 = vld [vmem:[#allocation173_spill] sm:$0xff] }
 0x6ad   : > { %3264 = vperm.xlu1 %7498, %v13715_v45  }
 0x6ae   : > { %4643 = vst.msk [vmem:[#allocation3] sm:$0xff] %vm4642_vm1, %v4578_v25  ;;  %7887 = vpow2.f32 %v3932_v51 }
 0x6af   : > { %v3235_v29 = vpop.permute.xlu1 %3234  ;;  %7889 = vpow2.f32 %v3936_v57 }
 0x6b0   : > { %v3514_v37 = vsub.f32 %v13718_v42, %v3235_v29  ;;  %v3515_v6 = vsub.f32 %v13719_v34, %v3235_v29  ;;  %v3516_v44 = vsub.f32 %v13720_v0, %v3235_v29  ;;  %v3517_v3 = vsub.f32 %v13721_v49, %v3235_v29  ;;  %v13725_v49 = vld [vmem:[#allocation180_spill] sm:$0xff] }
 0x6b2   : > { %v3922_v40 = vmul.f32 1.442695, %v3514_v37  ;;  %v3924_v25 = vmul.f32 1.442695, %v3515_v6  ;;  %v3926_v1 = vmul.f32 1.442695, %v3516_v44 }
 0x6b3   : > { %v11584_v61 = vpop.permute.xlu1 %4943  ;;  %v3928_v42 = vmul.f32 1.442695, %v3517_v3  ;;  %v13726_v37 = vld [vmem:[#allocation185_spill] sm:$0xff] }
 0x6b4   : > { %7891 = vpow2.f32 %v3922_v40  ;;  %v13727_v40 = vld [vmem:[#allocation184_spill] sm:$0xff] }
 0x6b5   : > { %7893 = vpow2.f32 %v3924_v25  ;;  %v3527_v27 = vsub.f32 %v13727_v40, %v11558_v2  ;;  %v3529_v25 = vsub.f32 %v13728_v47, %v11558_v2  ;;  %v13734_v40 = vld [vmem:[#allocation322_spill] sm:$0xff] }
 0x6b6   : > { %7895 = vpow2.f32 %v3926_v1 }
 0x6b7   : > { %v3245_v34 = vpop.permute.xlu1 %3244  ;;  %7897 = vpow2.f32 %v3928_v42  ;;  %v5116_v42 = vmul.f32 %v11309_v20, %v4732_v56 }
 0x6b8   : > { %v3522_v0 = vsub.f32 %v13723_v24, %v3245_v34  ;;  %v3523_v55 = vsub.f32 %v13724_v30, %v3245_v34  ;;  %v3524_v29 = vsub.f32 %v13725_v49, %v3245_v34  ;;  %v5341_v54 = vpop.f32.mrf.mxu0  ;;  %v3525_v6 = vsub.f32 %v13726_v37, %v3245_v34 }
 0x6b9   : > { %v3934_v49 = vmul.f32 1.442695, %v3520_v58  ;;  %v3948_v37 = vmul.f32 1.442695, %v3527_v27  ;;  %v2893_v27 = vsub.f32 %v13734_v40, %v13634_v7 }
 0x6ba   : > { %v3938_v44 = vmul.f32 1.442695, %v3522_v0  ;;  %v3940_v51 = vmul.f32 1.442695, %v3523_v55  ;;  %v3942_v32 = vmul.f32 1.442695, %v3524_v29  ;;  %v5726_v57 = vpop.f32.mrf.mxu1  ;;  %v5343_v3 = vpop.f32.mrf.mxu0 }
 0x6bb   : > { %v3944_v24 = vmul.f32 1.442695, %v3525_v6  ;;  %v5727_v30 = vadd.f32 %v5726_v57, %v5341_v54  ;;  %v13729_v55 = vld [vmem:[#allocation181_spill] sm:$0xff]  ;;  %v3000_v47 = vmul.f32 1.442695, %v2893_v27  ;;  %v13743_v27 = vld [vmem:[#allocation304_spill] sm:$0xff] }
 0x6bc   : > { %7899 = vpow2.f32 %v3938_v44  ;;  %v5728_v4 = vpop.f32.mrf.mxu1  ;;  %v5346_v33 = vpop.f32.mrf.mxu0  ;;  %v3526_v34 = vsub.f32 %v13729_v55, %v11558_v2  ;;  %v3952_v44 = vmul.f32 1.442695, %v3529_v25 }
 0x6bd   : > { %7901 = vpow2.f32 %v3940_v51  ;;  %v5949_v1 = vadd.f32 %v5727_v30, %v5115_v13  ;;  %v13730_v4 = vld [vmem:[#allocation188_spill] sm:$0xff]  ;;  %v11602_v13 = vpop.eup %7885 }
 0x6be   : > { %7903 = vpow2.f32 %v3942_v32  ;;  %v5731_v0 = vpop.f32.mrf.mxu1  ;;  %v5348_v29 = vpop.f32.mrf.mxu0  ;;  %v3528_v58 = vsub.f32 %v13730_v4, %v11558_v2  ;;  %13731 = vst [vmem:[#allocation92_spill] sm:$0xff] %v11602_v13  ;;  %v3946_v57 = vmul.f32 1.442695, %v3526_v34 }
 0x6bf   : > { %7905 = vpow2.f32 %v3944_v24  ;;  %6013 = vst [vmem:[#allocation4 + $0x1e8] sm:$0xff] %v5949_v1  ;;  %v5732_v54 = vadd.f32 %v5731_v0, %v5346_v33  ;;  %v11604_v3 = vpop.eup %7887  ;;  %v13735_v0 = vld [vmem:[#allocation259_spill] sm:$0xff] }
 0x6c0   : > { %7907 = vpow2.f32 %v3934_v49  ;;  %v5733_v6 = vpop.f32.mrf.mxu1  ;;  %13732 = vst [vmem:[#allocation216_spill] sm:$0xff] %v11604_v3  ;;  %v11606_v32 = vpop.eup %7889  ;;  %v3950_v20 = vmul.f32 1.442695, %v3528_v58  ;;  %v2890_v29 = vsub.f32 %v13735_v0, %v13638_v36 }
 0x6c1   : > { %v5950_v51 = vadd.f32 %v5732_v54, %v5116_v42  ;;  %7909 = vpow2.f32 %v3948_v37  ;;  %13733 = vst [vmem:[#allocation230_spill] sm:$0xff] %v11606_v32  ;;  %v7892_v56 = vpop.eup %7891  ;;  %v13738_v6 = vld [vmem:[#allocation316_spill] sm:$0xff] }
 0x6c2   : > { %7911 = vpow2.f32 %v3952_v44  ;;  %v7894_v2 = vpop.eup %7893  ;;  %v2994_v58 = vmul.f32 1.442695, %v2890_v29  ;;  %v11629_v44 = vpop.permute.xlu0 %4958 }
 0x6c3   : > { %6014 = vst [vmem:[#allocation4 + $0xf8] sm:$0xff] %v5950_v51  ;;  %7913 = vpow2.f32 %v3946_v57  ;;  %v7896_v24 = vpop.eup %7895  ;;  %5409 = vmatprep.mubr.f32.mxu0 %v7894_v2  ;;  %v4448_v30 = vadd.f32 %v7894_v2, %v7892_v56 }
 0x6c4   : > { %v7898_v49 = vpop.eup %7897  ;;  %7915 = vpow2.f32 %v3950_v20  ;;  %5410 = vmatmul.mubr.f32.gmra.mxu0 %v7892_v56  ;;  %v4136_v56 = vld [vmem:[#allocation3 + $0x30] sm:$0xff] }
 0x6c5   : > { %4311 = vadd.xlane.f32.xlu0 %v10817_v15  ;;  %5794 = vmatprep.mubr.f32.mxu1 %v7898_v49  ;;  %v4449_v25 = vadd.f32 %v7896_v24, %v4448_v30  ;;  %7917 = vpow2.f32 %v3000_v47  ;;  %v4200_v2 = vmul.f32 %v13743_v27, %v4136_v56  ;;  %v13745_v47 = vld [vmem:[#allocation159_spill] sm:$0xff]  ;;  %v13748_v56 = vld [vmem:[#allocation189_spill] sm:$0xff] }
 0x6c6   : > { %5414 = vmatprep.mubr.f32.mxu0 %v11604_v3  ;;  %5795 = vmatmul.mubr.f32.gmra.mxu1 %v7896_v24  ;;  %7919 = vpow2.f32 %v2994_v58  ;;  %v3260_v20 = vpop.permute.xlu0 %3259  ;;  %v13754_v3 = vld [vmem:[#allocation222_spill] sm:$0xff] }
 0x6c7   : > { %5799 = vmatprep.mubr.f32.mxu1 %v11606_v32  ;;  %v11613_v15 = vadd.f32 %v7898_v49, %v4449_v25  ;;  %v13746_v25 = vld [vmem:[#allocation213_spill] sm:$0xff] }
 0x6c8   : > { %5415 = vmatmul.mubr.f32.gmra.mxu0 %v11602_v13 }
 0x6c9   : > { %v7900_v33 = vpop.eup %7899 }
 0x6ca   : > { %v7902_v1 = vpop.eup %7901 }
 0x6cb   : > { %v7904_v7 = vpop.eup %7903  ;;  %v4458_v55 = vadd.f32 %v7902_v1, %v7900_v33  ;;  %5419 = vmatprep.mubr.f32.mxu0 %v7902_v1 }
 0x6cc   : > { %v7906_v34 = vpop.eup %7905  ;;  %5420 = vmatmul.mubr.f32.gmra.mxu0 %v7900_v33  ;;  %v4133_v33 = vld [vmem:[#allocation3 + $0x18] sm:$0xff] }
 0x6cd   : > { %v11618_v42 = vpop.eup %7907  ;;  %v4459_v37 = vadd.f32 %v7904_v7, %v4458_v55  ;;  %v4197_v1 = vmul.f32 %v13746_v25, %v4133_v33  ;;  %v13752_v25 = vld [vmem:[#allocation224_spill] sm:$0xff] }
 0x6ce   : > { %13736 = vst [vmem:[#allocation305_spill] sm:$0xff] %v11618_v42  ;;  %5800 = vmatmul.mubr.f32.gmra.mxu1 %v11618_v42  ;;  %v11623_v4 = vpop.eup %7909 }
 0x6cf   : > { %5804 = vmatprep.mubr.f32.mxu1 %v7906_v34  ;;  %v11621_v54 = vadd.f32 %v7906_v34, %v4459_v37  ;;  %13737 = vst [vmem:[#allocation232_spill] sm:$0xff] %v11623_v4  ;;  %5424 = vmatprep.mubr.f32.mxu0 %v11623_v4  ;;  %v11627_v36 = vpop.eup %7911  ;;  %v13747_v34 = vld [vmem:[#allocation220_spill] sm:$0xff] }
 0x6d0   : > { %13739 = vst [vmem:[#allocation101_spill] sm:$0xff] %v11627_v36  ;;  %v11631_v51 = vpop.eup %7913  ;;  %v3535_v0 = vsub.f32 %v13747_v34, %v3260_v20 }
 0x6d1   : > { %4296 = vadd.xlane.f32.xlu1 %v13738_v6  ;;  %13740 = vst [vmem:[#allocation284_spill] sm:$0xff] %v11631_v51  ;;  %5425 = vmatmul.mubr.f32.gmra.mxu0 %v11631_v51  ;;  %v11635_v57 = vpop.eup %7915  ;;  %v4733_v6 = vld [vmem:[#allocation4 + $0x160] sm:$0xff] }
 0x6d2   : > { %5805 = vmatmul.mubr.f32.gmra.mxu1 %v7904_v7  ;;  %13741 = vst [vmem:[#allocation95_spill] sm:$0xff] %v11635_v57  ;;  %v11638_v40 = vpop.eup %7917  ;;  %v3964_v37 = vmul.f32 1.442695, %v3535_v0  ;;  %v5117_v4 = vmul.f32 %v11436_v50, %v4733_v6 }
 0x6d3   : > { %5809 = vmatprep.mubr.f32.mxu1 %v11627_v36  ;;  %13742 = vst [vmem:[#allocation97_spill] sm:$0xff] %v11638_v40  ;;  %v11644_v49 = vpop.eup %7919 }
 0x6d4   : > { %13744 = vst [vmem:[#allocation96_spill] sm:$0xff] %v11644_v49  ;;  %7921 = vpow2.f32 %v3964_v37 }
 0x6d6   : > { %5810 = vmatmul.mubr.f32.gmra.mxu1 %v11635_v57 }
 0x6db   : > { %4988 = vperm.xlu0 %7497, %v11638_v40  }
 0x6dc   : > { %v4292_v24 = vpop.xlane.xlu0 %4291 }
 0x6dd   : > { %v4584_v30 = vadd.f32 %v4292_v24, %v4200_v2  ;;  %v13749_v2 = vld [vmem:[#allocation192_spill] sm:$0xff] }
 0x6df   : > { %4649 = vst.msk [vmem:[#allocation3 + $0x30] sm:$0xff] %vm4642_vm1, %v4584_v30  ;;  %3289 = vperm.xlu0 %7497, %v10913_v18   ;;  %v13750_v30 = vld [vmem:[#allocation196_spill] sm:$0xff] }
 0x6e2   : > { %4973 = vperm.xlu1 %7498, %v11644_v49   ;;  %v13751_v49 = vld [vmem:[#allocation199_spill] sm:$0xff] }
 0x6e6   : > { %3274 = vperm.xlu1 %7498, %v13745_v47  }
 0x6e8   : > { %v4277_v7 = vpop.xlane.xlu1 %4276 }
 0x6e9   : > { %v4581_v55 = vadd.f32 %v4277_v7, %v4197_v1  ;;  %v3537_v1 = vsub.f32 %v13752_v25, %v3260_v20  ;;  %v13753_v7 = vld [vmem:[#allocation218_spill] sm:$0xff] }
 0x6ea   : > { %v3534_v34 = vsub.f32 %v13753_v7, %v3260_v20 }
 0x6eb   : > { %4646 = vst.msk [vmem:[#allocation3 + $0x18] sm:$0xff] %vm4642_vm1, %v4581_v55  ;;  %v3968_v13 = vmul.f32 1.442695, %v3537_v1  ;;  %v13755_v1 = vld [vmem:[#allocation265_spill] sm:$0xff] }
 0x6ec   : > { %v11651_v29 = vpop.permute.xlu1 %4953  ;;  %v3962_v7 = vmul.f32 1.442695, %v3534_v34  ;;  %v2892_v34 = vsub.f32 %v13755_v1, %v13687_v53  ;;  %v13764_v1 = vld [vmem:[#allocation226_spill] sm:$0xff] }
 0x6f0   : > { %v3255_v58 = vpop.permute.xlu1 %3254 }
 0x6f1   : > { %v3530_v27 = vsub.f32 %v13748_v56, %v3255_v58  ;;  %v3531_v24 = vsub.f32 %v13749_v2, %v3255_v58  ;;  %v3532_v40 = vsub.f32 %v13750_v30, %v3255_v58  ;;  %v3533_v36 = vsub.f32 %v13751_v49, %v3255_v58  ;;  %v5351_v33 = vpop.f32.mrf.mxu0  ;;  %v4734_v2 = vld [vmem:[#allocation4 + $0x30] sm:$0xff] }
 0x6f2   : > { %v3536_v30 = vsub.f32 %v13754_v3, %v3260_v20  ;;  %v2895_v3 = vsub.f32 %v10785_v35, %v10789_v46 }
 0x6f3   : > { %v3954_v57 = vmul.f32 1.442695, %v3530_v27  ;;  %v3956_v55 = vmul.f32 1.442695, %v3531_v24  ;;  %v3958_v32 = vmul.f32 1.442695, %v3532_v40  ;;  %v5736_v51 = vpop.f32.mrf.mxu1  ;;  %v5353_v0 = vpop.f32.mrf.mxu0  ;;  %v5118_v24 = vmul.f32 %v11313_v43, %v4734_v2 }
 0x6f4   : > { %v3960_v56 = vmul.f32 1.442695, %v3533_v36  ;;  %v5737_v42 = vadd.f32 %v5736_v51, %v5351_v33  ;;  %v3966_v36 = vmul.f32 1.442695, %v3536_v30 }
 0x6f5   : > { %7923 = vpow2.f32 %v3954_v57  ;;  %v5738_v49 = vpop.f32.mrf.mxu1  ;;  %v5356_v58 = vpop.f32.mrf.mxu0 }
 0x6f6   : > { %7925 = vpow2.f32 %v3956_v55  ;;  %v5951_v25 = vadd.f32 %v5737_v42, %v5117_v4  ;;  %v11667_v42 = vpop.eup %7921  ;;  %v3004_v4 = vmul.f32 1.442695, %v2895_v3  ;;  %v11684_v55 = vpop.permute.xlu0 %4968 }
 0x6f7   : > { %7927 = vpow2.f32 %v3958_v32  ;;  %v5741_v27 = vpop.f32.mrf.mxu1  ;;  %v5358_v40 = vpop.f32.mrf.mxu0  ;;  %v4303_v32 = vadd.f32 %v10751_v5, %v10742_v23 }
 0x6f8   : > { %7929 = vpow2.f32 %v3960_v56  ;;  %6015 = vst [vmem:[#allocation4 + $0x160] sm:$0xff] %v5951_v25  ;;  %v5742_v50 = vadd.f32 %v5741_v27, %v5356_v58  ;;  %v4138_v56 = vld [vmem:[#allocation3 + $0x40] sm:$0xff] }
 0x6f9   : > { %v5743_v51 = vpop.f32.mrf.mxu1  ;;  %7931 = vpow2.f32 %v3968_v13  ;;  %v4304_v13 = vadd.f32 %v10758_v28, %v4303_v32  ;;  %v13759_v27 = vld [vmem:[#allocation231_spill] sm:$0xff] }
 0x6fa   : > { %v5952_v37 = vadd.f32 %v5742_v50, %v5118_v24  ;;  %7933 = vpow2.f32 %v3962_v7  ;;  %v3270_v0 = vpop.permute.xlu0 %3269  ;;  %v4135_v7 = vld [vmem:[#allocation3 + $0x28] sm:$0xff] }
 0x6fb   : > { %7935 = vpow2.f32 %v3966_v36  ;;  %v4305_v28 = vadd.f32 %v10749_v62, %v4304_v13  ;;  %v13757_v62 = vld [vmem:[#allocation152_spill] sm:$0xff]  ;;  %v4199_v40 = vmul.f32 %v13759_v27, %v4135_v7  ;;  %v13760_v36 = vld [vmem:[#allocation238_spill] sm:$0xff] }
 0x6fc   : > { %6016 = vst [vmem:[#allocation4 + $0x30] sm:$0xff] %v5952_v37  ;;  %7937 = vpow2.f32 %v3004_v4  ;;  %v4202_v30 = vmul.f32 %v13757_v62, %v4138_v56  ;;  %v3543_v51 = vsub.f32 %v13760_v36, %v3270_v0  ;;  %v13761_v4 = vld [vmem:[#allocation221_spill] sm:$0xff]  ;;  %v4736_v36 = vld [vmem:[#allocation4] sm:$0xff] }
 0x6fd   : > { %v13766_v56 = vld [vmem:[#allocation237_spill] sm:$0xff] }
 0x6fe   : > { %4321 = vadd.xlane.f32.xlu0 %v10879_v11  ;;  %v2998_v11 = vmul.f32 1.442695, %v2892_v34  ;;  %v3980_v3 = vmul.f32 1.442695, %v3543_v51  ;;  %v3542_v62 = vsub.f32 %v13766_v56, %v3270_v0  ;;  %v13767_v51 = vld [vmem:[#allocation240_spill] sm:$0xff] }
 0x700   : > { %7939 = vpow2.f32 %v2998_v11 }
 0x701   : > { %7941 = vpow2.f32 %v3980_v3  ;;  %v4737_v3 = vld [vmem:[#allocation4 + $0xf0] sm:$0xff] }
 0x702   : > { %v7924_v43 = vpop.eup %7923 }
 0x703   : > { %v7926_v57 = vpop.eup %7925 }
 0x704   : > { %v7928_v20 = vpop.eup %7927  ;;  %5429 = vmatprep.mubr.f32.mxu0 %v7926_v57  ;;  %v4468_v6 = vadd.f32 %v7926_v57, %v7924_v43 }
 0x705   : > { %v7930_v33 = vpop.eup %7929  ;;  %5430 = vmatmul.mubr.f32.gmra.mxu0 %v7924_v43  ;;  %v4735_v43 = vld [vmem:[#allocation4 + $0x1e0] sm:$0xff] }
 0x706   : > { %5814 = vmatprep.mubr.f32.mxu1 %v7930_v33  ;;  %5434 = vmatprep.mubr.f32.mxu0 %v11667_v42  ;;  %v4469_v23 = vadd.f32 %v7928_v20, %v4468_v6  ;;  %v11673_v5 = vpop.eup %7931  ;;  %v13763_v6 = vld [vmem:[#allocation225_spill] sm:$0xff] }
 0x707   : > { %5815 = vmatmul.mubr.f32.gmra.mxu1 %v7928_v20  ;;  %v11675_v35 = vpop.eup %7933  ;;  %v13762_v20 = vld [vmem:[#allocation223_spill] sm:$0xff] }
 0x708   : > { %5819 = vmatprep.mubr.f32.mxu1 %v11673_v5  ;;  %v11679_v46 = vadd.f32 %v7930_v33, %v4469_v23  ;;  %v11682_v53 = vpop.eup %7935 }
 0x709   : > { %5435 = vmatmul.mubr.f32.gmra.mxu0 %v11675_v35  ;;  %v11687_v2 = vpop.eup %7937 }
 0x70a   : > { %4306 = vadd.xlane.f32.xlu1 %v4305_v28  ;;  %13756 = vst [vmem:[#allocation102_spill] sm:$0xff] %v11687_v2  ;;  %v13765_v28 = vld [vmem:[#allocation242_spill] sm:$0xff] }
 0x70b   : > { %5820 = vmatmul.mubr.f32.gmra.mxu1 %v11682_v53  ;;  %v3545_v11 = vsub.f32 %v13765_v28, %v3270_v0  ;;  %v3978_v28 = vmul.f32 1.442695, %v3542_v62 }
 0x70d   : > { %v11693_v25 = vpop.eup %7939 }
 0x70e   : > { %13758 = vst [vmem:[#allocation98_spill] sm:$0xff] %v11693_v25 }
 0x714   : > { %4998 = vperm.xlu0 %7497, %v11687_v2  }
 0x715   : > { %v4302_v49 = vpop.xlane.xlu0 %4301 }
 0x716   : > { %v4586_v58 = vadd.f32 %v4302_v49, %v4202_v30 }
 0x718   : > { %4651 = vst.msk [vmem:[#allocation3 + $0x40] sm:$0xff] %vm4642_vm1, %v4586_v58  ;;  %3299 = vperm.xlu0 %7497, %v10975_v19  }
 0x71b   : > { %4983 = vperm.xlu1 %7498, %v11693_v25  }
 0x71f   : > { %3284 = vperm.xlu1 %7498, %v10772_v41  }
 0x721   : > { %v4287_v24 = vpop.xlane.xlu1 %4286 }
 0x722   : > { %v4583_v50 = vadd.f32 %v4287_v24, %v4199_v40  ;;  %v5119_v40 = vmul.f32 %v11460_v39, %v4735_v43 }
 0x724   : > { %4648 = vst.msk [vmem:[#allocation3 + $0x28] sm:$0xff] %vm4642_vm1, %v4583_v50 }
 0x725   : > { %v11700_v37 = vpop.permute.xlu1 %4963 }
 0x729   : > { %v3265_v32 = vpop.permute.xlu1 %3264 }
 0x72a   : > { %v3538_v57 = vsub.f32 %v13761_v4, %v3265_v32  ;;  %v3539_v13 = vsub.f32 %v13762_v20, %v3265_v32  ;;  %v3540_v33 = vsub.f32 %v13763_v6, %v3265_v32  ;;  %v3541_v34 = vsub.f32 %v13764_v1, %v3265_v32  ;;  %v5361_v23 = vpop.f32.mrf.mxu0 }
 0x72b   : > { %v3544_v4 = vsub.f32 %v13767_v51, %v3270_v0  ;;  %v3984_v6 = vmul.f32 1.442695, %v3545_v11  ;;  %v11718_v51 = vpop.eup %7941 }
 0x72c   : > { %v3970_v30 = vmul.f32 1.442695, %v3538_v57  ;;  %v3972_v49 = vmul.f32 1.442695, %v3539_v13  ;;  %v3974_v58 = vmul.f32 1.442695, %v3540_v33  ;;  %v5746_v7 = vpop.f32.mrf.mxu1  ;;  %v5363_v27 = vpop.f32.mrf.mxu0  ;;  %v5120_v33 = vmul.f32 %v11327_v9, %v4736_v36 }
 0x72d   : > { %v3976_v24 = vmul.f32 1.442695, %v3541_v34  ;;  %v5747_v50 = vadd.f32 %v5746_v7, %v5361_v23  ;;  %v3982_v43 = vmul.f32 1.442695, %v3544_v4  ;;  %v2897_v7 = vsub.f32 %v10847_v14, %v10851_v63  ;;  %v4739_v4 = vld [vmem:[#allocation4 + $0x148] sm:$0xff] }
 0x72e   : > { %7943 = vpow2.f32 %v3970_v30  ;;  %v5748_v32 = vpop.f32.mrf.mxu1  ;;  %v5366_v20 = vpop.f32.mrf.mxu0  ;;  %v5121_v30 = vmul.f32 %v11483_v38, %v4737_v3  ;;  %v4313_v38 = vadd.f32 %v10813_v52, %v10804_v17  ;;  %v13769_v3 = vld [vmem:[#allocation296_spill] sm:$0xff] }
 0x72f   : > { %7945 = vpow2.f32 %v3972_v49  ;;  %v5953_v1 = vadd.f32 %v5747_v50, %v5119_v40  ;;  %v4738_v49 = vld [vmem:[#allocation4 + $0x8] sm:$0xff] }
 0x730   : > { %7947 = vpow2.f32 %v3974_v58  ;;  %v5751_v57 = vpop.f32.mrf.mxu1  ;;  %v5368_v13 = vpop.f32.mrf.mxu0  ;;  %v5122_v50 = vmul.f32 %v11350_v21, %v4738_v49 }
 0x731   : > { %7949 = vpow2.f32 %v3976_v24  ;;  %6017 = vst [vmem:[#allocation4 + $0x1e0] sm:$0xff] %v5953_v1  ;;  %v5752_v39 = vadd.f32 %v5751_v57, %v5366_v20  ;;  %v3008_v1 = vmul.f32 1.442695, %v2897_v7  ;;  %v5123_v13 = vmul.f32 %v11566_v22, %v4739_v4  ;;  %v13771_v7 = vld [vmem:[#allocation30_spill] sm:$0xff] }
 0x732   : > { %v5753_v34 = vpop.f32.mrf.mxu1  ;;  %v5371_v23 = vpop.f32.mrf.mxu0  ;;  %7951 = vpow2.f32 %v3984_v6 }
 0x733   : > { %v5954_v0 = vadd.f32 %v5752_v39, %v5120_v33  ;;  %7953 = vpow2.f32 %v3978_v28  ;;  %v13768_v33 = vld [vmem:[#allocation26_spill] sm:$0xff]  ;;  %v4740_v34 = vld [vmem:[#allocation4 + $0x1d0] sm:$0xff] }
 0x734   : > { %v5756_v56 = vpop.f32.mrf.mxu1  ;;  %v5373_v11 = vpop.f32.mrf.mxu0  ;;  %7955 = vpow2.f32 %v3982_v43  ;;  %v4314_v39 = vadd.f32 %v13768_v33, %v4313_v38  ;;  %v2894_v43 = vsub.f32 %v13769_v3, %v13715_v45 }
 0x735   : > { %6018 = vst [vmem:[#allocation4] sm:$0xff] %v5954_v0  ;;  %v5757_v62 = vadd.f32 %v5756_v56, %v5371_v23  ;;  %7957 = vpow2.f32 %v3008_v1 }
 0x736   : > { %v5758_v58 = vpop.f32.mrf.mxu1  ;;  %v5376_v9 = vpop.f32.mrf.mxu0 }
 0x737   : > { %v5955_v27 = vadd.f32 %v5757_v62, %v5121_v30  ;;  %4331 = vadd.xlane.f32.xlu0 %v10941_v59  ;;  %v13770_v58 = vld [vmem:[#allocation235_spill] sm:$0xff] }
 0x738   : > { %v5761_v40 = vpop.f32.mrf.mxu1  ;;  %v5378_v24 = vpop.f32.mrf.mxu0 }
 0x739   : > { %6019 = vst [vmem:[#allocation4 + $0xf0] sm:$0xff] %v5955_v27  ;;  %v5762_v36 = vadd.f32 %v5761_v40, %v5376_v9  ;;  %v5124_v9 = vmul.f32 %v13770_v58, %v4740_v34  ;;  %v4315_v27 = vadd.f32 %v13771_v7, %v4314_v39  ;;  %v3002_v24 = vmul.f32 1.442695, %v2894_v43  ;;  %v4140_v43 = vld [vmem:[#allocation3 + $0x50] sm:$0xff] }
 0x73a   : > { %v5763_v32 = vpop.f32.mrf.mxu1  ;;  %v5381_v20 = vpop.f32.mrf.mxu0  ;;  %v13774_v7 = vld [vmem:[#allocation49_spill] sm:$0xff] }
 0x73b   : > { %v7944_v6 = vpop.eup %7943  ;;  %v5956_v14 = vadd.f32 %v5762_v36, %v5122_v50  ;;  %v4741_v50 = vld [vmem:[#allocation4 + $0x100] sm:$0xff]  ;;  %v11737_v32 = vpop.permute.xlu0 %4978  ;;  %7959 = vpow2.f32 %v3002_v24 }
 0x73c   : > { %v7946_v63 = vpop.eup %7945  ;;  %v5766_v28 = vpop.f32.mrf.mxu1 }
 0x73d   : > { %v5383_v59 = vpop.f32.mrf.mxu0  ;;  %v7948_v57 = vpop.eup %7947  ;;  %6020 = vst [vmem:[#allocation4 + $0x8] sm:$0xff] %v5956_v14  ;;  %v5767_v21 = vadd.f32 %v5766_v28, %v5381_v20  ;;  %5439 = vmatprep.mubr.f32.mxu0 %v7946_v63  ;;  %v4478_v17 = vadd.f32 %v7946_v63, %v7944_v6  ;;  %v5125_v14 = vmul.f32 %v11584_v61, %v4741_v50  ;;  %v4742_v28 = vld [vmem:[#allocation4 + $0xc8] sm:$0xff] }
 0x73e   : > { %v7950_v52 = vpop.eup %7949  ;;  %v5768_v23 = vpop.f32.mrf.mxu1  ;;  %5440 = vmatmul.mubr.f32.gmra.mxu0 %v7944_v6  ;;  %v5126_v39 = vmul.f32 %v11556_v10, %v4742_v28  ;;  %v13773_v61 = vld [vmem:[#allocation24_spill] sm:$0xff]  ;;  %v4137_v28 = vld [vmem:[#allocation3 + $0x38] sm:$0xff] }
 0x73f   : > { %v5386_v0 = vpop.f32.mrf.mxu0  ;;  %v5957_v56 = vadd.f32 %v5767_v21, %v5123_v13  ;;  %5824 = vmatprep.mubr.f32.mxu1 %v7950_v52  ;;  %5444 = vmatprep.mubr.f32.mxu0 %v11718_v51  ;;  %v4479_v22 = vadd.f32 %v7948_v57, %v4478_v17  ;;  %v11725_v11 = vpop.eup %7951 }
 0x740   : > { %5825 = vmatmul.mubr.f32.gmra.mxu1 %v7948_v57  ;;  %v5771_v30 = vpop.f32.mrf.mxu1  ;;  %v11727_v49 = vpop.eup %7953 }
 0x741   : > { %v5388_v62 = vpop.f32.mrf.mxu0  ;;  %6021 = vst [vmem:[#allocation4 + $0x148] sm:$0xff] %v5957_v56  ;;  %v5772_v45 = vadd.f32 %v5771_v30, %v5386_v0  ;;  %5829 = vmatprep.mubr.f32.mxu1 %v11725_v11  ;;  %v11732_v40 = vadd.f32 %v7950_v52, %v4479_v22  ;;  %v11735_v4 = vpop.eup %7955  ;;  %v4204_v0 = vmul.f32 %v13773_v61, %v4140_v43  ;;  %v4743_v56 = vld [vmem:[#allocation4 + $0x40] sm:$0xff] }
 0x742   : > { %v5773_v36 = vpop.f32.mrf.mxu1  ;;  %5445 = vmatmul.mubr.f32.gmra.mxu0 %v11727_v49  ;;  %v3280_v52 = vpop.permute.xlu0 %3279  ;;  %v5127_v10 = vmul.f32 %v11651_v29, %v4743_v56 }
 0x743   : > { %v5391_v38 = vpop.f32.mrf.mxu0  ;;  %v5958_v20 = vadd.f32 %v5772_v45, %v5124_v9  ;;  %4316 = vadd.xlane.f32.xlu1 %v4315_v27  ;;  %v11742_v23 = vpop.eup %7957  ;;  %v4744_v27 = vld [vmem:[#allocation4 + $0x1f8] sm:$0xff] }
 0x744   : > { %5830 = vmatmul.mubr.f32.gmra.mxu1 %v11735_v4  ;;  %13772 = vst [vmem:[#allocation99_spill] sm:$0xff] %v11742_v23 }
 0x745   : > { %v5776_v6 = vpop.f32.mrf.mxu1  ;;  %v5393_v1 = vpop.f32.mrf.mxu0  ;;  %6022 = vst [vmem:[#allocation4 + $0x1d0] sm:$0xff] %v5958_v20 }
 0x746   : > { %v5777_v63 = vadd.f32 %v5776_v6, %v5391_v38  ;;  %v5128_v1 = vmul.f32 %v11629_v44, %v4744_v27 }
 0x747   : > { %v5778_v59 = vpop.f32.mrf.mxu1  ;;  %v5396_v57 = vpop.f32.mrf.mxu0 }
 0x748   : > { %v5959_v13 = vadd.f32 %v5777_v63, %v5125_v14  ;;  %v11749_v36 = vpop.eup %7959  ;;  %v13776_v59 = vld [vmem:[#allocation28_spill] sm:$0xff] }
 0x749   : > { %v5781_v21 = vpop.f32.mrf.mxu1  ;;  %v5398_v33 = vpop.f32.mrf.mxu0  ;;  %13775 = vst [vmem:[#allocation214_spill] sm:$0xff] %v11749_v36 }
 0x74a   : > { %6023 = vst [vmem:[#allocation4 + $0x100] sm:$0xff] %v5959_v13  ;;  %v5782_v17 = vadd.f32 %v5781_v21, %v5396_v57  ;;  %v13777_v57 = vld [vmem:[#allocation263_spill] sm:$0xff] }
 0x74b   : > { %v5783_v3 = vpop.f32.mrf.mxu1  ;;  %v4201_v13 = vmul.f32 %v13777_v57, %v4137_v28  ;;  %v13786_v28 = vld [vmem:[#allocation35_spill] sm:$0xff] }
 0x74c   : > { %v5960_v34 = vadd.f32 %v5782_v17, %v5126_v39  ;;  %v5401_v22 = vpop.f32.mrf.mxu0  ;;  %v13778_v39 = vld [vmem:[#allocation249_spill] sm:$0xff]  ;;  %v2899_v57 = vsub.f32 %v13786_v28, %v10913_v18 }
 0x74d   : > { %5008 = vperm.xlu0 %7497, %v11742_v23   ;;  %v3551_v17 = vsub.f32 %v13778_v39, %v3280_v52 }
 0x74e   : > { %6024 = vst [vmem:[#allocation4 + $0xc8] sm:$0xff] %v5960_v34  ;;  %v4312_v30 = vpop.xlane.xlu0 %4311  ;;  %v5786_v58 = vpop.f32.mrf.mxu1  ;;  %v13779_v34 = vld [vmem:[#allocation239_spill] sm:$0xff] }
 0x74f   : > { %v4588_v62 = vadd.f32 %v4312_v30, %v4204_v0  ;;  %v5403_v9 = vpop.f32.mrf.mxu0  ;;  %v5787_v45 = vadd.f32 %v5786_v58, %v5401_v22  ;;  %v3996_v43 = vmul.f32 1.442695, %v3551_v17  ;;  %v13780_v0 = vld [vmem:[#allocation241_spill] sm:$0xff]  ;;  %v13781_v22 = vld [vmem:[#allocation243_spill] sm:$0xff] }
 0x750   : > { %v5788_v24 = vpop.f32.mrf.mxu1  ;;  %v13783_v9 = vld [vmem:[#allocation250_spill] sm:$0xff] }
 0x751   : > { %4653 = vst.msk [vmem:[#allocation3 + $0x50] sm:$0xff] %vm4642_vm1, %v4588_v62  ;;  %3309 = vperm.xlu0 %7497, %v13774_v7   ;;  %v5406_v50 = vpop.f32.mrf.mxu0  ;;  %v5961_v38 = vadd.f32 %v5787_v45, %v5127_v10  ;;  %v13782_v62 = vld [vmem:[#allocation244_spill] sm:$0xff]  ;;  %v3553_v10 = vsub.f32 %v13783_v9, %v3280_v52  ;;  %v13784_v45 = vld [vmem:[#allocation246_spill] sm:$0xff]  ;;  %7961 = vpow2.f32 %v3996_v43  ;;  %v3012_v43 = vmul.f32 1.442695, %v2899_v57 }
 0x752   : > { %v5791_v20 = vpop.f32.mrf.mxu1  ;;  %v3550_v27 = vsub.f32 %v13784_v45, %v3280_v52 }
 0x753   : > { %v5408_v6 = vpop.f32.mrf.mxu0  ;;  %6025 = vst [vmem:[#allocation4 + $0x40] sm:$0xff] %v5961_v38  ;;  %v5792_v14 = vadd.f32 %v5791_v20, %v5406_v50 }
 0x754   : > { %4993 = vperm.xlu1 %7498, %v11749_v36   ;;  %v5793_v29 = vpop.f32.mrf.mxu1  ;;  %v13785_v6 = vld [vmem:[#allocation247_spill] sm:$0xff] }
 0x755   : > { %v5962_v63 = vadd.f32 %v5792_v14, %v5128_v1  ;;  %v3552_v1 = vsub.f32 %v13785_v6, %v3280_v52  ;;  %v4000_v14 = vmul.f32 1.442695, %v3553_v10  ;;  %v3994_v29 = vmul.f32 1.442695, %v3550_v27  ;;  %v13792_v10 = vld [vmem:[#allocation157_spill] sm:$0xff] }
 0x757   : > { %6026 = vst [vmem:[#allocation4 + $0x1f8] sm:$0xff] %v5962_v63  ;;  %v3998_v63 = vmul.f32 1.442695, %v3552_v1  ;;  %v13794_v1 = vld [vmem:[#allocation145_spill] sm:$0xff] }
 0x758   : > { %3294 = vperm.xlu1 %7498, %v13776_v59  }
 0x75a   : > { %v4297_v21 = vpop.xlane.xlu1 %4296 }
 0x75b   : > { %v4585_v33 = vadd.f32 %v4297_v21, %v4201_v13  ;;  %v13787_v13 = vld [vmem:[#allocation44_spill] sm:$0xff]  ;;  %v13788_v21 = vld [vmem:[#allocation163_spill] sm:$0xff] }
 0x75d   : > { %4650 = vst.msk [vmem:[#allocation3 + $0x38] sm:$0xff] %vm4642_vm1, %v4585_v33  ;;  %v13789_v33 = vld [vmem:[#allocation37_spill] sm:$0xff] }
 0x75e   : > { %v11757_v3 = vpop.permute.xlu1 %4973  ;;  %v4323_v39 = vadd.f32 %v13789_v33, %v13788_v21  ;;  %v11771_v17 = vpop.eup %7961  ;;  %v13795_v33 = vld [vmem:[#allocation57_spill] sm:$0xff] }
 0x762   : > { %v3275_v44 = vpop.permute.xlu1 %3274 }
 0x763   : > { %v3546_v61 = vsub.f32 %v13779_v34, %v3275_v44  ;;  %v3547_v56 = vsub.f32 %v13780_v0, %v3275_v44  ;;  %v3548_v30 = vsub.f32 %v13781_v22, %v3275_v44  ;;  %v3549_v58 = vsub.f32 %v13782_v62, %v3275_v44 }
 0x765   : > { %v3986_v24 = vmul.f32 1.442695, %v3546_v61  ;;  %v3988_v50 = vmul.f32 1.442695, %v3547_v56  ;;  %v3990_v38 = vmul.f32 1.442695, %v3548_v30 }
 0x766   : > { %v3992_v20 = vmul.f32 1.442695, %v3549_v58  ;;  %v13790_v61 = vld [vmem:[#allocation31_spill] sm:$0xff]  ;;  %v13791_v30 = vld [vmem:[#allocation320_spill] sm:$0xff] }
 0x767   : > { %7963 = vpow2.f32 %v3986_v24  ;;  %v4324_v0 = vadd.f32 %v13790_v61, %v4323_v39  ;;  %v2896_v62 = vsub.f32 %v13791_v30, %v13745_v47 }
 0x768   : > { %7965 = vpow2.f32 %v3988_v50  ;;  %v11788_v50 = vpop.permute.xlu0 %4988 }
 0x769   : > { %7967 = vpow2.f32 %v3990_v38  ;;  %v4325_v45 = vadd.f32 %v13792_v10, %v4324_v0  ;;  %v3006_v24 = vmul.f32 1.442695, %v2896_v62 }
 0x76a   : > { %7969 = vpow2.f32 %v3992_v20  ;;  %v4142_v20 = vld [vmem:[#allocation3 + $0x60] sm:$0xff] }
 0x76b   : > { %7971 = vpow2.f32 %v4000_v14  ;;  %v4206_v14 = vmul.f32 %v13794_v1, %v4142_v20  ;;  %v13797_v20 = vld [vmem:[#allocation38_spill] sm:$0xff] }
 0x76c   : > { %7973 = vpow2.f32 %v3994_v29  ;;  %v11791_v38 = vpop.permute.xlu0 %3289 }
 0x76d   : > { %7975 = vpow2.f32 %v3998_v63  ;;  %v4745_v63 = vld [vmem:[#allocation4 + $0x20] sm:$0xff] }
 0x76e   : > { %7977 = vpow2.f32 %v3012_v43  ;;  %v5129_v39 = vmul.f32 %v11700_v37, %v4745_v63 }
 0x76f   : > { %7979 = vpow2.f32 %v3006_v24  ;;  %v4139_v24 = vld [vmem:[#allocation3 + $0x48] sm:$0xff] }
 0x770   : > { %4341 = vadd.xlane.f32.xlu0 %v13787_v13 }
 0x774   : > { %v7964_v52 = vpop.eup %7963 }
 0x775   : > { %v7966_v44 = vpop.eup %7965 }
 0x776   : > { %v7968_v34 = vpop.eup %7967  ;;  %5449 = vmatprep.mubr.f32.mxu0 %v7966_v44  ;;  %v4488_v56 = vadd.f32 %v7966_v44, %v7964_v52  ;;  %v4746_v44 = vld [vmem:[#allocation4 + $0x128] sm:$0xff] }
 0x777   : > { %v7970_v22 = vpop.eup %7969  ;;  %5450 = vmatmul.mubr.f32.gmra.mxu0 %v7964_v52  ;;  %v5130_v30 = vmul.f32 %v11684_v55, %v4746_v44 }
 0x778   : > { %5834 = vmatprep.mubr.f32.mxu1 %v7970_v22  ;;  %5454 = vmatprep.mubr.f32.mxu0 %v11771_v17  ;;  %v4489_v18 = vadd.f32 %v7968_v34, %v4488_v56  ;;  %v11777_v58 = vpop.eup %7971 }
 0x779   : > { %5835 = vmatmul.mubr.f32.gmra.mxu1 %v7968_v34  ;;  %v11779_v9 = vpop.eup %7973 }
 0x77a   : > { %5839 = vmatprep.mubr.f32.mxu1 %v11777_v58  ;;  %v11783_v27 = vadd.f32 %v7970_v22, %v4489_v18  ;;  %v11786_v47 = vpop.eup %7975  ;;  %v4747_v18 = vld [vmem:[#allocation4 + $0x1a0] sm:$0xff] }
 0x77b   : > { %5455 = vmatmul.mubr.f32.gmra.mxu0 %v11779_v9  ;;  %v11793_v6 = vpop.eup %7977 }
 0x77c   : > { %4326 = vadd.xlane.f32.xlu1 %v4325_v45  ;;  %13793 = vst [vmem:[#allocation100_spill] sm:$0xff] %v11793_v6  ;;  %v11800_v43 = vpop.eup %7979 }
 0x77d   : > { %5840 = vmatmul.mubr.f32.gmra.mxu1 %v11786_v47  ;;  %13796 = vst [vmem:[#allocation227_spill] sm:$0xff] %v11800_v43 }
 0x784   : > { %v5411_v28 = vpop.f32.mrf.mxu0 }
 0x786   : > { %5018 = vperm.xlu0 %7497, %v11793_v6   ;;  %v5796_v13 = vpop.f32.mrf.mxu1  ;;  %v5413_v21 = vpop.f32.mrf.mxu0 }
 0x787   : > { %v4322_v29 = vpop.xlane.xlu0 %4321  ;;  %v5797_v52 = vadd.f32 %v5796_v13, %v5411_v28  ;;  %v13798_v28 = vld [vmem:[#allocation299_spill] sm:$0xff]  ;;  %v4748_v21 = vld [vmem:[#allocation4 + $0x1f0] sm:$0xff] }
 0x788   : > { %v4590_v57 = vadd.f32 %v4322_v29, %v4206_v14  ;;  %v5798_v34 = vpop.f32.mrf.mxu1  ;;  %v5416_v61 = vpop.f32.mrf.mxu0  ;;  %v5131_v29 = vmul.f32 %v11757_v3, %v4747_v18 }
 0x789   : > { %v5963_v0 = vadd.f32 %v5797_v52, %v5129_v39 }
 0x78a   : > { %4655 = vst.msk [vmem:[#allocation3 + $0x60] sm:$0xff] %vm4642_vm1, %v4590_v57  ;;  %3319 = vperm.xlu0 %7497, %v13795_v33   ;;  %v5418_v22 = vpop.f32.mrf.mxu0  ;;  %v4203_v57 = vmul.f32 %v13798_v28, %v4139_v24  ;;  %v13800_v24 = vld [vmem:[#allocation251_spill] sm:$0xff] }
 0x78b   : > { %6027 = vst [vmem:[#allocation4 + $0x20] sm:$0xff] %v5963_v0  ;;  %v5132_v0 = vmul.f32 %v11737_v32, %v4748_v21  ;;  %v13805_v21 = vld [vmem:[#allocation255_spill] sm:$0xff] }
 0x78c   : > { %v5421_v45 = vpop.f32.mrf.mxu0 }
 0x78d   : > { %5003 = vperm.xlu1 %7498, %v11800_v43  }
 0x78e   : > { %v5801_v56 = vpop.f32.mrf.mxu1  ;;  %v5423_v14 = vpop.f32.mrf.mxu0 }
 0x78f   : > { %v5802_v62 = vadd.f32 %v5801_v56, %v5416_v61  ;;  %v13799_v56 = vld [vmem:[#allocation257_spill] sm:$0xff] }
 0x790   : > { %v5803_v10 = vpop.f32.mrf.mxu1  ;;  %v3559_v22 = vsub.f32 %v13799_v56, %v11791_v38 }
 0x791   : > { %v5964_v37 = vadd.f32 %v5802_v62, %v5130_v30  ;;  %3304 = vperm.xlu1 %7498, %v13797_v20   ;;  %v5426_v39 = vpop.f32.mrf.mxu0 }
 0x792   : > { %v5806_v1 = vpop.f32.mrf.mxu1  ;;  %v4012_v10 = vmul.f32 1.442695, %v3559_v22 }
 0x793   : > { %6028 = vst [vmem:[#allocation4 + $0x128] sm:$0xff] %v5964_v37  ;;  %v5807_v63 = vadd.f32 %v5806_v1, %v5421_v45  ;;  %v4307_v13 = vpop.xlane.xlu1 %4306  ;;  %v5428_v61 = vpop.f32.mrf.mxu0  ;;  %v13801_v1 = vld [vmem:[#allocation253_spill] sm:$0xff] }
 0x794   : > { %v5808_v55 = vpop.f32.mrf.mxu1  ;;  %v4587_v44 = vadd.f32 %v4307_v13, %v4203_v57  ;;  %v13804_v57 = vld [vmem:[#allocation258_spill] sm:$0xff]  ;;  %7981 = vpow2.f32 %v4012_v10  ;;  %v13806_v61 = vld [vmem:[#allocation256_spill] sm:$0xff] }
 0x795   : > { %v5965_v52 = vadd.f32 %v5807_v63, %v5131_v29  ;;  %v13802_v29 = vld [vmem:[#allocation252_spill] sm:$0xff]  ;;  %v13803_v63 = vld [vmem:[#allocation254_spill] sm:$0xff]  ;;  %v3561_v13 = vsub.f32 %v13804_v57, %v11791_v38  ;;  %v3558_v55 = vsub.f32 %v13805_v21, %v11791_v38  ;;  %v13812_v21 = vld [vmem:[#allocation23_spill] sm:$0xff] }
 0x796   : > { %v5811_v34 = vpop.f32.mrf.mxu1  ;;  %4652 = vst.msk [vmem:[#allocation3 + $0x48] sm:$0xff] %vm4642_vm1, %v4587_v44  ;;  %v13809_v10 = vld [vmem:[#allocation36_spill] sm:$0xff] }
 0x797   : > { %6029 = vst [vmem:[#allocation4 + $0x1a0] sm:$0xff] %v5965_v52  ;;  %v5812_v30 = vadd.f32 %v5811_v34, %v5426_v39  ;;  %v11811_v3 = vpop.permute.xlu1 %4983  ;;  %v4016_v56 = vmul.f32 1.442695, %v3561_v13  ;;  %v4010_v22 = vmul.f32 1.442695, %v3558_v55  ;;  %v2898_v55 = vsub.f32 %v13812_v21, %v10772_v41 }
 0x798   : > { %v5813_v62 = vpop.f32.mrf.mxu1 }
 0x799   : > { %v5966_v18 = vadd.f32 %v5812_v30, %v5132_v0  ;;  %v3560_v0 = vsub.f32 %v13806_v61, %v11791_v38  ;;  %v13807_v62 = vld [vmem:[#allocation40_spill] sm:$0xff] }
 0x79b   : > { %6030 = vst [vmem:[#allocation4 + $0x1f0] sm:$0xff] %v5966_v18  ;;  %v3285_v45 = vpop.permute.xlu1 %3284  ;;  %v4014_v30 = vmul.f32 1.442695, %v3560_v0  ;;  %v2901_v18 = vsub.f32 %v13807_v62, %v10975_v19  ;;  %v3010_v0 = vmul.f32 1.442695, %v2898_v55 }
 0x79c   : > { %v3554_v37 = vsub.f32 %v13800_v24, %v3285_v45  ;;  %v3555_v14 = vsub.f32 %v13801_v1, %v3285_v45  ;;  %v3556_v32 = vsub.f32 %v13802_v29, %v3285_v45  ;;  %v3557_v28 = vsub.f32 %v13803_v63, %v3285_v45  ;;  %v13808_v45 = vld [vmem:[#allocation51_spill] sm:$0xff]  ;;  %v13811_v63 = vld [vmem:[#allocation170_spill] sm:$0xff] }
 0x79d   : > { %v13810_v24 = vld [vmem:[#allocation151_spill] sm:$0xff] }
 0x79e   : > { %v4002_v39 = vmul.f32 1.442695, %v3554_v37  ;;  %v4004_v52 = vmul.f32 1.442695, %v3555_v14  ;;  %v4006_v44 = vmul.f32 1.442695, %v3556_v32  ;;  %v4333_v37 = vadd.f32 %v13810_v24, %v13809_v10 }
 0x79f   : > { %v4008_v34 = vmul.f32 1.442695, %v3557_v28  ;;  %v3016_v14 = vmul.f32 1.442695, %v2901_v18  ;;  %v13816_v18 = vld [vmem:[#allocation34_spill] sm:$0xff] }
 0x7a0   : > { %7983 = vpow2.f32 %v4002_v39  ;;  %v4334_v28 = vadd.f32 %v13811_v63, %v4333_v37  ;;  %v13817_v37 = vld [vmem:[#allocation70_spill] sm:$0xff] }
 0x7a1   : > { %7985 = vpow2.f32 %v4004_v52  ;;  %v11828_v1 = vpop.eup %7981 }
 0x7a2   : > { %7987 = vpow2.f32 %v4006_v44  ;;  %v13814_v44 = vld [vmem:[#allocation158_spill] sm:$0xff] }
 0x7a3   : > { %7989 = vpow2.f32 %v4008_v34  ;;  %v4335_v34 = vadd.f32 %v13814_v44, %v4334_v28 }
 0x7a4   : > { %7991 = vpow2.f32 %v4016_v56  ;;  %v11845_v56 = vpop.permute.xlu0 %4998 }
 0x7a5   : > { %7993 = vpow2.f32 %v4010_v22 }
 0x7a6   : > { %7995 = vpow2.f32 %v4014_v30  ;;  %v4144_v30 = vld [vmem:[#allocation3 + $0x70] sm:$0xff] }
 0x7a7   : > { %7997 = vpow2.f32 %v3016_v14  ;;  %v4749_v14 = vld [vmem:[#allocation4 + $0xe8] sm:$0xff] }
 0x7a8   : > { %7999 = vpow2.f32 %v3010_v0  ;;  %v3300_v22 = vpop.permute.xlu0 %3299  ;;  %v5133_v28 = vmul.f32 %v11811_v3, %v4749_v14  ;;  %v13821_v14 = vld [vmem:[#allocation273_spill] sm:$0xff] }
 0x7a9   : > { %4351 = vadd.xlane.f32.xlu0 %v13808_v45  ;;  %v4208_v45 = vmul.f32 %v13816_v18, %v4144_v30 }
 0x7ad   : > { %v7984_v38 = vpop.eup %7983 }
 0x7ae   : > { %v7986_v29 = vpop.eup %7985 }
 0x7af   : > { %v7988_v32 = vpop.eup %7987  ;;  %5459 = vmatprep.mubr.f32.mxu0 %v7986_v29  ;;  %v4498_v57 = vadd.f32 %v7986_v29, %v7984_v38 }
 0x7b0   : > { %v7990_v13 = vpop.eup %7989  ;;  %5460 = vmatmul.mubr.f32.gmra.mxu0 %v7984_v38 }
 0x7b1   : > { %5844 = vmatprep.mubr.f32.mxu1 %v7990_v13  ;;  %5464 = vmatprep.mubr.f32.mxu0 %v11828_v1  ;;  %v4499_v19 = vadd.f32 %v7988_v32, %v4498_v57  ;;  %v11834_v39 = vpop.eup %7991 }
 0x7b2   : > { %13813 = vst [vmem:[#allocation236_spill] sm:$0xff] %v11834_v39  ;;  %5845 = vmatmul.mubr.f32.gmra.mxu1 %v7988_v32  ;;  %v11836_v52 = vpop.eup %7993 }
 0x7b3   : > { %5849 = vmatprep.mubr.f32.mxu1 %v11834_v39  ;;  %v11840_v61 = vadd.f32 %v7990_v13, %v4499_v19  ;;  %v11843_v41 = vpop.eup %7995  ;;  %v4750_v13 = vld [vmem:[#allocation4 + $0x78] sm:$0xff] }
 0x7b4   : > { %5465 = vmatmul.mubr.f32.gmra.mxu0 %v11836_v52  ;;  %v11848_v62 = vpop.eup %7997  ;;  %v4141_v19 = vld [vmem:[#allocation3 + $0x58] sm:$0xff]  ;;  %v5134_v18 = vmul.f32 %v11788_v50, %v4750_v13 }
 0x7b5   : > { %4336 = vadd.xlane.f32.xlu1 %v4335_v34  ;;  %13815 = vst [vmem:[#allocation215_spill] sm:$0xff] %v11848_v62  ;;  %v11854_v38 = vpop.eup %7999  ;;  %v13819_v34 = vld [vmem:[#allocation45_spill] sm:$0xff]  ;;  %v13823_v50 = vld [vmem:[#allocation266_spill] sm:$0xff] }
 0x7b6   : > { %5850 = vmatmul.mubr.f32.gmra.mxu1 %v11843_v41  ;;  %13818 = vst [vmem:[#allocation29_spill] sm:$0xff] %v11854_v38 }
 0x7bf   : > { %5028 = vperm.xlu0 %7497, %v11848_v62  }
 0x7c0   : > { %v4332_v10 = vpop.xlane.xlu0 %4331 }
 0x7c1   : > { %v4592_v24 = vadd.f32 %v4332_v10, %v4208_v45  ;;  %v13820_v10 = vld [vmem:[#allocation321_spill] sm:$0xff] }
 0x7c3   : > { %4657 = vst.msk [vmem:[#allocation3 + $0x70] sm:$0xff] %vm4642_vm1, %v4592_v24  ;;  %3329 = vperm.xlu0 %7497, %v13817_v37   ;;  %v4205_v24 = vmul.f32 %v13820_v10, %v4141_v19  ;;  %v13825_v19 = vld [vmem:[#allocation269_spill] sm:$0xff]  ;;  %v13826_v10 = vld [vmem:[#allocation274_spill] sm:$0xff] }
 0x7c5   : > { %v5431_v29 = vpop.f32.mrf.mxu0 }
 0x7c6   : > { %5013 = vperm.xlu1 %7498, %v11854_v38   ;;  %v13843_v38 = vld [vmem:[#allocation25_spill] sm:$0xff] }
 0x7c7   : > { %v5816_v32 = vpop.f32.mrf.mxu1  ;;  %v5433_v63 = vpop.f32.mrf.mxu0 }
 0x7c8   : > { %v5817_v57 = vadd.f32 %v5816_v32, %v5431_v29  ;;  %v3567_v29 = vsub.f32 %v13821_v14, %v3300_v22  ;;  %v13828_v14 = vld [vmem:[#allocation272_spill] sm:$0xff] }
 0x7c9   : > { %v5818_v21 = vpop.f32.mrf.mxu1  ;;  %v5436_v55 = vpop.f32.mrf.mxu0 }
 0x7ca   : > { %v5967_v44 = vadd.f32 %v5817_v57, %v5133_v28  ;;  %3314 = vperm.xlu1 %7498, %v13819_v34   ;;  %v4028_v28 = vmul.f32 1.442695, %v3567_v29  ;;  %v13822_v21 = vld [vmem:[#allocation260_spill] sm:$0xff]  ;;  %v3568_v29 = vsub.f32 %v13828_v14, %v3300_v22 }
 0x7cb   : > { %v5821_v0 = vpop.f32.mrf.mxu1  ;;  %v5438_v30 = vpop.f32.mrf.mxu0 }
 0x7cc   : > { %6031 = vst [vmem:[#allocation4 + $0xe8] sm:$0xff] %v5967_v44  ;;  %v5822_v45 = vadd.f32 %v5821_v0, %v5436_v55  ;;  %v4317_v62 = vpop.xlane.xlu1 %4316  ;;  %v13824_v55 = vld [vmem:[#allocation262_spill] sm:$0xff]  ;;  %8001 = vpow2.f32 %v4028_v28  ;;  %v13832_v28 = vld [vmem:[#allocation43_spill] sm:$0xff] }
 0x7cd   : > { %v5823_v63 = vpop.f32.mrf.mxu1  ;;  %v4589_v3 = vadd.f32 %v4317_v62, %v4205_v24  ;;  %v13827_v62 = vld [vmem:[#allocation270_spill] sm:$0xff] }
 0x7ce   : > { %v5968_v6 = vadd.f32 %v5822_v45, %v5134_v18  ;;  %v3569_v18 = vsub.f32 %v13826_v10, %v3300_v22  ;;  %v3566_v45 = vsub.f32 %v13827_v62, %v3300_v22  ;;  %v13833_v62 = vld [vmem:[#allocation162_spill] sm:$0xff] }
 0x7cf   : > { %4654 = vst.msk [vmem:[#allocation3 + $0x58] sm:$0xff] %vm4642_vm1, %v4589_v3 }
 0x7d0   : > { %6032 = vst [vmem:[#allocation4 + $0x78] sm:$0xff] %v5968_v6  ;;  %v11863_v32 = vpop.permute.xlu1 %4993  ;;  %v4032_v23 = vmul.f32 1.442695, %v3569_v18 }
 0x7d4   : > { %v3295_v57 = vpop.permute.xlu1 %3294 }
 0x7d5   : > { %v3562_v30 = vsub.f32 %v13822_v21, %v3295_v57  ;;  %v3563_v13 = vsub.f32 %v13823_v50, %v3295_v57  ;;  %v3564_v44 = vsub.f32 %v13824_v55, %v3295_v57  ;;  %v3565_v0 = vsub.f32 %v13825_v19, %v3295_v57  ;;  %v13829_v57 = vld [vmem:[#allocation47_spill] sm:$0xff] }
 0x7d6   : > { %v4026_v21 = vmul.f32 1.442695, %v3566_v45  ;;  %v4030_v50 = vmul.f32 1.442695, %v3568_v29  ;;  %v2903_v55 = vsub.f32 %v13829_v57, %v13774_v7  ;;  %v13836_v29 = vld [vmem:[#allocation42_spill] sm:$0xff] }
 0x7d7   : > { %v4018_v24 = vmul.f32 1.442695, %v3562_v30  ;;  %v4020_v6 = vmul.f32 1.442695, %v3563_v13  ;;  %v4022_v63 = vmul.f32 1.442695, %v3564_v44 }
 0x7d8   : > { %v4024_v3 = vmul.f32 1.442695, %v3565_v0  ;;  %v13830_v30 = vld [vmem:[#allocation164_spill] sm:$0xff]  ;;  %v13831_v13 = vld [vmem:[#allocation46_spill] sm:$0xff]  ;;  %v3020_v0 = vmul.f32 1.442695, %v2903_v55  ;;  %v11894_v55 = vpop.permute.xlu0 %5008 }
 0x7d9   : > { %8003 = vpow2.f32 %v4018_v24  ;;  %v4343_v44 = vadd.f32 %v13832_v28, %v13831_v13  ;;  %v11877_v19 = vpop.eup %8001  ;;  %v4146_v13 = vld [vmem:[#allocation3 + $0x80] sm:$0xff] }
 0x7da   : > { %8005 = vpow2.f32 %v4020_v6  ;;  %v13834_v6 = vld [vmem:[#allocation27_spill] sm:$0xff] }
 0x7db   : > { %8007 = vpow2.f32 %v4022_v63  ;;  %v4344_v45 = vadd.f32 %v13833_v62, %v4343_v44  ;;  %v2900_v63 = vsub.f32 %v13834_v6, %v13776_v59  ;;  %v13839_v44 = vld [vmem:[#allocation41_spill] sm:$0xff] }
 0x7dc   : > { %8009 = vpow2.f32 %v4024_v3 }
 0x7dd   : > { %8011 = vpow2.f32 %v4032_v23  ;;  %v3014_v57 = vmul.f32 1.442695, %v2900_v63 }
 0x7de   : > { %8013 = vpow2.f32 %v4026_v21  ;;  %v4345_v21 = vadd.f32 %v13836_v29, %v4344_v45  ;;  %v4751_v45 = vld [vmem:[#allocation4 + $0x70] sm:$0xff] }
 0x7df   : > { %8015 = vpow2.f32 %v4030_v50  ;;  %v5135_v63 = vmul.f32 %v11863_v32, %v4751_v45  ;;  %v4752_v29 = vld [vmem:[#allocation4 + $0x90] sm:$0xff] }
 0x7e0   : > { %8017 = vpow2.f32 %v3020_v0  ;;  %v13844_v45 = vld [vmem:[#allocation281_spill] sm:$0xff] }
 0x7e1   : > { %8019 = vpow2.f32 %v3014_v57 }
 0x7e2   : > { %4361 = vadd.xlane.f32.xlu0 %v13830_v30  ;;  %v3310_v30 = vpop.permute.xlu0 %3309 }
 0x7e6   : > { %v8004_v22 = vpop.eup %8003 }
 0x7e7   : > { %v8006_v10 = vpop.eup %8005 }
 0x7e8   : > { %v8008_v18 = vpop.eup %8007  ;;  %5469 = vmatprep.mubr.f32.mxu0 %v8006_v10  ;;  %v4508_v23 = vadd.f32 %v8006_v10, %v8004_v22 }
 0x7e9   : > { %v8010_v24 = vpop.eup %8009  ;;  %5470 = vmatmul.mubr.f32.gmra.mxu0 %v8004_v22  ;;  %v4210_v22 = vmul.f32 %v13839_v44, %v4146_v13  ;;  %v4143_v13 = vld [vmem:[#allocation3 + $0x68] sm:$0xff] }
 0x7ea   : > { %5854 = vmatprep.mubr.f32.mxu1 %v8010_v24  ;;  %5474 = vmatprep.mubr.f32.mxu0 %v11877_v19  ;;  %v4509_v7 = vadd.f32 %v8008_v18, %v4508_v23  ;;  %v11883_v3 = vpop.eup %8011 }
 0x7eb   : > { %13835 = vst [vmem:[#allocation261_spill] sm:$0xff] %v11883_v3  ;;  %5855 = vmatmul.mubr.f32.gmra.mxu1 %v8008_v18  ;;  %v11885_v14 = vpop.eup %8013  ;;  %v13840_v18 = vld [vmem:[#allocation203_spill] sm:$0xff] }
 0x7ec   : > { %5859 = vmatprep.mubr.f32.mxu1 %v11883_v3  ;;  %v11889_v50 = vadd.f32 %v8010_v24, %v4509_v7  ;;  %v11892_v59 = vpop.eup %8015 }
 0x7ed   : > { %5475 = vmatmul.mubr.f32.gmra.mxu0 %v11885_v14  ;;  %13837 = vst [vmem:[#allocation229_spill] sm:$0xff] %v11892_v59  ;;  %v11897_v28 = vpop.eup %8017 }
 0x7ee   : > { %4346 = vadd.xlane.f32.xlu1 %v4345_v21  ;;  %13838 = vst [vmem:[#allocation264_spill] sm:$0xff] %v11897_v28  ;;  %v11903_v62 = vpop.eup %8019 }
 0x7ef   : > { %5860 = vmatmul.mubr.f32.gmra.mxu1 %v11892_v59  ;;  %13841 = vst [vmem:[#allocation107_spill] sm:$0xff] %v11903_v62 }
 0x7f8   : > { %5038 = vperm.xlu0 %7497, %v11897_v28   ;;  %v5136_v28 = vmul.f32 %v11845_v56, %v4752_v29  ;;  %v13846_v56 = vld [vmem:[#allocation277_spill] sm:$0xff] }
 0x7f9   : > { %v4342_v0 = vpop.xlane.xlu0 %4341 }
 0x7fa   : > { %v4594_v10 = vadd.f32 %v4342_v0, %v4210_v22  ;;  %v13842_v22 = vld [vmem:[#allocation178_spill] sm:$0xff] }
 0x7fc   : > { %4659 = vst.msk [vmem:[#allocation3 + $0x80] sm:$0xff] %vm4642_vm1, %v4594_v10  ;;  %3339 = vperm.xlu0 %7497, %v13840_v18  }
 0x7fe   : > { %v5441_v23 = vpop.f32.mrf.mxu0 }
 0x7ff   : > { %5023 = vperm.xlu1 %7498, %v11903_v62   ;;  %v4207_v62 = vmul.f32 %v13843_v38, %v4143_v13  ;;  %v13848_v38 = vld [vmem:[#allocation278_spill] sm:$0xff] }
 0x800   : > { %v5826_v24 = vpop.f32.mrf.mxu1  ;;  %v5443_v6 = vpop.f32.mrf.mxu0 }
 0x801   : > { %v5827_v7 = vadd.f32 %v5826_v24, %v5441_v23  ;;  %v3575_v23 = vsub.f32 %v13844_v45, %v3310_v30  ;;  %v13851_v45 = vld [vmem:[#allocation280_spill] sm:$0xff] }
 0x802   : > { %v5828_v21 = vpop.f32.mrf.mxu1  ;;  %v5446_v57 = vpop.f32.mrf.mxu0 }
 0x803   : > { %v5969_v44 = vadd.f32 %v5827_v7, %v5135_v63  ;;  %3324 = vperm.xlu1 %7498, %v13842_v22   ;;  %v4044_v63 = vmul.f32 1.442695, %v3575_v23  ;;  %v13845_v21 = vld [vmem:[#allocation275_spill] sm:$0xff]  ;;  %v3576_v23 = vsub.f32 %v13851_v45, %v3310_v30 }
 0x804   : > { %v5831_v0 = vpop.f32.mrf.mxu1  ;;  %v5448_v10 = vpop.f32.mrf.mxu0 }
 0x805   : > { %6033 = vst [vmem:[#allocation4 + $0x70] sm:$0xff] %v5969_v44  ;;  %v5832_v2 = vadd.f32 %v5831_v0, %v5446_v57  ;;  %v4327_v43 = vpop.xlane.xlu1 %4326  ;;  %v13847_v57 = vld [vmem:[#allocation276_spill] sm:$0xff]  ;;  %v13849_v0 = vld [vmem:[#allocation282_spill] sm:$0xff]  ;;  %8021 = vpow2.f32 %v4044_v63 }
 0x806   : > { %v5833_v6 = vpop.f32.mrf.mxu1  ;;  %v4591_v32 = vadd.f32 %v4327_v43, %v4207_v62  ;;  %v13850_v43 = vld [vmem:[#allocation279_spill] sm:$0xff]  ;;  %v13855_v63 = vld [vmem:[#allocation50_spill] sm:$0xff] }
 0x807   : > { %v5970_v36 = vadd.f32 %v5832_v2, %v5136_v28  ;;  %v3577_v2 = vsub.f32 %v13849_v0, %v3310_v30  ;;  %v3574_v28 = vsub.f32 %v13850_v43, %v3310_v30  ;;  %v13857_v43 = vld [vmem:[#allocation52_spill] sm:$0xff] }
 0x808   : > { %4656 = vst.msk [vmem:[#allocation3 + $0x68] sm:$0xff] %vm4642_vm1, %v4591_v32 }
 0x809   : > { %6034 = vst [vmem:[#allocation4 + $0x90] sm:$0xff] %v5970_v36  ;;  %v11912_v24 = vpop.permute.xlu1 %5003  ;;  %v4048_v25 = vmul.f32 1.442695, %v3577_v2 }
 0x80d   : > { %v3305_v7 = vpop.permute.xlu1 %3304 }
 0x80e   : > { %v3570_v10 = vsub.f32 %v13845_v21, %v3305_v7  ;;  %v3571_v29 = vsub.f32 %v13846_v56, %v3305_v7  ;;  %v3572_v44 = vsub.f32 %v13847_v57, %v3305_v7  ;;  %v3573_v13 = vsub.f32 %v13848_v38, %v3305_v7  ;;  %v13852_v7 = vld [vmem:[#allocation55_spill] sm:$0xff] }
 0x80f   : > { %v4042_v21 = vmul.f32 1.442695, %v3574_v28  ;;  %v4046_v56 = vmul.f32 1.442695, %v3576_v23  ;;  %v2905_v57 = vsub.f32 %v13852_v7, %v13795_v33  ;;  %v13861_v23 = vld [vmem:[#allocation54_spill] sm:$0xff] }
 0x810   : > { %v4034_v62 = vmul.f32 1.442695, %v3570_v10  ;;  %v4036_v36 = vmul.f32 1.442695, %v3571_v29  ;;  %v4038_v6 = vmul.f32 1.442695, %v3572_v44 }
 0x811   : > { %v4040_v32 = vmul.f32 1.442695, %v3573_v13  ;;  %v13853_v10 = vld [vmem:[#allocation183_spill] sm:$0xff]  ;;  %v13854_v29 = vld [vmem:[#allocation48_spill] sm:$0xff]  ;;  %v3024_v13 = vmul.f32 1.442695, %v2905_v57  ;;  %v11943_v57 = vpop.permute.xlu0 %5018 }
 0x812   : > { %8023 = vpow2.f32 %v4034_v62  ;;  %v4353_v44 = vadd.f32 %v13855_v63, %v13854_v29  ;;  %v11926_v38 = vpop.eup %8021  ;;  %v4148_v29 = vld [vmem:[#allocation3 + $0x90] sm:$0xff] }
 0x813   : > { %8025 = vpow2.f32 %v4036_v36  ;;  %13856 = vst [vmem:[#allocation109_spill] sm:$0xff] %v11926_v38  ;;  %v13858_v36 = vld [vmem:[#allocation33_spill] sm:$0xff] }
 0x814   : > { %8027 = vpow2.f32 %v4038_v6  ;;  %v4354_v28 = vadd.f32 %v13857_v43, %v4353_v44  ;;  %v2902_v6 = vsub.f32 %v13858_v36, %v13797_v20  ;;  %v13864_v44 = vld [vmem:[#allocation53_spill] sm:$0xff] }
 0x815   : > { %8029 = vpow2.f32 %v4040_v32 }
 0x816   : > { %8031 = vpow2.f32 %v4048_v25  ;;  %v3018_v7 = vmul.f32 1.442695, %v2902_v6 }
 0x817   : > { %8033 = vpow2.f32 %v4042_v21  ;;  %v4355_v21 = vadd.f32 %v13861_v23, %v4354_v28  ;;  %v4753_v28 = vld [vmem:[#allocation4 + $0x1d8] sm:$0xff]  ;;  %v4754_v23 = vld [vmem:[#allocation4 + $0xd0] sm:$0xff] }
 0x818   : > { %8035 = vpow2.f32 %v4046_v56  ;;  %v5137_v6 = vmul.f32 %v11912_v24, %v4753_v28  ;;  %v13869_v28 = vld [vmem:[#allocation291_spill] sm:$0xff] }
 0x819   : > { %8037 = vpow2.f32 %v3024_v13 }
 0x81a   : > { %8039 = vpow2.f32 %v3018_v7 }
 0x81b   : > { %4371 = vadd.xlane.f32.xlu0 %v13853_v10  ;;  %v3320_v10 = vpop.permute.xlu0 %3319 }
 0x81f   : > { %v8024_v30 = vpop.eup %8023 }
 0x820   : > { %v8026_v0 = vpop.eup %8025 }
 0x821   : > { %v8028_v2 = vpop.eup %8027  ;;  %5479 = vmatprep.mubr.f32.mxu0 %v8026_v0  ;;  %v4518_v25 = vadd.f32 %v8026_v0, %v8024_v30 }
 0x822   : > { %v8030_v62 = vpop.eup %8029  ;;  %5480 = vmatmul.mubr.f32.gmra.mxu0 %v8024_v30  ;;  %v4212_v30 = vmul.f32 %v13864_v44, %v4148_v29  ;;  %v4145_v29 = vld [vmem:[#allocation3 + $0x78] sm:$0xff] }
 0x823   : > { %5864 = vmatprep.mubr.f32.mxu1 %v8030_v62  ;;  %5484 = vmatprep.mubr.f32.mxu0 %v11926_v38  ;;  %v4519_v33 = vadd.f32 %v8028_v2, %v4518_v25  ;;  %v11932_v32 = vpop.eup %8031 }
 0x824   : > { %13859 = vst [vmem:[#allocation108_spill] sm:$0xff] %v11932_v32  ;;  %5865 = vmatmul.mubr.f32.gmra.mxu1 %v8028_v2  ;;  %v11934_v45 = vpop.eup %8033  ;;  %v13865_v2 = vld [vmem:[#allocation211_spill] sm:$0xff] }
 0x825   : > { %13860 = vst [vmem:[#allocation110_spill] sm:$0xff] %v11934_v45  ;;  %5869 = vmatprep.mubr.f32.mxu1 %v11932_v32  ;;  %v11938_v56 = vadd.f32 %v8030_v62, %v4519_v33  ;;  %v11941_v20 = vpop.eup %8035 }
 0x826   : > { %5485 = vmatmul.mubr.f32.gmra.mxu0 %v11934_v45  ;;  %13862 = vst [vmem:[#allocation115_spill] sm:$0xff] %v11941_v20  ;;  %v11946_v63 = vpop.eup %8037 }
 0x827   : > { %4356 = vadd.xlane.f32.xlu1 %v4355_v21  ;;  %13863 = vst [vmem:[#allocation117_spill] sm:$0xff] %v11946_v63  ;;  %v11952_v43 = vpop.eup %8039 }
 0x828   : > { %5870 = vmatmul.mubr.f32.gmra.mxu1 %v11941_v20  ;;  %13866 = vst [vmem:[#allocation312_spill] sm:$0xff] %v11952_v43  ;;  %v13868_v20 = vld [vmem:[#allocation154_spill] sm:$0xff] }
 0x831   : > { %5048 = vperm.xlu0 %7497, %v11946_v63   ;;  %v5138_v63 = vmul.f32 %v11894_v55, %v4754_v23  ;;  %v13871_v55 = vld [vmem:[#allocation286_spill] sm:$0xff] }
 0x832   : > { %v4352_v13 = vpop.xlane.xlu0 %4351 }
 0x833   : > { %v4596_v0 = vadd.f32 %v4352_v13, %v4212_v30  ;;  %v13867_v30 = vld [vmem:[#allocation160_spill] sm:$0xff] }
 0x835   : > { %4661 = vst.msk [vmem:[#allocation3 + $0x90] sm:$0xff] %vm4642_vm1, %v4596_v0  ;;  %3349 = vperm.xlu0 %7497, %v13865_v2  }
 0x837   : > { %v5451_v25 = vpop.f32.mrf.mxu0 }
 0x838   : > { %5033 = vperm.xlu1 %7498, %v11952_v43   ;;  %v4209_v43 = vmul.f32 %v13868_v20, %v4145_v29  ;;  %v13873_v20 = vld [vmem:[#allocation288_spill] sm:$0xff] }
 0x839   : > { %v5836_v62 = vpop.f32.mrf.mxu1  ;;  %v5453_v36 = vpop.f32.mrf.mxu0 }
 0x83a   : > { %v5837_v33 = vadd.f32 %v5836_v62, %v5451_v25  ;;  %v3583_v25 = vsub.f32 %v13869_v28, %v3320_v10  ;;  %v13876_v28 = vld [vmem:[#allocation290_spill] sm:$0xff] }
 0x83b   : > { %v5838_v21 = vpop.f32.mrf.mxu1  ;;  %v5456_v7 = vpop.f32.mrf.mxu0 }
 0x83c   : > { %v5971_v44 = vadd.f32 %v5837_v33, %v5137_v6  ;;  %3334 = vperm.xlu1 %7498, %v13867_v30   ;;  %v4060_v6 = vmul.f32 1.442695, %v3583_v25  ;;  %v13870_v21 = vld [vmem:[#allocation283_spill] sm:$0xff]  ;;  %v3584_v25 = vsub.f32 %v13876_v28, %v3320_v10 }
 0x83d   : > { %v5841_v13 = vpop.f32.mrf.mxu1  ;;  %v5458_v0 = vpop.f32.mrf.mxu0 }
 0x83e   : > { %6035 = vst [vmem:[#allocation4 + $0x1d8] sm:$0xff] %v5971_v44  ;;  %v5842_v32 = vadd.f32 %v5841_v13, %v5456_v7  ;;  %v4337_v3 = vpop.xlane.xlu1 %4336  ;;  %v13872_v7 = vld [vmem:[#allocation285_spill] sm:$0xff]  ;;  %v13874_v13 = vld [vmem:[#allocation136_spill] sm:$0xff]  ;;  %8041 = vpow2.f32 %v4060_v6  ;;  %v13880_v6 = vld [vmem:[#allocation175_spill] sm:$0xff] }
 0x83f   : > { %v5843_v36 = vpop.f32.mrf.mxu1  ;;  %v4593_v24 = vadd.f32 %v4337_v3, %v4209_v43  ;;  %v13875_v3 = vld [vmem:[#allocation289_spill] sm:$0xff] }
 0x840   : > { %v5972_v45 = vadd.f32 %v5842_v32, %v5138_v63  ;;  %v3585_v32 = vsub.f32 %v13874_v13, %v3320_v10  ;;  %v3582_v63 = vsub.f32 %v13875_v3, %v3320_v10  ;;  %v13882_v3 = vld [vmem:[#allocation182_spill] sm:$0xff] }
 0x841   : > { %4658 = vst.msk [vmem:[#allocation3 + $0x78] sm:$0xff] %vm4642_vm1, %v4593_v24 }
 0x842   : > { %6036 = vst [vmem:[#allocation4 + $0xd0] sm:$0xff] %v5972_v45  ;;  %v11961_v62 = vpop.permute.xlu1 %5013  ;;  %v4064_v38 = vmul.f32 1.442695, %v3585_v32 }
 0x846   : > { %v3315_v33 = vpop.permute.xlu1 %3314 }
 0x847   : > { %v3578_v0 = vsub.f32 %v13870_v21, %v3315_v33  ;;  %v3579_v23 = vsub.f32 %v13871_v55, %v3315_v33  ;;  %v3580_v44 = vsub.f32 %v13872_v7, %v3315_v33  ;;  %v3581_v29 = vsub.f32 %v13873_v20, %v3315_v33  ;;  %v13877_v33 = vld [vmem:[#allocation64_spill] sm:$0xff] }
 0x848   : > { %v4058_v21 = vmul.f32 1.442695, %v3582_v63  ;;  %v4062_v55 = vmul.f32 1.442695, %v3584_v25  ;;  %v2907_v7 = vsub.f32 %v13877_v33, %v13817_v37  ;;  %v13886_v25 = vld [vmem:[#allocation60_spill] sm:$0xff] }
 0x849   : > { %v4050_v43 = vmul.f32 1.442695, %v3578_v0  ;;  %v4052_v45 = vmul.f32 1.442695, %v3579_v23  ;;  %v4054_v36 = vmul.f32 1.442695, %v3580_v44 }
 0x84a   : > { %v4056_v24 = vmul.f32 1.442695, %v3581_v29  ;;  %v13878_v0 = vld [vmem:[#allocation78_spill] sm:$0xff]  ;;  %v13879_v23 = vld [vmem:[#allocation59_spill] sm:$0xff]  ;;  %v3028_v29 = vmul.f32 1.442695, %v2907_v7  ;;  %v11992_v7 = vpop.permute.xlu0 %5028 }
 0x84b   : > { %8043 = vpow2.f32 %v4050_v43  ;;  %v4363_v44 = vadd.f32 %v13880_v6, %v13879_v23  ;;  %v11975_v20 = vpop.eup %8041  ;;  %v4150_v23 = vld [vmem:[#allocation3 + $0xa0] sm:$0xff] }
 0x84c   : > { %8045 = vpow2.f32 %v4052_v45  ;;  %13881 = vst [vmem:[#allocation103_spill] sm:$0xff] %v11975_v20  ;;  %v13883_v45 = vld [vmem:[#allocation161_spill] sm:$0xff] }
 0x84d   : > { %8047 = vpow2.f32 %v4054_v36  ;;  %v4364_v63 = vadd.f32 %v13882_v3, %v4363_v44  ;;  %v2904_v36 = vsub.f32 %v13883_v45, %v13819_v34  ;;  %v13889_v44 = vld [vmem:[#allocation174_spill] sm:$0xff] }
 0x84e   : > { %8049 = vpow2.f32 %v4056_v24 }
 0x84f   : > { %8051 = vpow2.f32 %v4064_v38  ;;  %v3022_v33 = vmul.f32 1.442695, %v2904_v36 }
 0x850   : > { %8053 = vpow2.f32 %v4058_v21  ;;  %v4365_v21 = vadd.f32 %v13886_v25, %v4364_v63  ;;  %v4755_v63 = vld [vmem:[#allocation4 + $0xb8] sm:$0xff]  ;;  %v4756_v25 = vld [vmem:[#allocation4 + $0x88] sm:$0xff] }
 0x851   : > { %8055 = vpow2.f32 %v4062_v55  ;;  %v5139_v36 = vmul.f32 %v11961_v62, %v4755_v63  ;;  %v13894_v63 = vld [vmem:[#allocation300_spill] sm:$0xff] }
 0x852   : > { %8057 = vpow2.f32 %v3028_v29 }
 0x853   : > { %8059 = vpow2.f32 %v3022_v33 }
 0x854   : > { %4381 = vadd.xlane.f32.xlu0 %v13878_v0  ;;  %v3330_v0 = vpop.permute.xlu0 %3329 }
 0x858   : > { %v8044_v10 = vpop.eup %8043 }
 0x859   : > { %v8046_v13 = vpop.eup %8045 }
 0x85a   : > { %v8048_v32 = vpop.eup %8047  ;;  %5489 = vmatprep.mubr.f32.mxu0 %v8046_v13  ;;  %v4528_v38 = vadd.f32 %v8046_v13, %v8044_v10 }
 0x85b   : > { %v8050_v43 = vpop.eup %8049  ;;  %5490 = vmatmul.mubr.f32.gmra.mxu0 %v8044_v10  ;;  %v4214_v10 = vmul.f32 %v13889_v44, %v4150_v23  ;;  %v4147_v23 = vld [vmem:[#allocation3 + $0x88] sm:$0xff] }
 0x85c   : > { %5874 = vmatprep.mubr.f32.mxu1 %v8050_v43  ;;  %5494 = vmatprep.mubr.f32.mxu0 %v11975_v20  ;;  %v4529_v37 = vadd.f32 %v8048_v32, %v4528_v38  ;;  %v11981_v24 = vpop.eup %8051 }
 0x85d   : > { %13884 = vst [vmem:[#allocation105_spill] sm:$0xff] %v11981_v24  ;;  %5875 = vmatmul.mubr.f32.gmra.mxu1 %v8048_v32  ;;  %v11983_v28 = vpop.eup %8053  ;;  %v13890_v32 = vld [vmem:[#allocation228_spill] sm:$0xff] }
 0x85e   : > { %13885 = vst [vmem:[#allocation104_spill] sm:$0xff] %v11983_v28  ;;  %5879 = vmatprep.mubr.f32.mxu1 %v11981_v24  ;;  %v11987_v55 = vadd.f32 %v8050_v43, %v4529_v37  ;;  %v11990_v34 = vpop.eup %8055 }
 0x85f   : > { %5495 = vmatmul.mubr.f32.gmra.mxu0 %v11983_v28  ;;  %13887 = vst [vmem:[#allocation116_spill] sm:$0xff] %v11990_v34  ;;  %v11995_v6 = vpop.eup %8057 }
 0x860   : > { %4366 = vadd.xlane.f32.xlu1 %v4365_v21  ;;  %13888 = vst [vmem:[#allocation106_spill] sm:$0xff] %v11995_v6  ;;  %v12001_v3 = vpop.eup %8059 }
 0x861   : > { %5880 = vmatmul.mubr.f32.gmra.mxu1 %v11990_v34  ;;  %13891 = vst [vmem:[#allocation118_spill] sm:$0xff] %v12001_v3  ;;  %v13893_v34 = vld [vmem:[#allocation32_spill] sm:$0xff] }
 0x86a   : > { %5058 = vperm.xlu0 %7497, %v11995_v6   ;;  %v5140_v6 = vmul.f32 %v11943_v57, %v4756_v25  ;;  %v13896_v57 = vld [vmem:[#allocation294_spill] sm:$0xff] }
 0x86b   : > { %v4362_v29 = vpop.xlane.xlu0 %4361 }
 0x86c   : > { %v4598_v13 = vadd.f32 %v4362_v29, %v4214_v10  ;;  %v13892_v10 = vld [vmem:[#allocation63_spill] sm:$0xff] }
 0x86e   : > { %4663 = vst.msk [vmem:[#allocation3 + $0xa0] sm:$0xff] %vm4642_vm1, %v4598_v13  ;;  %3359 = vperm.xlu0 %7497, %v13890_v32  }
 0x870   : > { %v5461_v38 = vpop.f32.mrf.mxu0 }
 0x871   : > { %5043 = vperm.xlu1 %7498, %v12001_v3   ;;  %v4211_v3 = vmul.f32 %v13893_v34, %v4147_v23  ;;  %v13898_v34 = vld [vmem:[#allocation295_spill] sm:$0xff] }
 0x872   : > { %v5846_v43 = vpop.f32.mrf.mxu1  ;;  %v5463_v45 = vpop.f32.mrf.mxu0 }
 0x873   : > { %v5847_v37 = vadd.f32 %v5846_v43, %v5461_v38  ;;  %v3591_v38 = vsub.f32 %v13894_v63, %v3330_v0  ;;  %v13901_v63 = vld [vmem:[#allocation155_spill] sm:$0xff] }
 0x874   : > { %v5848_v21 = vpop.f32.mrf.mxu1  ;;  %v5466_v33 = vpop.f32.mrf.mxu0 }
 0x875   : > { %v5973_v44 = vadd.f32 %v5847_v37, %v5139_v36  ;;  %3344 = vperm.xlu1 %7498, %v13892_v10   ;;  %v4076_v36 = vmul.f32 1.442695, %v3591_v38  ;;  %v13895_v21 = vld [vmem:[#allocation292_spill] sm:$0xff]  ;;  %v3592_v38 = vsub.f32 %v13901_v63, %v3330_v0 }
 0x876   : > { %v5851_v29 = vpop.f32.mrf.mxu1  ;;  %v5468_v13 = vpop.f32.mrf.mxu0 }
 0x877   : > { %6037 = vst [vmem:[#allocation4 + $0xb8] sm:$0xff] %v5973_v44  ;;  %v5852_v24 = vadd.f32 %v5851_v29, %v5466_v33  ;;  %v4347_v28 = vpop.xlane.xlu1 %4346  ;;  %v13897_v33 = vld [vmem:[#allocation293_spill] sm:$0xff]  ;;  %8061 = vpow2.f32 %v4076_v36  ;;  %v13905_v36 = vld [vmem:[#allocation68_spill] sm:$0xff] }
 0x878   : > { %v5853_v45 = vpop.f32.mrf.mxu1  ;;  %v4595_v62 = vadd.f32 %v4347_v28, %v4211_v3  ;;  %v13899_v29 = vld [vmem:[#allocation301_spill] sm:$0xff] }
 0x879   : > { %v5974_v20 = vadd.f32 %v5852_v24, %v5140_v6  ;;  %v3593_v24 = vsub.f32 %v13899_v29, %v3330_v0  ;;  %v13900_v28 = vld [vmem:[#allocation297_spill] sm:$0xff] }
 0x87a   : > { %4660 = vst.msk [vmem:[#allocation3 + $0x88] sm:$0xff] %vm4642_vm1, %v4595_v62  ;;  %v3590_v6 = vsub.f32 %v13900_v28, %v3330_v0  ;;  %v13907_v28 = vld [vmem:[#allocation171_spill] sm:$0xff] }
 0x87b   : > { %6038 = vst [vmem:[#allocation4 + $0x88] sm:$0xff] %v5974_v20  ;;  %v12010_v43 = vpop.permute.xlu1 %5023  ;;  %v4080_v59 = vmul.f32 1.442695, %v3593_v24 }
 0x87f   : > { %v3325_v37 = vpop.permute.xlu1 %3324 }
 0x880   : > { %v3586_v13 = vsub.f32 %v13895_v21, %v3325_v37  ;;  %v3587_v25 = vsub.f32 %v13896_v57, %v3325_v37  ;;  %v3588_v44 = vsub.f32 %v13897_v33, %v3325_v37  ;;  %v3589_v23 = vsub.f32 %v13898_v34, %v3325_v37  ;;  %v13902_v37 = vld [vmem:[#allocation204_spill] sm:$0xff] }
 0x881   : > { %v4074_v21 = vmul.f32 1.442695, %v3590_v6  ;;  %v4078_v57 = vmul.f32 1.442695, %v3592_v38  ;;  %v2909_v33 = vsub.f32 %v13902_v37, %v13840_v18  ;;  %v13911_v38 = vld [vmem:[#allocation67_spill] sm:$0xff] }
 0x882   : > { %v4066_v3 = vmul.f32 1.442695, %v3586_v13  ;;  %v4068_v20 = vmul.f32 1.442695, %v3587_v25  ;;  %v4070_v45 = vmul.f32 1.442695, %v3588_v44 }
 0x883   : > { %v4072_v62 = vmul.f32 1.442695, %v3589_v23  ;;  %v13903_v13 = vld [vmem:[#allocation85_spill] sm:$0xff]  ;;  %v13904_v25 = vld [vmem:[#allocation66_spill] sm:$0xff]  ;;  %v3032_v23 = vmul.f32 1.442695, %v2909_v33  ;;  %v12041_v33 = vpop.permute.xlu0 %5038 }
 0x884   : > { %8063 = vpow2.f32 %v4066_v3  ;;  %v4373_v44 = vadd.f32 %v13905_v36, %v13904_v25  ;;  %v12024_v34 = vpop.eup %8061  ;;  %v4152_v25 = vld [vmem:[#allocation3 + $0xb0] sm:$0xff] }
 0x885   : > { %8065 = vpow2.f32 %v4068_v20  ;;  %13906 = vst [vmem:[#allocation111_spill] sm:$0xff] %v12024_v34  ;;  %v13908_v20 = vld [vmem:[#allocation156_spill] sm:$0xff] }
 0x886   : > { %8067 = vpow2.f32 %v4070_v45  ;;  %v4374_v6 = vadd.f32 %v13907_v28, %v4373_v44  ;;  %v2906_v45 = vsub.f32 %v13908_v20, %v13842_v22  ;;  %v13914_v44 = vld [vmem:[#allocation65_spill] sm:$0xff]  ;;  %v4757_v28 = vld [vmem:[#allocation4 + $0xa8] sm:$0xff] }
 0x887   : > { %8069 = vpow2.f32 %v4072_v62  ;;  %v5141_v20 = vmul.f32 %v12010_v43, %v4757_v28  ;;  %v13918_v28 = vld [vmem:[#allocation16_spill] sm:$0xff] }
 0x888   : > { %8071 = vpow2.f32 %v4080_v59  ;;  %v3026_v37 = vmul.f32 1.442695, %v2906_v45 }
 0x889   : > { %8073 = vpow2.f32 %v4074_v21  ;;  %v4375_v21 = vadd.f32 %v13911_v38, %v4374_v6 }
 0x88a   : > { %8075 = vpow2.f32 %v4078_v57 }
 0x88b   : > { %8077 = vpow2.f32 %v3032_v23 }
 0x88c   : > { %8079 = vpow2.f32 %v3026_v37  ;;  %v4149_v37 = vld [vmem:[#allocation3 + $0x98] sm:$0xff] }
 0x88d   : > { %4391 = vadd.xlane.f32.xlu0 %v13903_v13  ;;  %v3340_v13 = vpop.permute.xlu0 %3339 }
 0x891   : > { %v8064_v0 = vpop.eup %8063 }
 0x892   : > { %v8066_v29 = vpop.eup %8065 }
 0x893   : > { %v8068_v24 = vpop.eup %8067  ;;  %5499 = vmatprep.mubr.f32.mxu0 %v8066_v29  ;;  %v4538_v59 = vadd.f32 %v8066_v29, %v8064_v0 }
 0x894   : > { %v8070_v3 = vpop.eup %8069  ;;  %5500 = vmatmul.mubr.f32.gmra.mxu0 %v8064_v0  ;;  %v4216_v0 = vmul.f32 %v13914_v44, %v4152_v25  ;;  %v13916_v44 = vld [vmem:[#allocation200_spill] sm:$0xff] }
 0x895   : > { %5884 = vmatprep.mubr.f32.mxu1 %v8070_v3  ;;  %5504 = vmatprep.mubr.f32.mxu0 %v12024_v34  ;;  %v4539_v18 = vadd.f32 %v8068_v24, %v4538_v59  ;;  %v12030_v62 = vpop.eup %8071  ;;  %v13943_v34 = vld [vmem:[#allocation319_spill] sm:$0xff] }
 0x896   : > { %13909 = vst [vmem:[#allocation113_spill] sm:$0xff] %v12030_v62  ;;  %5885 = vmatmul.mubr.f32.gmra.mxu1 %v8068_v24  ;;  %v12032_v63 = vpop.eup %8073 }
 0x897   : > { %13910 = vst [vmem:[#allocation112_spill] sm:$0xff] %v12032_v63  ;;  %5889 = vmatprep.mubr.f32.mxu1 %v12030_v62  ;;  %v12036_v57 = vadd.f32 %v8070_v3, %v4539_v18  ;;  %v12039_v22 = vpop.eup %8075  ;;  %v4758_v18 = vld [vmem:[#allocation4 + $0x1c8] sm:$0xff]  ;;  %v13917_v62 = vld [vmem:[#allocation39_spill] sm:$0xff] }
 0x898   : > { %5505 = vmatmul.mubr.f32.gmra.mxu0 %v12032_v63  ;;  %13912 = vst [vmem:[#allocation114_spill] sm:$0xff] %v12039_v22  ;;  %v12044_v36 = vpop.eup %8077 }
 0x899   : > { %4376 = vadd.xlane.f32.xlu1 %v4375_v21  ;;  %13913 = vst [vmem:[#allocation123_spill] sm:$0xff] %v12044_v36  ;;  %v12049_v24 = vpop.eup %8079 }
 0x89a   : > { %5890 = vmatmul.mubr.f32.gmra.mxu1 %v12039_v22  ;;  %13915 = vst [vmem:[#allocation248_spill] sm:$0xff] %v12049_v24 }
 0x8a3   : > { %5068 = vperm.xlu0 %7497, %v12044_v36  }
 0x8a4   : > { %v4372_v23 = vpop.xlane.xlu0 %4371 }
 0x8a5   : > { %v4600_v29 = vadd.f32 %v4372_v23, %v4216_v0 }
 0x8a7   : > { %4665 = vst.msk [vmem:[#allocation3 + $0xb0] sm:$0xff] %vm4642_vm1, %v4600_v29  ;;  %v5142_v29 = vmul.f32 %v11992_v7, %v4758_v18  ;;  %v13920_v7 = vld [vmem:[#allocation306_spill] sm:$0xff] }
 0x8a9   : > { %v5471_v6 = vpop.f32.mrf.mxu0 }
 0x8aa   : > { %5053 = vperm.xlu1 %7498, %v12049_v24   ;;  %v4213_v24 = vmul.f32 %v13917_v62, %v4149_v37  ;;  %v13922_v62 = vld [vmem:[#allocation307_spill] sm:$0xff] }
 0x8ab   : > { %v5856_v59 = vpop.f32.mrf.mxu1  ;;  %v5473_v3 = vpop.f32.mrf.mxu0 }
 0x8ac   : > { %v5857_v45 = vadd.f32 %v5856_v59, %v5471_v6  ;;  %v3599_v6 = vsub.f32 %v13918_v28, %v3340_v13  ;;  %v13925_v28 = vld [vmem:[#allocation17_spill] sm:$0xff] }
 0x8ad   : > { %v5858_v38 = vpop.f32.mrf.mxu1  ;;  %v5476_v21 = vpop.f32.mrf.mxu0 }
 0x8ae   : > { %v5975_v25 = vadd.f32 %v5857_v45, %v5141_v20  ;;  %3354 = vperm.xlu1 %7498, %v13916_v44   ;;  %v4092_v20 = vmul.f32 1.442695, %v3599_v6  ;;  %v13919_v38 = vld [vmem:[#allocation302_spill] sm:$0xff]  ;;  %v3600_v6 = vsub.f32 %v13925_v28, %v3340_v13 }
 0x8af   : > { %v5861_v0 = vpop.f32.mrf.mxu1  ;;  %v5478_v23 = vpop.f32.mrf.mxu0 }
 0x8b0   : > { %6039 = vst [vmem:[#allocation4 + $0xa8] sm:$0xff] %v5975_v25  ;;  %v5862_v36 = vadd.f32 %v5861_v0, %v5476_v21  ;;  %v4357_v22 = vpop.xlane.xlu1 %4356  ;;  %v13921_v21 = vld [vmem:[#allocation303_spill] sm:$0xff]  ;;  %v13923_v0 = vld [vmem:[#allocation18_spill] sm:$0xff]  ;;  %8081 = vpow2.f32 %v4092_v20 }
 0x8b1   : > { %v5863_v3 = vpop.f32.mrf.mxu1  ;;  %v4597_v43 = vadd.f32 %v4357_v22, %v4213_v24  ;;  %v13924_v22 = vld [vmem:[#allocation15_spill] sm:$0xff] }
 0x8b2   : > { %v5976_v63 = vadd.f32 %v5862_v36, %v5142_v29  ;;  %v3601_v36 = vsub.f32 %v13923_v0, %v3340_v13  ;;  %v3598_v24 = vsub.f32 %v13924_v22, %v3340_v13  ;;  %v13927_v20 = vld [vmem:[#allocation71_spill] sm:$0xff] }
 0x8b3   : > { %4662 = vst.msk [vmem:[#allocation3 + $0x98] sm:$0xff] %vm4642_vm1, %v4597_v43 }
 0x8b4   : > { %6040 = vst [vmem:[#allocation4 + $0x1c8] sm:$0xff] %v5976_v63  ;;  %v12058_v59 = vpop.permute.xlu1 %5033  ;;  %v4096_v44 = vmul.f32 1.442695, %v3601_v36  ;;  %v13930_v36 = vld [vmem:[#allocation75_spill] sm:$0xff] }
 0x8b8   : > { %v3335_v45 = vpop.permute.xlu1 %3334 }
 0x8b9   : > { %v3594_v23 = vsub.f32 %v13919_v38, %v3335_v45  ;;  %v3595_v18 = vsub.f32 %v13920_v7, %v3335_v45  ;;  %v3596_v25 = vsub.f32 %v13921_v21, %v3335_v45  ;;  %v3597_v37 = vsub.f32 %v13922_v62, %v3335_v45  ;;  %v13926_v45 = vld [vmem:[#allocation212_spill] sm:$0xff] }
 0x8ba   : > { %v4090_v38 = vmul.f32 1.442695, %v3598_v24  ;;  %v4094_v7 = vmul.f32 1.442695, %v3600_v6  ;;  %v2911_v21 = vsub.f32 %v13926_v45, %v13865_v2 }
 0x8bb   : > { %v4082_v29 = vmul.f32 1.442695, %v3594_v23  ;;  %v4084_v63 = vmul.f32 1.442695, %v3595_v18  ;;  %v4086_v3 = vmul.f32 1.442695, %v3596_v25 }
 0x8bc   : > { %v4088_v43 = vmul.f32 1.442695, %v3597_v37  ;;  %v3036_v23 = vmul.f32 1.442695, %v2911_v21  ;;  %v13928_v18 = vld [vmem:[#allocation72_spill] sm:$0xff] }
 0x8bd   : > { %8083 = vpow2.f32 %v4082_v29  ;;  %v4383_v25 = vadd.f32 %v13928_v18, %v13927_v20  ;;  %v12072_v13 = vpop.eup %8081  ;;  %v13937_v20 = vld [vmem:[#allocation198_spill] sm:$0xff] }
 0x8be   : > { %8085 = vpow2.f32 %v4084_v63  ;;  %13929 = vst [vmem:[#allocation125_spill] sm:$0xff] %v12072_v13 }
 0x8bf   : > { %8087 = vpow2.f32 %v4086_v3  ;;  %v4384_v22 = vadd.f32 %v13930_v36, %v4383_v25 }
 0x8c0   : > { %8089 = vpow2.f32 %v4088_v43  ;;  %v13934_v43 = vld [vmem:[#allocation73_spill] sm:$0xff] }
 0x8c1   : > { %8091 = vpow2.f32 %v4096_v44  ;;  %v13931_v44 = vld [vmem:[#allocation167_spill] sm:$0xff]  ;;  %v4385_v28 = vadd.f32 %v13934_v43, %v4384_v22 }
 0x8c2   : > { %4401 = vadd.xlane.f32.xlu0 %v11468_v16  ;;  %8093 = vpow2.f32 %v4090_v38  ;;  %v2908_v16 = vsub.f32 %v13931_v44, %v13867_v30 }
 0x8c3   : > { %8095 = vpow2.f32 %v4094_v7  ;;  %v12089_v7 = vpop.permute.xlu0 %5048 }
 0x8c4   : > { %8097 = vpow2.f32 %v3036_v23  ;;  %v3030_v38 = vmul.f32 1.442695, %v2908_v16  ;;  %v4154_v23 = vld [vmem:[#allocation3 + $0xc0] sm:$0xff] }
 0x8c5   : > { %v4218_v18 = vmul.f32 %v13937_v20, %v4154_v23 }
 0x8c6   : > { %8099 = vpow2.f32 %v3030_v38  ;;  %v4151_v38 = vld [vmem:[#allocation3 + $0xa8] sm:$0xff] }
 0x8c7   : > { %v12095_v21 = vpop.permute.xlu0 %3349 }
 0x8ca   : > { %v8084_v62 = vpop.eup %8083 }
 0x8cb   : > { %v8086_v37 = vpop.eup %8085 }
 0x8cc   : > { %v8088_v0 = vpop.eup %8087  ;;  %5509 = vmatprep.mubr.f32.mxu0 %v8086_v37  ;;  %v4548_v24 = vadd.f32 %v8086_v37, %v8084_v62 }
 0x8cd   : > { %v8090_v2 = vpop.eup %8089  ;;  %5510 = vmatmul.mubr.f32.gmra.mxu0 %v8084_v62 }
 0x8ce   : > { %5894 = vmatprep.mubr.f32.mxu1 %v8090_v2  ;;  %5514 = vmatprep.mubr.f32.mxu0 %v12072_v13  ;;  %v4549_v29 = vadd.f32 %v8088_v0, %v4548_v24  ;;  %v12078_v63 = vpop.eup %8091 }
 0x8cf   : > { %13932 = vst [vmem:[#allocation124_spill] sm:$0xff] %v12078_v63  ;;  %5895 = vmatmul.mubr.f32.gmra.mxu1 %v8088_v0  ;;  %v12080_v3 = vpop.eup %8093  ;;  %v4759_v0 = vld [vmem:[#allocation4 + $0x170] sm:$0xff] }
 0x8d0   : > { %13933 = vst [vmem:[#allocation119_spill] sm:$0xff] %v12080_v3  ;;  %5899 = vmatprep.mubr.f32.mxu1 %v12078_v63  ;;  %v12084_v6 = vadd.f32 %v8090_v2, %v4549_v29  ;;  %v12087_v30 = vpop.eup %8095  ;;  %v5143_v2 = vmul.f32 %v12058_v59, %v4759_v0  ;;  %v4760_v29 = vld [vmem:[#allocation4 + $0x178] sm:$0xff]  ;;  %v13940_v59 = vld [vmem:[#allocation140_spill] sm:$0xff] }
 0x8d1   : > { %5515 = vmatmul.mubr.f32.gmra.mxu0 %v12080_v3  ;;  %13935 = vst [vmem:[#allocation121_spill] sm:$0xff] %v12087_v30  ;;  %v12092_v45 = vpop.eup %8097  ;;  %v13942_v3 = vld [vmem:[#allocation317_spill] sm:$0xff] }
 0x8d2   : > { %4386 = vadd.xlane.f32.xlu1 %v4385_v28  ;;  %13936 = vst [vmem:[#allocation120_spill] sm:$0xff] %v12092_v45 }
 0x8d3   : > { %5900 = vmatmul.mubr.f32.gmra.mxu1 %v12087_v30  ;;  %v12099_v37 = vpop.eup %8099 }
 0x8d4   : > { %13938 = vst [vmem:[#allocation122_spill] sm:$0xff] %v12099_v37 }
 0x8d8   : > { %5078 = vperm.xlu0 %7497, %v12092_v45  }
 0x8dd   : > { %v4382_v25 = vpop.xlane.xlu0 %4381 }
 0x8de   : > { %v4602_v62 = vadd.f32 %v4382_v25, %v4218_v18  ;;  %v5144_v25 = vmul.f32 %v12041_v33, %v4760_v29  ;;  %v13944_v33 = vld [vmem:[#allocation310_spill] sm:$0xff] }
 0x8df   : > { %v3607_v29 = vsub.f32 %v13944_v33, %v12095_v21 }
 0x8e0   : > { %4667 = vst.msk [vmem:[#allocation3 + $0xc0] sm:$0xff] %vm4642_vm1, %v4602_v62 }
 0x8e2   : > { %v5481_v36 = vpop.f32.mrf.mxu0 }
 0x8e3   : > { %5063 = vperm.xlu1 %7498, %v12099_v37   ;;  %v13939_v37 = vld [vmem:[#allocation166_spill] sm:$0xff] }
 0x8e4   : > { %v5866_v22 = vpop.f32.mrf.mxu1  ;;  %v5483_v24 = vpop.f32.mrf.mxu0  ;;  %v4215_v63 = vmul.f32 %v13939_v37, %v4151_v38  ;;  %v4108_v38 = vmul.f32 1.442695, %v3607_v29 }
 0x8e5   : > { %v5867_v44 = vadd.f32 %v5866_v22, %v5481_v36  ;;  %v12103_v16 = vpop.permute.xlu0 %5058  ;;  %v13941_v36 = vld [vmem:[#allocation318_spill] sm:$0xff] }
 0x8e6   : > { %v5868_v43 = vpop.f32.mrf.mxu1  ;;  %v5486_v28 = vpop.f32.mrf.mxu0 }
 0x8e7   : > { %v5977_v23 = vadd.f32 %v5867_v44, %v5143_v2 }
 0x8e8   : > { %v5871_v20 = vpop.f32.mrf.mxu1  ;;  %v5488_v18 = vpop.f32.mrf.mxu0 }
 0x8e9   : > { %6041 = vst [vmem:[#allocation4 + $0x170] sm:$0xff] %v5977_v23  ;;  %v5872_v62 = vadd.f32 %v5871_v20, %v5486_v28  ;;  %v3360_v45 = vpop.permute.xlu0 %3359  ;;  %v4367_v24 = vpop.xlane.xlu1 %4366  ;;  %v13945_v23 = vld [vmem:[#allocation19_spill] sm:$0xff]  ;;  %v13947_v20 = vld [vmem:[#allocation21_spill] sm:$0xff] }
 0x8ea   : > { %v5873_v30 = vpop.f32.mrf.mxu1  ;;  %v3614_v0 = vsub.f32 %v13940_v59, %v3360_v45  ;;  %v3615_v22 = vsub.f32 %v13941_v36, %v3360_v45  ;;  %v3616_v43 = vsub.f32 %v13942_v3, %v3360_v45  ;;  %v3617_v2 = vsub.f32 %v13943_v34, %v3360_v45 }
 0x8eb   : > { %v5978_v13 = vadd.f32 %v5872_v62, %v5144_v25  ;;  %v4599_v44 = vadd.f32 %v4367_v24, %v4215_v63  ;;  %v13946_v63 = vld [vmem:[#allocation20_spill] sm:$0xff]  ;;  %v13948_v62 = vld [vmem:[#allocation22_spill] sm:$0xff] }
 0x8ec   : > { %v4122_v18 = vmul.f32 1.442695, %v3614_v0  ;;  %v4124_v39 = vmul.f32 1.442695, %v3615_v22  ;;  %v4126_v28 = vmul.f32 1.442695, %v3616_v43 }
 0x8ed   : > { %6042 = vst [vmem:[#allocation4 + $0x178] sm:$0xff] %v5978_v13  ;;  %4664 = vst.msk [vmem:[#allocation3 + $0xa8] sm:$0xff] %vm4642_vm1, %v4599_v44  ;;  %v12114_v30 = vpop.permute.xlu1 %5043  ;;  %v4128_v37 = vmul.f32 1.442695, %v3617_v2  ;;  %v13949_v13 = vld [vmem:[#allocation311_spill] sm:$0xff]  ;;  %v13950_v0 = vld [vmem:[#allocation308_spill] sm:$0xff] }
 0x8ee   : > { %8101 = vpow2.f32 %v4122_v18  ;;  %v3609_v59 = vsub.f32 %v13949_v13, %v12095_v21  ;;  %v3606_v36 = vsub.f32 %v13950_v0, %v12095_v21  ;;  %v13951_v44 = vld [vmem:[#allocation309_spill] sm:$0xff] }
 0x8ef   : > { %8103 = vpow2.f32 %v4124_v39  ;;  %v3608_v18 = vsub.f32 %v13951_v44, %v12095_v21  ;;  %v13955_v13 = vld [vmem:[#allocation69_spill] sm:$0xff] }
 0x8f0   : > { %8105 = vpow2.f32 %v4126_v28  ;;  %v4112_v33 = vmul.f32 1.442695, %v3609_v59  ;;  %v4106_v29 = vmul.f32 1.442695, %v3606_v36  ;;  %v2910_v59 = vsub.f32 %v13955_v13, %v13892_v10  ;;  %v4156_v44 = vld [vmem:[#allocation3 + $0xd0] sm:$0xff] }
 0x8f1   : > { %v3345_v3 = vpop.permute.xlu1 %3344  ;;  %8107 = vpow2.f32 %v4128_v37  ;;  %v4110_v28 = vmul.f32 1.442695, %v3608_v18  ;;  %v13957_v18 = vld [vmem:[#allocation190_spill] sm:$0xff] }
 0x8f2   : > { %v3602_v34 = vsub.f32 %v13945_v23, %v3345_v3  ;;  %v3603_v45 = vsub.f32 %v13946_v63, %v3345_v3  ;;  %v3604_v25 = vsub.f32 %v13947_v20, %v3345_v3  ;;  %v3605_v24 = vsub.f32 %v13948_v62, %v3345_v3  ;;  %v13952_v23 = vld [vmem:[#allocation219_spill] sm:$0xff] }
 0x8f3   : > { %8109 = vpow2.f32 %v4108_v38 }
 0x8f4   : > { %v4098_v39 = vmul.f32 1.442695, %v3602_v34  ;;  %v4100_v22 = vmul.f32 1.442695, %v3603_v45  ;;  %v4102_v43 = vmul.f32 1.442695, %v3604_v25 }
 0x8f5   : > { %v4104_v2 = vmul.f32 1.442695, %v3605_v24  ;;  %v13954_v25 = vld [vmem:[#allocation81_spill] sm:$0xff] }
 0x8f6   : > { %8111 = vpow2.f32 %v4098_v39  ;;  %v13956_v39 = vld [vmem:[#allocation179_spill] sm:$0xff] }
 0x8f7   : > { %8113 = vpow2.f32 %v4100_v22  ;;  %4411 = vadd.xlane.f32.xlu0 %v11494_v26  ;;  %v13953_v26 = vld [vmem:[#allocation197_spill] sm:$0xff] }
 0x8f8   : > { %8115 = vpow2.f32 %v4102_v43  ;;  %v4393_v34 = vadd.f32 %v13953_v26, %v13952_v23  ;;  %v3034_v43 = vmul.f32 1.442695, %v2910_v59 }
 0x8f9   : > { %8117 = vpow2.f32 %v4104_v2 }
 0x8fa   : > { %8119 = vpow2.f32 %v4112_v33  ;;  %v4394_v62 = vadd.f32 %v13954_v25, %v4393_v34  ;;  %v4220_v33 = vmul.f32 %v13957_v18, %v4156_v44  ;;  %v4153_v34 = vld [vmem:[#allocation3 + $0xb8] sm:$0xff] }
 0x8fb   : > { %v12127_v37 = vpop.eup %8101  ;;  %4421 = vadd.xlane.f32.xlu0 %v11514_v48  ;;  %8121 = vpow2.f32 %v4106_v29 }
 0x8fc   : > { %v12130_v3 = vpop.eup %8103  ;;  %8123 = vpow2.f32 %v4110_v28  ;;  %v4395_v22 = vadd.f32 %v13956_v39, %v4394_v62  ;;  %v13958_v39 = vld [vmem:[#allocation186_spill] sm:$0xff] }
 0x8fd   : > { %v4573_v21 = vadd.f32 %v12130_v3, %v12127_v37  ;;  %v12134_v38 = vpop.eup %8105  ;;  %8125 = vpow2.f32 %v3034_v43 }
 0x8fe   : > { %v12140_v45 = vpop.eup %8107 }
 0x8ff   : > { %4431 = vadd.xlane.f32.xlu0 %v11529_v12  ;;  %v4574_v63 = vadd.f32 %v12134_v38, %v4573_v21 }
 0x900   : > { %v12145_v20 = vpop.eup %8109 }
 0x901   : > { %v12143_v48 = vadd.f32 %v12140_v45, %v4574_v63  ;;  %v4762_v63 = vld [vmem:[#allocation4 + $0x190] sm:$0xff] }
 0x902   : > { %v5146_v43 = vmul.f32 %v12089_v7, %v4762_v63  ;;  %v13960_v7 = vld [vmem:[#allocation314_spill] sm:$0xff] }
 0x903   : > { %v8112_v24 = vpop.eup %8111  ;;  %4441 = vadd.xlane.f32.xlu0 %v11547_v8 }
 0x904   : > { %v8114_v0 = vpop.eup %8113 }
 0x905   : > { %v12151_v36 = vpop.eup %8115  ;;  %5519 = vmatprep.mubr.f32.mxu0 %v8114_v0 }
 0x906   : > { %v12153_v12 = vpop.eup %8117  ;;  %5520 = vmatmul.mubr.f32.gmra.mxu0 %v8112_v24 }
 0x907   : > { %5904 = vmatprep.mubr.f32.mxu1 %v12153_v12  ;;  %5524 = vmatprep.mubr.f32.mxu0 %v12145_v20  ;;  %v12158_v2 = vpop.eup %8119 }
 0x908   : > { %5905 = vmatmul.mubr.f32.gmra.mxu1 %v12151_v36  ;;  %4396 = vadd.xlane.f32.xlu1 %v4395_v22  ;;  %v12161_v8 = vpop.eup %8121  ;;  %v4217_v22 = vmul.f32 %v13958_v39, %v4153_v34  ;;  %v13965_v39 = vld [vmem:[#allocation187_spill] sm:$0xff] }
 0x909   : > { %5909 = vmatprep.mubr.f32.mxu1 %v12158_v2  ;;  %4451 = vadd.xlane.f32.xlu0 %v11613_v15  ;;  %v12166_v10 = vpop.eup %8123  ;;  %v4761_v15 = vld [vmem:[#allocation4 + $0x68] sm:$0xff] }
 0x90a   : > { %5525 = vmatmul.mubr.f32.gmra.mxu0 %v12161_v8  ;;  %v12173_v21 = vpop.eup %8125 }
 0x90c   : > { %5910 = vmatmul.mubr.f32.gmra.mxu1 %v12166_v10 }
 0x90d   : > { %4461 = vadd.xlane.f32.xlu0 %v11621_v54 }
 0x911   : > { %4471 = vadd.xlane.f32.xlu0 %v11679_v46 }
 0x915   : > { %4481 = vadd.xlane.f32.xlu0 %v11732_v40  ;;  %v5145_v40 = vmul.f32 %v12114_v30, %v4761_v15  ;;  %v13959_v15 = vld [vmem:[#allocation149_spill] sm:$0xff] }
 0x916   : > { %v4392_v29 = vpop.xlane.xlu0 %4391 }
 0x917   : > { %v4604_v28 = vadd.f32 %v4392_v29, %v4220_v33 }
 0x919   : > { %4669 = vst.msk [vmem:[#allocation3 + $0xd0] sm:$0xff] %vm4642_vm1, %v4604_v28  ;;  %4491 = vadd.xlane.f32.xlu0 %v11783_v27  ;;  %5073 = vperm.xlu1 %7498, %v12173_v21   ;;  %v4558_v28 = vadd.f32 %v8114_v0, %v8112_v24  ;;  %v4403_v24 = vadd.f32 %v11438_v31, %v11432_v60  ;;  %v13963_v0 = vld [vmem:[#allocation83_spill] sm:$0xff]  ;;  %v13970_v31 = vld [vmem:[#allocation202_spill] sm:$0xff] }
 0x91b   : > { %v5491_v23 = vpop.f32.mrf.mxu0 }
 0x91d   : > { %v5876_v54 = vpop.f32.mrf.mxu1  ;;  %4501 = vadd.xlane.f32.xlu0 %v11840_v61  ;;  %v5493_v46 = vpop.f32.mrf.mxu0 }
 0x91e   : > { %v5877_v26 = vadd.f32 %v5876_v54, %v5491_v23  ;;  %v13961_v46 = vld [vmem:[#allocation313_spill] sm:$0xff] }
 0x91f   : > { %v5878_v25 = vpop.f32.mrf.mxu1  ;;  %v5496_v62 = vpop.f32.mrf.mxu0 }
 0x920   : > { %v5979_v13 = vadd.f32 %v5877_v26, %v5145_v40  ;;  %v13962_v26 = vld [vmem:[#allocation315_spill] sm:$0xff] }
 0x921   : > { %v5881_v59 = vpop.f32.mrf.mxu1  ;;  %4511 = vadd.xlane.f32.xlu0 %v11889_v50  ;;  %v5498_v27 = vpop.f32.mrf.mxu0 }
 0x922   : > { %6043 = vst [vmem:[#allocation4 + $0x68] sm:$0xff] %v5979_v13  ;;  %v5882_v44 = vadd.f32 %v5881_v59, %v5496_v62  ;;  %v4377_v61 = vpop.xlane.xlu1 %4376  ;;  %v4559_v13 = vadd.f32 %v12151_v36, %v4558_v28  ;;  %v4404_v59 = vadd.f32 %v13963_v0, %v4403_v24  ;;  %v13964_v27 = vld [vmem:[#allocation267_spill] sm:$0xff]  ;;  %v13978_v24 = vld [vmem:[#allocation80_spill] sm:$0xff] }
 0x923   : > { %v5883_v18 = vpop.f32.mrf.mxu1  ;;  %v4601_v33 = vadd.f32 %v4377_v61, %v4217_v22  ;;  %v13966_v22 = vld [vmem:[#allocation84_spill] sm:$0xff]  ;;  %v13968_v61 = vld [vmem:[#allocation201_spill] sm:$0xff]  ;;  %v2913_v0 = vsub.f32 %v13978_v24, %v13890_v32  ;;  %v13984_v32 = vld [vmem:[#allocation94_spill] sm:$0xff] }
 0x924   : > { %v5980_v30 = vadd.f32 %v5882_v44, %v5146_v43  ;;  %v4405_v43 = vadd.f32 %v13966_v22, %v4404_v59  ;;  %v13967_v44 = vld [vmem:[#allocation195_spill] sm:$0xff]  ;;  %v13969_v18 = vld [vmem:[#allocation206_spill] sm:$0xff]  ;;  %v13982_v22 = vld [vmem:[#allocation216_spill] sm:$0xff] }
 0x925   : > { %4666 = vst.msk [vmem:[#allocation3 + $0xb8] sm:$0xff] %vm4642_vm1, %v4601_v33  ;;  %4521 = vadd.xlane.f32.xlu0 %v11938_v56  ;;  %v4423_v33 = vadd.f32 %v13969_v18, %v13968_v61 }
 0x926   : > { %6044 = vst [vmem:[#allocation4 + $0x190] sm:$0xff] %v5980_v30  ;;  %v12185_v29 = vpop.permute.xlu1 %5053 }
 0x929   : > { %4531 = vadd.xlane.f32.xlu0 %v11987_v55  ;;  %v4560_v55 = vadd.f32 %v12153_v12, %v4559_v13  ;;  %v13977_v13 = vld [vmem:[#allocation90_spill] sm:$0xff] }
 0x92a   : > { %v3355_v50 = vpop.permute.xlu1 %3354 }
 0x92b   : > { %v3610_v23 = vsub.f32 %v13959_v15, %v3355_v50  ;;  %v3611_v54 = vsub.f32 %v13960_v7, %v3355_v50  ;;  %v3612_v40 = vsub.f32 %v13961_v46, %v3355_v50  ;;  %v3613_v34 = vsub.f32 %v13962_v26, %v3355_v50  ;;  %v13971_v15 = vld [vmem:[#allocation205_spill] sm:$0xff] }
 0x92c   : > { %v13972_v7 = vld [vmem:[#allocation93_spill] sm:$0xff] }
 0x92d   : > { %v4114_v63 = vmul.f32 1.442695, %v3610_v23  ;;  %v4116_v25 = vmul.f32 1.442695, %v3611_v54  ;;  %v4118_v62 = vmul.f32 1.442695, %v3612_v40  ;;  %4541 = vadd.xlane.f32.xlu0 %v12036_v57  ;;  %v4413_v57 = vadd.f32 %v13965_v39, %v13964_v27 }
 0x92e   : > { %v4120_v56 = vmul.f32 1.442695, %v3613_v34  ;;  %v4424_v23 = vadd.f32 %v13971_v15, %v4423_v33  ;;  %v13973_v54 = vld [vmem:[#allocation87_spill] sm:$0xff]  ;;  %v13974_v34 = vld [vmem:[#allocation217_spill] sm:$0xff] }
 0x92f   : > { %8127 = vpow2.f32 %v4114_v63  ;;  %v4414_v36 = vadd.f32 %v13967_v44, %v4413_v57  ;;  %v4433_v46 = vadd.f32 %v13973_v54, %v13972_v7  ;;  %v4158_v27 = vld [vmem:[#allocation3 + $0xe0] sm:$0xff]  ;;  %v13981_v57 = vld [vmem:[#allocation92_spill] sm:$0xff]  ;;  %v3040_v44 = vmul.f32 1.442695, %v2913_v0 }
 0x930   : > { %8129 = vpow2.f32 %v4116_v25  ;;  %v4425_v63 = vadd.f32 %v13974_v34, %v4424_v23  ;;  %v13975_v25 = vld [vmem:[#allocation89_spill] sm:$0xff]  ;;  %v13989_v15 = vld [vmem:[#allocation95_spill] sm:$0xff]  ;;  %v4473_v7 = vadd.f32 %v11675_v35, %v11667_v42  ;;  %v4483_v54 = vadd.f32 %v11727_v49, %v11718_v51  ;;  %v4763_v34 = vld [vmem:[#allocation4 + $0x198] sm:$0xff] }
 0x931   : > { %8131 = vpow2.f32 %v4118_v62  ;;  %4551 = vadd.xlane.f32.xlu0 %v12084_v6  ;;  %v4415_v28 = vadd.f32 %v13970_v31, %v4414_v36  ;;  %v4434_v62 = vadd.f32 %v13975_v25, %v4433_v46  ;;  %v13983_v36 = vld [vmem:[#allocation208_spill] sm:$0xff]  ;;  %v13988_v31 = vld [vmem:[#allocation230_spill] sm:$0xff]  ;;  %v13990_v46 = vld [vmem:[#allocation101_spill] sm:$0xff]  ;;  %v4493_v51 = vadd.f32 %v11779_v9, %v11771_v17 }
 0x932   : > { %8133 = vpow2.f32 %v4120_v56  ;;  %v13976_v56 = vld [vmem:[#allocation88_spill] sm:$0xff]  ;;  %v4222_v61 = vmul.f32 %v13983_v36, %v4158_v27  ;;  %v4764_v49 = vld [vmem:[#allocation4 + $0x38] sm:$0xff] }
 0x933   : > { %8135 = vpow2.f32 %v3040_v44  ;;  %v4155_v35 = vld [vmem:[#allocation3 + $0xc8] sm:$0xff]  ;;  %v4494_v9 = vadd.f32 %v11786_v47, %v4493_v51 }
 0x935   : > { %4561 = vadd.xlane.f32.xlu0 %v4560_v55  ;;  %v4443_v55 = vadd.f32 %v13977_v13, %v13976_v56  ;;  %v4484_v56 = vadd.f32 %v11735_v4, %v4483_v54  ;;  %v5147_v13 = vmul.f32 %v12185_v29, %v4763_v34  ;;  %v13991_v4 = vld [vmem:[#allocation61_spill] sm:$0xff]  ;;  %v4495_v36 = vadd.f32 %v11777_v58, %v4494_v9  ;;  %v13999_v58 = vld [vmem:[#allocation104_spill] sm:$0xff]  ;;  %v14007_v34 = vld [vmem:[#allocation119_spill] sm:$0xff] }
 0x936   : > { %v4219_v29 = vmul.f32 %v13991_v4, %v4155_v35  ;;  %v14013_v4 = vld [vmem:[#allocation207_spill] sm:$0xff] }
 0x93c   : > { %v8128_v6 = vpop.eup %8127 }
 0x93d   : > { %v8130_v30 = vpop.eup %8129  ;;  %4406 = vadd.xlane.f32.xlu1 %v4405_v43  ;;  %v4453_v43 = vadd.f32 %v13982_v22, %v13981_v57  ;;  %v4503_v57 = vadd.f32 %v11836_v52, %v11828_v1  ;;  %v13994_v1 = vld [vmem:[#allocation109_spill] sm:$0xff]  ;;  %v13995_v52 = vld [vmem:[#allocation110_spill] sm:$0xff] }
 0x93e   : > { %v8132_v12 = vpop.eup %8131  ;;  %5529 = vmatprep.mubr.f32.mxu0 %v8130_v30  ;;  %v4568_v50 = vadd.f32 %v8130_v30, %v8128_v6  ;;  %v13986_v30 = vld [vmem:[#allocation232_spill] sm:$0xff] }
 0x93f   : > { %v8134_v60 = vpop.eup %8133  ;;  %5530 = vmatmul.mubr.f32.gmra.mxu0 %v8128_v6  ;;  %v13985_v6 = vld [vmem:[#allocation305_spill] sm:$0xff] }
 0x940   : > { %5914 = vmatprep.mubr.f32.mxu1 %v8134_v60  ;;  %5534 = vmatprep.mubr.f32.mxu0 %v12130_v3  ;;  %v4569_v40 = vadd.f32 %v8132_v12, %v4568_v50  ;;  %v12219_v3 = vpop.permute.xlu0 %5068 }
 0x941   : > { %5915 = vmatmul.mubr.f32.gmra.mxu1 %v8132_v12  ;;  %4416 = vadd.xlane.f32.xlu1 %v4415_v28  ;;  %v13987_v12 = vld [vmem:[#allocation284_spill] sm:$0xff] }
 0x942   : > { %5919 = vmatprep.mubr.f32.mxu1 %v12140_v45  ;;  %v4570_v26 = vadd.f32 %v8134_v60, %v4569_v40  ;;  %v13979_v45 = vld [vmem:[#allocation245_spill] sm:$0xff]  ;;  %v4463_v50 = vadd.f32 %v13987_v12, %v13986_v30  ;;  %v13997_v30 = vld [vmem:[#allocation115_spill] sm:$0xff] }
 0x943   : > { %5535 = vmatmul.mubr.f32.gmra.mxu0 %v12127_v37  ;;  %v4435_v59 = vadd.f32 %v13979_v45, %v4434_v62  ;;  %v13980_v37 = vld [vmem:[#allocation91_spill] sm:$0xff] }
 0x944   : > { %4571 = vadd.xlane.f32.xlu0 %v4570_v26  ;;  %v4444_v39 = vadd.f32 %v13980_v37, %v4443_v55  ;;  %v4464_v23 = vadd.f32 %v13989_v15, %v4463_v50  ;;  %v4474_v26 = vadd.f32 %v11682_v53, %v4473_v7  ;;  %v12244_v53 = vpop.eup %8135  ;;  %v4485_v37 = vadd.f32 %v11725_v11, %v4484_v56  ;;  %v13998_v50 = vld [vmem:[#allocation103_spill] sm:$0xff]  ;;  %v14003_v15 = vld [vmem:[#allocation112_spill] sm:$0xff]  ;;  %v14004_v7 = vld [vmem:[#allocation105_spill] sm:$0xff] }
 0x945   : > { %5920 = vmatmul.mubr.f32.gmra.mxu1 %v12134_v38  ;;  %4426 = vadd.xlane.f32.xlu1 %v4425_v63  ;;  %v4454_v38 = vadd.f32 %v13985_v6, %v4453_v43  ;;  %v4504_v11 = vadd.f32 %v11843_v41, %v4503_v57  ;;  %v13996_v6 = vld [vmem:[#allocation261_spill] sm:$0xff]  ;;  %v14000_v41 = vld [vmem:[#allocation108_spill] sm:$0xff]  ;;  %v14015_v57 = vld [vmem:[#allocation79_spill] sm:$0xff] }
 0x946   : > { %v4445_v33 = vadd.f32 %v13984_v32, %v4444_v39  ;;  %v4465_v40 = vadd.f32 %v13990_v46, %v4464_v23  ;;  %v4475_v42 = vadd.f32 %v11673_v5, %v4474_v26  ;;  %v5148_v5 = vmul.f32 %v12103_v16, %v4764_v49  ;;  %v14005_v46 = vld [vmem:[#allocation114_spill] sm:$0xff]  ;;  %v14006_v26 = vld [vmem:[#allocation125_spill] sm:$0xff] }
 0x947   : > { %v4455_v28 = vadd.f32 %v13988_v31, %v4454_v38  ;;  %v4513_v16 = vadd.f32 %v11885_v14, %v11877_v19  ;;  %v14001_v19 = vld [vmem:[#allocation116_spill] sm:$0xff]  ;;  %v14009_v56 = vld [vmem:[#allocation121_spill] sm:$0xff] }
 0x949   : > { %4436 = vadd.xlane.f32.xlu1 %v4435_v59 }
 0x94b   : > { %v4402_v18 = vpop.xlane.xlu0 %4401 }
 0x94c   : > { %v4606_v60 = vadd.f32 %v4402_v18, %v4222_v61  ;;  %v13992_v61 = vld [vmem:[#allocation236_spill] sm:$0xff]  ;;  %v13993_v18 = vld [vmem:[#allocation229_spill] sm:$0xff] }
 0x94d   : > { %4446 = vadd.xlane.f32.xlu1 %v4445_v33  ;;  %v4505_v47 = vadd.f32 %v13992_v61, %v4504_v11  ;;  %v4514_v32 = vadd.f32 %v13993_v18, %v4513_v16  ;;  %v4523_v33 = vadd.f32 %v13995_v52, %v13994_v1  ;;  %v14016_v11 = vld [vmem:[#allocation86_spill] sm:$0xff]  ;;  %v4765_v61 = vld [vmem:[#allocation4 + $0xc0] sm:$0xff]  ;;  %v4168_v1 = vld [vmem:[#allocation3 + $0x130] sm:$0xff] }
 0x94e   : > { %4671 = vst.msk [vmem:[#allocation3 + $0xe0] sm:$0xff] %vm4642_vm1, %v4606_v60  ;;  %v4533_v60 = vadd.f32 %v13999_v58, %v13998_v50  ;;  %v4157_v52 = vld [vmem:[#allocation3 + $0xd8] sm:$0xff]  ;;  %v4766_v50 = vld [vmem:[#allocation4 + $0x1c0] sm:$0xff] }
 0x94f   : > { %v4515_v38 = vadd.f32 %v13996_v6, %v4514_v32  ;;  %v4524_v12 = vadd.f32 %v13997_v30, %v4523_v33 }
 0x950   : > { %v4534_v14 = vadd.f32 %v14001_v19, %v4533_v60  ;;  %v14017_v60 = vld [vmem:[#allocation209_spill] sm:$0xff]  ;;  %v14018_v19 = vld [vmem:[#allocation56_spill] sm:$0xff] }
 0x951   : > { %4456 = vadd.xlane.f32.xlu1 %v4455_v28  ;;  %v4525_v31 = vadd.f32 %v14000_v41, %v4524_v12  ;;  %v14002_v28 = vld [vmem:[#allocation111_spill] sm:$0xff]  ;;  %v4232_v41 = vmul.f32 %v14017_v60, %v4168_v1  ;;  %v14026_v1 = vld [vmem:[#allocation118_spill] sm:$0xff]  ;;  %v4188_v60 = vld [vmem:[#allocation3 + $0x1d0] sm:$0xff] }
 0x952   : > { %v4543_v23 = vadd.f32 %v14003_v15, %v14002_v28  ;;  %v4535_v54 = vadd.f32 %v14004_v7, %v4534_v14  ;;  %v4221_v14 = vmul.f32 %v14018_v19, %v4157_v52  ;;  %v4170_v7 = vld [vmem:[#allocation3 + $0x140] sm:$0xff] }
 0x954   : > { %v5501_v63 = vpop.f32.mrf.mxu0 }
 0x955   : > { %4466 = vadd.xlane.f32.xlu1 %v4465_v40  ;;  %v4544_v40 = vadd.f32 %v14005_v46, %v4543_v23 }
 0x956   : > { %v5886_v25 = vpop.f32.mrf.mxu1  ;;  %v5503_v62 = vpop.f32.mrf.mxu0 }
 0x957   : > { %v5887_v55 = vadd.f32 %v5886_v25, %v5501_v63  ;;  %v4553_v63 = vadd.f32 %v14007_v34, %v14006_v26  ;;  %v14008_v25 = vld [vmem:[#allocation113_spill] sm:$0xff]  ;;  %v5150_v34 = vmul.f32 %v12219_v3, %v4766_v50  ;;  %v4174_v3 = vld [vmem:[#allocation3 + $0x160] sm:$0xff] }
 0x958   : > { %v5888_v24 = vpop.f32.mrf.mxu1  ;;  %v5506_v0 = vpop.f32.mrf.mxu0  ;;  %v4545_v62 = vadd.f32 %v14008_v25, %v4544_v40 }
 0x959   : > { %v5981_v45 = vadd.f32 %v5887_v55, %v5147_v13  ;;  %4476 = vadd.xlane.f32.xlu1 %v4475_v42  ;;  %v4554_v13 = vadd.f32 %v14009_v56, %v4553_v63  ;;  %v4563_v55 = vadd.f32 %v12161_v8, %v12145_v20  ;;  %v14010_v42 = vld [vmem:[#allocation124_spill] sm:$0xff]  ;;  %v4162_v20 = vld [vmem:[#allocation3 + $0x100] sm:$0xff] }
 0x95a   : > { %v5891_v59 = vpop.f32.mrf.mxu1  ;;  %v5508_v27 = vpop.f32.mrf.mxu0  ;;  %5088 = vperm.xlu0 %7497, %v12244_v53   ;;  %v14011_v24 = vld [vmem:[#allocation200_spill] sm:$0xff] }
 0x95b   : > { %6045 = vst [vmem:[#allocation4 + $0x198] sm:$0xff] %v5981_v45  ;;  %v5892_v39 = vadd.f32 %v5891_v59, %v5506_v0  ;;  %v4387_v17 = vpop.xlane.xlu1 %4386  ;;  %v4555_v35 = vadd.f32 %v14010_v42, %v4554_v13  ;;  %v4564_v51 = vadd.f32 %v12166_v10, %v4563_v55  ;;  %v14012_v0 = vld [vmem:[#allocation191_spill] sm:$0xff]  ;;  %v12283_v59 = vpop.permute.xlu0 %5078  ;;  %v4160_v27 = vld [vmem:[#allocation3 + $0xf0] sm:$0xff]  ;;  %v14014_v10 = vld [vmem:[#allocation74_spill] sm:$0xff] }
 0x95c   : > { %v5893_v22 = vpop.f32.mrf.mxu1  ;;  %v4603_v43 = vadd.f32 %v4387_v17, %v4219_v29  ;;  %v2912_v45 = vsub.f32 %v14012_v0, %v14011_v24  ;;  %v4224_v29 = vmul.f32 %v14013_v4, %v4160_v27  ;;  %v4164_v17 = vld [vmem:[#allocation3 + $0x110] sm:$0xff] }
 0x95d   : > { %v5982_v44 = vadd.f32 %v5892_v39, %v5148_v5  ;;  %4486 = vadd.xlane.f32.xlu1 %v4485_v37  ;;  %v4565_v49 = vadd.f32 %v12158_v2, %v4564_v51  ;;  %v4226_v39 = vmul.f32 %v14014_v10, %v4162_v20  ;;  %v4228_v22 = vmul.f32 %v14015_v57, %v4164_v17  ;;  %v4172_v42 = vld [vmem:[#allocation3 + $0x150] sm:$0xff]  ;;  %v14020_v51 = vld [vmem:[#allocation98_spill] sm:$0xff]  ;;  %v4178_v10 = vld [vmem:[#allocation3 + $0x180] sm:$0xff] }
 0x95e   : > { %4668 = vst.msk [vmem:[#allocation3 + $0xc8] sm:$0xff] %vm4642_vm1, %v4603_v43  ;;  %v3038_v37 = vmul.f32 1.442695, %v2912_v45  ;;  %v14021_v45 = vld [vmem:[#allocation214_spill] sm:$0xff]  ;;  %v4180_v57 = vld [vmem:[#allocation3 + $0x190] sm:$0xff] }
 0x95f   : > { %6046 = vst [vmem:[#allocation4 + $0x38] sm:$0xff] %v5982_v44  ;;  %v4166_v44 = vld [vmem:[#allocation3 + $0x120] sm:$0xff]  ;;  %v4238_v27 = vmul.f32 %v14021_v45, %v4174_v3 }
 0x960   : > { %8137 = vpow2.f32 %v3038_v37  ;;  %v4230_v16 = vmul.f32 %v14016_v11, %v4166_v44  ;;  %v4182_v11 = vld [vmem:[#allocation3 + $0x1a0] sm:$0xff] }
 0x961   : > { %4496 = vadd.xlane.f32.xlu1 %v4495_v36 }
 0x965   : > { %4506 = vadd.xlane.f32.xlu1 %v4505_v47  ;;  %v5064_v47 = vpop.permute.xlu1 %5063 }
 0x969   : > { %4516 = vadd.xlane.f32.xlu1 %v4515_v38  ;;  %v5149_v38 = vmul.f32 %v5064_v47, %v4765_v61 }
 0x96d   : > { %4526 = vadd.xlane.f32.xlu1 %v4525_v31  ;;  %v12294_v12 = vpop.eup %8137 }
 0x971   : > { %4536 = vadd.xlane.f32.xlu1 %v4535_v54 }
 0x975   : > { %4546 = vadd.xlane.f32.xlu1 %v4545_v62  ;;  %v14019_v62 = vld [vmem:[#allocation96_spill] sm:$0xff] }
 0x976   : > { %v4234_v56 = vmul.f32 %v14019_v62, %v4170_v7 }
 0x979   : > { %4556 = vadd.xlane.f32.xlu1 %v4555_v35 }
 0x97d   : > { %4566 = vadd.xlane.f32.xlu1 %v4565_v49  ;;  %v4236_v49 = vmul.f32 %v14020_v51, %v4172_v42 }
 0x980   : > { %v4412_v5 = vpop.xlane.xlu0 %4411 }
 0x981   : > { %v4608_v8 = vadd.f32 %v4412_v5, %v4224_v29  ;;  %4576 = vadd.xlane.f32.xlu1 %v12143_v48  ;;  %v4176_v29 = vld [vmem:[#allocation3 + $0x170] sm:$0xff]  ;;  %v14022_v5 = vld [vmem:[#allocation227_spill] sm:$0xff] }
 0x982   : > { %v4240_v20 = vmul.f32 %v14022_v5, %v4176_v29  ;;  %v4163_v29 = vld [vmem:[#allocation3 + $0x108] sm:$0xff] }
 0x983   : > { %4673 = vst.msk [vmem:[#allocation3 + $0xf0] sm:$0xff] %vm4642_vm1, %v4608_v8 }
 0x984   : > { %v4422_v2 = vpop.xlane.xlu0 %4421 }
 0x985   : > { %v4610_v9 = vadd.f32 %v4422_v2, %v4226_v39  ;;  %v14023_v2 = vld [vmem:[#allocation29_spill] sm:$0xff] }
 0x986   : > { %v4242_v17 = vmul.f32 %v14023_v2, %v4178_v10 }
 0x987   : > { %4675 = vst.msk [vmem:[#allocation3 + $0x100] sm:$0xff] %vm4642_vm1, %v4610_v9 }
 0x988   : > { %v4432_v43 = vpop.xlane.xlu0 %4431 }
 0x989   : > { %v4612_v36 = vadd.f32 %v4432_v43, %v4228_v22  ;;  %v14024_v43 = vld [vmem:[#allocation107_spill] sm:$0xff] }
 0x98a   : > { %v4244_v44 = vmul.f32 %v14024_v43, %v4180_v57  ;;  %v14031_v57 = vld [vmem:[#allocation194_spill] sm:$0xff] }
 0x98b   : > { %4677 = vst.msk [vmem:[#allocation3 + $0x110] sm:$0xff] %vm4642_vm1, %v4612_v36 }
 0x98c   : > { %v4442_v48 = vpop.xlane.xlu0 %4441 }
 0x98d   : > { %v4614_v18 = vadd.f32 %v4442_v48, %v4230_v16  ;;  %v5511_v32 = vpop.f32.mrf.mxu0  ;;  %v14025_v48 = vld [vmem:[#allocation312_spill] sm:$0xff] }
 0x98e   : > { %v4246_v61 = vmul.f32 %v14025_v48, %v4182_v11  ;;  %v4167_v48 = vld [vmem:[#allocation3 + $0x128] sm:$0xff] }
 0x98f   : > { %4679 = vst.msk [vmem:[#allocation3 + $0x120] sm:$0xff] %vm4642_vm1, %v4614_v18  ;;  %v5896_v33 = vpop.f32.mrf.mxu1  ;;  %v5513_v6 = vpop.f32.mrf.mxu0  ;;  %v4184_v18 = vld [vmem:[#allocation3 + $0x1b0] sm:$0xff] }
 0x990   : > { %v5897_v30 = vadd.f32 %v5896_v33, %v5511_v32  ;;  %v4248_v52 = vmul.f32 %v14026_v1, %v4184_v18  ;;  %v4186_v6 = vld [vmem:[#allocation3 + $0x1c0] sm:$0xff]  ;;  %v4169_v1 = vld [vmem:[#allocation3 + $0x138] sm:$0xff] }
 0x991   : > { %v5898_v58 = vpop.f32.mrf.mxu1  ;;  %v5516_v31 = vpop.f32.mrf.mxu0 }
 0x992   : > { %v5983_v28 = vadd.f32 %v5897_v30, %v5149_v38  ;;  %v4452_v15 = vpop.xlane.xlu0 %4451  ;;  %v4397_v23 = vpop.xlane.xlu1 %4396  ;;  %5083 = vperm.xlu1 %7498, %v12294_v12   ;;  %v14027_v30 = vld [vmem:[#allocation248_spill] sm:$0xff] }
 0x993   : > { %v4616_v54 = vadd.f32 %v4452_v15, %v4232_v41  ;;  %v5901_v46 = vpop.f32.mrf.mxu1  ;;  %v4605_v40 = vadd.f32 %v4397_v23, %v4221_v14  ;;  %v5518_v26 = vpop.f32.mrf.mxu0  ;;  %v4250_v50 = vmul.f32 %v14027_v30, %v4186_v6  ;;  %v4171_v30 = vld [vmem:[#allocation3 + $0x148] sm:$0xff] }
 0x994   : > { %6047 = vst [vmem:[#allocation4 + $0xc0] sm:$0xff] %v5983_v28  ;;  %v5902_v63 = vadd.f32 %v5901_v46, %v5516_v31  ;;  %v14028_v31 = vld [vmem:[#allocation122_spill] sm:$0xff]  ;;  %v4190_v28 = vld [vmem:[#allocation3 + $0x1e0] sm:$0xff] }
 0x995   : > { %4681 = vst.msk [vmem:[#allocation3 + $0x130] sm:$0xff] %vm4642_vm1, %v4616_v54  ;;  %4670 = vst.msk [vmem:[#allocation3 + $0xd8] sm:$0xff] %vm4642_vm1, %v4605_v40  ;;  %v5903_v25 = vpop.f32.mrf.mxu1  ;;  %v4252_v19 = vmul.f32 %v14028_v31, %v4188_v60  ;;  %v4254_v23 = vmul.f32 %v12173_v21, %v4190_v28  ;;  %v4159_v40 = vld [vmem:[#allocation3 + $0xe8] sm:$0xff]  ;;  %v14029_v26 = vld [vmem:[#allocation62_spill] sm:$0xff] }
 0x996   : > { %v5984_v13 = vadd.f32 %v5902_v63, %v5150_v34  ;;  %v4462_v55 = vpop.xlane.xlu0 %4461  ;;  %v5074_v46 = vpop.permute.xlu1 %5073  ;;  %v4223_v34 = vmul.f32 %v14029_v26, %v4159_v40  ;;  %v4767_v63 = vld [vmem:[#allocation4 + $0x158] sm:$0xff]  ;;  %v4192_v21 = vld [vmem:[#allocation3 + $0x1f0] sm:$0xff] }
 0x997   : > { %v4618_v35 = vadd.f32 %v4462_v55, %v4234_v56  ;;  %v4173_v31 = vld [vmem:[#allocation3 + $0x158] sm:$0xff] }
 0x998   : > { %6048 = vst [vmem:[#allocation4 + $0x1c0] sm:$0xff] %v5984_v13  ;;  %v4161_v13 = vld [vmem:[#allocation3 + $0xf8] sm:$0xff] }
 0x999   : > { %4683 = vst.msk [vmem:[#allocation3 + $0x140] sm:$0xff] %vm4642_vm1, %v4618_v35  ;;  %v5151_v35 = vmul.f32 %v5074_v46, %v4767_v63  ;;  %v4177_v26 = vld [vmem:[#allocation3 + $0x178] sm:$0xff]  ;;  %v14038_v63 = vld [vmem:[#allocation99_spill] sm:$0xff] }
 0x99a   : > { %v4472_v24 = vpop.xlane.xlu0 %4471 }
 0x99b   : > { %v4620_v0 = vadd.f32 %v4472_v24, %v4236_v49  ;;  %v4768_v49 = vld [vmem:[#allocation4 + $0x10] sm:$0xff] }
 0x99c   : > { %v5152_v10 = vmul.f32 %v12283_v59, %v4768_v49  ;;  %v14040_v49 = vld [vmem:[#allocation215_spill] sm:$0xff] }
 0x99d   : > { %4685 = vst.msk [vmem:[#allocation3 + $0x150] sm:$0xff] %vm4642_vm1, %v4620_v0  ;;  %v14030_v0 = vld [vmem:[#allocation58_spill] sm:$0xff] }
 0x99e   : > { %v4482_v4 = vpop.xlane.xlu0 %4481  ;;  %v4225_v45 = vmul.f32 %v14030_v0, %v4161_v13  ;;  %v4183_v0 = vld [vmem:[#allocation3 + $0x1a8] sm:$0xff] }
 0x99f   : > { %v4622_v37 = vadd.f32 %v4482_v4, %v4238_v27 }
 0x9a1   : > { %4687 = vst.msk [vmem:[#allocation3 + $0x160] sm:$0xff] %vm4642_vm1, %v4622_v37 }
 0x9a2   : > { %v4492_v8 = vpop.xlane.xlu0 %4491 }
 0x9a3   : > { %v4624_v39 = vadd.f32 %v4492_v8, %v4240_v20  ;;  %v4256_v8 = vmul.f32 %v12294_v12, %v4192_v21  ;;  %v14032_v12 = vld [vmem:[#allocation77_spill] sm:$0xff] }
 0x9a5   : > { %4689 = vst.msk [vmem:[#allocation3 + $0x170] sm:$0xff] %vm4642_vm1, %v4624_v39 }
 0x9a6   : > { %v4502_v9 = vpop.xlane.xlu0 %4501 }
 0x9a7   : > { %v4626_v22 = vadd.f32 %v4502_v9, %v4242_v17 }
 0x9a9   : > { %4691 = vst.msk [vmem:[#allocation3 + $0x180] sm:$0xff] %vm4642_vm1, %v4626_v22  ;;  %v4227_v22 = vmul.f32 %v14031_v57, %v4163_v29 }
 0x9aa   : > { %v4512_v36 = vpop.xlane.xlu0 %4511 }
 0x9ab   : > { %v4628_v16 = vadd.f32 %v4512_v36, %v4244_v44  ;;  %v4165_v36 = vld [vmem:[#allocation3 + $0x118] sm:$0xff] }
 0x9ac   : > { %v4229_v59 = vmul.f32 %v14032_v12, %v4165_v36 }
 0x9ad   : > { %4693 = vst.msk [vmem:[#allocation3 + $0x190] sm:$0xff] %vm4642_vm1, %v4628_v16 }
 0x9ae   : > { %v4522_v47 = vpop.xlane.xlu0 %4521 }
 0x9af   : > { %v4630_v32 = vadd.f32 %v4522_v47, %v4246_v61  ;;  %v14033_v47 = vld [vmem:[#allocation76_spill] sm:$0xff] }
 0x9b0   : > { %v4231_v18 = vmul.f32 %v14033_v47, %v4167_v48  ;;  %v4770_v48 = vld [vmem:[#allocation4 + $0xa0] sm:$0xff] }
 0x9b1   : > { %4695 = vst.msk [vmem:[#allocation3 + $0x1a0] sm:$0xff] %vm4642_vm1, %v4630_v32 }
 0x9b2   : > { %v4532_v33 = vpop.xlane.xlu0 %4531 }
 0x9b3   : > { %v4632_v38 = vadd.f32 %v4532_v33, %v4248_v52  ;;  %v14034_v33 = vld [vmem:[#allocation82_spill] sm:$0xff] }
 0x9b4   : > { %v4233_v6 = vmul.f32 %v14034_v33, %v4169_v1 }
 0x9b5   : > { %4697 = vst.msk [vmem:[#allocation3 + $0x1b0] sm:$0xff] %vm4642_vm1, %v4632_v38 }
 0x9b6   : > { %v4542_v58 = vpop.xlane.xlu0 %4541 }
 0x9b7   : > { %v4634_v41 = vadd.f32 %v4542_v58, %v4250_v50  ;;  %v14035_v58 = vld [vmem:[#allocation210_spill] sm:$0xff] }
 0x9b8   : > { %v4235_v60 = vmul.f32 %v14035_v58, %v4171_v30  ;;  %v14045_v30 = vld [vmem:[#allocation120_spill] sm:$0xff] }
 0x9b9   : > { %4699 = vst.msk [vmem:[#allocation3 + $0x1c0] sm:$0xff] %vm4642_vm1, %v4634_v41 }
 0x9ba   : > { %v4552_v14 = vpop.xlane.xlu0 %4551 }
 0x9bb   : > { %v4636_v15 = vadd.f32 %v4552_v14, %v4252_v19  ;;  %v14036_v14 = vld [vmem:[#allocation97_spill] sm:$0xff] }
 0x9bc   : > { %v4237_v28 = vmul.f32 %v14036_v14, %v4173_v31 }
 0x9bd   : > { %4701 = vst.msk [vmem:[#allocation3 + $0x1d0] sm:$0xff] %vm4642_vm1, %v4636_v15 }
 0x9be   : > { %v4562_v7 = vpop.xlane.xlu0 %4561 }
 0x9bf   : > { %v4638_v54 = vadd.f32 %v4562_v7, %v4254_v23  ;;  %v4175_v23 = vld [vmem:[#allocation3 + $0x168] sm:$0xff] }
 0x9c1   : > { %4703 = vst.msk [vmem:[#allocation3 + $0x1e0] sm:$0xff] %vm4642_vm1, %v4638_v54  ;;  %v14037_v54 = vld [vmem:[#allocation102_spill] sm:$0xff] }
 0x9c2   : > { %v4239_v46 = vmul.f32 %v14037_v54, %v4175_v23  ;;  %v4769_v23 = vld [vmem:[#allocation4 + $0x58] sm:$0xff] }
 0x9c6   : > { %v5521_v25 = vpop.f32.mrf.mxu0  ;;  %v4407_v62 = vpop.xlane.xlu1 %4406 }
 0x9c7   : > { %v4607_v56 = vadd.f32 %v4407_v62, %v4223_v34 }
 0x9c8   : > { %v5906_v55 = vpop.f32.mrf.mxu1  ;;  %v5523_v42 = vpop.f32.mrf.mxu0 }
 0x9c9   : > { %v5907_v51 = vadd.f32 %v5906_v55, %v5521_v25  ;;  %4672 = vst.msk [vmem:[#allocation3 + $0xe8] sm:$0xff] %vm4642_vm1, %v4607_v56  ;;  %v4241_v25 = vmul.f32 %v14038_v63, %v4177_v26  ;;  %v4179_v56 = vld [vmem:[#allocation3 + $0x188] sm:$0xff] }
 0x9ca   : > { %v5908_v24 = vpop.f32.mrf.mxu1  ;;  %v5526_v3 = vpop.f32.mrf.mxu0  ;;  %v14039_v55 = vld [vmem:[#allocation100_spill] sm:$0xff] }
 0x9cb   : > { %v5985_v27 = vadd.f32 %v5907_v51, %v5151_v35  ;;  %v4417_v4 = vpop.xlane.xlu1 %4416  ;;  %v4243_v42 = vmul.f32 %v14039_v55, %v4179_v56  ;;  %v4181_v51 = vld [vmem:[#allocation3 + $0x198] sm:$0xff] }
 0x9cc   : > { %v5911_v37 = vpop.f32.mrf.mxu1  ;;  %v4609_v5 = vadd.f32 %v4417_v4, %v4225_v45  ;;  %v5528_v20 = vpop.f32.mrf.mxu0  ;;  %v4245_v24 = vmul.f32 %v14040_v49, %v4181_v51 }
 0x9cd   : > { %6049 = vst [vmem:[#allocation4 + $0x158] sm:$0xff] %v5985_v27  ;;  %v5912_v39 = vadd.f32 %v5911_v37, %v5526_v3  ;;  %v4572_v2 = vpop.xlane.xlu0 %4571  ;;  %v14041_v27 = vld [vmem:[#allocation264_spill] sm:$0xff]  ;;  %v4185_v37 = vld [vmem:[#allocation3 + $0x1b8] sm:$0xff]  ;;  %v14042_v20 = vld [vmem:[#allocation117_spill] sm:$0xff] }
 0x9ce   : > { %4674 = vst.msk [vmem:[#allocation3 + $0xf8] sm:$0xff] %vm4642_vm1, %v4609_v5  ;;  %v5913_v17 = vpop.f32.mrf.mxu1  ;;  %v4640_v9 = vadd.f32 %v4572_v2, %v4256_v8  ;;  %v4247_v4 = vmul.f32 %v14041_v27, %v4183_v0  ;;  %v4249_v8 = vmul.f32 %v14042_v20, %v4185_v37 }
 0x9cf   : > { %v5986_v43 = vadd.f32 %v5912_v39, %v5152_v10  ;;  %v4427_v44 = vpop.xlane.xlu1 %4426  ;;  %v4187_v39 = vld [vmem:[#allocation3 + $0x1c8] sm:$0xff]  ;;  %v14043_v17 = vld [vmem:[#allocation106_spill] sm:$0xff] }
 0x9d0   : > { %4705 = vst.msk [vmem:[#allocation3 + $0x1f0] sm:$0xff] %vm4642_vm1, %v4640_v9  ;;  %v4611_v11 = vadd.f32 %v4427_v44, %v4227_v22  ;;  %v4251_v9 = vmul.f32 %v14043_v17, %v4187_v39 }
 0x9d1   : > { %6050 = vst [vmem:[#allocation4 + $0x10] sm:$0xff] %v5986_v43  ;;  %v4189_v43 = vld [vmem:[#allocation3 + $0x1d8] sm:$0xff] }
 0x9d2   : > { %4676 = vst.msk [vmem:[#allocation3 + $0x108] sm:$0xff] %vm4642_vm1, %v4611_v11 }
 0x9d3   : > { %v4437_v16 = vpop.xlane.xlu1 %4436 }
 0x9d4   : > { %v4613_v61 = vadd.f32 %v4437_v16, %v4229_v59  ;;  %v14044_v59 = vld [vmem:[#allocation123_spill] sm:$0xff] }
 0x9d5   : > { %v5089_v12 = vpop.permute.xlu0 %5088  ;;  %v4253_v16 = vmul.f32 %v14044_v59, %v4189_v43 }
 0x9d6   : > { %4678 = vst.msk [vmem:[#allocation3 + $0x118] sm:$0xff] %vm4642_vm1, %v4613_v61  ;;  %v5154_v33 = vmul.f32 %v5089_v12, %v4770_v48 }
 0x9d7   : > { %v4447_v32 = vpop.xlane.xlu1 %4446 }
 0x9d8   : > { %v4615_v52 = vadd.f32 %v4447_v32, %v4231_v18  ;;  %v4191_v18 = vld [vmem:[#allocation3 + $0x1e8] sm:$0xff] }
 0x9da   : > { %4680 = vst.msk [vmem:[#allocation3 + $0x128] sm:$0xff] %vm4642_vm1, %v4615_v52 }
 0x9db   : > { %v4457_v38 = vpop.xlane.xlu1 %4456 }
 0x9dc   : > { %v4617_v50 = vadd.f32 %v4457_v38, %v4233_v6 }
 0x9de   : > { %4682 = vst.msk [vmem:[#allocation3 + $0x138] sm:$0xff] %vm4642_vm1, %v4617_v50  ;;  %v4255_v50 = vmul.f32 %v14045_v30, %v4191_v18 }
 0x9df   : > { %v4467_v41 = vpop.xlane.xlu1 %4466 }
 0x9e0   : > { %v4619_v19 = vadd.f32 %v4467_v41, %v4235_v60  ;;  %v4193_v41 = vld [vmem:[#allocation3 + $0x1f8] sm:$0xff] }
 0x9e1   : > { %v4257_v14 = vmul.f32 %v12244_v53, %v4193_v41 }
 0x9e2   : > { %4684 = vst.msk [vmem:[#allocation3 + $0x148] sm:$0xff] %vm4642_vm1, %v4619_v19 }
 0x9e3   : > { %v4477_v15 = vpop.xlane.xlu1 %4476 }
 0x9e4   : > { %v4621_v7 = vadd.f32 %v4477_v15, %v4237_v28 }
 0x9e6   : > { %4686 = vst.msk [vmem:[#allocation3 + $0x158] sm:$0xff] %vm4642_vm1, %v4621_v7 }
 0x9e7   : > { %v4487_v40 = vpop.xlane.xlu1 %4486 }
 0x9e8   : > { %v4623_v34 = vadd.f32 %v4487_v40, %v4239_v46 }
 0x9ea   : > { %4688 = vst.msk [vmem:[#allocation3 + $0x168] sm:$0xff] %vm4642_vm1, %v4623_v34 }
 0x9eb   : > { %v4497_v62 = vpop.xlane.xlu1 %4496 }
 0x9ec   : > { %v4625_v13 = vadd.f32 %v4497_v62, %v4241_v25 }
 0x9ee   : > { %4690 = vst.msk [vmem:[#allocation3 + $0x178] sm:$0xff] %vm4642_vm1, %v4625_v13 }
 0x9ef   : > { %v4507_v35 = vpop.xlane.xlu1 %4506 }
 0x9f0   : > { %v4627_v21 = vadd.f32 %v4507_v35, %v4243_v42 }
 0x9f2   : > { %4692 = vst.msk [vmem:[#allocation3 + $0x188] sm:$0xff] %vm4642_vm1, %v4627_v21 }
 0x9f3   : > { %v4517_v3 = vpop.xlane.xlu1 %4516 }
 0x9f4   : > { %v4629_v45 = vadd.f32 %v4517_v3, %v4245_v24 }
 0x9f6   : > { %4694 = vst.msk [vmem:[#allocation3 + $0x198] sm:$0xff] %vm4642_vm1, %v4629_v45 }
 0x9f7   : > { %v4527_v29 = vpop.xlane.xlu1 %4526 }
 0x9f8   : > { %v4631_v5 = vadd.f32 %v4527_v29, %v4247_v4 }
 0x9fa   : > { %4696 = vst.msk [vmem:[#allocation3 + $0x1a8] sm:$0xff] %vm4642_vm1, %v4631_v5 }
 0x9fb   : > { %v4537_v10 = vpop.xlane.xlu1 %4536 }
 0x9fc   : > { %v4633_v2 = vadd.f32 %v4537_v10, %v4249_v8 }
 0x9fe   : > { %4698 = vst.msk [vmem:[#allocation3 + $0x1b8] sm:$0xff] %vm4642_vm1, %v4633_v2 }
 0x9ff   : > { %v4547_v57 = vpop.xlane.xlu1 %4546  ;;  %v5531_v22 = vpop.f32.mrf.mxu0 }
 0xa00   : > { %v4635_v44 = vadd.f32 %v4547_v57, %v4251_v9 }
 0xa01   : > { %v5916_v36 = vpop.f32.mrf.mxu1  ;;  %v5533_v11 = vpop.f32.mrf.mxu0 }
 0xa02   : > { %4700 = vst.msk [vmem:[#allocation3 + $0x1c8] sm:$0xff] %vm4642_vm1, %v4635_v44  ;;  %v5917_v54 = vadd.f32 %v5916_v36, %v5531_v22 }
 0xa03   : > { %v5918_v61 = vpop.f32.mrf.mxu1  ;;  %v4557_v47 = vpop.xlane.xlu1 %4556 }
 0xa04   : > { %v4637_v32 = vadd.f32 %v4557_v47, %v4253_v16  ;;  %v5536_v1 = vpop.f32.mrf.mxu0 }
 0xa05   : > { %v5921_v52 = vpop.f32.mrf.mxu1 }
 0xa06   : > { %4702 = vst.msk [vmem:[#allocation3 + $0x1d8] sm:$0xff] %vm4642_vm1, %v4637_v32  ;;  %v5922_v6 = vadd.f32 %v5921_v52, %v5536_v1  ;;  %v5538_v38 = vpop.f32.mrf.mxu0 }
 0xa07   : > { %v5923_v58 = vpop.f32.mrf.mxu1  ;;  %v4567_v60 = vpop.xlane.xlu1 %4566 }
 0xa08   : > { %v5988_v31 = vadd.f32 %v5922_v6, %v5154_v33  ;;  %v4639_v19 = vadd.f32 %v4567_v60, %v4255_v50 }
 0xa0a   : > { %6052 = vst [vmem:[#allocation4 + $0xa0] sm:$0xff] %v5988_v31  ;;  %4704 = vst.msk [vmem:[#allocation3 + $0x1e8] sm:$0xff] %vm4642_vm1, %v4639_v19 }
 0xa0b   : > { %v4577_v28 = vpop.xlane.xlu1 %4576 }
 0xa0c   : > { %v4641_v15 = vadd.f32 %v4577_v28, %v4257_v14 }
 0xa0e   : > { %4706 = vst.msk [vmem:[#allocation3 + $0x1f8] sm:$0xff] %vm4642_vm1, %v4641_v15 }
 0xa0f   : > { %v5084_v7 = vpop.permute.xlu1 %5083 }
 0xa10   : > { %v5153_v46 = vmul.f32 %v5084_v7, %v4769_v23  ;;  %6120 = sbr.rel (%p7058_p6) target bundleno = 2848 (0xb20), region = 154 }
 0xa12   : > { %v5987_v40 = vadd.f32 %v5917_v54, %v5153_v46 }
 0xa14   : > { %6051 = vst [vmem:[#allocation4 + $0x58] sm:$0xff] %v5987_v40 }
 0xa15   : > { %v6123_v26 = vld [vmem:[#allocation3 + $0x10] sm:$0xff]  ;;  %v6121_v34 = vld [vmem:[#allocation3] sm:$0xff]  ;;  %v6124_v63 = vld [vmem:[#allocation3 + $0x18] sm:$0xff]  ;;  %v8399_v25 = vmov 0  }
 0xa16   : > { %8140 = vset.pattern.permute.xlu1 %v8399_v25  ;;  %8139 = vset.pattern.permute.xlu0 %v8399_v25  ;;  %8141 = vrcp.f32 %v6123_v26  ;;  %v6122_v53 = vld [vmem:[#allocation3 + $0x8] sm:$0xff]  ;;  %v6125_v56 = vld [vmem:[#allocation3 + $0x20] sm:$0xff]  ;;  %v6128_v13 = vld [vmem:[#allocation3 + $0x38] sm:$0xff] }
 0xa17   : > { %8143 = vrcp.f32 %v6121_v34  ;;  %v6126_v62 = vld [vmem:[#allocation3 + $0x28] sm:$0xff]  ;;  %v6127_v55 = vld [vmem:[#allocation3 + $0x30] sm:$0xff]  ;;  %v6129_v35 = vld [vmem:[#allocation3 + $0x40] sm:$0xff] }
 0xa18   : > { %8145 = vrcp.f32 %v6124_v63  ;;  %v6130_v42 = vld [vmem:[#allocation3 + $0x48] sm:$0xff]  ;;  %v6132_v24 = vld [vmem:[#allocation3 + $0x58] sm:$0xff]  ;;  %v6131_v0 = vld [vmem:[#allocation3 + $0x50] sm:$0xff] }
 0xa19   : > { %8147 = vrcp.f32 %v6122_v53  ;;  %v6134_v27 = vld [vmem:[#allocation3 + $0x68] sm:$0xff]  ;;  %v6133_v29 = vld [vmem:[#allocation3 + $0x60] sm:$0xff]  ;;  %v6136_v5 = vld [vmem:[#allocation3 + $0x78] sm:$0xff] }
 0xa1a   : > { %8149 = vrcp.f32 %v6126_v62  ;;  %v6135_v8 = vld [vmem:[#allocation3 + $0x70] sm:$0xff]  ;;  %v6138_v39 = vld [vmem:[#allocation3 + $0x88] sm:$0xff]  ;;  %v6137_v17 = vld [vmem:[#allocation3 + $0x80] sm:$0xff] }
 0xa1b   : > { %8151 = vrcp.f32 %v6125_v56  ;;  %v6140_v57 = vld [vmem:[#allocation3 + $0x98] sm:$0xff]  ;;  %v6139_v43 = vld [vmem:[#allocation3 + $0x90] sm:$0xff]  ;;  %v6142_v36 = vld [vmem:[#allocation3 + $0xa8] sm:$0xff] }
 0xa1c   : > { %8153 = vrcp.f32 %v6128_v13  ;;  %v6141_v12 = vld [vmem:[#allocation3 + $0xa0] sm:$0xff]  ;;  %v6144_v16 = vld [vmem:[#allocation3 + $0xb8] sm:$0xff]  ;;  %v6143_v61 = vld [vmem:[#allocation3 + $0xb0] sm:$0xff] }
 0xa1d   : > { %8155 = vrcp.f32 %v6127_v55  ;;  %v6146_v18 = vld [vmem:[#allocation3 + $0xc8] sm:$0xff]  ;;  %v6145_v1 = vld [vmem:[#allocation3 + $0xc0] sm:$0xff]  ;;  %v6148_v33 = vld [vmem:[#allocation3 + $0xd8] sm:$0xff] }
 0xa1e   : > { %8157 = vrcp.f32 %v6130_v42  ;;  %v6147_v38 = vld [vmem:[#allocation3 + $0xd0] sm:$0xff]  ;;  %v6150_v50 = vld [vmem:[#allocation3 + $0xe8] sm:$0xff]  ;;  %v6149_v60 = vld [vmem:[#allocation3 + $0xe0] sm:$0xff] }
 0xa1f   : > { %8159 = vrcp.f32 %v6129_v35  ;;  %v6152_v31 = vld [vmem:[#allocation3 + $0xf8] sm:$0xff]  ;;  %v6151_v14 = vld [vmem:[#allocation3 + $0xf0] sm:$0xff]  ;;  %v6154_v15 = vld [vmem:[#allocation3 + $0x108] sm:$0xff] }
 0xa20   : > { %8161 = vrcp.f32 %v6132_v24  ;;  %v6153_v7 = vld [vmem:[#allocation3 + $0x100] sm:$0xff]  ;;  %v6156_v46 = vld [vmem:[#allocation3 + $0x118] sm:$0xff]  ;;  %v6155_v26 = vld [vmem:[#allocation3 + $0x110] sm:$0xff] }
 0xa21   : > { %8163 = vrcp.f32 %v6131_v0  ;;  %v6158_v63 = vld [vmem:[#allocation3 + $0x128] sm:$0xff]  ;;  %v6157_v53 = vld [vmem:[#allocation3 + $0x120] sm:$0xff]  ;;  %v6160_v56 = vld [vmem:[#allocation3 + $0x138] sm:$0xff] }
 0xa22   : > { %8165 = vrcp.f32 %v6134_v27  ;;  %v6159_v55 = vld [vmem:[#allocation3 + $0x130] sm:$0xff]  ;;  %v6162_v35 = vld [vmem:[#allocation3 + $0x148] sm:$0xff]  ;;  %v6164_v24 = vld [vmem:[#allocation3 + $0x158] sm:$0xff] }
 0xa23   : > { %v8142_v51 = vpop.eup %8141  ;;  %8167 = vrcp.f32 %v6133_v29  ;;  %v6163_v0 = vld [vmem:[#allocation3 + $0x150] sm:$0xff]  ;;  %v6166_v27 = vld [vmem:[#allocation3 + $0x168] sm:$0xff]  ;;  %v6165_v29 = vld [vmem:[#allocation3 + $0x160] sm:$0xff] }
 0xa24   : > { %v8144_v21 = vpop.eup %8143  ;;  %6325 = vperm.xlu1 %8140, %v8142_v51   ;;  %8169 = vrcp.f32 %v6136_v5  ;;  %v6168_v5 = vld [vmem:[#allocation3 + $0x178] sm:$0xff] }
 0xa25   : > { %v8146_v49 = vpop.eup %8145  ;;  %6315 = vperm.xlu0 %8139, %v8144_v21   ;;  %8171 = vrcp.f32 %v6135_v8  ;;  %v6161_v21 = vld [vmem:[#allocation3 + $0x140] sm:$0xff]  ;;  %v6167_v8 = vld [vmem:[#allocation3 + $0x170] sm:$0xff] }
 0xa26   : > { %v8148_v3 = vpop.eup %8147  ;;  %8173 = vrcp.f32 %v6138_v39  ;;  %v6170_v39 = vld [vmem:[#allocation3 + $0x188] sm:$0xff] }
 0xa27   : > { %v8150_v45 = vpop.eup %8149  ;;  %8175 = vrcp.f32 %v6137_v17  ;;  %v6169_v17 = vld [vmem:[#allocation3 + $0x180] sm:$0xff] }
 0xa28   : > { %6330 = vperm.xlu1 %8140, %v8146_v49   ;;  %v8152_v4 = vpop.eup %8151  ;;  %8177 = vrcp.f32 %v6140_v57  ;;  %v6172_v57 = vld [vmem:[#allocation3 + $0x198] sm:$0xff] }
 0xa29   : > { %6320 = vperm.xlu0 %8139, %v8148_v3   ;;  %v8154_v37 = vpop.eup %8153  ;;  %8179 = vrcp.f32 %v6139_v43  ;;  %v6171_v43 = vld [vmem:[#allocation3 + $0x190] sm:$0xff] }
 0xa2a   : > { %v8156_v20 = vpop.eup %8155  ;;  %8181 = vrcp.f32 %v6142_v36  ;;  %v6174_v36 = vld [vmem:[#allocation3 + $0x1a8] sm:$0xff] }
 0xa2b   : > { %v8158_v10 = vpop.eup %8157  ;;  %8183 = vrcp.f32 %v6141_v12  ;;  %v6173_v12 = vld [vmem:[#allocation3 + $0x1a0] sm:$0xff] }
 0xa2c   : > { %6340 = vperm.xlu1 %8140, %v8150_v45   ;;  %v8160_v2 = vpop.eup %8159  ;;  %8185 = vrcp.f32 %v6144_v16  ;;  %v6176_v16 = vld [vmem:[#allocation3 + $0x1b8] sm:$0xff] }
 0xa2d   : > { %6335 = vperm.xlu0 %8139, %v8152_v4   ;;  %v8162_v9 = vpop.eup %8161  ;;  %8187 = vrcp.f32 %v6143_v61  ;;  %v6175_v61 = vld [vmem:[#allocation3 + $0x1b0] sm:$0xff] }
 0xa2e   : > { %v8164_v22 = vpop.eup %8163  ;;  %8189 = vrcp.f32 %v6146_v18  ;;  %v6178_v18 = vld [vmem:[#allocation3 + $0x1c8] sm:$0xff] }
 0xa2f   : > { %v8166_v44 = vpop.eup %8165  ;;  %8191 = vrcp.f32 %v6145_v1  ;;  %v6177_v1 = vld [vmem:[#allocation3 + $0x1c0] sm:$0xff] }
 0xa30   : > { %6350 = vperm.xlu1 %8140, %v8154_v37   ;;  %v8168_v11 = vpop.eup %8167  ;;  %8193 = vrcp.f32 %v6148_v33  ;;  %v6180_v33 = vld [vmem:[#allocation3 + $0x1d8] sm:$0xff] }
 0xa31   : > { %6345 = vperm.xlu0 %8139, %v8156_v20   ;;  %v8170_v59 = vpop.eup %8169  ;;  %8195 = vrcp.f32 %v6147_v38  ;;  %v6179_v38 = vld [vmem:[#allocation3 + $0x1d0] sm:$0xff] }
 0xa32   : > { %v8172_v48 = vpop.eup %8171  ;;  %8197 = vrcp.f32 %v6150_v50  ;;  %v6182_v50 = vld [vmem:[#allocation3 + $0x1e8] sm:$0xff] }
 0xa33   : > { %v8174_v47 = vpop.eup %8173  ;;  %8199 = vrcp.f32 %v6149_v60  ;;  %v6181_v60 = vld [vmem:[#allocation3 + $0x1e0] sm:$0xff] }
 0xa34   : > { %6360 = vperm.xlu1 %8140, %v8158_v10   ;;  %v8176_v32 = vpop.eup %8175  ;;  %8201 = vrcp.f32 %v6152_v31  ;;  %v6184_v31 = vld [vmem:[#allocation3 + $0x1f8] sm:$0xff] }
 0xa35   : > { %6355 = vperm.xlu0 %8139, %v8160_v2   ;;  %v8178_v52 = vpop.eup %8177  ;;  %8203 = vrcp.f32 %v6151_v14  ;;  %v6183_v14 = vld [vmem:[#allocation3 + $0x1f0] sm:$0xff] }
 0xa36   : > { %v8180_v6 = vpop.eup %8179  ;;  %8205 = vrcp.f32 %v6154_v15 }
 0xa37   : > { %v8182_v30 = vpop.eup %8181  ;;  %8207 = vrcp.f32 %v6153_v7 }
 0xa38   : > { %6370 = vperm.xlu1 %8140, %v8162_v9   ;;  %v8184_v58 = vpop.eup %8183  ;;  %8209 = vrcp.f32 %v6156_v46 }
 0xa39   : > { %6365 = vperm.xlu0 %8139, %v8164_v22   ;;  %v8186_v41 = vpop.eup %8185  ;;  %8211 = vrcp.f32 %v6155_v26  ;;  %v6251_v26 = vld [vmem:[#allocation4 + $0xd8] sm:$0xff] }
 0xa3a   : > { %v8188_v19 = vpop.eup %8187  ;;  %8213 = vrcp.f32 %v6158_v63  ;;  %v6249_v63 = vld [vmem:[#allocation4 + $0xb0] sm:$0xff] }
 0xa3b   : > { %v8190_v28 = vpop.eup %8189  ;;  %8215 = vrcp.f32 %v6157_v53 }
 0xa3c   : > { %6380 = vperm.xlu1 %8140, %v8166_v44   ;;  %v8192_v23 = vpop.eup %8191  ;;  %8217 = vrcp.f32 %v6160_v56 }
 0xa3d   : > { %6375 = vperm.xlu0 %8139, %v8168_v11   ;;  %v8194_v54 = vpop.eup %8193  ;;  %8219 = vrcp.f32 %v6159_v55  ;;  %v6250_v55 = vld [vmem:[#allocation4 + $0x1b0] sm:$0xff] }
 0xa3e   : > { %v8196_v40 = vpop.eup %8195  ;;  %8221 = vrcp.f32 %v6162_v35 }
 0xa3f   : > { %v8198_v34 = vpop.eup %8197  ;;  %8223 = vrcp.f32 %v6161_v21 }
 0xa40   : > { %6390 = vperm.xlu1 %8140, %v8170_v59   ;;  %v8200_v25 = vpop.eup %8199  ;;  %8225 = vrcp.f32 %v6164_v24  ;;  %v6253_v24 = vld [vmem:[#allocation4 + $0x50] sm:$0xff] }
 0xa41   : > { %6385 = vperm.xlu0 %8139, %v8172_v48   ;;  %v8202_v62 = vpop.eup %8201  ;;  %8227 = vrcp.f32 %v6163_v0 }
 0xa42   : > { %v8204_v13 = vpop.eup %8203  ;;  %8229 = vrcp.f32 %v6166_v27 }
 0xa43   : > { %v8206_v42 = vpop.eup %8205  ;;  %8231 = vrcp.f32 %v6165_v29  ;;  %v6255_v29 = vld [vmem:[#allocation4 + $0x130] sm:$0xff] }
 0xa44   : > { %6400 = vperm.xlu1 %8140, %v8174_v47   ;;  %v8208_v51 = vpop.eup %8207  ;;  %8233 = vrcp.f32 %v6168_v5 }
 0xa45   : > { %6395 = vperm.xlu0 %8139, %v8176_v32   ;;  %v8210_v49 = vpop.eup %8209  ;;  %8235 = vrcp.f32 %v6167_v8 }
 0xa46   : > { %v8212_v3 = vpop.eup %8211  ;;  %8237 = vrcp.f32 %v6170_v39  ;;  %v6257_v39 = vld [vmem:[#allocation4 + $0x180] sm:$0xff] }
 0xa47   : > { %v8214_v45 = vpop.eup %8213  ;;  %8239 = vrcp.f32 %v6169_v17 }
 0xa48   : > { %6410 = vperm.xlu1 %8140, %v8178_v52   ;;  %v8216_v4 = vpop.eup %8215  ;;  %8241 = vrcp.f32 %v6172_v57 }
 0xa49   : > { %6405 = vperm.xlu0 %8139, %v8180_v6   ;;  %v8218_v37 = vpop.eup %8217  ;;  %8243 = vrcp.f32 %v6171_v43  ;;  %v6259_v43 = vld [vmem:[#allocation4 + $0x118] sm:$0xff] }
 0xa4a   : > { %v8220_v20 = vpop.eup %8219  ;;  %8245 = vrcp.f32 %v6174_v36 }
 0xa4b   : > { %v8222_v10 = vpop.eup %8221  ;;  %8247 = vrcp.f32 %v6173_v12 }
 0xa4c   : > { %6420 = vperm.xlu1 %8140, %v8182_v30   ;;  %v8224_v2 = vpop.eup %8223  ;;  %8249 = vrcp.f32 %v6176_v16  ;;  %v6261_v16 = vld [vmem:[#allocation4 + $0x120] sm:$0xff] }
 0xa4d   : > { %6415 = vperm.xlu0 %8139, %v8184_v58   ;;  %v8226_v9 = vpop.eup %8225  ;;  %8251 = vrcp.f32 %v6175_v61 }
 0xa4e   : > { %v8228_v22 = vpop.eup %8227  ;;  %8253 = vrcp.f32 %v6178_v18 }
 0xa4f   : > { %v8230_v44 = vpop.eup %8229  ;;  %8255 = vrcp.f32 %v6177_v1  ;;  %v6263_v1 = vld [vmem:[#allocation4 + $0x108] sm:$0xff] }
 0xa50   : > { %6430 = vperm.xlu1 %8140, %v8186_v41   ;;  %v8232_v11 = vpop.eup %8231  ;;  %8257 = vrcp.f32 %v6180_v33 }
 0xa51   : > { %6425 = vperm.xlu0 %8139, %v8188_v19   ;;  %v8234_v59 = vpop.eup %8233  ;;  %8259 = vrcp.f32 %v6179_v38 }
 0xa52   : > { %v8236_v48 = vpop.eup %8235  ;;  %8261 = vrcp.f32 %v6182_v50  ;;  %v6265_v50 = vld [vmem:[#allocation4 + $0xe0] sm:$0xff] }
 0xa53   : > { %v8238_v47 = vpop.eup %8237  ;;  %8263 = vrcp.f32 %v6181_v60 }
 0xa54   : > { %6440 = vperm.xlu1 %8140, %v8190_v28   ;;  %v8240_v32 = vpop.eup %8239  ;;  %8265 = vrcp.f32 %v6184_v31 }
 0xa55   : > { %6435 = vperm.xlu0 %8139, %v8192_v23   ;;  %v8242_v52 = vpop.eup %8241  ;;  %8267 = vrcp.f32 %v6183_v14  ;;  %v6267_v14 = vld [vmem:[#allocation4 + $0x138] sm:$0xff] }
 0xa56   : > { %v8244_v6 = vpop.eup %8243 }
 0xa57   : > { %v8246_v30 = vpop.eup %8245 }
 0xa58   : > { %6450 = vperm.xlu1 %8140, %v8194_v54   ;;  %v8248_v58 = vpop.eup %8247 }
 0xa59   : > { %6445 = vperm.xlu0 %8139, %v8196_v40   ;;  %v8250_v41 = vpop.eup %8249 }
 0xa5a   : > { %v8252_v19 = vpop.eup %8251 }
 0xa5b   : > { %v8254_v28 = vpop.eup %8253 }
 0xa5c   : > { %6460 = vperm.xlu1 %8140, %v8198_v34   ;;  %v8256_v15 = vpop.eup %8255 }
 0xa5d   : > { %6455 = vperm.xlu0 %8139, %v8200_v25   ;;  %v8258_v23 = vpop.eup %8257 }
 0xa5e   : > { %v8260_v7 = vpop.eup %8259 }
 0xa5f   : > { %v8262_v54 = vpop.eup %8261 }
 0xa60   : > { %6470 = vperm.xlu1 %8140, %v8202_v62   ;;  %v8264_v46 = vpop.eup %8263 }
 0xa61   : > { %6465 = vperm.xlu0 %8139, %v8204_v13   ;;  %v8266_v40 = vpop.eup %8265  ;;  %v6252_v13 = vld [vmem:[#allocation4 + $0x18] sm:$0xff] }
 0xa62   : > { %v8268_v34 = vpop.eup %8267 }
 0xa64   : > { %6480 = vperm.xlu1 %8140, %v8206_v42  }
 0xa65   : > { %6475 = vperm.xlu0 %8139, %v8208_v51  }
 0xa68   : > { %6490 = vperm.xlu1 %8140, %v8210_v49   ;;  %v6254_v49 = vld [vmem:[#allocation4 + $0x168] sm:$0xff] }
 0xa69   : > { %6485 = vperm.xlu0 %8139, %v8212_v3  }
 0xa6c   : > { %6500 = vperm.xlu1 %8140, %v8214_v45  }
 0xa6d   : > { %6495 = vperm.xlu0 %8139, %v8216_v4   ;;  %v6256_v4 = vld [vmem:[#allocation4 + $0x48] sm:$0xff] }
 0xa70   : > { %6510 = vperm.xlu1 %8140, %v8218_v37  }
 0xa71   : > { %6505 = vperm.xlu0 %8139, %v8220_v20  }
 0xa74   : > { %6520 = vperm.xlu1 %8140, %v8222_v10   ;;  %v6258_v10 = vld [vmem:[#allocation4 + $0x110] sm:$0xff] }
 0xa75   : > { %6515 = vperm.xlu0 %8139, %v8224_v2  }
 0xa78   : > { %6530 = vperm.xlu1 %8140, %v8226_v9  }
 0xa79   : > { %6525 = vperm.xlu0 %8139, %v8228_v22   ;;  %v6260_v22 = vld [vmem:[#allocation4 + $0x98] sm:$0xff] }
 0xa7c   : > { %6540 = vperm.xlu1 %8140, %v8230_v44  }
 0xa7d   : > { %6535 = vperm.xlu0 %8139, %v8232_v11  }
 0xa80   : > { %6550 = vperm.xlu1 %8140, %v8234_v59   ;;  %v6262_v59 = vld [vmem:[#allocation4 + $0x150] sm:$0xff] }
 0xa81   : > { %6545 = vperm.xlu0 %8139, %v8236_v48  }
 0xa84   : > { %6560 = vperm.xlu1 %8140, %v8238_v47  }
 0xa85   : > { %6555 = vperm.xlu0 %8139, %v8240_v32   ;;  %v6264_v32 = vld [vmem:[#allocation4 + $0x60] sm:$0xff] }
 0xa88   : > { %6570 = vperm.xlu1 %8140, %v8242_v52  }
 0xa89   : > { %6565 = vperm.xlu0 %8139, %v8244_v6  }
 0xa8c   : > { %6580 = vperm.xlu1 %8140, %v8246_v30   ;;  %v6266_v30 = vld [vmem:[#allocation4 + $0x188] sm:$0xff] }
 0xa8d   : > { %6575 = vperm.xlu0 %8139, %v8248_v58  }
 0xa90   : > { %6590 = vperm.xlu1 %8140, %v8250_v41  }
 0xa91   : > { %6585 = vperm.xlu0 %8139, %v8252_v19   ;;  %v6268_v19 = vld [vmem:[#allocation4 + $0x140] sm:$0xff] }
 0xa94   : > { %6600 = vperm.xlu1 %8140, %v8254_v28  }
 0xa95   : > { %6595 = vperm.xlu0 %8139, %v8256_v15  }
 0xa98   : > { %6610 = vperm.xlu1 %8140, %v8258_v23  }
 0xa99   : > { %6605 = vperm.xlu0 %8139, %v8260_v7  }
 0xa9c   : > { %6620 = vperm.xlu1 %8140, %v8262_v54   ;;  %v6270_v54 = vld [vmem:[#allocation4 + $0x1a8] sm:$0xff] }
 0xa9d   : > { %6615 = vperm.xlu0 %8139, %v8264_v46   ;;  %v6269_v46 = vld [vmem:[#allocation4 + $0x80] sm:$0xff] }
 0xa9f   : > { %v6326_v25 = vpop.permute.xlu1 %6325 }
 0xaa0   : > { %v6635_v53 = vmul.f32 %v6326_v25, %v6251_v26  ;;  %v6316_v62 = vpop.permute.xlu0 %6315  ;;  %6630 = vperm.xlu1 %8140, %v8266_v40   ;;  %v6272_v25 = vld [vmem:[#allocation4 + $0x28] sm:$0xff] }
 0xaa1   : > { %v6633_v56 = vmul.f32 %v6316_v62, %v6249_v63  ;;  %6625 = vperm.xlu0 %8139, %v8268_v34  }
 0xaa2   : > { %6699 = vst [vmem:[%s8972_s5 + $0x10] sm:$0xff] %v6635_v53  ;;  %v6271_v53 = vld [vmem:[#allocation4 + $0x1b8] sm:$0xff] }
 0xaa3   : > { %6697 = vst [vmem:[%s8972_s5] sm:$0xff] %v6633_v56  ;;  %v6331_v42 = vpop.permute.xlu1 %6330 }
 0xaa4   : > { %v6636_v35 = vmul.f32 %v6331_v42, %v6252_v13  ;;  %v6321_v51 = vpop.permute.xlu0 %6320  ;;  %v6274_v42 = vld [vmem:[#allocation4 + $0xf8] sm:$0xff] }
 0xaa5   : > { %v6634_v21 = vmul.f32 %v6321_v51, %v6250_v55 }
 0xaa6   : > { %6700 = vst [vmem:[%s8972_s5 + $0x18] sm:$0xff] %v6636_v35  ;;  %v6273_v35 = vld [vmem:[#allocation4 + $0x1e8] sm:$0xff] }
 0xaa7   : > { %6698 = vst [vmem:[%s8972_s5 + $0x8] sm:$0xff] %v6634_v21  ;;  %v6341_v3 = vpop.permute.xlu1 %6340 }
 0xaa8   : > { %v6638_v0 = vmul.f32 %v6341_v3, %v6254_v49  ;;  %v6336_v45 = vpop.permute.xlu0 %6335  ;;  %v6276_v3 = vld [vmem:[#allocation4 + $0x30] sm:$0xff] }
 0xaa9   : > { %v6637_v27 = vmul.f32 %v6336_v45, %v6253_v24 }
 0xaaa   : > { %6702 = vst [vmem:[%s8972_s5 + $0x28] sm:$0xff] %v6638_v0  ;;  %v6275_v0 = vld [vmem:[#allocation4 + $0x160] sm:$0xff] }
 0xaab   : > { %6701 = vst [vmem:[%s8972_s5 + $0x20] sm:$0xff] %v6637_v27  ;;  %v6351_v37 = vpop.permute.xlu1 %6350 }
 0xaac   : > { %v6640_v5 = vmul.f32 %v6351_v37, %v6256_v4  ;;  %v6346_v20 = vpop.permute.xlu0 %6345  ;;  %v6278_v37 = vld [vmem:[#allocation4] sm:$0xff] }
 0xaad   : > { %v6639_v8 = vmul.f32 %v6346_v20, %v6255_v29 }
 0xaae   : > { %6704 = vst [vmem:[%s8972_s5 + $0x38] sm:$0xff] %v6640_v5  ;;  %v6277_v5 = vld [vmem:[#allocation4 + $0x1e0] sm:$0xff] }
 0xaaf   : > { %6703 = vst [vmem:[%s8972_s5 + $0x30] sm:$0xff] %v6639_v8  ;;  %v6361_v2 = vpop.permute.xlu1 %6360 }
 0xab0   : > { %v6642_v17 = vmul.f32 %v6361_v2, %v6258_v10  ;;  %v6356_v9 = vpop.permute.xlu0 %6355  ;;  %v6280_v2 = vld [vmem:[#allocation4 + $0x8] sm:$0xff] }
 0xab1   : > { %v6641_v57 = vmul.f32 %v6356_v9, %v6257_v39 }
 0xab2   : > { %6706 = vst [vmem:[%s8972_s5 + $0x48] sm:$0xff] %v6642_v17  ;;  %v6279_v17 = vld [vmem:[#allocation4 + $0xf0] sm:$0xff] }
 0xab3   : > { %6705 = vst [vmem:[%s8972_s5 + $0x40] sm:$0xff] %v6641_v57  ;;  %v6371_v44 = vpop.permute.xlu1 %6370 }
 0xab4   : > { %v6644_v36 = vmul.f32 %v6371_v44, %v6260_v22  ;;  %v6366_v11 = vpop.permute.xlu0 %6365  ;;  %v6282_v44 = vld [vmem:[#allocation4 + $0x1d0] sm:$0xff] }
 0xab5   : > { %v6643_v12 = vmul.f32 %v6366_v11, %v6259_v43 }
 0xab6   : > { %6708 = vst [vmem:[%s8972_s5 + $0x58] sm:$0xff] %v6644_v36  ;;  %v6281_v36 = vld [vmem:[#allocation4 + $0x148] sm:$0xff] }
 0xab7   : > { %6707 = vst [vmem:[%s8972_s5 + $0x50] sm:$0xff] %v6643_v12  ;;  %v6381_v48 = vpop.permute.xlu1 %6380 }
 0xab8   : > { %v6646_v61 = vmul.f32 %v6381_v48, %v6262_v59  ;;  %v6376_v47 = vpop.permute.xlu0 %6375  ;;  %v6284_v48 = vld [vmem:[#allocation4 + $0xc8] sm:$0xff] }
 0xab9   : > { %v6645_v18 = vmul.f32 %v6376_v47, %v6261_v16 }
 0xaba   : > { %6710 = vst [vmem:[%s8972_s5 + $0x68] sm:$0xff] %v6646_v61  ;;  %v6283_v61 = vld [vmem:[#allocation4 + $0x100] sm:$0xff] }
 0xabb   : > { %6709 = vst [vmem:[%s8972_s5 + $0x60] sm:$0xff] %v6645_v18  ;;  %v6391_v52 = vpop.permute.xlu1 %6390 }
 0xabc   : > { %v6648_v33 = vmul.f32 %v6391_v52, %v6264_v32  ;;  %v6386_v6 = vpop.permute.xlu0 %6385  ;;  %v6286_v52 = vld [vmem:[#allocation4 + $0x1f8] sm:$0xff] }
 0xabd   : > { %v6647_v38 = vmul.f32 %v6386_v6, %v6263_v1 }
 0xabe   : > { %6712 = vst [vmem:[%s8972_s5 + $0x78] sm:$0xff] %v6648_v33  ;;  %v6285_v33 = vld [vmem:[#allocation4 + $0x40] sm:$0xff] }
 0xabf   : > { %6711 = vst [vmem:[%s8972_s5 + $0x70] sm:$0xff] %v6647_v38  ;;  %v6401_v58 = vpop.permute.xlu1 %6400 }
 0xac0   : > { %v6650_v60 = vmul.f32 %v6401_v58, %v6266_v30  ;;  %v6396_v41 = vpop.permute.xlu0 %6395  ;;  %v6288_v58 = vld [vmem:[#allocation4 + $0x128] sm:$0xff] }
 0xac1   : > { %v6649_v31 = vmul.f32 %v6396_v41, %v6265_v50 }
 0xac2   : > { %6714 = vst [vmem:[%s8972_s5 + $0x88] sm:$0xff] %v6650_v60  ;;  %v6287_v60 = vld [vmem:[#allocation4 + $0x20] sm:$0xff] }
 0xac3   : > { %6713 = vst [vmem:[%s8972_s5 + $0x80] sm:$0xff] %v6649_v31  ;;  %v6411_v28 = vpop.permute.xlu1 %6410 }
 0xac4   : > { %v6652_v15 = vmul.f32 %v6411_v28, %v6268_v19  ;;  %v6406_v23 = vpop.permute.xlu0 %6405  ;;  %v6290_v28 = vld [vmem:[#allocation4 + $0x1f0] sm:$0xff] }
 0xac5   : > { %v6651_v7 = vmul.f32 %v6406_v23, %v6267_v14 }
 0xac6   : > { %6716 = vst [vmem:[%s8972_s5 + $0x98] sm:$0xff] %v6652_v15  ;;  %v6289_v15 = vld [vmem:[#allocation4 + $0x1a0] sm:$0xff] }
 0xac7   : > { %6715 = vst [vmem:[%s8972_s5 + $0x90] sm:$0xff] %v6651_v7  ;;  %v6421_v40 = vpop.permute.xlu1 %6420 }
 0xac8   : > { %v6654_v26 = vmul.f32 %v6421_v40, %v6270_v54  ;;  %v6416_v34 = vpop.permute.xlu0 %6415  ;;  %v6292_v40 = vld [vmem:[#allocation4 + $0x78] sm:$0xff] }
 0xac9   : > { %v6653_v63 = vmul.f32 %v6416_v34, %v6269_v46 }
 0xaca   : > { %6718 = vst [vmem:[%s8972_s5 + $0xa8] sm:$0xff] %v6654_v26  ;;  %v6291_v26 = vld [vmem:[#allocation4 + $0xe8] sm:$0xff] }
 0xacb   : > { %6717 = vst [vmem:[%s8972_s5 + $0xa0] sm:$0xff] %v6653_v63  ;;  %v6431_v62 = vpop.permute.xlu1 %6430 }
 0xacc   : > { %v6656_v56 = vmul.f32 %v6431_v62, %v6272_v25  ;;  %v6426_v13 = vpop.permute.xlu0 %6425  ;;  %v6294_v62 = vld [vmem:[#allocation4 + $0x90] sm:$0xff] }
 0xacd   : > { %v6655_v55 = vmul.f32 %v6426_v13, %v6271_v53 }
 0xace   : > { %6720 = vst [vmem:[%s8972_s5 + $0xb8] sm:$0xff] %v6656_v56  ;;  %v6293_v56 = vld [vmem:[#allocation4 + $0x70] sm:$0xff] }
 0xacf   : > { %6719 = vst [vmem:[%s8972_s5 + $0xb0] sm:$0xff] %v6655_v55  ;;  %v6441_v51 = vpop.permute.xlu1 %6440 }
 0xad0   : > { %v6658_v21 = vmul.f32 %v6441_v51, %v6274_v42  ;;  %v6436_v49 = vpop.permute.xlu0 %6435  ;;  %v6296_v51 = vld [vmem:[#allocation4 + $0xd0] sm:$0xff] }
 0xad1   : > { %v6657_v24 = vmul.f32 %v6436_v49, %v6273_v35 }
 0xad2   : > { %6722 = vst [vmem:[%s8972_s5 + $0xc8] sm:$0xff] %v6658_v21  ;;  %v6295_v21 = vld [vmem:[#allocation4 + $0x1d8] sm:$0xff] }
 0xad3   : > { %6721 = vst [vmem:[%s8972_s5 + $0xc0] sm:$0xff] %v6657_v24  ;;  %v6451_v45 = vpop.permute.xlu1 %6450 }
 0xad4   : > { %v6660_v27 = vmul.f32 %v6451_v45, %v6276_v3  ;;  %v6446_v4 = vpop.permute.xlu0 %6445  ;;  %v6298_v45 = vld [vmem:[#allocation4 + $0x88] sm:$0xff] }
 0xad5   : > { %v6659_v29 = vmul.f32 %v6446_v4, %v6275_v0 }
 0xad6   : > { %6724 = vst [vmem:[%s8972_s5 + $0xd8] sm:$0xff] %v6660_v27  ;;  %v6297_v27 = vld [vmem:[#allocation4 + $0xb8] sm:$0xff] }
 0xad7   : > { %6723 = vst [vmem:[%s8972_s5 + $0xd0] sm:$0xff] %v6659_v29  ;;  %v6461_v20 = vpop.permute.xlu1 %6460 }
 0xad8   : > { %v6662_v8 = vmul.f32 %v6461_v20, %v6278_v37  ;;  %v6456_v10 = vpop.permute.xlu0 %6455  ;;  %v6300_v20 = vld [vmem:[#allocation4 + $0x1c8] sm:$0xff] }
 0xad9   : > { %v6661_v39 = vmul.f32 %v6456_v10, %v6277_v5 }
 0xada   : > { %6726 = vst [vmem:[%s8972_s5 + $0xe8] sm:$0xff] %v6662_v8  ;;  %v6299_v8 = vld [vmem:[#allocation4 + $0xa8] sm:$0xff] }
 0xadb   : > { %6725 = vst [vmem:[%s8972_s5 + $0xe0] sm:$0xff] %v6661_v39  ;;  %v6471_v9 = vpop.permute.xlu1 %6470 }
 0xadc   : > { %v6664_v57 = vmul.f32 %v6471_v9, %v6280_v2  ;;  %v6466_v22 = vpop.permute.xlu0 %6465  ;;  %v6302_v9 = vld [vmem:[#allocation4 + $0x178] sm:$0xff] }
 0xadd   : > { %v6663_v43 = vmul.f32 %v6466_v22, %v6279_v17 }
 0xade   : > { %6728 = vst [vmem:[%s8972_s5 + $0xf8] sm:$0xff] %v6664_v57  ;;  %v6301_v57 = vld [vmem:[#allocation4 + $0x170] sm:$0xff] }
 0xadf   : > { %6727 = vst [vmem:[%s8972_s5 + $0xf0] sm:$0xff] %v6663_v43  ;;  %v6481_v11 = vpop.permute.xlu1 %6480 }
 0xae0   : > { %v6666_v12 = vmul.f32 %v6481_v11, %v6282_v44  ;;  %v6476_v59 = vpop.permute.xlu0 %6475  ;;  %v6304_v11 = vld [vmem:[#allocation4 + $0x190] sm:$0xff] }
 0xae1   : > { %v6665_v16 = vmul.f32 %v6476_v59, %v6281_v36 }
 0xae2   : > { %6730 = vst [vmem:[%s8972_s5 + $0x108] sm:$0xff] %v6666_v12  ;;  %v6303_v12 = vld [vmem:[#allocation4 + $0x68] sm:$0xff] }
 0xae3   : > { %6729 = vst [vmem:[%s8972_s5 + $0x100] sm:$0xff] %v6665_v16  ;;  %v6491_v47 = vpop.permute.xlu1 %6490 }
 0xae4   : > { %v6668_v18 = vmul.f32 %v6491_v47, %v6284_v48  ;;  %v6486_v32 = vpop.permute.xlu0 %6485  ;;  %v6306_v47 = vld [vmem:[#allocation4 + $0x38] sm:$0xff] }
 0xae5   : > { %v6667_v1 = vmul.f32 %v6486_v32, %v6283_v61 }
 0xae6   : > { %6732 = vst [vmem:[%s8972_s5 + $0x118] sm:$0xff] %v6668_v18  ;;  %v6305_v18 = vld [vmem:[#allocation4 + $0x198] sm:$0xff] }
 0xae7   : > { %6731 = vst [vmem:[%s8972_s5 + $0x110] sm:$0xff] %v6667_v1  ;;  %v6501_v6 = vpop.permute.xlu1 %6500 }
 0xae8   : > { %v6670_v38 = vmul.f32 %v6501_v6, %v6286_v52  ;;  %v6496_v30 = vpop.permute.xlu0 %6495  ;;  %v6308_v6 = vld [vmem:[#allocation4 + $0x1c0] sm:$0xff] }
 0xae9   : > { %v6669_v50 = vmul.f32 %v6496_v30, %v6285_v33 }
 0xaea   : > { %6734 = vst [vmem:[%s8972_s5 + $0x128] sm:$0xff] %v6670_v38  ;;  %v6307_v38 = vld [vmem:[#allocation4 + $0xc0] sm:$0xff] }
 0xaeb   : > { %6733 = vst [vmem:[%s8972_s5 + $0x120] sm:$0xff] %v6669_v50  ;;  %v6511_v41 = vpop.permute.xlu1 %6510 }
 0xaec   : > { %v6672_v31 = vmul.f32 %v6511_v41, %v6288_v58  ;;  %v6506_v19 = vpop.permute.xlu0 %6505  ;;  %v6310_v41 = vld [vmem:[#allocation4 + $0x10] sm:$0xff] }
 0xaed   : > { %v6671_v14 = vmul.f32 %v6506_v19, %v6287_v60 }
 0xaee   : > { %6736 = vst [vmem:[%s8972_s5 + $0x138] sm:$0xff] %v6672_v31  ;;  %v6309_v31 = vld [vmem:[#allocation4 + $0x158] sm:$0xff] }
 0xaef   : > { %6735 = vst [vmem:[%s8972_s5 + $0x130] sm:$0xff] %v6671_v14  ;;  %v6521_v23 = vpop.permute.xlu1 %6520 }
 0xaf0   : > { %v6674_v7 = vmul.f32 %v6521_v23, %v6290_v28  ;;  %v6516_v54 = vpop.permute.xlu0 %6515  ;;  %v6312_v23 = vld [vmem:[#allocation4 + $0xa0] sm:$0xff] }
 0xaf1   : > { %v6673_v46 = vmul.f32 %v6516_v54, %v6289_v15 }
 0xaf2   : > { %6738 = vst [vmem:[%s8972_s5 + $0x148] sm:$0xff] %v6674_v7  ;;  %v6311_v7 = vld [vmem:[#allocation4 + $0x58] sm:$0xff] }
 0xaf3   : > { %6737 = vst [vmem:[%s8972_s5 + $0x140] sm:$0xff] %v6673_v46  ;;  %v6531_v34 = vpop.permute.xlu1 %6530 }
 0xaf4   : > { %v6676_v63 = vmul.f32 %v6531_v34, %v6292_v40  ;;  %v6526_v25 = vpop.permute.xlu0 %6525 }
 0xaf5   : > { %v6675_v53 = vmul.f32 %v6526_v25, %v6291_v26 }
 0xaf6   : > { %6740 = vst [vmem:[%s8972_s5 + $0x158] sm:$0xff] %v6676_v63 }
 0xaf7   : > { %6739 = vst [vmem:[%s8972_s5 + $0x150] sm:$0xff] %v6675_v53  ;;  %v6541_v13 = vpop.permute.xlu1 %6540 }
 0xaf8   : > { %v6678_v55 = vmul.f32 %v6541_v13, %v6294_v62  ;;  %v6536_v42 = vpop.permute.xlu0 %6535 }
 0xaf9   : > { %v6677_v35 = vmul.f32 %v6536_v42, %v6293_v56 }
 0xafa   : > { %6742 = vst [vmem:[%s8972_s5 + $0x168] sm:$0xff] %v6678_v55 }
 0xafb   : > { %6741 = vst [vmem:[%s8972_s5 + $0x160] sm:$0xff] %v6677_v35  ;;  %v6551_v49 = vpop.permute.xlu1 %6550 }
 0xafc   : > { %v6680_v24 = vmul.f32 %v6551_v49, %v6296_v51  ;;  %v6546_v3 = vpop.permute.xlu0 %6545 }
 0xafd   : > { %v6679_v0 = vmul.f32 %v6546_v3, %v6295_v21 }
 0xafe   : > { %6744 = vst [vmem:[%s8972_s5 + $0x178] sm:$0xff] %v6680_v24 }
 0xaff   : > { %6743 = vst [vmem:[%s8972_s5 + $0x170] sm:$0xff] %v6679_v0  ;;  %v6561_v4 = vpop.permute.xlu1 %6560 }
 0xb00   : > { %v6682_v29 = vmul.f32 %v6561_v4, %v6298_v45  ;;  %v6556_v37 = vpop.permute.xlu0 %6555 }
 0xb01   : > { %v6681_v5 = vmul.f32 %v6556_v37, %v6297_v27 }
 0xb02   : > { %6746 = vst [vmem:[%s8972_s5 + $0x188] sm:$0xff] %v6682_v29 }
 0xb03   : > { %6745 = vst [vmem:[%s8972_s5 + $0x180] sm:$0xff] %v6681_v5  ;;  %v6571_v10 = vpop.permute.xlu1 %6570 }
 0xb04   : > { %v6684_v39 = vmul.f32 %v6571_v10, %v6300_v20  ;;  %v6566_v2 = vpop.permute.xlu0 %6565 }
 0xb05   : > { %v6683_v17 = vmul.f32 %v6566_v2, %v6299_v8 }
 0xb06   : > { %6748 = vst [vmem:[%s8972_s5 + $0x198] sm:$0xff] %v6684_v39 }
 0xb07   : > { %6747 = vst [vmem:[%s8972_s5 + $0x190] sm:$0xff] %v6683_v17  ;;  %v6581_v22 = vpop.permute.xlu1 %6580 }
 0xb08   : > { %v6686_v43 = vmul.f32 %v6581_v22, %v6302_v9  ;;  %v6576_v44 = vpop.permute.xlu0 %6575 }
 0xb09   : > { %v6685_v36 = vmul.f32 %v6576_v44, %v6301_v57 }
 0xb0a   : > { %6750 = vst [vmem:[%s8972_s5 + $0x1a8] sm:$0xff] %v6686_v43 }
 0xb0b   : > { %6749 = vst [vmem:[%s8972_s5 + $0x1a0] sm:$0xff] %v6685_v36  ;;  %v6591_v59 = vpop.permute.xlu1 %6590 }
 0xb0c   : > { %v6688_v16 = vmul.f32 %v6591_v59, %v6304_v11  ;;  %v6586_v48 = vpop.permute.xlu0 %6585 }
 0xb0d   : > { %v6687_v61 = vmul.f32 %v6586_v48, %v6303_v12 }
 0xb0e   : > { %6752 = vst [vmem:[%s8972_s5 + $0x1b8] sm:$0xff] %v6688_v16 }
 0xb0f   : > { %6751 = vst [vmem:[%s8972_s5 + $0x1b0] sm:$0xff] %v6687_v61  ;;  %v6601_v32 = vpop.permute.xlu1 %6600 }
 0xb10   : > { %v6690_v1 = vmul.f32 %v6601_v32, %v6306_v47  ;;  %v6596_v52 = vpop.permute.xlu0 %6595 }
 0xb11   : > { %v6689_v33 = vmul.f32 %v6596_v52, %v6305_v18 }
 0xb12   : > { %6754 = vst [vmem:[%s8972_s5 + $0x1c8] sm:$0xff] %v6690_v1 }
 0xb13   : > { %6753 = vst [vmem:[%s8972_s5 + $0x1c0] sm:$0xff] %v6689_v33  ;;  %v6611_v30 = vpop.permute.xlu1 %6610 }
 0xb14   : > { %v6692_v50 = vmul.f32 %v6611_v30, %v6308_v6  ;;  %v6606_v58 = vpop.permute.xlu0 %6605 }
 0xb15   : > { %v6691_v60 = vmul.f32 %v6606_v58, %v6307_v38 }
 0xb16   : > { %6756 = vst [vmem:[%s8972_s5 + $0x1d8] sm:$0xff] %v6692_v50 }
 0xb17   : > { %6755 = vst [vmem:[%s8972_s5 + $0x1d0] sm:$0xff] %v6691_v60  ;;  %v6621_v19 = vpop.permute.xlu1 %6620 }
 0xb18   : > { %v6694_v14 = vmul.f32 %v6621_v19, %v6310_v41  ;;  %v6616_v28 = vpop.permute.xlu0 %6615 }
 0xb19   : > { %v6693_v15 = vmul.f32 %v6616_v28, %v6309_v31 }
 0xb1a   : > { %6758 = vst [vmem:[%s8972_s5 + $0x1e8] sm:$0xff] %v6694_v14 }
 0xb1b   : > { %6757 = vst [vmem:[%s8972_s5 + $0x1e0] sm:$0xff] %v6693_v15  ;;  %v6631_v54 = vpop.permute.xlu1 %6630 }
 0xb1c   : > { %v6696_v46 = vmul.f32 %v6631_v54, %v6312_v23  ;;  %v6626_v40 = vpop.permute.xlu0 %6625 }
 0xb1d   : > { %v6695_v26 = vmul.f32 %v6626_v40, %v6311_v7 }
 0xb1e   : > { %6760 = vst [vmem:[%s8972_s5 + $0x1f8] sm:$0xff] %v6696_v46 }
 0xb1f   : > { %6759 = vst [vmem:[%s8972_s5 + $0x1f0] sm:$0xff] %v6695_v26 }
 0xb20 PF: > { %s7060_s13 = sshll.u32 %s8373_s18, 6  ;;  %s7061_s17 = sshll.u32 %s8377_s19, 7 }
 0xb21   : > { %s6777_s30 = sshll.u32 %s8972_s5, 4  ;;  %s6774_s9 = sadd.s32 %s7061_s17, %s7060_s13  ;;  %s12431_s30 = int_to_ptr.vmem [resolvable:$true] %s6777_s30 }
 0xb22   : > { %s7062_s27 = sshll.u32 %s6774_s9, 7  ;;  %s12440_s28 = scalar_lea.sflag [#allocation9], %s1066_s29 }
 0xb23   : > { %s12436_s26 = scalar_lea.hbm %s12506_s3, %s7062_s27  ;;  %s8269_s4 = scalar_lea.vmem %s12431_s30, 8192 }
 0xb24   : > { %p8270_p7 = scmp.ne.s32.totalorder %s12431_s30, %s8269_s4  ;;  %s8400_s18 = smov [#allocation8]  }
 0xb25   : > { %s8273_s19 = sshll.u32 %s8400_s18, 4  ;;  %s8274_s19 = int_to_ptr.vmem [resolvable:$false] %s8273_s19 }
 0xb26   : > { %p8271_p8 = pnand %p8270_p7, %p8522_p11  ;;  %s8275_s8 = scalar_lea.vmem %s8274_s19, 16384 }
 0xb27   : > { %p8276_p10 = scmp.lt.s32.totalorder %s12431_s30, %s8274_s19  ;;  %p8277_p13 = scmp.lt.s32.totalorder %s8275_s8, %s8269_s4 }
 0xb28   : > { %p8272_p9 = pneg %p8271_p8 }
 0xb29   : > { %p8278_p0 = por %p8277_p13, %p8276_p10 }
 0xb2b   : > { %p8279_p2 = pnand %p8278_p0, %p8272_p9 }
 0xb2d   : > { %8282 = shalt.err (!%p8279_p2)
}
 0xb2e   : > { %s8283_s29 = scalar_lea.hbm %s12436_s26, 8192  ;;  %s8287_s13 = scalar_lea.hbm %s12506_s3, 32768 }
 0xb2f   : > { %p8284_p1 = scmp.ne.s32.totalorder %s12436_s26, %s8283_s29  ;;  %p8288_p5 = scmp.lt.s32.totalorder %s12436_s26, %s12506_s3 }
 0xb30   : > { %p8289_p6 = scmp.lt.s32.totalorder %s8287_s13, %s8283_s29 }
 0xb31   : > { %p8285_p3 = pnand %p8284_p1, %p8522_p11 }
 0xb32   : > { %p8290_p7 = por %p8289_p6, %p8288_p5 }
 0xb33   : > { %p8286_p4 = pneg %p8285_p3 }
 0xb35   : > { %p8291_p8 = pnand %p8290_p7, %p8286_p4 }
 0xb37   : > { %8294 = shalt.err (!%p8291_p8)
}
 0xb38   : > { %s8401_s27 = smov 128   ;;  %s8402_s6 = smov 8  }
 0xb39   : > { %7387 = dma.vmem_to_hbm [thread:$0]  (%p8522_p11), %s12431_s30, 8192, %s12436_s26, %s12440_s28, %s8401_s27, %s8401_s27, %s8402_s6  }
 0xb3a PF: > { %p7393_p9 = scmp.ge.s32.totalorder %s8393_s23, 2  ;;  %s6792_s4 = sand.u32 1, %s8349_s12  }
 0xb3b   : > { %s6793_s18 = scalar_lea.sflag [#allocation9], %s6792_s4 }
 0xb3c   : > { %p7390_p10 = pnand %p7393_p9, %p8526_p12 }
 0xb3e   : > { %p7391_p13 = pneg %p7390_p10 }
 0xb40   : > { %8344 = dma.done.wait (%p7391_p13), %s6793_s18, 8192  }
 0xb41   : > { %8346 = vsyncadd (%p7391_p13), %s6793_s18, 4294959104  ;;  %s16_s23 = sadd.s32 1, %s8393_s23   ;;  %s14047_s7 = sld [smem:[#allocation11_spill]] }
 0xb42   : > { %p13_p0 = scmp.ge.s32.totalorder %s16_s23, 10   ;;  %s14048_s30 = sld [smem:[#allocation12_spill]] }
 0xb43   : > { %s14049_s26 = sld [smem:[#allocation13_spill]]  ;;  %s14050_s12 = smov %s8361_s15 }
 0xb44   : > { %s14051_s13 = smov %s8357_s14  ;;  %s14052_s14 = smov %s8537_s25 }
 0xb45   : > { %s14053_s15 = smov %s8365_s16  ;;  %s14054_s16 = smov %s8534_s24 }
 0xb46   : > { %s14055_s17 = smov %s8381_s20  ;;  %s14056_s18 = smov %s8385_s21 }
 0xb47   : > { %s14057_s19 = smov %s8389_s22  ;;  %s14058_s20 = smov %s14047_s7 }
 0xb48   : > { %s14059_s21 = smov %s14048_s30  ;;  %15 = sbr.rel (!%p13_p0) target bundleno = 7 (0x7), region = 210 }
 0xb49   : > { %s14060_s22 = smov %s14049_s26 }
 0xb4d   :  { %6798 = vsyncpa [#allocation9], 1 }
 0xb4e   :  { %6800 = vsyncpa [#allocation9 + $0x1], 1 }

</bundles_post_ra>
